<compile_context>
chip_gen: v7x
topology: tpu7x:2x2x1
jax: 0.10.0
libtpu: 0.0.40
codegen_flags: <defaults>
</compile_context>

<pallas_src>
import functools

import jax
import jax.numpy as jnp
from jax.experimental import pallas as pl
from jax.experimental.pallas import tpu as pltpu

BN_EPS = 1e-5


def _round_up(x, m):
    return (x + m - 1) // m * m


# ---------------------------------------------------------------------------
# Fused Pallas kernels: O = maybe_relu((A @ W) + bias [+ residual])
# A / W / residual are bf16 (MXU native); accumulation is f32 in VMEM scratch.
# Grid = (M tiles, N tiles, K tiles); K is the innermost reduction axis.
# ---------------------------------------------------------------------------
def _mm_bias_kernel(a_ref, w_ref, bias_ref, o_ref, acc_ref, *, relu):
    k = pl.program_id(2)

    @pl.when(k == 0)
    def _():
        acc_ref[...] = jnp.zeros_like(acc_ref)

    acc_ref[...] += jnp.dot(a_ref[...], w_ref[...],
                            preferred_element_type=jnp.float32)

    @pl.when(k == pl.num_programs(2) - 1)
    def _():
        out = acc_ref[...] + bias_ref[...]
        if relu:
            out = jnp.maximum(out, 0.0)
        o_ref[...] = out.astype(o_ref.dtype)


def _mm_bias_res_kernel(a_ref, w_ref, bias_ref, res_ref, o_ref, acc_ref, *,
                        relu):
    k = pl.program_id(2)

    @pl.when(k == 0)
    def _():
        acc_ref[...] = jnp.zeros_like(acc_ref)

    acc_ref[...] += jnp.dot(a_ref[...], w_ref[...],
                            preferred_element_type=jnp.float32)

    @pl.when(k == pl.num_programs(2) - 1)
    def _():
        out = acc_ref[...] + bias_ref[...] + res_ref[...].astype(jnp.float32)
        if relu:
            out = jnp.maximum(out, 0.0)
        o_ref[...] = out.astype(o_ref.dtype)


def _pick_tk(kp):
    """Largest 128-multiple <= 512 that divides kp (kp is a 128-multiple)."""
    if kp <= 512:
        return kp
    for cand in (512, 384, 256):
        if kp % cand == 0:
            return cand
    return 128


def fused_matmul(a, w, bias, residual=None, relu=False,
                 out_dtype=jnp.bfloat16):
    """a: (M, K), w: (K, N), bias: (N,), residual: (M, N) or None."""
    M, K = a.shape
    N = w.shape[1]

    # --- tile selection ----------------------------------------------------
    if M <= 256:
        TM = _round_up(max(M, 8), 8)
        Mp = TM
    else:
        TM = 256
        Mp = _round_up(M, TM)

    Np = _round_up(N, 128)
    if Np <= 256:
        TN = Np
    else:
        TN = 256
        Np = _round_up(Np, TN)

    Kp = _round_up(K, 128)
    tk = _pick_tk(Kp)

    # --- pad operands once, in bf16 ----------------------------------------
    a_p = jnp.pad(a.astype(jnp.bfloat16), ((0, Mp - M), (0, Kp - K)))
    w_p = jnp.pad(w.astype(jnp.bfloat16), ((0, Kp - K), (0, Np - N)))
    bias_p = jnp.pad(bias.astype(jnp.float32).reshape(1, N),
                     ((0, 0), (0, Np - N)))

    grid = (Mp // TM, Np // TN, Kp // tk)

    in_specs = [
        pl.BlockSpec((TM, tk), lambda i, j, k: (i, k)),
        pl.BlockSpec((tk, TN), lambda i, j, k: (k, j)),
        pl.BlockSpec((1, TN), lambda i, j, k: (0, j)),
    ]
    operands = [a_p, w_p, bias_p]

    if residual is None:
        kernel = functools.partial(_mm_bias_kernel, relu=relu)
    else:
        res_p = jnp.pad(residual.astype(jnp.bfloat16),
                        ((0, Mp - M), (0, Np - N)))
        in_specs.append(pl.BlockSpec((TM, TN), lambda i, j, k: (i, j)))
        operands.append(res_p)
        kernel = functools.partial(_mm_bias_res_kernel, relu=relu)

    out = pl.pallas_call(
        kernel,
        out_shape=jax.ShapeDtypeStruct((Mp, Np), out_dtype),
        grid_spec=pltpu.PrefetchScalarGridSpec(
            num_scalar_prefetch=0,
            grid=grid,
            in_specs=in_specs,
            out_specs=pl.BlockSpec((TM, TN), lambda i, j, k: (i, j)),
            scratch_shapes=[pltpu.VMEM((TM, TN), jnp.float32)],
        ),
        compiler_params=pltpu.CompilerParams(
            dimension_semantics=("parallel", "parallel", "arbitrary"),
            vmem_limit_bytes=32 * 1024 * 1024),
    )(*operands)
    return out[:M, :N]


# ---------------------------------------------------------------------------
# Conv (im2col) / pooling glue
# ---------------------------------------------------------------------------
def _im2col(x_nhwc, kh, kw, stride, pad):
    if pad:
        x = jnp.pad(x_nhwc, ((0, 0), (pad, pad), (pad, pad), (0, 0)))
    else:
        x = x_nhwc
    n, h, w, c = x.shape
    oh = (h - kh) // stride + 1
    ow = (w - kw) // stride + 1
    patches = []
    for i in range(kh):
        for j in range(kw):
            patches.append(x[:, i:i + stride * oh:stride,
                             j:j + stride * ow:stride, :])
    cols = jnp.concatenate(patches, axis=-1)        # (n, oh, ow, kh*kw*c)
    return cols.reshape(n * oh * ow, kh * kw * c), (n, oh, ow)


def conv_bn(x_nhwc, w_oihw, bias, stride, pad, relu, residual=None):
    """Conv + (pre-folded) BN bias + optional residual + optional ReLU."""
    cout, cin, kh, kw = w_oihw.shape
    cols, (n, oh, ow) = _im2col(x_nhwc, kh, kw, stride, pad)
    # reorder torch (O, I, kh, kw) -> (kh, kw, I, O) to match patch layout
    wmat = jnp.transpose(w_oihw, (2, 3, 1, 0)).reshape(kh * kw * cin, cout)
    res = None if residual is None else residual.reshape(-1, cout)
    out = fused_matmul(cols, wmat, bias, residual=res, relu=relu)
    return out.reshape(n, oh, ow, cout)


def maxpool_3x3_s2_p1(x_nhwc):
    x = jnp.pad(x_nhwc, ((0, 0), (1, 1), (1, 1), (0, 0)),
                constant_values=-jnp.inf)
    n, h, w, c = x.shape
    oh = (h - 3) // 2 + 1
    ow = (w - 3) // 2 + 1
    out = jnp.full((n, oh, ow, c), -jnp.inf, dtype=x_nhwc.dtype)
    for i in range(3):
        for j in range(3):
            out = jnp.maximum(out, x[:, i:i + 2 * oh:2, j:j + 2 * ow:2, :])
    return out


# ---------------------------------------------------------------------------
# Deterministic parameter init (BasicBlock ResNet-18, eval-mode BN folded)
# ---------------------------------------------------------------------------
class _KeyGen:
    def __init__(self, key):
        self.key = key

    def __call__(self):
        self.key, sub = jax.random.split(self.key)
        return sub


def _conv_init(key, cout, cin, k):
    return jax.random.normal(key, (cout, cin, k, k), jnp.float32) * 0.05


def _bn_init(kg, c):
    gamma = jax.random.uniform(kg(), (c,), jnp.float32, 0.8, 1.2)
    beta = jax.random.normal(kg(), (c,), jnp.float32) * 0.01
    mean = jax.random.normal(kg(), (c,), jnp.float32) * 0.01
    var = jax.random.uniform(kg(), (c,), jnp.float32, 0.5, 1.5)
    scale = gamma / jnp.sqrt(var + BN_EPS)
    bias = beta - mean * scale
    return scale, bias


def _conv_bn_init(kg, cout, cin, k):
    """Conv weight with eval-mode BN scale folded in, plus the remaining bias."""
    w = _conv_init(kg(), cout, cin, k)
    scale, bias = _bn_init(kg, cout)
    return w * scale[:, None, None, None], bias


def init_resnet18_params(key, num_classes=10):
    kg = _KeyGen(key)
    p = {}
    p["conv1_w"], p["conv1_b"] = _conv_bn_init(kg, 64, 3, 7)

    in_planes = 64
    layers_cfg = [(64, 2, 1), (128, 2, 2), (256, 2, 2), (512, 2, 2)]
    p["layers"] = []
    for planes, blocks, stride in layers_cfg:
        layer = []
        for b in range(blocks):
            s = stride if b == 0 else 1
            bp = {"stride": s}
            bp["conv1_w"], bp["conv1_b"] = _conv_bn_init(kg, planes, in_planes, 3)
            bp["conv2_w"], bp["conv2_b"] = _conv_bn_init(kg, planes, planes, 3)
            if s != 1 or in_planes != planes:
                bp["ds_w"], bp["ds_b"] = _conv_bn_init(kg, planes, in_planes, 1)
            layer.append(bp)
            in_planes = planes
        p["layers"].append(layer)

    p["fc_w"] = jax.random.normal(kg(), (num_classes, 512), jnp.float32) * 0.02
    p["fc_b"] = jax.random.normal(kg(), (num_classes,), jnp.float32) * 0.01
    return p


# ---------------------------------------------------------------------------
# Forward pass
# ---------------------------------------------------------------------------
def basic_block_forward(x, bp):
    stride = bp["stride"]
    identity = x
    out = conv_bn(x, bp["conv1_w"], bp["conv1_b"],
                  stride=stride, pad=1, relu=True)
    if "ds_w" in bp:
        identity = conv_bn(x, bp["ds_w"], bp["ds_b"],
                           stride=stride, pad=0, relu=False)
    # relu(conv2_bn(out) + identity) fused in a single kernel call
    out = conv_bn(out, bp["conv2_w"], bp["conv2_b"],
                  stride=1, pad=1, relu=True, residual=identity)
    return out


def resnet18_forward(x_nchw, params):
    x = jnp.transpose(x_nchw, (0, 2, 3, 1)).astype(jnp.bfloat16)  # NCHW->NHWC
    x = conv_bn(x, params["conv1_w"], params["conv1_b"],
                stride=2, pad=3, relu=True)
    x = maxpool_3x3_s2_p1(x)
    for layer in params["layers"]:
        for bp in layer:
            x = basic_block_forward(x, bp)
    # AdaptiveAvgPool2d((1,1)) + flatten (mean in f32 for precision)
    feat = jnp.mean(x.astype(jnp.float32), axis=(1, 2))
    logits = fused_matmul(feat, params["fc_w"].T, params["fc_b"],
                          residual=None, relu=False, out_dtype=jnp.float32)
    return logits


if __name__ == "__main__":
    key = jax.random.PRNGKey(0)
    k_params, k_x = jax.random.split(key)
    params = init_resnet18_params(k_params, num_classes=10)
    # Small input consistent with the module: NCHW, 3 input channels.
    x = jax.random.normal(k_x, (2, 3, 32, 32), jnp.float32)

    forward = jax.jit(lambda inp: resnet18_forward(inp, params))
    out = forward(x)
    out = jax.block_until_ready(out)
    assert out.shape == (2, 10), out.shape
    assert jnp.all(jnp.isfinite(out))
    print("KERNEL_OK")
</pallas_src>

<mosaic_0001>
module attributes {stable_mosaic.version = 11 : i64} {
  func.func @_mm_bias_kernel(%arg0: i32, %arg1: i32, %arg2: i32, %arg3: memref<256x256xbf16, #tpu.memory_space<vmem>>, %arg4: memref<256x128xbf16, #tpu.memory_space<vmem>>, %arg5: memref<1x128xf32, #tpu.memory_space<vmem>>, %arg6: memref<256x128xbf16, #tpu.memory_space<vmem>>, %arg7: memref<256x128xf32, #tpu.memory_space<vmem>>) attributes {dimension_semantics = [#tpu.dimension_semantics<parallel>, #tpu.dimension_semantics<parallel>, #tpu.dimension_semantics<arbitrary>], iteration_bounds = array<i64: 2, 1, 1>, scalar_prefetch = 0 : i64, scratch_operands = 1 : i64, tpu.core_type = #tpu.core_type<tc>, window_params = [{transform_indices = @transform_0, window_bounds = array<i64: 256, 256>}, {transform_indices = @transform_1, window_bounds = array<i64: 256, 128>}, {transform_indices = @transform_2, window_bounds = array<i64: 1, 128>}, {transform_indices = @transform_3, window_bounds = array<i64: 256, 128>}]} {
    %c0_i32 = arith.constant 0 : i32
    %0 = arith.cmpi eq, %arg2, %c0_i32 : i32
    %1 = arith.extui %0 : i1 to i32
    %c0_i32_0 = arith.constant 0 : i32
    %2 = arith.cmpi ne, %1, %c0_i32_0 : i32
    scf.if %2 {
      %cst_10 = arith.constant 0.000000e+00 : f32
      %12 = vector.broadcast %cst_10 : f32 to vector<256x128xf32>
      %c0_11 = arith.constant 0 : index
      %c0_12 = arith.constant 0 : index
      %13 = vector.load %arg7[%c0_11, %c0_12] : memref<256x128xf32, #tpu.memory_space<vmem>>, vector<256x128xf32>
      tpu.vector_store %arg7[%c0_11, %c0_12], %12 {strides = array<i32>} : memref<256x128xf32, #tpu.memory_space<vmem>>, vector<256x128xf32>,
    } else {
    }
    %c0 = arith.constant 0 : index
    %c0_1 = arith.constant 0 : index
    %3 = vector.load %arg7[%c0, %c0_1] : memref<256x128xf32, #tpu.memory_space<vmem>>, vector<256x128xf32>
    %c0_2 = arith.constant 0 : index
    %c0_3 = arith.constant 0 : index
    %4 = vector.load %arg3[%c0_2, %c0_3] : memref<256x256xbf16, #tpu.memory_space<vmem>>, vector<256x256xbf16>
    %c0_4 = arith.constant 0 : index
    %c0_5 = arith.constant 0 : index
    %5 = vector.load %arg4[%c0_4, %c0_5] : memref<256x128xbf16, #tpu.memory_space<vmem>>, vector<256x128xbf16>
    %cst = arith.constant dense<0.000000e+00> : vector<256x128xf32>
    %6 = tpu.matmul %4, %5, %cst {dimension_numbers = #tpu.dot_dimension_numbers<[1], [0], [0], [1], [0, 0, 1, 1], [], []>} : vector<256x256xbf16>, vector<256x128xbf16>, vector<256x128xf32> -> vector<256x128xf32>
    %7 = arith.addf %3, %6 : vector<256x128xf32>
    %c0_6 = arith.constant 0 : index
    %c0_7 = arith.constant 0 : index
    %8 = vector.load %arg7[%c0_6, %c0_7] : memref<256x128xf32, #tpu.memory_space<vmem>>, vector<256x128xf32>
    tpu.vector_store %arg7[%c0_6, %c0_7], %7 {strides = array<i32>} : memref<256x128xf32, #tpu.memory_space<vmem>>, vector<256x128xf32>,
    %c0_i32_8 = arith.constant 0 : i32
    %9 = arith.cmpi eq, %arg2, %c0_i32_8 : i32
    %10 = arith.extui %9 : i1 to i32
    %c0_i32_9 = arith.constant 0 : i32
    %11 = arith.cmpi ne, %10, %c0_i32_9 : i32
    scf.if %11 {
      %c0_10 = arith.constant 0 : index
      %c0_11 = arith.constant 0 : index
      %12 = vector.load %arg7[%c0_10, %c0_11] : memref<256x128xf32, #tpu.memory_space<vmem>>, vector<256x128xf32>
      %c0_12 = arith.constant 0 : index
      %c0_13 = arith.constant 0 : index
      %13 = vector.load %arg5[%c0_12, %c0_13] : memref<1x128xf32, #tpu.memory_space<vmem>>, vector<1x128xf32>
      %14 = vector.broadcast %13 : vector<1x128xf32> to vector<256x128xf32>
      %15 = arith.addf %12, %14 : vector<256x128xf32>
      %cst_14 = arith.constant 0.000000e+00 : f32
      %16 = vector.broadcast %cst_14 : f32 to vector<256x128xf32>
      %17 = arith.maximumf %15, %16 : vector<256x128xf32>
      %18 = arith.truncf %17 : vector<256x128xf32> to vector<256x128xbf16>
      %c0_15 = arith.constant 0 : index
      %c0_16 = arith.constant 0 : index
      %19 = vector.load %arg6[%c0_15, %c0_16] : memref<256x128xbf16, #tpu.memory_space<vmem>>, vector<256x128xbf16>
      tpu.vector_store %arg6[%c0_15, %c0_16], %18 {strides = array<i32>} : memref<256x128xbf16, #tpu.memory_space<vmem>>, vector<256x128xbf16>,
    } else {
    }
    return
  }
  func.func @transform_0(%arg0: i32, %arg1: i32, %arg2: i32) -> (i32, i32) {
    %c0_i32 = arith.constant 0 : i32
    return %arg0, %arg2 : i32, i32
  }
  func.func @transform_1(%arg0: i32, %arg1: i32, %arg2: i32) -> (i32, i32) {
    %c0_i32 = arith.constant 0 : i32
    return %arg2, %arg1 : i32, i32
  }
  func.func @transform_2(%arg0: i32, %arg1: i32, %arg2: i32) -> (i32, i32) {
    %c0_i32 = arith.constant 0 : i32
    %c0_i32_0 = arith.constant 0 : i32
    return %c0_i32, %arg1 : i32, i32
  }
  func.func @transform_3(%arg0: i32, %arg1: i32, %arg2: i32) -> (i32, i32) {
    %c0_i32 = arith.constant 0 : i32
    return %arg0, %arg1 : i32, i32
  }
}

module attributes {stable_mosaic.version = 11 : i64} {
  func.func @_mm_bias_kernel(%arg0: i32, %arg1: i32, %arg2: i32, %arg3: memref<128x128xbf16, #tpu.memory_space<vmem>>, %arg4: memref<128x128xbf16, #tpu.memory_space<vmem>>, %arg5: memref<1x128xf32, #tpu.memory_space<vmem>>, %arg6: memref<128x128xbf16, #tpu.memory_space<vmem>>, %arg7: memref<128x128xf32, #tpu.memory_space<vmem>>) attributes {dimension_semantics = [#tpu.dimension_semantics<parallel>, #tpu.dimension_semantics<parallel>, #tpu.dimension_semantics<arbitrary>], iteration_bounds = array<i64: 1, 1, 5>, scalar_prefetch = 0 : i64, scratch_operands = 1 : i64, tpu.core_type = #tpu.core_type<tc>, window_params = [{transform_indices = @transform_0, window_bounds = array<i64: 128, 128>}, {transform_indices = @transform_1, window_bounds = array<i64: 128, 128>}, {transform_indices = @transform_2, window_bounds = array<i64: 1, 128>}, {transform_indices = @transform_3, window_bounds = array<i64: 128, 128>}]} {
    %c0_i32 = arith.constant 0 : i32
    %0 = arith.cmpi eq, %arg2, %c0_i32 : i32
    %1 = arith.extui %0 : i1 to i32
    %c0_i32_0 = arith.constant 0 : i32
    %2 = arith.cmpi ne, %1, %c0_i32_0 : i32
    scf.if %2 {
      %cst_9 = arith.constant 0.000000e+00 : f32
      %12 = vector.broadcast %cst_9 : f32 to vector<128x128xf32>
      %c0_10 = arith.constant 0 : index
      %c0_11 = arith.constant 0 : index
      %13 = vector.load %arg7[%c0_10, %c0_11] : memref<128x128xf32, #tpu.memory_space<vmem>>, vector<128x128xf32>
      tpu.vector_store %arg7[%c0_10, %c0_11], %12 {strides = array<i32>} : memref<128x128xf32, #tpu.memory_space<vmem>>, vector<128x128xf32>,
    } else {
    }
    %c0 = arith.constant 0 : index
    %c0_1 = arith.constant 0 : index
    %3 = vector.load %arg7[%c0, %c0_1] : memref<128x128xf32, #tpu.memory_space<vmem>>, vector<128x128xf32>
    %c0_2 = arith.constant 0 : index
    %c0_3 = arith.constant 0 : index
    %4 = vector.load %arg3[%c0_2, %c0_3] : memref<128x128xbf16, #tpu.memory_space<vmem>>, vector<128x128xbf16>
    %c0_4 = arith.constant 0 : index
    %c0_5 = arith.constant 0 : index
    %5 = vector.load %arg4[%c0_4, %c0_5] : memref<128x128xbf16, #tpu.memory_space<vmem>>, vector<128x128xbf16>
    %cst = arith.constant dense<0.000000e+00> : vector<128x128xf32>
    %6 = tpu.matmul %4, %5, %cst {dimension_numbers = #tpu.dot_dimension_numbers<[1], [0], [0], [1], [0, 0, 1, 1], [], []>} : vector<128x128xbf16>, vector<128x128xbf16>, vector<128x128xf32> -> vector<128x128xf32>
    %7 = arith.addf %3, %6 : vector<128x128xf32>
    %c0_6 = arith.constant 0 : index
    %c0_7 = arith.constant 0 : index
    %8 = vector.load %arg7[%c0_6, %c0_7] : memref<128x128xf32, #tpu.memory_space<vmem>>, vector<128x128xf32>
    tpu.vector_store %arg7[%c0_6, %c0_7], %7 {strides = array<i32>} : memref<128x128xf32, #tpu.memory_space<vmem>>, vector<128x128xf32>,
    %c4_i32 = arith.constant 4 : i32
    %9 = arith.cmpi eq, %arg2, %c4_i32 : i32
    %10 = arith.extui %9 : i1 to i32
    %c0_i32_8 = arith.constant 0 : i32
    %11 = arith.cmpi ne, %10, %c0_i32_8 : i32
    scf.if %11 {
      %c0_9 = arith.constant 0 : index
      %c0_10 = arith.constant 0 : index
      %12 = vector.load %arg7[%c0_9, %c0_10] : memref<128x128xf32, #tpu.memory_space<vmem>>, vector<128x128xf32>
      %c0_11 = arith.constant 0 : index
      %c0_12 = arith.constant 0 : index
      %13 = vector.load %arg5[%c0_11, %c0_12] : memref<1x128xf32, #tpu.memory_space<vmem>>, vector<1x128xf32>
      %14 = vector.broadcast %13 : vector<1x128xf32> to vector<128x128xf32>
      %15 = arith.addf %12, %14 : vector<128x128xf32>
      %cst_13 = arith.constant 0.000000e+00 : f32
      %16 = vector.broadcast %cst_13 : f32 to vector<128x128xf32>
      %17 = arith.maximumf %15, %16 : vector<128x128xf32>
      %18 = arith.truncf %17 : vector<128x128xf32> to vector<128x128xbf16>
      %c0_14 = arith.constant 0 : index
      %c0_15 = arith.constant 0 : index
      %19 = vector.load %arg6[%c0_14, %c0_15] : memref<128x128xbf16, #tpu.memory_space<vmem>>, vector<128x128xbf16>
      tpu.vector_store %arg6[%c0_14, %c0_15], %18 {strides = array<i32>} : memref<128x128xbf16, #tpu.memory_space<vmem>>, vector<128x128xbf16>,
    } else {
    }
    return
  }
  func.func @transform_0(%arg0: i32, %arg1: i32, %arg2: i32) -> (i32, i32) {
    %c0_i32 = arith.constant 0 : i32
    return %arg0, %arg2 : i32, i32
  }
  func.func @transform_1(%arg0: i32, %arg1: i32, %arg2: i32) -> (i32, i32) {
    %c0_i32 = arith.constant 0 : i32
    return %arg2, %arg1 : i32, i32
  }
  func.func @transform_2(%arg0: i32, %arg1: i32, %arg2: i32) -> (i32, i32) {
    %c0_i32 = arith.constant 0 : i32
    %c0_i32_0 = arith.constant 0 : i32
    return %c0_i32, %arg1 : i32, i32
  }
  func.func @transform_3(%arg0: i32, %arg1: i32, %arg2: i32) -> (i32, i32) {
    %c0_i32 = arith.constant 0 : i32
    return %arg0, %arg1 : i32, i32
  }
}

module attributes {stable_mosaic.version = 11 : i64} {
  func.func @_mm_bias_res_kernel(%arg0: i32, %arg1: i32, %arg2: i32, %arg3: memref<128x128xbf16, #tpu.memory_space<vmem>>, %arg4: memref<128x128xbf16, #tpu.memory_space<vmem>>, %arg5: memref<1x128xf32, #tpu.memory_space<vmem>>, %arg6: memref<128x128xbf16, #tpu.memory_space<vmem>>, %arg7: memref<128x128xbf16, #tpu.memory_space<vmem>>, %arg8: memref<128x128xf32, #tpu.memory_space<vmem>>) attributes {dimension_semantics = [#tpu.dimension_semantics<parallel>, #tpu.dimension_semantics<parallel>, #tpu.dimension_semantics<arbitrary>], iteration_bounds = array<i64: 1, 1, 5>, scalar_prefetch = 0 : i64, scratch_operands = 1 : i64, tpu.core_type = #tpu.core_type<tc>, window_params = [{transform_indices = @transform_0, window_bounds = array<i64: 128, 128>}, {transform_indices = @transform_1, window_bounds = array<i64: 128, 128>}, {transform_indices = @transform_2, window_bounds = array<i64: 1, 128>}, {transform_indices = @transform_3, window_bounds = array<i64: 128, 128>}, {transform_indices = @transform_4, window_bounds = array<i64: 128, 128>}]} {
    %c0_i32 = arith.constant 0 : i32
    %0 = arith.cmpi eq, %arg2, %c0_i32 : i32
    %1 = arith.extui %0 : i1 to i32
    %c0_i32_0 = arith.constant 0 : i32
    %2 = arith.cmpi ne, %1, %c0_i32_0 : i32
    scf.if %2 {
      %cst_9 = arith.constant 0.000000e+00 : f32
      %12 = vector.broadcast %cst_9 : f32 to vector<128x128xf32>
      %c0_10 = arith.constant 0 : index
      %c0_11 = arith.constant 0 : index
      %13 = vector.load %arg8[%c0_10, %c0_11] : memref<128x128xf32, #tpu.memory_space<vmem>>, vector<128x128xf32>
      tpu.vector_store %arg8[%c0_10, %c0_11], %12 {strides = array<i32>} : memref<128x128xf32, #tpu.memory_space<vmem>>, vector<128x128xf32>,
    } else {
    }
    %c0 = arith.constant 0 : index
    %c0_1 = arith.constant 0 : index
    %3 = vector.load %arg8[%c0, %c0_1] : memref<128x128xf32, #tpu.memory_space<vmem>>, vector<128x128xf32>
    %c0_2 = arith.constant 0 : index
    %c0_3 = arith.constant 0 : index
    %4 = vector.load %arg3[%c0_2, %c0_3] : memref<128x128xbf16, #tpu.memory_space<vmem>>, vector<128x128xbf16>
    %c0_4 = arith.constant 0 : index
    %c0_5 = arith.constant 0 : index
    %5 = vector.load %arg4[%c0_4, %c0_5] : memref<128x128xbf16, #tpu.memory_space<vmem>>, vector<128x128xbf16>
    %cst = arith.constant dense<0.000000e+00> : vector<128x128xf32>
    %6 = tpu.matmul %4, %5, %cst {dimension_numbers = #tpu.dot_dimension_numbers<[1], [0], [0], [1], [0, 0, 1, 1], [], []>} : vector<128x128xbf16>, vector<128x128xbf16>, vector<128x128xf32> -> vector<128x128xf32>
    %7 = arith.addf %3, %6 : vector<128x128xf32>
    %c0_6 = arith.constant 0 : index
    %c0_7 = arith.constant 0 : index
    %8 = vector.load %arg8[%c0_6, %c0_7] : memref<128x128xf32, #tpu.memory_space<vmem>>, vector<128x128xf32>
    tpu.vector_store %arg8[%c0_6, %c0_7], %7 {strides = array<i32>} : memref<128x128xf32, #tpu.memory_space<vmem>>, vector<128x128xf32>,
    %c4_i32 = arith.constant 4 : i32
    %9 = arith.cmpi eq, %arg2, %c4_i32 : i32
    %10 = arith.extui %9 : i1 to i32
    %c0_i32_8 = arith.constant 0 : i32
    %11 = arith.cmpi ne, %10, %c0_i32_8 : i32
    scf.if %11 {
      %c0_9 = arith.constant 0 : index
      %c0_10 = arith.constant 0 : index
      %12 = vector.load %arg8[%c0_9, %c0_10] : memref<128x128xf32, #tpu.memory_space<vmem>>, vector<128x128xf32>
      %c0_11 = arith.constant 0 : index
      %c0_12 = arith.constant 0 : index
      %13 = vector.load %arg5[%c0_11, %c0_12] : memref<1x128xf32, #tpu.memory_space<vmem>>, vector<1x128xf32>
      %14 = vector.broadcast %13 : vector<1x128xf32> to vector<128x128xf32>
      %15 = arith.addf %12, %14 : vector<128x128xf32>
      %c0_13 = arith.constant 0 : index
      %c0_14 = arith.constant 0 : index
      %16 = vector.load %arg6[%c0_13, %c0_14] : memref<128x128xbf16, #tpu.memory_space<vmem>>, vector<128x128xbf16>
      %17 = arith.extf %16 : vector<128x128xbf16> to vector<128x128xf32>
      %18 = arith.addf %15, %17 : vector<128x128xf32>
      %cst_15 = arith.constant 0.000000e+00 : f32
      %19 = vector.broadcast %cst_15 : f32 to vector<128x128xf32>
      %20 = arith.maximumf %18, %19 : vector<128x128xf32>
      %21 = arith.truncf %20 : vector<128x128xf32> to vector<128x128xbf16>
      %c0_16 = arith.constant 0 : index
      %c0_17 = arith.constant 0 : index
      %22 = vector.load %arg7[%c0_16, %c0_17] : memref<128x128xbf16, #tpu.memory_space<vmem>>, vector<128x128xbf16>
      tpu.vector_store %arg7[%c0_16, %c0_17], %21 {strides = array<i32>} : memref<128x128xbf16, #tpu.memory_space<vmem>>, vector<128x128xbf16>,
    } else {
    }
    return
  }
  func.func @transform_0(%arg0: i32, %arg1: i32, %arg2: i32) -> (i32, i32) {
    %c0_i32 = arith.constant 0 : i32
    return %arg0, %arg2 : i32, i32
  }
  func.func @transform_1(%arg0: i32, %arg1: i32, %arg2: i32) -> (i32, i32) {
    %c0_i32 = arith.constant 0 : i32
    return %arg2, %arg1 : i32, i32
  }
  func.func @transform_2(%arg0: i32, %arg1: i32, %arg2: i32) -> (i32, i32) {
    %c0_i32 = arith.constant 0 : i32
    %c0_i32_0 = arith.constant 0 : i32
    return %c0_i32, %arg1 : i32, i32
  }
  func.func @transform_3(%arg0: i32, %arg1: i32, %arg2: i32) -> (i32, i32) {
    %c0_i32 = arith.constant 0 : i32
    return %arg0, %arg1 : i32, i32
  }
  func.func @transform_4(%arg0: i32, %arg1: i32, %arg2: i32) -> (i32, i32) {
    %c0_i32 = arith.constant 0 : i32
    return %arg0, %arg1 : i32, i32
  }
}

module attributes {stable_mosaic.version = 11 : i64} {
  func.func @_mm_bias_kernel(%arg0: i32, %arg1: i32, %arg2: i32, %arg3: memref<32x128xbf16, #tpu.memory_space<vmem>>, %arg4: memref<128x128xbf16, #tpu.memory_space<vmem>>, %arg5: memref<1x128xf32, #tpu.memory_space<vmem>>, %arg6: memref<32x128xbf16, #tpu.memory_space<vmem>>, %arg7: memref<32x128xf32, #tpu.memory_space<vmem>>) attributes {dimension_semantics = [#tpu.dimension_semantics<parallel>, #tpu.dimension_semantics<parallel>, #tpu.dimension_semantics<arbitrary>], iteration_bounds = array<i64: 1, 1, 5>, scalar_prefetch = 0 : i64, scratch_operands = 1 : i64, tpu.core_type = #tpu.core_type<tc>, window_params = [{transform_indices = @transform_0, window_bounds = array<i64: 32, 128>}, {transform_indices = @transform_1, window_bounds = array<i64: 128, 128>}, {transform_indices = @transform_2, window_bounds = array<i64: 1, 128>}, {transform_indices = @transform_3, window_bounds = array<i64: 32, 128>}]} {
    %c0_i32 = arith.constant 0 : i32
    %0 = arith.cmpi eq, %arg2, %c0_i32 : i32
    %1 = arith.extui %0 : i1 to i32
    %c0_i32_0 = arith.constant 0 : i32
    %2 = arith.cmpi ne, %1, %c0_i32_0 : i32
    scf.if %2 {
      %cst_9 = arith.constant 0.000000e+00 : f32
      %12 = vector.broadcast %cst_9 : f32 to vector<32x128xf32>
      %c0_10 = arith.constant 0 : index
      %c0_11 = arith.constant 0 : index
      %13 = vector.load %arg7[%c0_10, %c0_11] : memref<32x128xf32, #tpu.memory_space<vmem>>, vector<32x128xf32>
      tpu.vector_store %arg7[%c0_10, %c0_11], %12 {strides = array<i32>} : memref<32x128xf32, #tpu.memory_space<vmem>>, vector<32x128xf32>,
    } else {
    }
    %c0 = arith.constant 0 : index
    %c0_1 = arith.constant 0 : index
    %3 = vector.load %arg7[%c0, %c0_1] : memref<32x128xf32, #tpu.memory_space<vmem>>, vector<32x128xf32>
    %c0_2 = arith.constant 0 : index
    %c0_3 = arith.constant 0 : index
    %4 = vector.load %arg3[%c0_2, %c0_3] : memref<32x128xbf16, #tpu.memory_space<vmem>>, vector<32x128xbf16>
    %c0_4 = arith.constant 0 : index
    %c0_5 = arith.constant 0 : index
    %5 = vector.load %arg4[%c0_4, %c0_5] : memref<128x128xbf16, #tpu.memory_space<vmem>>, vector<128x128xbf16>
    %cst = arith.constant dense<0.000000e+00> : vector<32x128xf32>
    %6 = tpu.matmul %4, %5, %cst {dimension_numbers = #tpu.dot_dimension_numbers<[1], [0], [0], [1], [0, 0, 1, 1], [], []>} : vector<32x128xbf16>, vector<128x128xbf16>, vector<32x128xf32> -> vector<32x128xf32>
    %7 = arith.addf %3, %6 : vector<32x128xf32>
    %c0_6 = arith.constant 0 : index
    %c0_7 = arith.constant 0 : index
    %8 = vector.load %arg7[%c0_6, %c0_7] : memref<32x128xf32, #tpu.memory_space<vmem>>, vector<32x128xf32>
    tpu.vector_store %arg7[%c0_6, %c0_7], %7 {strides = array<i32>} : memref<32x128xf32, #tpu.memory_space<vmem>>, vector<32x128xf32>,
    %c4_i32 = arith.constant 4 : i32
    %9 = arith.cmpi eq, %arg2, %c4_i32 : i32
    %10 = arith.extui %9 : i1 to i32
    %c0_i32_8 = arith.constant 0 : i32
    %11 = arith.cmpi ne, %10, %c0_i32_8 : i32
    scf.if %11 {
      %c0_9 = arith.constant 0 : index
      %c0_10 = arith.constant 0 : index
      %12 = vector.load %arg7[%c0_9, %c0_10] : memref<32x128xf32, #tpu.memory_space<vmem>>, vector<32x128xf32>
      %c0_11 = arith.constant 0 : index
      %c0_12 = arith.constant 0 : index
      %13 = vector.load %arg5[%c0_11, %c0_12] : memref<1x128xf32, #tpu.memory_space<vmem>>, vector<1x128xf32>
      %14 = vector.broadcast %13 : vector<1x128xf32> to vector<32x128xf32>
      %15 = arith.addf %12, %14 : vector<32x128xf32>
      %cst_13 = arith.constant 0.000000e+00 : f32
      %16 = vector.broadcast %cst_13 : f32 to vector<32x128xf32>
      %17 = arith.maximumf %15, %16 : vector<32x128xf32>
      %18 = arith.truncf %17 : vector<32x128xf32> to vector<32x128xbf16>
      %c0_14 = arith.constant 0 : index
      %c0_15 = arith.constant 0 : index
      %19 = vector.load %arg6[%c0_14, %c0_15] : memref<32x128xbf16, #tpu.memory_space<vmem>>, vector<32x128xbf16>
      tpu.vector_store %arg6[%c0_14, %c0_15], %18 {strides = array<i32>} : memref<32x128xbf16, #tpu.memory_space<vmem>>, vector<32x128xbf16>,
    } else {
    }
    return
  }
  func.func @transform_0(%arg0: i32, %arg1: i32, %arg2: i32) -> (i32, i32) {
    %c0_i32 = arith.constant 0 : i32
    return %arg0, %arg2 : i32, i32
  }
  func.func @transform_1(%arg0: i32, %arg1: i32, %arg2: i32) -> (i32, i32) {
    %c0_i32 = arith.constant 0 : i32
    return %arg2, %arg1 : i32, i32
  }
  func.func @transform_2(%arg0: i32, %arg1: i32, %arg2: i32) -> (i32, i32) {
    %c0_i32 = arith.constant 0 : i32
    %c0_i32_0 = arith.constant 0 : i32
    return %c0_i32, %arg1 : i32, i32
  }
  func.func @transform_3(%arg0: i32, %arg1: i32, %arg2: i32) -> (i32, i32) {
    %c0_i32 = arith.constant 0 : i32
    return %arg0, %arg1 : i32, i32
  }
}

module attributes {stable_mosaic.version = 11 : i64} {
  func.func @_mm_bias_kernel(%arg0: i32, %arg1: i32, %arg2: i32, %arg3: memref<32x128xbf16, #tpu.memory_space<vmem>>, %arg4: memref<128x128xbf16, #tpu.memory_space<vmem>>, %arg5: memref<1x128xf32, #tpu.memory_space<vmem>>, %arg6: memref<32x128xbf16, #tpu.memory_space<vmem>>, %arg7: memref<32x128xf32, #tpu.memory_space<vmem>>) attributes {dimension_semantics = [#tpu.dimension_semantics<parallel>, #tpu.dimension_semantics<parallel>, #tpu.dimension_semantics<arbitrary>], iteration_bounds = array<i64: 1, 1, 1>, scalar_prefetch = 0 : i64, scratch_operands = 1 : i64, tpu.core_type = #tpu.core_type<tc>, window_params = [{transform_indices = @transform_0, window_bounds = array<i64: 32, 128>}, {transform_indices = @transform_1, window_bounds = array<i64: 128, 128>}, {transform_indices = @transform_2, window_bounds = array<i64: 1, 128>}, {transform_indices = @transform_3, window_bounds = array<i64: 32, 128>}]} {
    %c0_i32 = arith.constant 0 : i32
    %0 = arith.cmpi eq, %arg2, %c0_i32 : i32
    %1 = arith.extui %0 : i1 to i32
    %c0_i32_0 = arith.constant 0 : i32
    %2 = arith.cmpi ne, %1, %c0_i32_0 : i32
    scf.if %2 {
      %cst_10 = arith.constant 0.000000e+00 : f32
      %12 = vector.broadcast %cst_10 : f32 to vector<32x128xf32>
      %c0_11 = arith.constant 0 : index
      %c0_12 = arith.constant 0 : index
      %13 = vector.load %arg7[%c0_11, %c0_12] : memref<32x128xf32, #tpu.memory_space<vmem>>, vector<32x128xf32>
      tpu.vector_store %arg7[%c0_11, %c0_12], %12 {strides = array<i32>} : memref<32x128xf32, #tpu.memory_space<vmem>>, vector<32x128xf32>,
    } else {
    }
    %c0 = arith.constant 0 : index
    %c0_1 = arith.constant 0 : index
    %3 = vector.load %arg7[%c0, %c0_1] : memref<32x128xf32, #tpu.memory_space<vmem>>, vector<32x128xf32>
    %c0_2 = arith.constant 0 : index
    %c0_3 = arith.constant 0 : index
    %4 = vector.load %arg3[%c0_2, %c0_3] : memref<32x128xbf16, #tpu.memory_space<vmem>>, vector<32x128xbf16>
    %c0_4 = arith.constant 0 : index
    %c0_5 = arith.constant 0 : index
    %5 = vector.load %arg4[%c0_4, %c0_5] : memref<128x128xbf16, #tpu.memory_space<vmem>>, vector<128x128xbf16>
    %cst = arith.constant dense<0.000000e+00> : vector<32x128xf32>
    %6 = tpu.matmul %4, %5, %cst {dimension_numbers = #tpu.dot_dimension_numbers<[1], [0], [0], [1], [0, 0, 1, 1], [], []>} : vector<32x128xbf16>, vector<128x128xbf16>, vector<32x128xf32> -> vector<32x128xf32>
    %7 = arith.addf %3, %6 : vector<32x128xf32>
    %c0_6 = arith.constant 0 : index
    %c0_7 = arith.constant 0 : index
    %8 = vector.load %arg7[%c0_6, %c0_7] : memref<32x128xf32, #tpu.memory_space<vmem>>, vector<32x128xf32>
    tpu.vector_store %arg7[%c0_6, %c0_7], %7 {strides = array<i32>} : memref<32x128xf32, #tpu.memory_space<vmem>>, vector<32x128xf32>,
    %c0_i32_8 = arith.constant 0 : i32
    %9 = arith.cmpi eq, %arg2, %c0_i32_8 : i32
    %10 = arith.extui %9 : i1 to i32
    %c0_i32_9 = arith.constant 0 : i32
    %11 = arith.cmpi ne, %10, %c0_i32_9 : i32
    scf.if %11 {
      %c0_10 = arith.constant 0 : index
      %c0_11 = arith.constant 0 : index
      %12 = vector.load %arg7[%c0_10, %c0_11] : memref<32x128xf32, #tpu.memory_space<vmem>>, vector<32x128xf32>
      %c0_12 = arith.constant 0 : index
      %c0_13 = arith.constant 0 : index
      %13 = vector.load %arg5[%c0_12, %c0_13] : memref<1x128xf32, #tpu.memory_space<vmem>>, vector<1x128xf32>
      %14 = vector.broadcast %13 : vector<1x128xf32> to vector<32x128xf32>
      %15 = arith.addf %12, %14 : vector<32x128xf32>
      %16 = arith.truncf %15 : vector<32x128xf32> to vector<32x128xbf16>
      %c0_14 = arith.constant 0 : index
      %c0_15 = arith.constant 0 : index
      %17 = vector.load %arg6[%c0_14, %c0_15] : memref<32x128xbf16, #tpu.memory_space<vmem>>, vector<32x128xbf16>
      tpu.vector_store %arg6[%c0_14, %c0_15], %16 {strides = array<i32>} : memref<32x128xbf16, #tpu.memory_space<vmem>>, vector<32x128xbf16>,
    } else {
    }
    return
  }
  func.func @transform_0(%arg0: i32, %arg1: i32, %arg2: i32) -> (i32, i32) {
    %c0_i32 = arith.constant 0 : i32
    return %arg0, %arg2 : i32, i32
  }
  func.func @transform_1(%arg0: i32, %arg1: i32, %arg2: i32) -> (i32, i32) {
    %c0_i32 = arith.constant 0 : i32
    return %arg2, %arg1 : i32, i32
  }
  func.func @transform_2(%arg0: i32, %arg1: i32, %arg2: i32) -> (i32, i32) {
    %c0_i32 = arith.constant 0 : i32
    %c0_i32_0 = arith.constant 0 : i32
    return %c0_i32, %arg1 : i32, i32
  }
  func.func @transform_3(%arg0: i32, %arg1: i32, %arg2: i32) -> (i32, i32) {
    %c0_i32 = arith.constant 0 : i32
    return %arg0, %arg1 : i32, i32
  }
}

module attributes {stable_mosaic.version = 11 : i64} {
  func.func @_mm_bias_res_kernel(%arg0: i32, %arg1: i32, %arg2: i32, %arg3: memref<32x384xbf16, #tpu.memory_space<vmem>>, %arg4: memref<384x128xbf16, #tpu.memory_space<vmem>>, %arg5: memref<1x128xf32, #tpu.memory_space<vmem>>, %arg6: memref<32x128xbf16, #tpu.memory_space<vmem>>, %arg7: memref<32x128xbf16, #tpu.memory_space<vmem>>, %arg8: memref<32x128xf32, #tpu.memory_space<vmem>>) attributes {dimension_semantics = [#tpu.dimension_semantics<parallel>, #tpu.dimension_semantics<parallel>, #tpu.dimension_semantics<arbitrary>], iteration_bounds = array<i64: 1, 1, 3>, scalar_prefetch = 0 : i64, scratch_operands = 1 : i64, tpu.core_type = #tpu.core_type<tc>, window_params = [{transform_indices = @transform_0, window_bounds = array<i64: 32, 384>}, {transform_indices = @transform_1, window_bounds = array<i64: 384, 128>}, {transform_indices = @transform_2, window_bounds = array<i64: 1, 128>}, {transform_indices = @transform_3, window_bounds = array<i64: 32, 128>}, {transform_indices = @transform_4, window_bounds = array<i64: 32, 128>}]} {
    %c0_i32 = arith.constant 0 : i32
    %0 = arith.cmpi eq, %arg2, %c0_i32 : i32
    %1 = arith.extui %0 : i1 to i32
    %c0_i32_0 = arith.constant 0 : i32
    %2 = arith.cmpi ne, %1, %c0_i32_0 : i32
    scf.if %2 {
      %cst_9 = arith.constant 0.000000e+00 : f32
      %12 = vector.broadcast %cst_9 : f32 to vector<32x128xf32>
      %c0_10 = arith.constant 0 : index
      %c0_11 = arith.constant 0 : index
      %13 = vector.load %arg8[%c0_10, %c0_11] : memref<32x128xf32, #tpu.memory_space<vmem>>, vector<32x128xf32>
      tpu.vector_store %arg8[%c0_10, %c0_11], %12 {strides = array<i32>} : memref<32x128xf32, #tpu.memory_space<vmem>>, vector<32x128xf32>,
    } else {
    }
    %c0 = arith.constant 0 : index
    %c0_1 = arith.constant 0 : index
    %3 = vector.load %arg8[%c0, %c0_1] : memref<32x128xf32, #tpu.memory_space<vmem>>, vector<32x128xf32>
    %c0_2 = arith.constant 0 : index
    %c0_3 = arith.constant 0 : index
    %4 = vector.load %arg3[%c0_2, %c0_3] : memref<32x384xbf16, #tpu.memory_space<vmem>>, vector<32x384xbf16>
    %c0_4 = arith.constant 0 : index
    %c0_5 = arith.constant 0 : index
    %5 = vector.load %arg4[%c0_4, %c0_5] : memref<384x128xbf16, #tpu.memory_space<vmem>>, vector<384x128xbf16>
    %cst = arith.constant dense<0.000000e+00> : vector<32x128xf32>
    %6 = tpu.matmul %4, %5, %cst {dimension_numbers = #tpu.dot_dimension_numbers<[1], [0], [0], [1], [0, 0, 1, 1], [], []>} : vector<32x384xbf16>, vector<384x128xbf16>, vector<32x128xf32> -> vector<32x128xf32>
    %7 = arith.addf %3, %6 : vector<32x128xf32>
    %c0_6 = arith.constant 0 : index
    %c0_7 = arith.constant 0 : index
    %8 = vector.load %arg8[%c0_6, %c0_7] : memref<32x128xf32, #tpu.memory_space<vmem>>, vector<32x128xf32>
    tpu.vector_store %arg8[%c0_6, %c0_7], %7 {strides = array<i32>} : memref<32x128xf32, #tpu.memory_space<vmem>>, vector<32x128xf32>,
    %c2_i32 = arith.constant 2 : i32
    %9 = arith.cmpi eq, %arg2, %c2_i32 : i32
    %10 = arith.extui %9 : i1 to i32
    %c0_i32_8 = arith.constant 0 : i32
    %11 = arith.cmpi ne, %10, %c0_i32_8 : i32
    scf.if %11 {
      %c0_9 = arith.constant 0 : index
      %c0_10 = arith.constant 0 : index
      %12 = vector.load %arg8[%c0_9, %c0_10] : memref<32x128xf32, #tpu.memory_space<vmem>>, vector<32x128xf32>
      %c0_11 = arith.constant 0 : index
      %c0_12 = arith.constant 0 : index
      %13 = vector.load %arg5[%c0_11, %c0_12] : memref<1x128xf32, #tpu.memory_space<vmem>>, vector<1x128xf32>
      %14 = vector.broadcast %13 : vector<1x128xf32> to vector<32x128xf32>
      %15 = arith.addf %12, %14 : vector<32x128xf32>
      %c0_13 = arith.constant 0 : index
      %c0_14 = arith.constant 0 : index
      %16 = vector.load %arg6[%c0_13, %c0_14] : memref<32x128xbf16, #tpu.memory_space<vmem>>, vector<32x128xbf16>
      %17 = arith.extf %16 : vector<32x128xbf16> to vector<32x128xf32>
      %18 = arith.addf %15, %17 : vector<32x128xf32>
      %cst_15 = arith.constant 0.000000e+00 : f32
      %19 = vector.broadcast %cst_15 : f32 to vector<32x128xf32>
      %20 = arith.maximumf %18, %19 : vector<32x128xf32>
      %21 = arith.truncf %20 : vector<32x128xf32> to vector<32x128xbf16>
      %c0_16 = arith.constant 0 : index
      %c0_17 = arith.constant 0 : index
      %22 = vector.load %arg7[%c0_16, %c0_17] : memref<32x128xbf16, #tpu.memory_space<vmem>>, vector<32x128xbf16>
      tpu.vector_store %arg7[%c0_16, %c0_17], %21 {strides = array<i32>} : memref<32x128xbf16, #tpu.memory_space<vmem>>, vector<32x128xbf16>,
    } else {
    }
    return
  }
  func.func @transform_0(%arg0: i32, %arg1: i32, %arg2: i32) -> (i32, i32) {
    %c0_i32 = arith.constant 0 : i32
    return %arg0, %arg2 : i32, i32
  }
  func.func @transform_1(%arg0: i32, %arg1: i32, %arg2: i32) -> (i32, i32) {
    %c0_i32 = arith.constant 0 : i32
    return %arg2, %arg1 : i32, i32
  }
  func.func @transform_2(%arg0: i32, %arg1: i32, %arg2: i32) -> (i32, i32) {
    %c0_i32 = arith.constant 0 : i32
    %c0_i32_0 = arith.constant 0 : i32
    return %c0_i32, %arg1 : i32, i32
  }
  func.func @transform_3(%arg0: i32, %arg1: i32, %arg2: i32) -> (i32, i32) {
    %c0_i32 = arith.constant 0 : i32
    return %arg0, %arg1 : i32, i32
  }
  func.func @transform_4(%arg0: i32, %arg1: i32, %arg2: i32) -> (i32, i32) {
    %c0_i32 = arith.constant 0 : i32
    return %arg0, %arg1 : i32, i32
  }
}

module attributes {stable_mosaic.version = 11 : i64} {
  func.func @_mm_bias_kernel(%arg0: i32, %arg1: i32, %arg2: i32, %arg3: memref<32x384xbf16, #tpu.memory_space<vmem>>, %arg4: memref<384x128xbf16, #tpu.memory_space<vmem>>, %arg5: memref<1x128xf32, #tpu.memory_space<vmem>>, %arg6: memref<32x128xbf16, #tpu.memory_space<vmem>>, %arg7: memref<32x128xf32, #tpu.memory_space<vmem>>) attributes {dimension_semantics = [#tpu.dimension_semantics<parallel>, #tpu.dimension_semantics<parallel>, #tpu.dimension_semantics<arbitrary>], iteration_bounds = array<i64: 1, 1, 3>, scalar_prefetch = 0 : i64, scratch_operands = 1 : i64, tpu.core_type = #tpu.core_type<tc>, window_params = [{transform_indices = @transform_0, window_bounds = array<i64: 32, 384>}, {transform_indices = @transform_1, window_bounds = array<i64: 384, 128>}, {transform_indices = @transform_2, window_bounds = array<i64: 1, 128>}, {transform_indices = @transform_3, window_bounds = array<i64: 32, 128>}]} {
    %c0_i32 = arith.constant 0 : i32
    %0 = arith.cmpi eq, %arg2, %c0_i32 : i32
    %1 = arith.extui %0 : i1 to i32
    %c0_i32_0 = arith.constant 0 : i32
    %2 = arith.cmpi ne, %1, %c0_i32_0 : i32
    scf.if %2 {
      %cst_9 = arith.constant 0.000000e+00 : f32
      %12 = vector.broadcast %cst_9 : f32 to vector<32x128xf32>
      %c0_10 = arith.constant 0 : index
      %c0_11 = arith.constant 0 : index
      %13 = vector.load %arg7[%c0_10, %c0_11] : memref<32x128xf32, #tpu.memory_space<vmem>>, vector<32x128xf32>
      tpu.vector_store %arg7[%c0_10, %c0_11], %12 {strides = array<i32>} : memref<32x128xf32, #tpu.memory_space<vmem>>, vector<32x128xf32>,
    } else {
    }
    %c0 = arith.constant 0 : index
    %c0_1 = arith.constant 0 : index
    %3 = vector.load %arg7[%c0, %c0_1] : memref<32x128xf32, #tpu.memory_space<vmem>>, vector<32x128xf32>
    %c0_2 = arith.constant 0 : index
    %c0_3 = arith.constant 0 : index
    %4 = vector.load %arg3[%c0_2, %c0_3] : memref<32x384xbf16, #tpu.memory_space<vmem>>, vector<32x384xbf16>
    %c0_4 = arith.constant 0 : index
    %c0_5 = arith.constant 0 : index
    %5 = vector.load %arg4[%c0_4, %c0_5] : memref<384x128xbf16, #tpu.memory_space<vmem>>, vector<384x128xbf16>
    %cst = arith.constant dense<0.000000e+00> : vector<32x128xf32>
    %6 = tpu.matmul %4, %5, %cst {dimension_numbers = #tpu.dot_dimension_numbers<[1], [0], [0], [1], [0, 0, 1, 1], [], []>} : vector<32x384xbf16>, vector<384x128xbf16>, vector<32x128xf32> -> vector<32x128xf32>
    %7 = arith.addf %3, %6 : vector<32x128xf32>
    %c0_6 = arith.constant 0 : index
    %c0_7 = arith.constant 0 : index
    %8 = vector.load %arg7[%c0_6, %c0_7] : memref<32x128xf32, #tpu.memory_space<vmem>>, vector<32x128xf32>
    tpu.vector_store %arg7[%c0_6, %c0_7], %7 {strides = array<i32>} : memref<32x128xf32, #tpu.memory_space<vmem>>, vector<32x128xf32>,
    %c2_i32 = arith.constant 2 : i32
    %9 = arith.cmpi eq, %arg2, %c2_i32 : i32
    %10 = arith.extui %9 : i1 to i32
    %c0_i32_8 = arith.constant 0 : i32
    %11 = arith.cmpi ne, %10, %c0_i32_8 : i32
    scf.if %11 {
      %c0_9 = arith.constant 0 : index
      %c0_10 = arith.constant 0 : index
      %12 = vector.load %arg7[%c0_9, %c0_10] : memref<32x128xf32, #tpu.memory_space<vmem>>, vector<32x128xf32>
      %c0_11 = arith.constant 0 : index
      %c0_12 = arith.constant 0 : index
      %13 = vector.load %arg5[%c0_11, %c0_12] : memref<1x128xf32, #tpu.memory_space<vmem>>, vector<1x128xf32>
      %14 = vector.broadcast %13 : vector<1x128xf32> to vector<32x128xf32>
      %15 = arith.addf %12, %14 : vector<32x128xf32>
      %cst_13 = arith.constant 0.000000e+00 : f32
      %16 = vector.broadcast %cst_13 : f32 to vector<32x128xf32>
      %17 = arith.maximumf %15, %16 : vector<32x128xf32>
      %18 = arith.truncf %17 : vector<32x128xf32> to vector<32x128xbf16>
      %c0_14 = arith.constant 0 : index
      %c0_15 = arith.constant 0 : index
      %19 = vector.load %arg6[%c0_14, %c0_15] : memref<32x128xbf16, #tpu.memory_space<vmem>>, vector<32x128xbf16>
      tpu.vector_store %arg6[%c0_14, %c0_15], %18 {strides = array<i32>} : memref<32x128xbf16, #tpu.memory_space<vmem>>, vector<32x128xbf16>,
    } else {
    }
    return
  }
  func.func @transform_0(%arg0: i32, %arg1: i32, %arg2: i32) -> (i32, i32) {
    %c0_i32 = arith.constant 0 : i32
    return %arg0, %arg2 : i32, i32
  }
  func.func @transform_1(%arg0: i32, %arg1: i32, %arg2: i32) -> (i32, i32) {
    %c0_i32 = arith.constant 0 : i32
    return %arg2, %arg1 : i32, i32
  }
  func.func @transform_2(%arg0: i32, %arg1: i32, %arg2: i32) -> (i32, i32) {
    %c0_i32 = arith.constant 0 : i32
    %c0_i32_0 = arith.constant 0 : i32
    return %c0_i32, %arg1 : i32, i32
  }
  func.func @transform_3(%arg0: i32, %arg1: i32, %arg2: i32) -> (i32, i32) {
    %c0_i32 = arith.constant 0 : i32
    return %arg0, %arg1 : i32, i32
  }
}

module attributes {stable_mosaic.version = 11 : i64} {
  func.func @_mm_bias_kernel(%arg0: i32, %arg1: i32, %arg2: i32, %arg3: memref<8x384xbf16, #tpu.memory_space<vmem>>, %arg4: memref<384x256xbf16, #tpu.memory_space<vmem>>, %arg5: memref<1x256xf32, #tpu.memory_space<vmem>>, %arg6: memref<8x256xbf16, #tpu.memory_space<vmem>>, %arg7: memref<8x256xf32, #tpu.memory_space<vmem>>) attributes {dimension_semantics = [#tpu.dimension_semantics<parallel>, #tpu.dimension_semantics<parallel>, #tpu.dimension_semantics<arbitrary>], iteration_bounds = array<i64: 1, 1, 3>, scalar_prefetch = 0 : i64, scratch_operands = 1 : i64, tpu.core_type = #tpu.core_type<tc>, window_params = [{transform_indices = @transform_0, window_bounds = array<i64: 8, 384>}, {transform_indices = @transform_1, window_bounds = array<i64: 384, 256>}, {transform_indices = @transform_2, window_bounds = array<i64: 1, 256>}, {transform_indices = @transform_3, window_bounds = array<i64: 8, 256>}]} {
    %c0_i32 = arith.constant 0 : i32
    %0 = arith.cmpi eq, %arg2, %c0_i32 : i32
    %1 = arith.extui %0 : i1 to i32
    %c0_i32_0 = arith.constant 0 : i32
    %2 = arith.cmpi ne, %1, %c0_i32_0 : i32
    scf.if %2 {
      %cst_9 = arith.constant 0.000000e+00 : f32
      %12 = vector.broadcast %cst_9 : f32 to vector<8x256xf32>
      %c0_10 = arith.constant 0 : index
      %c0_11 = arith.constant 0 : index
      %13 = vector.load %arg7[%c0_10, %c0_11] : memref<8x256xf32, #tpu.memory_space<vmem>>, vector<8x256xf32>
      tpu.vector_store %arg7[%c0_10, %c0_11], %12 {strides = array<i32>} : memref<8x256xf32, #tpu.memory_space<vmem>>, vector<8x256xf32>,
    } else {
    }
    %c0 = arith.constant 0 : index
    %c0_1 = arith.constant 0 : index
    %3 = vector.load %arg7[%c0, %c0_1] : memref<8x256xf32, #tpu.memory_space<vmem>>, vector<8x256xf32>
    %c0_2 = arith.constant 0 : index
    %c0_3 = arith.constant 0 : index
    %4 = vector.load %arg3[%c0_2, %c0_3] : memref<8x384xbf16, #tpu.memory_space<vmem>>, vector<8x384xbf16>
    %c0_4 = arith.constant 0 : index
    %c0_5 = arith.constant 0 : index
    %5 = vector.load %arg4[%c0_4, %c0_5] : memref<384x256xbf16, #tpu.memory_space<vmem>>, vector<384x256xbf16>
    %cst = arith.constant dense<0.000000e+00> : vector<8x256xf32>
    %6 = tpu.matmul %4, %5, %cst {dimension_numbers = #tpu.dot_dimension_numbers<[1], [0], [0], [1], [0, 0, 1, 1], [], []>} : vector<8x384xbf16>, vector<384x256xbf16>, vector<8x256xf32> -> vector<8x256xf32>
    %7 = arith.addf %3, %6 : vector<8x256xf32>
    %c0_6 = arith.constant 0 : index
    %c0_7 = arith.constant 0 : index
    %8 = vector.load %arg7[%c0_6, %c0_7] : memref<8x256xf32, #tpu.memory_space<vmem>>, vector<8x256xf32>
    tpu.vector_store %arg7[%c0_6, %c0_7], %7 {strides = array<i32>} : memref<8x256xf32, #tpu.memory_space<vmem>>, vector<8x256xf32>,
    %c2_i32 = arith.constant 2 : i32
    %9 = arith.cmpi eq, %arg2, %c2_i32 : i32
    %10 = arith.extui %9 : i1 to i32
    %c0_i32_8 = arith.constant 0 : i32
    %11 = arith.cmpi ne, %10, %c0_i32_8 : i32
    scf.if %11 {
      %c0_9 = arith.constant 0 : index
      %c0_10 = arith.constant 0 : index
      %12 = vector.load %arg7[%c0_9, %c0_10] : memref<8x256xf32, #tpu.memory_space<vmem>>, vector<8x256xf32>
      %c0_11 = arith.constant 0 : index
      %c0_12 = arith.constant 0 : index
      %13 = vector.load %arg5[%c0_11, %c0_12] : memref<1x256xf32, #tpu.memory_space<vmem>>, vector<1x256xf32>
      %14 = vector.broadcast %13 : vector<1x256xf32> to vector<8x256xf32>
      %15 = arith.addf %12, %14 : vector<8x256xf32>
      %cst_13 = arith.constant 0.000000e+00 : f32
      %16 = vector.broadcast %cst_13 : f32 to vector<8x256xf32>
      %17 = arith.maximumf %15, %16 : vector<8x256xf32>
      %18 = arith.truncf %17 : vector<8x256xf32> to vector<8x256xbf16>
      %c0_14 = arith.constant 0 : index
      %c0_15 = arith.constant 0 : index
      %19 = vector.load %arg6[%c0_14, %c0_15] : memref<8x256xbf16, #tpu.memory_space<vmem>>, vector<8x256xbf16>
      tpu.vector_store %arg6[%c0_14, %c0_15], %18 {strides = array<i32>} : memref<8x256xbf16, #tpu.memory_space<vmem>>, vector<8x256xbf16>,
    } else {
    }
    return
  }
  func.func @transform_0(%arg0: i32, %arg1: i32, %arg2: i32) -> (i32, i32) {
    %c0_i32 = arith.constant 0 : i32
    return %arg0, %arg2 : i32, i32
  }
  func.func @transform_1(%arg0: i32, %arg1: i32, %arg2: i32) -> (i32, i32) {
    %c0_i32 = arith.constant 0 : i32
    return %arg2, %arg1 : i32, i32
  }
  func.func @transform_2(%arg0: i32, %arg1: i32, %arg2: i32) -> (i32, i32) {
    %c0_i32 = arith.constant 0 : i32
    %c0_i32_0 = arith.constant 0 : i32
    return %c0_i32, %arg1 : i32, i32
  }
  func.func @transform_3(%arg0: i32, %arg1: i32, %arg2: i32) -> (i32, i32) {
    %c0_i32 = arith.constant 0 : i32
    return %arg0, %arg1 : i32, i32
  }
}

module attributes {stable_mosaic.version = 11 : i64} {
  func.func @_mm_bias_kernel(%arg0: i32, %arg1: i32, %arg2: i32, %arg3: memref<8x128xbf16, #tpu.memory_space<vmem>>, %arg4: memref<128x256xbf16, #tpu.memory_space<vmem>>, %arg5: memref<1x256xf32, #tpu.memory_space<vmem>>, %arg6: memref<8x256xbf16, #tpu.memory_space<vmem>>, %arg7: memref<8x256xf32, #tpu.memory_space<vmem>>) attributes {dimension_semantics = [#tpu.dimension_semantics<parallel>, #tpu.dimension_semantics<parallel>, #tpu.dimension_semantics<arbitrary>], iteration_bounds = array<i64: 1, 1, 1>, scalar_prefetch = 0 : i64, scratch_operands = 1 : i64, tpu.core_type = #tpu.core_type<tc>, window_params = [{transform_indices = @transform_0, window_bounds = array<i64: 8, 128>}, {transform_indices = @transform_1, window_bounds = array<i64: 128, 256>}, {transform_indices = @transform_2, window_bounds = array<i64: 1, 256>}, {transform_indices = @transform_3, window_bounds = array<i64: 8, 256>}]} {
    %c0_i32 = arith.constant 0 : i32
    %0 = arith.cmpi eq, %arg2, %c0_i32 : i32
    %1 = arith.extui %0 : i1 to i32
    %c0_i32_0 = arith.constant 0 : i32
    %2 = arith.cmpi ne, %1, %c0_i32_0 : i32
    scf.if %2 {
      %cst_10 = arith.constant 0.000000e+00 : f32
      %12 = vector.broadcast %cst_10 : f32 to vector<8x256xf32>
      %c0_11 = arith.constant 0 : index
      %c0_12 = arith.constant 0 : index
      %13 = vector.load %arg7[%c0_11, %c0_12] : memref<8x256xf32, #tpu.memory_space<vmem>>, vector<8x256xf32>
      tpu.vector_store %arg7[%c0_11, %c0_12], %12 {strides = array<i32>} : memref<8x256xf32, #tpu.memory_space<vmem>>, vector<8x256xf32>,
    } else {
    }
    %c0 = arith.constant 0 : index
    %c0_1 = arith.constant 0 : index
    %3 = vector.load %arg7[%c0, %c0_1] : memref<8x256xf32, #tpu.memory_space<vmem>>, vector<8x256xf32>
    %c0_2 = arith.constant 0 : index
    %c0_3 = arith.constant 0 : index
    %4 = vector.load %arg3[%c0_2, %c0_3] : memref<8x128xbf16, #tpu.memory_space<vmem>>, vector<8x128xbf16>
    %c0_4 = arith.constant 0 : index
    %c0_5 = arith.constant 0 : index
    %5 = vector.load %arg4[%c0_4, %c0_5] : memref<128x256xbf16, #tpu.memory_space<vmem>>, vector<128x256xbf16>
    %cst = arith.constant dense<0.000000e+00> : vector<8x256xf32>
    %6 = tpu.matmul %4, %5, %cst {dimension_numbers = #tpu.dot_dimension_numbers<[1], [0], [0], [1], [0, 0, 1, 1], [], []>} : vector<8x128xbf16>, vector<128x256xbf16>, vector<8x256xf32> -> vector<8x256xf32>
    %7 = arith.addf %3, %6 : vector<8x256xf32>
    %c0_6 = arith.constant 0 : index
    %c0_7 = arith.constant 0 : index
    %8 = vector.load %arg7[%c0_6, %c0_7] : memref<8x256xf32, #tpu.memory_space<vmem>>, vector<8x256xf32>
    tpu.vector_store %arg7[%c0_6, %c0_7], %7 {strides = array<i32>} : memref<8x256xf32, #tpu.memory_space<vmem>>, vector<8x256xf32>,
    %c0_i32_8 = arith.constant 0 : i32
    %9 = arith.cmpi eq, %arg2, %c0_i32_8 : i32
    %10 = arith.extui %9 : i1 to i32
    %c0_i32_9 = arith.constant 0 : i32
    %11 = arith.cmpi ne, %10, %c0_i32_9 : i32
    scf.if %11 {
      %c0_10 = arith.constant 0 : index
      %c0_11 = arith.constant 0 : index
      %12 = vector.load %arg7[%c0_10, %c0_11] : memref<8x256xf32, #tpu.memory_space<vmem>>, vector<8x256xf32>
      %c0_12 = arith.constant 0 : index
      %c0_13 = arith.constant 0 : index
      %13 = vector.load %arg5[%c0_12, %c0_13] : memref<1x256xf32, #tpu.memory_space<vmem>>, vector<1x256xf32>
      %14 = vector.broadcast %13 : vector<1x256xf32> to vector<8x256xf32>
      %15 = arith.addf %12, %14 : vector<8x256xf32>
      %16 = arith.truncf %15 : vector<8x256xf32> to vector<8x256xbf16>
      %c0_14 = arith.constant 0 : index
      %c0_15 = arith.constant 0 : index
      %17 = vector.load %arg6[%c0_14, %c0_15] : memref<8x256xbf16, #tpu.memory_space<vmem>>, vector<8x256xbf16>
      tpu.vector_store %arg6[%c0_14, %c0_15], %16 {strides = array<i32>} : memref<8x256xbf16, #tpu.memory_space<vmem>>, vector<8x256xbf16>,
    } else {
    }
    return
  }
  func.func @transform_0(%arg0: i32, %arg1: i32, %arg2: i32) -> (i32, i32) {
    %c0_i32 = arith.constant 0 : i32
    return %arg0, %arg2 : i32, i32
  }
  func.func @transform_1(%arg0: i32, %arg1: i32, %arg2: i32) -> (i32, i32) {
    %c0_i32 = arith.constant 0 : i32
    return %arg2, %arg1 : i32, i32
  }
  func.func @transform_2(%arg0: i32, %arg1: i32, %arg2: i32) -> (i32, i32) {
    %c0_i32 = arith.constant 0 : i32
    %c0_i32_0 = arith.constant 0 : i32
    return %c0_i32, %arg1 : i32, i32
  }
  func.func @transform_3(%arg0: i32, %arg1: i32, %arg2: i32) -> (i32, i32) {
    %c0_i32 = arith.constant 0 : i32
    return %arg0, %arg1 : i32, i32
  }
}

module attributes {stable_mosaic.version = 11 : i64} {
  func.func @_mm_bias_res_kernel(%arg0: i32, %arg1: i32, %arg2: i32, %arg3: memref<8x384xbf16, #tpu.memory_space<vmem>>, %arg4: memref<384x256xbf16, #tpu.memory_space<vmem>>, %arg5: memref<1x256xf32, #tpu.memory_space<vmem>>, %arg6: memref<8x256xbf16, #tpu.memory_space<vmem>>, %arg7: memref<8x256xbf16, #tpu.memory_space<vmem>>, %arg8: memref<8x256xf32, #tpu.memory_space<vmem>>) attributes {dimension_semantics = [#tpu.dimension_semantics<parallel>, #tpu.dimension_semantics<parallel>, #tpu.dimension_semantics<arbitrary>], iteration_bounds = array<i64: 1, 1, 6>, scalar_prefetch = 0 : i64, scratch_operands = 1 : i64, tpu.core_type = #tpu.core_type<tc>, window_params = [{transform_indices = @transform_0, window_bounds = array<i64: 8, 384>}, {transform_indices = @transform_1, window_bounds = array<i64: 384, 256>}, {transform_indices = @transform_2, window_bounds = array<i64: 1, 256>}, {transform_indices = @transform_3, window_bounds = array<i64: 8, 256>}, {transform_indices = @transform_4, window_bounds = array<i64: 8, 256>}]} {
    %c0_i32 = arith.constant 0 : i32
    %0 = arith.cmpi eq, %arg2, %c0_i32 : i32
    %1 = arith.extui %0 : i1 to i32
    %c0_i32_0 = arith.constant 0 : i32
    %2 = arith.cmpi ne, %1, %c0_i32_0 : i32
    scf.if %2 {
      %cst_9 = arith.constant 0.000000e+00 : f32
      %12 = vector.broadcast %cst_9 : f32 to vector<8x256xf32>
      %c0_10 = arith.constant 0 : index
      %c0_11 = arith.constant 0 : index
      %13 = vector.load %arg8[%c0_10, %c0_11] : memref<8x256xf32, #tpu.memory_space<vmem>>, vector<8x256xf32>
      tpu.vector_store %arg8[%c0_10, %c0_11], %12 {strides = array<i32>} : memref<8x256xf32, #tpu.memory_space<vmem>>, vector<8x256xf32>,
    } else {
    }
    %c0 = arith.constant 0 : index
    %c0_1 = arith.constant 0 : index
    %3 = vector.load %arg8[%c0, %c0_1] : memref<8x256xf32, #tpu.memory_space<vmem>>, vector<8x256xf32>
    %c0_2 = arith.constant 0 : index
    %c0_3 = arith.constant 0 : index
    %4 = vector.load %arg3[%c0_2, %c0_3] : memref<8x384xbf16, #tpu.memory_space<vmem>>, vector<8x384xbf16>
    %c0_4 = arith.constant 0 : index
    %c0_5 = arith.constant 0 : index
    %5 = vector.load %arg4[%c0_4, %c0_5] : memref<384x256xbf16, #tpu.memory_space<vmem>>, vector<384x256xbf16>
    %cst = arith.constant dense<0.000000e+00> : vector<8x256xf32>
    %6 = tpu.matmul %4, %5, %cst {dimension_numbers = #tpu.dot_dimension_numbers<[1], [0], [0], [1], [0, 0, 1, 1], [], []>} : vector<8x384xbf16>, vector<384x256xbf16>, vector<8x256xf32> -> vector<8x256xf32>
    %7 = arith.addf %3, %6 : vector<8x256xf32>
    %c0_6 = arith.constant 0 : index
    %c0_7 = arith.constant 0 : index
    %8 = vector.load %arg8[%c0_6, %c0_7] : memref<8x256xf32, #tpu.memory_space<vmem>>, vector<8x256xf32>
    tpu.vector_store %arg8[%c0_6, %c0_7], %7 {strides = array<i32>} : memref<8x256xf32, #tpu.memory_space<vmem>>, vector<8x256xf32>,
    %c5_i32 = arith.constant 5 : i32
    %9 = arith.cmpi eq, %arg2, %c5_i32 : i32
    %10 = arith.extui %9 : i1 to i32
    %c0_i32_8 = arith.constant 0 : i32
    %11 = arith.cmpi ne, %10, %c0_i32_8 : i32
    scf.if %11 {
      %c0_9 = arith.constant 0 : index
      %c0_10 = arith.constant 0 : index
      %12 = vector.load %arg8[%c0_9, %c0_10] : memref<8x256xf32, #tpu.memory_space<vmem>>, vector<8x256xf32>
      %c0_11 = arith.constant 0 : index
      %c0_12 = arith.constant 0 : index
      %13 = vector.load %arg5[%c0_11, %c0_12] : memref<1x256xf32, #tpu.memory_space<vmem>>, vector<1x256xf32>
      %14 = vector.broadcast %13 : vector<1x256xf32> to vector<8x256xf32>
      %15 = arith.addf %12, %14 : vector<8x256xf32>
      %c0_13 = arith.constant 0 : index
      %c0_14 = arith.constant 0 : index
      %16 = vector.load %arg6[%c0_13, %c0_14] : memref<8x256xbf16, #tpu.memory_space<vmem>>, vector<8x256xbf16>
      %17 = arith.extf %16 : vector<8x256xbf16> to vector<8x256xf32>
      %18 = arith.addf %15, %17 : vector<8x256xf32>
      %cst_15 = arith.constant 0.000000e+00 : f32
      %19 = vector.broadcast %cst_15 : f32 to vector<8x256xf32>
      %20 = arith.maximumf %18, %19 : vector<8x256xf32>
      %21 = arith.truncf %20 : vector<8x256xf32> to vector<8x256xbf16>
      %c0_16 = arith.constant 0 : index
      %c0_17 = arith.constant 0 : index
      %22 = vector.load %arg7[%c0_16, %c0_17] : memref<8x256xbf16, #tpu.memory_space<vmem>>, vector<8x256xbf16>
      tpu.vector_store %arg7[%c0_16, %c0_17], %21 {strides = array<i32>} : memref<8x256xbf16, #tpu.memory_space<vmem>>, vector<8x256xbf16>,
    } else {
    }
    return
  }
  func.func @transform_0(%arg0: i32, %arg1: i32, %arg2: i32) -> (i32, i32) {
    %c0_i32 = arith.constant 0 : i32
    return %arg0, %arg2 : i32, i32
  }
  func.func @transform_1(%arg0: i32, %arg1: i32, %arg2: i32) -> (i32, i32) {
    %c0_i32 = arith.constant 0 : i32
    return %arg2, %arg1 : i32, i32
  }
  func.func @transform_2(%arg0: i32, %arg1: i32, %arg2: i32) -> (i32, i32) {
    %c0_i32 = arith.constant 0 : i32
    %c0_i32_0 = arith.constant 0 : i32
    return %c0_i32, %arg1 : i32, i32
  }
  func.func @transform_3(%arg0: i32, %arg1: i32, %arg2: i32) -> (i32, i32) {
    %c0_i32 = arith.constant 0 : i32
    return %arg0, %arg1 : i32, i32
  }
  func.func @transform_4(%arg0: i32, %arg1: i32, %arg2: i32) -> (i32, i32) {
    %c0_i32 = arith.constant 0 : i32
    return %arg0, %arg1 : i32, i32
  }
}

module attributes {stable_mosaic.version = 11 : i64} {
  func.func @_mm_bias_kernel(%arg0: i32, %arg1: i32, %arg2: i32, %arg3: memref<8x384xbf16, #tpu.memory_space<vmem>>, %arg4: memref<384x256xbf16, #tpu.memory_space<vmem>>, %arg5: memref<1x256xf32, #tpu.memory_space<vmem>>, %arg6: memref<8x256xbf16, #tpu.memory_space<vmem>>, %arg7: memref<8x256xf32, #tpu.memory_space<vmem>>) attributes {dimension_semantics = [#tpu.dimension_semantics<parallel>, #tpu.dimension_semantics<parallel>, #tpu.dimension_semantics<arbitrary>], iteration_bounds = array<i64: 1, 1, 6>, scalar_prefetch = 0 : i64, scratch_operands = 1 : i64, tpu.core_type = #tpu.core_type<tc>, window_params = [{transform_indices = @transform_0, window_bounds = array<i64: 8, 384>}, {transform_indices = @transform_1, window_bounds = array<i64: 384, 256>}, {transform_indices = @transform_2, window_bounds = array<i64: 1, 256>}, {transform_indices = @transform_3, window_bounds = array<i64: 8, 256>}]} {
    %c0_i32 = arith.constant 0 : i32
    %0 = arith.cmpi eq, %arg2, %c0_i32 : i32
    %1 = arith.extui %0 : i1 to i32
    %c0_i32_0 = arith.constant 0 : i32
    %2 = arith.cmpi ne, %1, %c0_i32_0 : i32
    scf.if %2 {
      %cst_9 = arith.constant 0.000000e+00 : f32
      %12 = vector.broadcast %cst_9 : f32 to vector<8x256xf32>
      %c0_10 = arith.constant 0 : index
      %c0_11 = arith.constant 0 : index
      %13 = vector.load %arg7[%c0_10, %c0_11] : memref<8x256xf32, #tpu.memory_space<vmem>>, vector<8x256xf32>
      tpu.vector_store %arg7[%c0_10, %c0_11], %12 {strides = array<i32>} : memref<8x256xf32, #tpu.memory_space<vmem>>, vector<8x256xf32>,
    } else {
    }
    %c0 = arith.constant 0 : index
    %c0_1 = arith.constant 0 : index
    %3 = vector.load %arg7[%c0, %c0_1] : memref<8x256xf32, #tpu.memory_space<vmem>>, vector<8x256xf32>
    %c0_2 = arith.constant 0 : index
    %c0_3 = arith.constant 0 : index
    %4 = vector.load %arg3[%c0_2, %c0_3] : memref<8x384xbf16, #tpu.memory_space<vmem>>, vector<8x384xbf16>
    %c0_4 = arith.constant 0 : index
    %c0_5 = arith.constant 0 : index
    %5 = vector.load %arg4[%c0_4, %c0_5] : memref<384x256xbf16, #tpu.memory_space<vmem>>, vector<384x256xbf16>
    %cst = arith.constant dense<0.000000e+00> : vector<8x256xf32>
    %6 = tpu.matmul %4, %5, %cst {dimension_numbers = #tpu.dot_dimension_numbers<[1], [0], [0], [1], [0, 0, 1, 1], [], []>} : vector<8x384xbf16>, vector<384x256xbf16>, vector<8x256xf32> -> vector<8x256xf32>
    %7 = arith.addf %3, %6 : vector<8x256xf32>
    %c0_6 = arith.constant 0 : index
    %c0_7 = arith.constant 0 : index
    %8 = vector.load %arg7[%c0_6, %c0_7] : memref<8x256xf32, #tpu.memory_space<vmem>>, vector<8x256xf32>
    tpu.vector_store %arg7[%c0_6, %c0_7], %7 {strides = array<i32>} : memref<8x256xf32, #tpu.memory_space<vmem>>, vector<8x256xf32>,
    %c5_i32 = arith.constant 5 : i32
    %9 = arith.cmpi eq, %arg2, %c5_i32 : i32
    %10 = arith.extui %9 : i1 to i32
    %c0_i32_8 = arith.constant 0 : i32
    %11 = arith.cmpi ne, %10, %c0_i32_8 : i32
    scf.if %11 {
      %c0_9 = arith.constant 0 : index
      %c0_10 = arith.constant 0 : index
      %12 = vector.load %arg7[%c0_9, %c0_10] : memref<8x256xf32, #tpu.memory_space<vmem>>, vector<8x256xf32>
      %c0_11 = arith.constant 0 : index
      %c0_12 = arith.constant 0 : index
      %13 = vector.load %arg5[%c0_11, %c0_12] : memref<1x256xf32, #tpu.memory_space<vmem>>, vector<1x256xf32>
      %14 = vector.broadcast %13 : vector<1x256xf32> to vector<8x256xf32>
      %15 = arith.addf %12, %14 : vector<8x256xf32>
      %cst_13 = arith.constant 0.000000e+00 : f32
      %16 = vector.broadcast %cst_13 : f32 to vector<8x256xf32>
      %17 = arith.maximumf %15, %16 : vector<8x256xf32>
      %18 = arith.truncf %17 : vector<8x256xf32> to vector<8x256xbf16>
      %c0_14 = arith.constant 0 : index
      %c0_15 = arith.constant 0 : index
      %19 = vector.load %arg6[%c0_14, %c0_15] : memref<8x256xbf16, #tpu.memory_space<vmem>>, vector<8x256xbf16>
      tpu.vector_store %arg6[%c0_14, %c0_15], %18 {strides = array<i32>} : memref<8x256xbf16, #tpu.memory_space<vmem>>, vector<8x256xbf16>,
    } else {
    }
    return
  }
  func.func @transform_0(%arg0: i32, %arg1: i32, %arg2: i32) -> (i32, i32) {
    %c0_i32 = arith.constant 0 : i32
    return %arg0, %arg2 : i32, i32
  }
  func.func @transform_1(%arg0: i32, %arg1: i32, %arg2: i32) -> (i32, i32) {
    %c0_i32 = arith.constant 0 : i32
    return %arg2, %arg1 : i32, i32
  }
  func.func @transform_2(%arg0: i32, %arg1: i32, %arg2: i32) -> (i32, i32) {
    %c0_i32 = arith.constant 0 : i32
    %c0_i32_0 = arith.constant 0 : i32
    return %c0_i32, %arg1 : i32, i32
  }
  func.func @transform_3(%arg0: i32, %arg1: i32, %arg2: i32) -> (i32, i32) {
    %c0_i32 = arith.constant 0 : i32
    return %arg0, %arg1 : i32, i32
  }
}

module attributes {stable_mosaic.version = 11 : i64} {
  func.func @_mm_bias_kernel(%arg0: i32, %arg1: i32, %arg2: i32, %arg3: memref<8x384xbf16, #tpu.memory_space<vmem>>, %arg4: memref<384x256xbf16, #tpu.memory_space<vmem>>, %arg5: memref<1x256xf32, #tpu.memory_space<vmem>>, %arg6: memref<8x256xbf16, #tpu.memory_space<vmem>>, %arg7: memref<8x256xf32, #tpu.memory_space<vmem>>) attributes {dimension_semantics = [#tpu.dimension_semantics<parallel>, #tpu.dimension_semantics<parallel>, #tpu.dimension_semantics<arbitrary>], iteration_bounds = array<i64: 1, 2, 6>, scalar_prefetch = 0 : i64, scratch_operands = 1 : i64, tpu.core_type = #tpu.core_type<tc>, window_params = [{transform_indices = @transform_0, window_bounds = array<i64: 8, 384>}, {transform_indices = @transform_1, window_bounds = array<i64: 384, 256>}, {transform_indices = @transform_2, window_bounds = array<i64: 1, 256>}, {transform_indices = @transform_3, window_bounds = array<i64: 8, 256>}]} {
    %c0_i32 = arith.constant 0 : i32
    %0 = arith.cmpi eq, %arg2, %c0_i32 : i32
    %1 = arith.extui %0 : i1 to i32
    %c0_i32_0 = arith.constant 0 : i32
    %2 = arith.cmpi ne, %1, %c0_i32_0 : i32
    scf.if %2 {
      %cst_9 = arith.constant 0.000000e+00 : f32
      %12 = vector.broadcast %cst_9 : f32 to vector<8x256xf32>
      %c0_10 = arith.constant 0 : index
      %c0_11 = arith.constant 0 : index
      %13 = vector.load %arg7[%c0_10, %c0_11] : memref<8x256xf32, #tpu.memory_space<vmem>>, vector<8x256xf32>
      tpu.vector_store %arg7[%c0_10, %c0_11], %12 {strides = array<i32>} : memref<8x256xf32, #tpu.memory_space<vmem>>, vector<8x256xf32>,
    } else {
    }
    %c0 = arith.constant 0 : index
    %c0_1 = arith.constant 0 : index
    %3 = vector.load %arg7[%c0, %c0_1] : memref<8x256xf32, #tpu.memory_space<vmem>>, vector<8x256xf32>
    %c0_2 = arith.constant 0 : index
    %c0_3 = arith.constant 0 : index
    %4 = vector.load %arg3[%c0_2, %c0_3] : memref<8x384xbf16, #tpu.memory_space<vmem>>, vector<8x384xbf16>
    %c0_4 = arith.constant 0 : index
    %c0_5 = arith.constant 0 : index
    %5 = vector.load %arg4[%c0_4, %c0_5] : memref<384x256xbf16, #tpu.memory_space<vmem>>, vector<384x256xbf16>
    %cst = arith.constant dense<0.000000e+00> : vector<8x256xf32>
    %6 = tpu.matmul %4, %5, %cst {dimension_numbers = #tpu.dot_dimension_numbers<[1], [0], [0], [1], [0, 0, 1, 1], [], []>} : vector<8x384xbf16>, vector<384x256xbf16>, vector<8x256xf32> -> vector<8x256xf32>
    %7 = arith.addf %3, %6 : vector<8x256xf32>
    %c0_6 = arith.constant 0 : index
    %c0_7 = arith.constant 0 : index
    %8 = vector.load %arg7[%c0_6, %c0_7] : memref<8x256xf32, #tpu.memory_space<vmem>>, vector<8x256xf32>
    tpu.vector_store %arg7[%c0_6, %c0_7], %7 {strides = array<i32>} : memref<8x256xf32, #tpu.memory_space<vmem>>, vector<8x256xf32>,
    %c5_i32 = arith.constant 5 : i32
    %9 = arith.cmpi eq, %arg2, %c5_i32 : i32
    %10 = arith.extui %9 : i1 to i32
    %c0_i32_8 = arith.constant 0 : i32
    %11 = arith.cmpi ne, %10, %c0_i32_8 : i32
    scf.if %11 {
      %c0_9 = arith.constant 0 : index
      %c0_10 = arith.constant 0 : index
      %12 = vector.load %arg7[%c0_9, %c0_10] : memref<8x256xf32, #tpu.memory_space<vmem>>, vector<8x256xf32>
      %c0_11 = arith.constant 0 : index
      %c0_12 = arith.constant 0 : index
      %13 = vector.load %arg5[%c0_11, %c0_12] : memref<1x256xf32, #tpu.memory_space<vmem>>, vector<1x256xf32>
      %14 = vector.broadcast %13 : vector<1x256xf32> to vector<8x256xf32>
      %15 = arith.addf %12, %14 : vector<8x256xf32>
      %cst_13 = arith.constant 0.000000e+00 : f32
      %16 = vector.broadcast %cst_13 : f32 to vector<8x256xf32>
      %17 = arith.maximumf %15, %16 : vector<8x256xf32>
      %18 = arith.truncf %17 : vector<8x256xf32> to vector<8x256xbf16>
      %c0_14 = arith.constant 0 : index
      %c0_15 = arith.constant 0 : index
      %19 = vector.load %arg6[%c0_14, %c0_15] : memref<8x256xbf16, #tpu.memory_space<vmem>>, vector<8x256xbf16>
      tpu.vector_store %arg6[%c0_14, %c0_15], %18 {strides = array<i32>} : memref<8x256xbf16, #tpu.memory_space<vmem>>, vector<8x256xbf16>,
    } else {
    }
    return
  }
  func.func @transform_0(%arg0: i32, %arg1: i32, %arg2: i32) -> (i32, i32) {
    %c0_i32 = arith.constant 0 : i32
    return %arg0, %arg2 : i32, i32
  }
  func.func @transform_1(%arg0: i32, %arg1: i32, %arg2: i32) -> (i32, i32) {
    %c0_i32 = arith.constant 0 : i32
    return %arg2, %arg1 : i32, i32
  }
  func.func @transform_2(%arg0: i32, %arg1: i32, %arg2: i32) -> (i32, i32) {
    %c0_i32 = arith.constant 0 : i32
    %c0_i32_0 = arith.constant 0 : i32
    return %c0_i32, %arg1 : i32, i32
  }
  func.func @transform_3(%arg0: i32, %arg1: i32, %arg2: i32) -> (i32, i32) {
    %c0_i32 = arith.constant 0 : i32
    return %arg0, %arg1 : i32, i32
  }
}

module attributes {stable_mosaic.version = 11 : i64} {
  func.func @_mm_bias_kernel(%arg0: i32, %arg1: i32, %arg2: i32, %arg3: memref<8x256xbf16, #tpu.memory_space<vmem>>, %arg4: memref<256x256xbf16, #tpu.memory_space<vmem>>, %arg5: memref<1x256xf32, #tpu.memory_space<vmem>>, %arg6: memref<8x256xbf16, #tpu.memory_space<vmem>>, %arg7: memref<8x256xf32, #tpu.memory_space<vmem>>) attributes {dimension_semantics = [#tpu.dimension_semantics<parallel>, #tpu.dimension_semantics<parallel>, #tpu.dimension_semantics<arbitrary>], iteration_bounds = array<i64: 1, 2, 1>, scalar_prefetch = 0 : i64, scratch_operands = 1 : i64, tpu.core_type = #tpu.core_type<tc>, window_params = [{transform_indices = @transform_0, window_bounds = array<i64: 8, 256>}, {transform_indices = @transform_1, window_bounds = array<i64: 256, 256>}, {transform_indices = @transform_2, window_bounds = array<i64: 1, 256>}, {transform_indices = @transform_3, window_bounds = array<i64: 8, 256>}]} {
    %c0_i32 = arith.constant 0 : i32
    %0 = arith.cmpi eq, %arg2, %c0_i32 : i32
    %1 = arith.extui %0 : i1 to i32
    %c0_i32_0 = arith.constant 0 : i32
    %2 = arith.cmpi ne, %1, %c0_i32_0 : i32
    scf.if %2 {
      %cst_10 = arith.constant 0.000000e+00 : f32
      %12 = vector.broadcast %cst_10 : f32 to vector<8x256xf32>
      %c0_11 = arith.constant 0 : index
      %c0_12 = arith.constant 0 : index
      %13 = vector.load %arg7[%c0_11, %c0_12] : memref<8x256xf32, #tpu.memory_space<vmem>>, vector<8x256xf32>
      tpu.vector_store %arg7[%c0_11, %c0_12], %12 {strides = array<i32>} : memref<8x256xf32, #tpu.memory_space<vmem>>, vector<8x256xf32>,
    } else {
    }
    %c0 = arith.constant 0 : index
    %c0_1 = arith.constant 0 : index
    %3 = vector.load %arg7[%c0, %c0_1] : memref<8x256xf32, #tpu.memory_space<vmem>>, vector<8x256xf32>
    %c0_2 = arith.constant 0 : index
    %c0_3 = arith.constant 0 : index
    %4 = vector.load %arg3[%c0_2, %c0_3] : memref<8x256xbf16, #tpu.memory_space<vmem>>, vector<8x256xbf16>
    %c0_4 = arith.constant 0 : index
    %c0_5 = arith.constant 0 : index
    %5 = vector.load %arg4[%c0_4, %c0_5] : memref<256x256xbf16, #tpu.memory_space<vmem>>, vector<256x256xbf16>
    %cst = arith.constant dense<0.000000e+00> : vector<8x256xf32>
    %6 = tpu.matmul %4, %5, %cst {dimension_numbers = #tpu.dot_dimension_numbers<[1], [0], [0], [1], [0, 0, 1, 1], [], []>} : vector<8x256xbf16>, vector<256x256xbf16>, vector<8x256xf32> -> vector<8x256xf32>
    %7 = arith.addf %3, %6 : vector<8x256xf32>
    %c0_6 = arith.constant 0 : index
    %c0_7 = arith.constant 0 : index
    %8 = vector.load %arg7[%c0_6, %c0_7] : memref<8x256xf32, #tpu.memory_space<vmem>>, vector<8x256xf32>
    tpu.vector_store %arg7[%c0_6, %c0_7], %7 {strides = array<i32>} : memref<8x256xf32, #tpu.memory_space<vmem>>, vector<8x256xf32>,
    %c0_i32_8 = arith.constant 0 : i32
    %9 = arith.cmpi eq, %arg2, %c0_i32_8 : i32
    %10 = arith.extui %9 : i1 to i32
    %c0_i32_9 = arith.constant 0 : i32
    %11 = arith.cmpi ne, %10, %c0_i32_9 : i32
    scf.if %11 {
      %c0_10 = arith.constant 0 : index
      %c0_11 = arith.constant 0 : index
      %12 = vector.load %arg7[%c0_10, %c0_11] : memref<8x256xf32, #tpu.memory_space<vmem>>, vector<8x256xf32>
      %c0_12 = arith.constant 0 : index
      %c0_13 = arith.constant 0 : index
      %13 = vector.load %arg5[%c0_12, %c0_13] : memref<1x256xf32, #tpu.memory_space<vmem>>, vector<1x256xf32>
      %14 = vector.broadcast %13 : vector<1x256xf32> to vector<8x256xf32>
      %15 = arith.addf %12, %14 : vector<8x256xf32>
      %16 = arith.truncf %15 : vector<8x256xf32> to vector<8x256xbf16>
      %c0_14 = arith.constant 0 : index
      %c0_15 = arith.constant 0 : index
      %17 = vector.load %arg6[%c0_14, %c0_15] : memref<8x256xbf16, #tpu.memory_space<vmem>>, vector<8x256xbf16>
      tpu.vector_store %arg6[%c0_14, %c0_15], %16 {strides = array<i32>} : memref<8x256xbf16, #tpu.memory_space<vmem>>, vector<8x256xbf16>,
    } else {
    }
    return
  }
  func.func @transform_0(%arg0: i32, %arg1: i32, %arg2: i32) -> (i32, i32) {
    %c0_i32 = arith.constant 0 : i32
    return %arg0, %arg2 : i32, i32
  }
  func.func @transform_1(%arg0: i32, %arg1: i32, %arg2: i32) -> (i32, i32) {
    %c0_i32 = arith.constant 0 : i32
    return %arg2, %arg1 : i32, i32
  }
  func.func @transform_2(%arg0: i32, %arg1: i32, %arg2: i32) -> (i32, i32) {
    %c0_i32 = arith.constant 0 : i32
    %c0_i32_0 = arith.constant 0 : i32
    return %c0_i32, %arg1 : i32, i32
  }
  func.func @transform_3(%arg0: i32, %arg1: i32, %arg2: i32) -> (i32, i32) {
    %c0_i32 = arith.constant 0 : i32
    return %arg0, %arg1 : i32, i32
  }
}

module attributes {stable_mosaic.version = 11 : i64} {
  func.func @_mm_bias_res_kernel(%arg0: i32, %arg1: i32, %arg2: i32, %arg3: memref<8x512xbf16, #tpu.memory_space<vmem>>, %arg4: memref<512x256xbf16, #tpu.memory_space<vmem>>, %arg5: memref<1x256xf32, #tpu.memory_space<vmem>>, %arg6: memref<8x256xbf16, #tpu.memory_space<vmem>>, %arg7: memref<8x256xbf16, #tpu.memory_space<vmem>>, %arg8: memref<8x256xf32, #tpu.memory_space<vmem>>) attributes {dimension_semantics = [#tpu.dimension_semantics<parallel>, #tpu.dimension_semantics<parallel>, #tpu.dimension_semantics<arbitrary>], iteration_bounds = array<i64: 1, 2, 9>, scalar_prefetch = 0 : i64, scratch_operands = 1 : i64, tpu.core_type = #tpu.core_type<tc>, window_params = [{transform_indices = @transform_0, window_bounds = array<i64: 8, 512>}, {transform_indices = @transform_1, window_bounds = array<i64: 512, 256>}, {transform_indices = @transform_2, window_bounds = array<i64: 1, 256>}, {transform_indices = @transform_3, window_bounds = array<i64: 8, 256>}, {transform_indices = @transform_4, window_bounds = array<i64: 8, 256>}]} {
    %c0_i32 = arith.constant 0 : i32
    %0 = arith.cmpi eq, %arg2, %c0_i32 : i32
    %1 = arith.extui %0 : i1 to i32
    %c0_i32_0 = arith.constant 0 : i32
    %2 = arith.cmpi ne, %1, %c0_i32_0 : i32
    scf.if %2 {
      %cst_9 = arith.constant 0.000000e+00 : f32
      %12 = vector.broadcast %cst_9 : f32 to vector<8x256xf32>
      %c0_10 = arith.constant 0 : index
      %c0_11 = arith.constant 0 : index
      %13 = vector.load %arg8[%c0_10, %c0_11] : memref<8x256xf32, #tpu.memory_space<vmem>>, vector<8x256xf32>
      tpu.vector_store %arg8[%c0_10, %c0_11], %12 {strides = array<i32>} : memref<8x256xf32, #tpu.memory_space<vmem>>, vector<8x256xf32>,
    } else {
    }
    %c0 = arith.constant 0 : index
    %c0_1 = arith.constant 0 : index
    %3 = vector.load %arg8[%c0, %c0_1] : memref<8x256xf32, #tpu.memory_space<vmem>>, vector<8x256xf32>
    %c0_2 = arith.constant 0 : index
    %c0_3 = arith.constant 0 : index
    %4 = vector.load %arg3[%c0_2, %c0_3] : memref<8x512xbf16, #tpu.memory_space<vmem>>, vector<8x512xbf16>
    %c0_4 = arith.constant 0 : index
    %c0_5 = arith.constant 0 : index
    %5 = vector.load %arg4[%c0_4, %c0_5] : memref<512x256xbf16, #tpu.memory_space<vmem>>, vector<512x256xbf16>
    %cst = arith.constant dense<0.000000e+00> : vector<8x256xf32>
    %6 = tpu.matmul %4, %5, %cst {dimension_numbers = #tpu.dot_dimension_numbers<[1], [0], [0], [1], [0, 0, 1, 1], [], []>} : vector<8x512xbf16>, vector<512x256xbf16>, vector<8x256xf32> -> vector<8x256xf32>
    %7 = arith.addf %3, %6 : vector<8x256xf32>
    %c0_6 = arith.constant 0 : index
    %c0_7 = arith.constant 0 : index
    %8 = vector.load %arg8[%c0_6, %c0_7] : memref<8x256xf32, #tpu.memory_space<vmem>>, vector<8x256xf32>
    tpu.vector_store %arg8[%c0_6, %c0_7], %7 {strides = array<i32>} : memref<8x256xf32, #tpu.memory_space<vmem>>, vector<8x256xf32>,
    %c8_i32 = arith.constant 8 : i32
    %9 = arith.cmpi eq, %arg2, %c8_i32 : i32
    %10 = arith.extui %9 : i1 to i32
    %c0_i32_8 = arith.constant 0 : i32
    %11 = arith.cmpi ne, %10, %c0_i32_8 : i32
    scf.if %11 {
      %c0_9 = arith.constant 0 : index
      %c0_10 = arith.constant 0 : index
      %12 = vector.load %arg8[%c0_9, %c0_10] : memref<8x256xf32, #tpu.memory_space<vmem>>, vector<8x256xf32>
      %c0_11 = arith.constant 0 : index
      %c0_12 = arith.constant 0 : index
      %13 = vector.load %arg5[%c0_11, %c0_12] : memref<1x256xf32, #tpu.memory_space<vmem>>, vector<1x256xf32>
      %14 = vector.broadcast %13 : vector<1x256xf32> to vector<8x256xf32>
      %15 = arith.addf %12, %14 : vector<8x256xf32>
      %c0_13 = arith.constant 0 : index
      %c0_14 = arith.constant 0 : index
      %16 = vector.load %arg6[%c0_13, %c0_14] : memref<8x256xbf16, #tpu.memory_space<vmem>>, vector<8x256xbf16>
      %17 = arith.extf %16 : vector<8x256xbf16> to vector<8x256xf32>
      %18 = arith.addf %15, %17 : vector<8x256xf32>
      %cst_15 = arith.constant 0.000000e+00 : f32
      %19 = vector.broadcast %cst_15 : f32 to vector<8x256xf32>
      %20 = arith.maximumf %18, %19 : vector<8x256xf32>
      %21 = arith.truncf %20 : vector<8x256xf32> to vector<8x256xbf16>
      %c0_16 = arith.constant 0 : index
      %c0_17 = arith.constant 0 : index
      %22 = vector.load %arg7[%c0_16, %c0_17] : memref<8x256xbf16, #tpu.memory_space<vmem>>, vector<8x256xbf16>
      tpu.vector_store %arg7[%c0_16, %c0_17], %21 {strides = array<i32>} : memref<8x256xbf16, #tpu.memory_space<vmem>>, vector<8x256xbf16>,
    } else {
    }
    return
  }
  func.func @transform_0(%arg0: i32, %arg1: i32, %arg2: i32) -> (i32, i32) {
    %c0_i32 = arith.constant 0 : i32
    return %arg0, %arg2 : i32, i32
  }
  func.func @transform_1(%arg0: i32, %arg1: i32, %arg2: i32) -> (i32, i32) {
    %c0_i32 = arith.constant 0 : i32
    return %arg2, %arg1 : i32, i32
  }
  func.func @transform_2(%arg0: i32, %arg1: i32, %arg2: i32) -> (i32, i32) {
    %c0_i32 = arith.constant 0 : i32
    %c0_i32_0 = arith.constant 0 : i32
    return %c0_i32, %arg1 : i32, i32
  }
  func.func @transform_3(%arg0: i32, %arg1: i32, %arg2: i32) -> (i32, i32) {
    %c0_i32 = arith.constant 0 : i32
    return %arg0, %arg1 : i32, i32
  }
  func.func @transform_4(%arg0: i32, %arg1: i32, %arg2: i32) -> (i32, i32) {
    %c0_i32 = arith.constant 0 : i32
    return %arg0, %arg1 : i32, i32
  }
}

module attributes {stable_mosaic.version = 11 : i64} {
  func.func @_mm_bias_kernel(%arg0: i32, %arg1: i32, %arg2: i32, %arg3: memref<8x512xbf16, #tpu.memory_space<vmem>>, %arg4: memref<512x256xbf16, #tpu.memory_space<vmem>>, %arg5: memref<1x256xf32, #tpu.memory_space<vmem>>, %arg6: memref<8x256xbf16, #tpu.memory_space<vmem>>, %arg7: memref<8x256xf32, #tpu.memory_space<vmem>>) attributes {dimension_semantics = [#tpu.dimension_semantics<parallel>, #tpu.dimension_semantics<parallel>, #tpu.dimension_semantics<arbitrary>], iteration_bounds = array<i64: 1, 2, 9>, scalar_prefetch = 0 : i64, scratch_operands = 1 : i64, tpu.core_type = #tpu.core_type<tc>, window_params = [{transform_indices = @transform_0, window_bounds = array<i64: 8, 512>}, {transform_indices = @transform_1, window_bounds = array<i64: 512, 256>}, {transform_indices = @transform_2, window_bounds = array<i64: 1, 256>}, {transform_indices = @transform_3, window_bounds = array<i64: 8, 256>}]} {
    %c0_i32 = arith.constant 0 : i32
    %0 = arith.cmpi eq, %arg2, %c0_i32 : i32
    %1 = arith.extui %0 : i1 to i32
    %c0_i32_0 = arith.constant 0 : i32
    %2 = arith.cmpi ne, %1, %c0_i32_0 : i32
    scf.if %2 {
      %cst_9 = arith.constant 0.000000e+00 : f32
      %12 = vector.broadcast %cst_9 : f32 to vector<8x256xf32>
      %c0_10 = arith.constant 0 : index
      %c0_11 = arith.constant 0 : index
      %13 = vector.load %arg7[%c0_10, %c0_11] : memref<8x256xf32, #tpu.memory_space<vmem>>, vector<8x256xf32>
      tpu.vector_store %arg7[%c0_10, %c0_11], %12 {strides = array<i32>} : memref<8x256xf32, #tpu.memory_space<vmem>>, vector<8x256xf32>,
    } else {
    }
    %c0 = arith.constant 0 : index
    %c0_1 = arith.constant 0 : index
    %3 = vector.load %arg7[%c0, %c0_1] : memref<8x256xf32, #tpu.memory_space<vmem>>, vector<8x256xf32>
    %c0_2 = arith.constant 0 : index
    %c0_3 = arith.constant 0 : index
    %4 = vector.load %arg3[%c0_2, %c0_3] : memref<8x512xbf16, #tpu.memory_space<vmem>>, vector<8x512xbf16>
    %c0_4 = arith.constant 0 : index
    %c0_5 = arith.constant 0 : index
    %5 = vector.load %arg4[%c0_4, %c0_5] : memref<512x256xbf16, #tpu.memory_space<vmem>>, vector<512x256xbf16>
    %cst = arith.constant dense<0.000000e+00> : vector<8x256xf32>
    %6 = tpu.matmul %4, %5, %cst {dimension_numbers = #tpu.dot_dimension_numbers<[1], [0], [0], [1], [0, 0, 1, 1], [], []>} : vector<8x512xbf16>, vector<512x256xbf16>, vector<8x256xf32> -> vector<8x256xf32>
    %7 = arith.addf %3, %6 : vector<8x256xf32>
    %c0_6 = arith.constant 0 : index
    %c0_7 = arith.constant 0 : index
    %8 = vector.load %arg7[%c0_6, %c0_7] : memref<8x256xf32, #tpu.memory_space<vmem>>, vector<8x256xf32>
    tpu.vector_store %arg7[%c0_6, %c0_7], %7 {strides = array<i32>} : memref<8x256xf32, #tpu.memory_space<vmem>>, vector<8x256xf32>,
    %c8_i32 = arith.constant 8 : i32
    %9 = arith.cmpi eq, %arg2, %c8_i32 : i32
    %10 = arith.extui %9 : i1 to i32
    %c0_i32_8 = arith.constant 0 : i32
    %11 = arith.cmpi ne, %10, %c0_i32_8 : i32
    scf.if %11 {
      %c0_9 = arith.constant 0 : index
      %c0_10 = arith.constant 0 : index
      %12 = vector.load %arg7[%c0_9, %c0_10] : memref<8x256xf32, #tpu.memory_space<vmem>>, vector<8x256xf32>
      %c0_11 = arith.constant 0 : index
      %c0_12 = arith.constant 0 : index
      %13 = vector.load %arg5[%c0_11, %c0_12] : memref<1x256xf32, #tpu.memory_space<vmem>>, vector<1x256xf32>
      %14 = vector.broadcast %13 : vector<1x256xf32> to vector<8x256xf32>
      %15 = arith.addf %12, %14 : vector<8x256xf32>
      %cst_13 = arith.constant 0.000000e+00 : f32
      %16 = vector.broadcast %cst_13 : f32 to vector<8x256xf32>
      %17 = arith.maximumf %15, %16 : vector<8x256xf32>
      %18 = arith.truncf %17 : vector<8x256xf32> to vector<8x256xbf16>
      %c0_14 = arith.constant 0 : index
      %c0_15 = arith.constant 0 : index
      %19 = vector.load %arg6[%c0_14, %c0_15] : memref<8x256xbf16, #tpu.memory_space<vmem>>, vector<8x256xbf16>
      tpu.vector_store %arg6[%c0_14, %c0_15], %18 {strides = array<i32>} : memref<8x256xbf16, #tpu.memory_space<vmem>>, vector<8x256xbf16>,
    } else {
    }
    return
  }
  func.func @transform_0(%arg0: i32, %arg1: i32, %arg2: i32) -> (i32, i32) {
    %c0_i32 = arith.constant 0 : i32
    return %arg0, %arg2 : i32, i32
  }
  func.func @transform_1(%arg0: i32, %arg1: i32, %arg2: i32) -> (i32, i32) {
    %c0_i32 = arith.constant 0 : i32
    return %arg2, %arg1 : i32, i32
  }
  func.func @transform_2(%arg0: i32, %arg1: i32, %arg2: i32) -> (i32, i32) {
    %c0_i32 = arith.constant 0 : i32
    %c0_i32_0 = arith.constant 0 : i32
    return %c0_i32, %arg1 : i32, i32
  }
  func.func @transform_3(%arg0: i32, %arg1: i32, %arg2: i32) -> (i32, i32) {
    %c0_i32 = arith.constant 0 : i32
    return %arg0, %arg1 : i32, i32
  }
}

module attributes {stable_mosaic.version = 11 : i64} {
  func.func @_mm_bias_kernel(%arg0: i32, %arg1: i32, %arg2: i32, %arg3: memref<8x512xbf16, #tpu.memory_space<vmem>>, %arg4: memref<512x128xbf16, #tpu.memory_space<vmem>>, %arg5: memref<1x128xf32, #tpu.memory_space<vmem>>, %arg6: memref<8x128xf32, #tpu.memory_space<vmem>>, %arg7: memref<8x128xf32, #tpu.memory_space<vmem>>) attributes {dimension_semantics = [#tpu.dimension_semantics<parallel>, #tpu.dimension_semantics<parallel>, #tpu.dimension_semantics<arbitrary>], iteration_bounds = array<i64: 1, 1, 1>, scalar_prefetch = 0 : i64, scratch_operands = 1 : i64, tpu.core_type = #tpu.core_type<tc>, window_params = [{transform_indices = @transform_0, window_bounds = array<i64: 8, 512>}, {transform_indices = @transform_1, window_bounds = array<i64: 512, 128>}, {transform_indices = @transform_2, window_bounds = array<i64: 1, 128>}, {transform_indices = @transform_3, window_bounds = array<i64: 8, 128>}]} {
    %c0_i32 = arith.constant 0 : i32
    %0 = arith.cmpi eq, %arg2, %c0_i32 : i32
    %1 = arith.extui %0 : i1 to i32
    %c0_i32_0 = arith.constant 0 : i32
    %2 = arith.cmpi ne, %1, %c0_i32_0 : i32
    scf.if %2 {
      %cst_10 = arith.constant 0.000000e+00 : f32
      %12 = vector.broadcast %cst_10 : f32 to vector<8x128xf32>
      %c0_11 = arith.constant 0 : index
      %c0_12 = arith.constant 0 : index
      %13 = vector.load %arg7[%c0_11, %c0_12] : memref<8x128xf32, #tpu.memory_space<vmem>>, vector<8x128xf32>
      tpu.vector_store %arg7[%c0_11, %c0_12], %12 {strides = array<i32>} : memref<8x128xf32, #tpu.memory_space<vmem>>, vector<8x128xf32>,
    } else {
    }
    %c0 = arith.constant 0 : index
    %c0_1 = arith.constant 0 : index
    %3 = vector.load %arg7[%c0, %c0_1] : memref<8x128xf32, #tpu.memory_space<vmem>>, vector<8x128xf32>
    %c0_2 = arith.constant 0 : index
    %c0_3 = arith.constant 0 : index
    %4 = vector.load %arg3[%c0_2, %c0_3] : memref<8x512xbf16, #tpu.memory_space<vmem>>, vector<8x512xbf16>
    %c0_4 = arith.constant 0 : index
    %c0_5 = arith.constant 0 : index
    %5 = vector.load %arg4[%c0_4, %c0_5] : memref<512x128xbf16, #tpu.memory_space<vmem>>, vector<512x128xbf16>
    %cst = arith.constant dense<0.000000e+00> : vector<8x128xf32>
    %6 = tpu.matmul %4, %5, %cst {dimension_numbers = #tpu.dot_dimension_numbers<[1], [0], [0], [1], [0, 0, 1, 1], [], []>} : vector<8x512xbf16>, vector<512x128xbf16>, vector<8x128xf32> -> vector<8x128xf32>
    %7 = arith.addf %3, %6 : vector<8x128xf32>
    %c0_6 = arith.constant 0 : index
    %c0_7 = arith.constant 0 : index
    %8 = vector.load %arg7[%c0_6, %c0_7] : memref<8x128xf32, #tpu.memory_space<vmem>>, vector<8x128xf32>
    tpu.vector_store %arg7[%c0_6, %c0_7], %7 {strides = array<i32>} : memref<8x128xf32, #tpu.memory_space<vmem>>, vector<8x128xf32>,
    %c0_i32_8 = arith.constant 0 : i32
    %9 = arith.cmpi eq, %arg2, %c0_i32_8 : i32
    %10 = arith.extui %9 : i1 to i32
    %c0_i32_9 = arith.constant 0 : i32
    %11 = arith.cmpi ne, %10, %c0_i32_9 : i32
    scf.if %11 {
      %c0_10 = arith.constant 0 : index
      %c0_11 = arith.constant 0 : index
      %12 = vector.load %arg7[%c0_10, %c0_11] : memref<8x128xf32, #tpu.memory_space<vmem>>, vector<8x128xf32>
      %c0_12 = arith.constant 0 : index
      %c0_13 = arith.constant 0 : index
      %13 = vector.load %arg5[%c0_12, %c0_13] : memref<1x128xf32, #tpu.memory_space<vmem>>, vector<1x128xf32>
      %14 = vector.broadcast %13 : vector<1x128xf32> to vector<8x128xf32>
      %15 = arith.addf %12, %14 : vector<8x128xf32>
      %c0_14 = arith.constant 0 : index
      %c0_15 = arith.constant 0 : index
      %16 = vector.load %arg6[%c0_14, %c0_15] : memref<8x128xf32, #tpu.memory_space<vmem>>, vector<8x128xf32>
      tpu.vector_store %arg6[%c0_14, %c0_15], %15 {strides = array<i32>} : memref<8x128xf32, #tpu.memory_space<vmem>>, vector<8x128xf32>,
    } else {
    }
    return
  }
  func.func @transform_0(%arg0: i32, %arg1: i32, %arg2: i32) -> (i32, i32) {
    %c0_i32 = arith.constant 0 : i32
    return %arg0, %arg2 : i32, i32
  }
  func.func @transform_1(%arg0: i32, %arg1: i32, %arg2: i32) -> (i32, i32) {
    %c0_i32 = arith.constant 0 : i32
    return %arg2, %arg1 : i32, i32
  }
  func.func @transform_2(%arg0: i32, %arg1: i32, %arg2: i32) -> (i32, i32) {
    %c0_i32 = arith.constant 0 : i32
    %c0_i32_0 = arith.constant 0 : i32
    return %c0_i32, %arg1 : i32, i32
  }
  func.func @transform_3(%arg0: i32, %arg1: i32, %arg2: i32) -> (i32, i32) {
    %c0_i32 = arith.constant 0 : i32
    return %arg0, %arg1 : i32, i32
  }
}

</mosaic_0001>

<bundles_post_ra>
// kernel: _lambda_.21
= control target key start
LH: loop header
LB: loop body
LE: loop exit
PB: predicated region body
PF: predicated region fallthrough
CT: control target
= control target key end

     0   :  { %s1744_s12 = smov 0   ;;  %s1746_s13 = smov 0   ;;  %s1918_s0 = inlined_call_operand.vmem [shape: bf16[512,256], index: 0, kind: input, shape index: {}]   ;;  %s1919_s1 = inlined_call_operand.vmem [shape: bf16[256,128], index: 1, kind: input, shape index: {}]   ;;  %s1920_s2 = inlined_call_operand.vmem [shape: f32[1,128], index: 2, kind: input, shape index: {}]   ;;  %s1921_s3 = inlined_call_operand.vmem [shape: bf16[512,128], index: 3, kind: output, shape index: {}]  }
   0x1   :  { %s1748_s14 = smov 0  }
   0x2 LB: > { %s32_s15 = sadd.s32 1, %s1718_s13  ;;  %p1267_p0 = scmp.ge.s32.totalorder %s1722_s14, 1  ;;  %s1722_s14 = sphi %s1748_s14, %s13_s14   ;;  %s1718_s13 = sphi %s1746_s13, %s1923_s13   ;;  %s1714_s12 = sphi %s1744_s12, %s1922_s12  }
   0x3   : > { %p34_p1 = scmp.ge.s32.totalorder %s32_s15, 2  ;;  %p191_p2 = scmp.lt.s32.totalorder %s1722_s14, 3 }
   0x5   : > { %s1925_s15 = smov (%p34_p1, %s32_s15), 0  ;;  %p192_p3 = pnand %p1267_p0, %p191_p2 }
   0x6   : > { %v1636_v0 = vld [vmem:[%s1919_s1 + $0x40] sm:$0xff] (!%p192_p3)   ;;  %s1268_s18 = sshll.u32 (!%p192_p3), %s1714_s12, 5  ;;  %v1638_v2 = vld [vmem:[%s1919_s1 + $0x48] sm:$0xff] (!%p192_p3)   ;;  %v1640_v4 = vld [vmem:[%s1919_s1 + $0x50] sm:$0xff] (!%p192_p3)  }
   0x7   : > { %195 = sbr.rel (%p192_p3) target bundleno = 320 (0x140), region = 32  ;;  %v1637_v1 = vld [vmem:[%s1919_s1] sm:$0xff] (!%p192_p3)   ;;  %1484 = vmatprep.subr.bf16.mxu0 (!%p192_p3), %v1636_v0  ;;  %1596 = vmatprep.subr.bf16.mxu1 (!%p192_p3), %v1636_v0  ;;  %v1639_v3 = vld [vmem:[%s1919_s1 + $0x8] sm:$0xff] (!%p192_p3)   ;;  %p236_p4 = scmp.lt.s32.totalorder (!%p192_p3), %s1268_s18, 63  ;;  %v1641_v5 = vld [vmem:[%s1919_s1 + $0x10] sm:$0xff] (!%p192_p3)  }
   0x8   : > { %1485 = vmatpush3.bf16.msra.mxu0 (!%p192_p3), %v1637_v1  ;;  %1604 = vmatpush3.bf16.msra.mxu1 (!%p192_p3), %v1637_v1  ;;  %v1642_v6 = vld [vmem:[%s1919_s1 + $0x58] sm:$0xff] (!%p192_p3)   ;;  %v1644_v8 = vld [vmem:[%s1919_s1 + $0x60] sm:$0xff] (!%p192_p3)   ;;  %v1646_v10 = vld [vmem:[%s1919_s1 + $0x68] sm:$0xff] (!%p192_p3)  }
   0x9   : > { %1486 = vmatprep.subr.bf16.mxu0 (!%p192_p3), %v1638_v2  ;;  %1597 = vmatprep.subr.bf16.mxu1 (!%p192_p3), %v1638_v2  ;;  %v1643_v7 = vld [vmem:[%s1919_s1 + $0x18] sm:$0xff] (!%p192_p3)   ;;  %v1645_v9 = vld [vmem:[%s1919_s1 + $0x20] sm:$0xff] (!%p192_p3)   ;;  %v1647_v13 = vld [vmem:[%s1919_s1 + $0x28] sm:$0xff] (!%p192_p3)  }
   0xa   : > { %v1648_v14 = vld [vmem:[%s1919_s1 + $0x70] sm:$0xff] (!%p192_p3)   ;;  %v1650_v16 = vld [vmem:[%s1919_s1 + $0x78] sm:$0xff] (!%p192_p3)   ;;  %v1853_v51 = vld [vmem:[%s1920_s2] ss:$0 sm:$0xff] (!%p192_p3) }
   0xb   : > { %v1649_v15 = vld [vmem:[%s1919_s1 + $0x30] sm:$0xff] (!%p192_p3)   ;;  %v1651_v17 = vld [vmem:[%s1919_s1 + $0x38] sm:$0xff] (!%p192_p3)  }
   0xc   : > { %1487 = vmatpush3.bf16.msra.mxu0 (!%p192_p3), %v1639_v3  ;;  %1605 = vmatpush3.bf16.msra.mxu1 (!%p192_p3), %v1639_v3 }
   0xd   : > { %1488 = vmatprep.subr.bf16.mxu0 (!%p192_p3), %v1640_v4  ;;  %1598 = vmatprep.subr.bf16.mxu1 (!%p192_p3), %v1640_v4 }
   0xe   : > { %s1927_s18 = smov (!%p236_p4, %s1268_s18), 63 }
   0xf   : > { %s1356_s6 = sshll.u32 %s1927_s18, 3  ;;  %s1272_s5 = sshll.u32 %s1927_s18, 2 }
  0x10   : > { %1489 = vmatpush3.bf16.msra.mxu0 %v1641_v5  ;;  %1606 = vmatpush3.bf16.msra.mxu1 %v1641_v5  ;;  %s1795_s11 = scalar_lea.vmem %s1918_s0, %s1356_s6  ;;  %s1863_s8 = scalar_lea.vmem %s1921_s3, %s1272_s5 }
  0x11   : > { %1490 = vmatprep.subr.bf16.mxu0 %v1642_v6  ;;  %1599 = vmatprep.subr.bf16.mxu1 %v1642_v6  ;;  %v1654_v11 = vld [vmem:[%s1795_s11 + $0x4] ss:$8 sps:$4 sm:$0xff]   ;;  %v1652_v18 = vld [vmem:[%s1795_s11] ss:$8 sps:$4 sm:$0xff]   ;;  %v1658_v20 = vld [vmem:[%s1795_s11 + $0x14] ss:$8 sps:$4 sm:$0xff]  }
  0x12   : > { %v1657_v12 = vld [vmem:[%s1795_s11 + $0x84] ss:$8 sps:$4 sm:$0xff]   ;;  %688 = vmatprep.mubr.bf16.mxu0 %v1654_v11  ;;  %v1655_v19 = vld [vmem:[%s1795_s11 + $0x80] ss:$8 sps:$4 sm:$0xff]   ;;  %v1660_v21 = vld [vmem:[%s1795_s11 + $0x94] ss:$8 sps:$4 sm:$0xff]  }
  0x13   : > { %752 = vmatprep.mubr.bf16.mxu1 %v1657_v12  ;;  %v1662_v22 = vld [vmem:[%s1795_s11 + $0x10] ss:$8 sps:$4 sm:$0xff]   ;;  %v1664_v24 = vld [vmem:[%s1795_s11 + $0x24] ss:$8 sps:$4 sm:$0xff]   ;;  %v1668_v26 = vld [vmem:[%s1795_s11 + $0x20] ss:$8 sps:$4 sm:$0xff]  }
  0x14   : > { %1491 = vmatpush3.bf16.msra.mxu0 %v1643_v7  ;;  %1607 = vmatpush3.bf16.msra.mxu1 %v1643_v7  ;;  %v1663_v23 = vld [vmem:[%s1795_s11 + $0x90] ss:$8 sps:$4 sm:$0xff]   ;;  %v1666_v25 = vld [vmem:[%s1795_s11 + $0xa4] ss:$8 sps:$4 sm:$0xff]   ;;  %v1669_v27 = vld [vmem:[%s1795_s11 + $0xa0] ss:$8 sps:$4 sm:$0xff]  }
  0x15   : > { %1492 = vmatprep.subr.bf16.mxu0 %v1644_v8  ;;  %1600 = vmatprep.subr.bf16.mxu1 %v1644_v8  ;;  %v1670_v28 = vld [vmem:[%s1795_s11 + $0x34] ss:$8 sps:$4 sm:$0xff]   ;;  %v1674_v30 = vld [vmem:[%s1795_s11 + $0x30] ss:$8 sps:$4 sm:$0xff]   ;;  %v1676_v32 = vld [vmem:[%s1795_s11 + $0x44] ss:$8 sps:$4 sm:$0xff]  }
  0x16   : > { %v1672_v29 = vld [vmem:[%s1795_s11 + $0xb4] ss:$8 sps:$4 sm:$0xff]   ;;  %v1675_v31 = vld [vmem:[%s1795_s11 + $0xb0] ss:$8 sps:$4 sm:$0xff]   ;;  %v1678_v33 = vld [vmem:[%s1795_s11 + $0xc4] ss:$8 sps:$4 sm:$0xff]  }
  0x17   : > { %v1680_v34 = vld [vmem:[%s1795_s11 + $0x40] ss:$8 sps:$4 sm:$0xff]   ;;  %v1682_v36 = vld [vmem:[%s1795_s11 + $0x54] ss:$8 sps:$4 sm:$0xff]   ;;  %v1686_v38 = vld [vmem:[%s1795_s11 + $0x50] ss:$8 sps:$4 sm:$0xff]  }
  0x18   : > { %1493 = vmatpush3.bf16.msra.mxu0 %v1645_v9  ;;  %1608 = vmatpush3.bf16.msra.mxu1 %v1645_v9  ;;  %v1681_v35 = vld [vmem:[%s1795_s11 + $0xc0] ss:$8 sps:$4 sm:$0xff]   ;;  %v1684_v37 = vld [vmem:[%s1795_s11 + $0xd4] ss:$8 sps:$4 sm:$0xff]   ;;  %v1687_v39 = vld [vmem:[%s1795_s11 + $0xd0] ss:$8 sps:$4 sm:$0xff]  }
  0x19   : > { %1494 = vmatprep.subr.bf16.mxu0 %v1646_v10  ;;  %1601 = vmatprep.subr.bf16.mxu1 %v1646_v10  ;;  %v1688_v40 = vld [vmem:[%s1795_s11 + $0x64] ss:$8 sps:$4 sm:$0xff]   ;;  %v1692_v42 = vld [vmem:[%s1795_s11 + $0x60] ss:$8 sps:$4 sm:$0xff]   ;;  %v1694_v44 = vld [vmem:[%s1795_s11 + $0x74] ss:$8 sps:$4 sm:$0xff]  }
  0x1a   : > { %v1690_v41 = vld [vmem:[%s1795_s11 + $0xe4] ss:$8 sps:$4 sm:$0xff]   ;;  %v1693_v43 = vld [vmem:[%s1795_s11 + $0xe0] ss:$8 sps:$4 sm:$0xff]   ;;  %v1696_v45 = vld [vmem:[%s1795_s11 + $0xf4] ss:$8 sps:$4 sm:$0xff]  }
  0x1b   : > { %v1698_v46 = vld [vmem:[%s1795_s11 + $0x70] ss:$8 sps:$4 sm:$0xff]  }
  0x1c   : > { %1495 = vmatpush3.bf16.msra.mxu0 %v1647_v13  ;;  %1609 = vmatpush3.bf16.msra.mxu1 %v1647_v13  ;;  %v1699_v47 = vld [vmem:[%s1795_s11 + $0xf0] ss:$8 sps:$4 sm:$0xff]  }
  0x1d   : > { %1496 = vmatprep.subr.bf16.mxu0 %v1648_v14  ;;  %1602 = vmatprep.subr.bf16.mxu1 %v1648_v14 }
  0x20   : > { %1497 = vmatpush3.bf16.msra.mxu0 %v1649_v15  ;;  %1610 = vmatpush3.bf16.msra.mxu1 %v1649_v15 }
  0x21   : > { %1498 = vmatprep.subr.bf16.mxu0 %v1650_v16  ;;  %1603 = vmatprep.subr.bf16.mxu1 %v1650_v16 }
  0x24   : > { %1499 = vmatpush3.bf16.msra.mxu0 %v1651_v17  ;;  %1611 = vmatpush3.bf16.msra.mxu1 %v1651_v17 }
  0x27   : > { %689 = vmatmul.mubr.bf16.vlgmr.msra.gmra.mrb[0].mxu0 %v1652_v18  ;;  %753 = vmatmul.mubr.bf16.vlgmr.msra.gmra.mrb[0].mxu1 %v1655_v19 }
  0x28   : > { %696 = vmatprep.mubr.bf16.mxu0 %v1658_v20  ;;  %760 = vmatprep.mubr.bf16.mxu1 %v1660_v21 }
  0x2f   : > { %697 = vmatmul.mubr.bf16.gmra.mrb[4].mxu0 %v1662_v22  ;;  %761 = vmatmul.mubr.bf16.gmra.mrb[4].mxu1 %v1663_v23 }
  0x30   : > { %704 = vmatprep.mubr.bf16.mxu0 %v1664_v24  ;;  %768 = vmatprep.mubr.bf16.mxu1 %v1666_v25 }
  0x37   : > { %705 = vmatmul.mubr.bf16.gmra.mrb[8].mxu0 %v1668_v26  ;;  %769 = vmatmul.mubr.bf16.gmra.mrb[8].mxu1 %v1669_v27 }
  0x38   : > { %712 = vmatprep.mubr.bf16.mxu0 %v1670_v28  ;;  %776 = vmatprep.mubr.bf16.mxu1 %v1672_v29 }
  0x3f   : > { %713 = vmatmul.mubr.bf16.gmra.mrb[12].mxu0 %v1674_v30  ;;  %777 = vmatmul.mubr.bf16.gmra.mrb[12].mxu1 %v1675_v31 }
  0x40   : > { %720 = vmatprep.mubr.bf16.mxu0 %v1676_v32  ;;  %784 = vmatprep.mubr.bf16.mxu1 %v1678_v33 }
  0x47   : > { %721 = vmatmul.mubr.bf16.gmra.mrb[16].mxu0 %v1680_v34  ;;  %785 = vmatmul.mubr.bf16.gmra.mrb[16].mxu1 %v1681_v35 }
  0x48   : > { %728 = vmatprep.mubr.bf16.mxu0 %v1682_v36  ;;  %792 = vmatprep.mubr.bf16.mxu1 %v1684_v37 }
  0x4f   : > { %729 = vmatmul.mubr.bf16.gmra.mrb[20].mxu0 %v1686_v38  ;;  %793 = vmatmul.mubr.bf16.gmra.mrb[20].mxu1 %v1687_v39 }
  0x50   : > { %736 = vmatprep.mubr.bf16.mxu0 %v1688_v40  ;;  %800 = vmatprep.mubr.bf16.mxu1 %v1690_v41 }
  0x57   : > { %737 = vmatmul.mubr.bf16.gmra.mrb[24].mxu0 %v1692_v42  ;;  %801 = vmatmul.mubr.bf16.gmra.mrb[24].mxu1 %v1693_v43 }
  0x58   : > { %744 = vmatprep.mubr.bf16.mxu0 %v1694_v44  ;;  %808 = vmatprep.mubr.bf16.mxu1 %v1696_v45 }
  0x5f   : > { %745 = vmatmul.mubr.bf16.gmra.mrb[28].mxu0 %v1698_v46  ;;  %809 = vmatmul.mubr.bf16.gmra.mrb[28].mxu1 %v1699_v47 }
  0xfa   : > { %v1500_v48 = vpop.f32.mrb[0].mxu0  ;;  %v1548_v49 = vpop.f32.mrb[0].mxu1 }
  0xfb   : > { %v1501_v50 = vpop.f32.mrb[1].mxu0  ;;  %v1549_v52 = vpop.f32.mrb[1].mxu1 }
  0xfc   : > { %v1502_v53 = vadd.f32 %v1501_v50, %v1500_v48  ;;  %v1550_v54 = vadd.f32 %v1549_v52, %v1548_v49  ;;  %v1503_v55 = vpop.f32.mrb[2].mxu0  ;;  %v1551_v56 = vpop.f32.mrb[2].mxu1 }
  0xfd   : > { %v1504_v57 = vpop.f32.mrb[3].mxu0  ;;  %v1552_v58 = vpop.f32.mrb[3].mxu1 }
  0xfe   : > { %v923_v59 = vadd.f32 %v1502_v53, %v1853_v51  ;;  %v939_v60 = vadd.f32 %v1550_v54, %v1853_v51  ;;  %v1505_v61 = vadd.f32 %v1504_v57, %v1503_v55  ;;  %v1553_v62 = vadd.f32 %v1552_v58, %v1551_v56 }
 0x100   : > { %v924_v63 = vadd.f32 %v1505_v61, %v1853_v51  ;;  %v940_v0 = vadd.f32 %v1553_v62, %v1853_v51  ;;  %v955_v1 = vmax.f32 %v923_v59, 0.0  ;;  %v971_v2 = vmax.f32 %v939_v60, 0.0 }
 0x102   : > { %v956_v3 = vmax.f32 %v924_v63, 0.0  ;;  %v972_v4 = vmax.f32 %v940_v0, 0.0  ;;  %v1506_v5 = vpop.f32.mrb[4].mxu0  ;;  %v1554_v6 = vpop.f32.mrb[4].mxu1 }
 0x103   : > { %v1507_v7 = vpop.f32.mrb[5].mxu0  ;;  %v1555_v8 = vpop.f32.mrb[5].mxu1 }
 0x104   : > { %v1392_v9 = vpack.c.bf16 %v956_v3, %v955_v1  ;;  %v1432_v10 = vpack.c.bf16 %v972_v4, %v971_v2  ;;  %v1508_v11 = vadd.f32 %v1507_v7, %v1506_v5  ;;  %v1556_v12 = vadd.f32 %v1555_v8, %v1554_v6  ;;  %v1509_v13 = vpop.f32.mrb[6].mxu0  ;;  %v1557_v14 = vpop.f32.mrb[6].mxu1 }
 0x105   : > { %v1510_v15 = vpop.f32.mrb[7].mxu0  ;;  %v1558_v16 = vpop.f32.mrb[7].mxu1 }
 0x106   : > { %1393 = vst [vmem:[%s1863_s8] sm:$0xff] %v1392_v9   ;;  %1476 = vst [vmem:[%s1863_s8 + $0x40] sm:$0xff] %v1432_v10   ;;  %v925_v17 = vadd.f32 %v1508_v11, %v1853_v51  ;;  %v941_v18 = vadd.f32 %v1556_v12, %v1853_v51  ;;  %v1511_v19 = vadd.f32 %v1510_v15, %v1509_v13 }
 0x107   : > { %v1559_v20 = vadd.f32 %v1558_v16, %v1557_v14 }
 0x108   : > { %v926_v21 = vadd.f32 %v1511_v19, %v1853_v51  ;;  %v957_v23 = vmax.f32 %v925_v17, 0.0  ;;  %v973_v24 = vmax.f32 %v941_v18, 0.0 }
 0x109   : > { %v942_v22 = vadd.f32 %v1559_v20, %v1853_v51 }
 0x10a   : > { %v958_v25 = vmax.f32 %v926_v21, 0.0  ;;  %v1512_v27 = vpop.f32.mrb[8].mxu0  ;;  %v1560_v28 = vpop.f32.mrb[8].mxu1 }
 0x10b   : > { %v974_v26 = vmax.f32 %v942_v22, 0.0  ;;  %v1513_v29 = vpop.f32.mrb[9].mxu0  ;;  %v1561_v30 = vpop.f32.mrb[9].mxu1 }
 0x10c   : > { %v1397_v31 = vpack.c.bf16 %v958_v25, %v957_v23  ;;  %v1514_v33 = vadd.f32 %v1513_v29, %v1512_v27  ;;  %v1562_v34 = vadd.f32 %v1561_v30, %v1560_v28  ;;  %v1515_v35 = vpop.f32.mrb[10].mxu0  ;;  %v1563_v36 = vpop.f32.mrb[10].mxu1 }
 0x10d   : > { %v1437_v32 = vpack.c.bf16 %v974_v26, %v973_v24  ;;  %v1516_v37 = vpop.f32.mrb[11].mxu0  ;;  %v1564_v38 = vpop.f32.mrb[11].mxu1 }
 0x10e   : > { %1469 = vst [vmem:[%s1863_s8 + $0x8] sm:$0xff] %v1397_v31   ;;  %v927_v39 = vadd.f32 %v1514_v33, %v1853_v51  ;;  %v943_v40 = vadd.f32 %v1562_v34, %v1853_v51  ;;  %v1517_v41 = vadd.f32 %v1516_v37, %v1515_v35  ;;  %v1565_v42 = vadd.f32 %v1564_v38, %v1563_v36 }
 0x10f   : > { %1477 = vst [vmem:[%s1863_s8 + $0x48] sm:$0xff] %v1437_v32  }
 0x110   : > { %v928_v43 = vadd.f32 %v1517_v41, %v1853_v51  ;;  %v944_v44 = vadd.f32 %v1565_v42, %v1853_v51  ;;  %v959_v45 = vmax.f32 %v927_v39, 0.0  ;;  %v975_v46 = vmax.f32 %v943_v40, 0.0 }
 0x112   : > { %v960_v47 = vmax.f32 %v928_v43, 0.0  ;;  %v976_v48 = vmax.f32 %v944_v44, 0.0  ;;  %v1518_v49 = vpop.f32.mrb[12].mxu0  ;;  %v1566_v50 = vpop.f32.mrb[12].mxu1 }
 0x113   : > { %v1519_v52 = vpop.f32.mrb[13].mxu0  ;;  %v1567_v53 = vpop.f32.mrb[13].mxu1 }
 0x114   : > { %v1402_v54 = vpack.c.bf16 %v960_v47, %v959_v45  ;;  %v1442_v55 = vpack.c.bf16 %v976_v48, %v975_v46  ;;  %v1520_v56 = vadd.f32 %v1519_v52, %v1518_v49  ;;  %v1568_v57 = vadd.f32 %v1567_v53, %v1566_v50  ;;  %v1521_v58 = vpop.f32.mrb[14].mxu0  ;;  %v1569_v59 = vpop.f32.mrb[14].mxu1 }
 0x115   : > { %v1522_v60 = vpop.f32.mrb[15].mxu0  ;;  %v1570_v61 = vpop.f32.mrb[15].mxu1 }
 0x116   : > { %1470 = vst [vmem:[%s1863_s8 + $0x10] sm:$0xff] %v1402_v54   ;;  %1478 = vst [vmem:[%s1863_s8 + $0x50] sm:$0xff] %v1442_v55   ;;  %v929_v62 = vadd.f32 %v1520_v56, %v1853_v51  ;;  %v945_v63 = vadd.f32 %v1568_v57, %v1853_v51  ;;  %v1523_v0 = vadd.f32 %v1522_v60, %v1521_v58 }
 0x117   : > { %v1571_v1 = vadd.f32 %v1570_v61, %v1569_v59 }
 0x118   : > { %v930_v2 = vadd.f32 %v1523_v0, %v1853_v51  ;;  %v961_v4 = vmax.f32 %v929_v62, 0.0  ;;  %v977_v5 = vmax.f32 %v945_v63, 0.0 }
 0x119   : > { %v946_v3 = vadd.f32 %v1571_v1, %v1853_v51 }
 0x11a   : > { %v962_v6 = vmax.f32 %v930_v2, 0.0  ;;  %v1524_v8 = vpop.f32.mrb[16].mxu0  ;;  %v1572_v9 = vpop.f32.mrb[16].mxu1 }
 0x11b   : > { %v978_v7 = vmax.f32 %v946_v3, 0.0  ;;  %v1525_v10 = vpop.f32.mrb[17].mxu0  ;;  %v1573_v11 = vpop.f32.mrb[17].mxu1 }
 0x11c   : > { %v1407_v12 = vpack.c.bf16 %v962_v6, %v961_v4  ;;  %v1526_v14 = vadd.f32 %v1525_v10, %v1524_v8  ;;  %v1574_v15 = vadd.f32 %v1573_v11, %v1572_v9  ;;  %v1527_v16 = vpop.f32.mrb[18].mxu0  ;;  %v1575_v17 = vpop.f32.mrb[18].mxu1 }
 0x11d   : > { %v1447_v13 = vpack.c.bf16 %v978_v7, %v977_v5  ;;  %v1528_v18 = vpop.f32.mrb[19].mxu0  ;;  %v1576_v19 = vpop.f32.mrb[19].mxu1 }
 0x11e   : > { %1471 = vst [vmem:[%s1863_s8 + $0x18] sm:$0xff] %v1407_v12   ;;  %v931_v20 = vadd.f32 %v1526_v14, %v1853_v51  ;;  %v947_v21 = vadd.f32 %v1574_v15, %v1853_v51  ;;  %v1529_v22 = vadd.f32 %v1528_v18, %v1527_v16  ;;  %v1577_v23 = vadd.f32 %v1576_v19, %v1575_v17 }
 0x11f   : > { %1479 = vst [vmem:[%s1863_s8 + $0x58] sm:$0xff] %v1447_v13  }
 0x120   : > { %v932_v24 = vadd.f32 %v1529_v22, %v1853_v51  ;;  %v948_v25 = vadd.f32 %v1577_v23, %v1853_v51  ;;  %v963_v26 = vmax.f32 %v931_v20, 0.0  ;;  %v979_v27 = vmax.f32 %v947_v21, 0.0 }
 0x122   : > { %v964_v28 = vmax.f32 %v932_v24, 0.0  ;;  %v980_v29 = vmax.f32 %v948_v25, 0.0  ;;  %v1530_v30 = vpop.f32.mrb[20].mxu0  ;;  %v1578_v31 = vpop.f32.mrb[20].mxu1 }
 0x123   : > { %v1531_v32 = vpop.f32.mrb[21].mxu0  ;;  %v1579_v33 = vpop.f32.mrb[21].mxu1 }
 0x124   : > { %v1412_v34 = vpack.c.bf16 %v964_v28, %v963_v26  ;;  %v1452_v35 = vpack.c.bf16 %v980_v29, %v979_v27  ;;  %v1532_v36 = vadd.f32 %v1531_v32, %v1530_v30  ;;  %v1580_v37 = vadd.f32 %v1579_v33, %v1578_v31  ;;  %v1533_v38 = vpop.f32.mrb[22].mxu0  ;;  %v1581_v39 = vpop.f32.mrb[22].mxu1 }
 0x125   : > { %v1534_v40 = vpop.f32.mrb[23].mxu0  ;;  %v1582_v41 = vpop.f32.mrb[23].mxu1 }
 0x126   : > { %1472 = vst [vmem:[%s1863_s8 + $0x20] sm:$0xff] %v1412_v34   ;;  %1480 = vst [vmem:[%s1863_s8 + $0x60] sm:$0xff] %v1452_v35   ;;  %v933_v42 = vadd.f32 %v1532_v36, %v1853_v51  ;;  %v949_v43 = vadd.f32 %v1580_v37, %v1853_v51  ;;  %v1535_v44 = vadd.f32 %v1534_v40, %v1533_v38 }
 0x127   : > { %v1583_v45 = vadd.f32 %v1582_v41, %v1581_v39 }
 0x128   : > { %v934_v46 = vadd.f32 %v1535_v44, %v1853_v51  ;;  %v965_v48 = vmax.f32 %v933_v42, 0.0  ;;  %v981_v49 = vmax.f32 %v949_v43, 0.0 }
 0x129   : > { %v950_v47 = vadd.f32 %v1583_v45, %v1853_v51 }
 0x12a   : > { %v966_v50 = vmax.f32 %v934_v46, 0.0  ;;  %v1536_v53 = vpop.f32.mrb[24].mxu0  ;;  %v1584_v54 = vpop.f32.mrb[24].mxu1 }
 0x12b   : > { %v982_v52 = vmax.f32 %v950_v47, 0.0  ;;  %v1537_v55 = vpop.f32.mrb[25].mxu0  ;;  %v1585_v56 = vpop.f32.mrb[25].mxu1 }
 0x12c   : > { %v1417_v57 = vpack.c.bf16 %v966_v50, %v965_v48  ;;  %v1538_v59 = vadd.f32 %v1537_v55, %v1536_v53  ;;  %v1586_v60 = vadd.f32 %v1585_v56, %v1584_v54  ;;  %v1539_v61 = vpop.f32.mrb[26].mxu0  ;;  %v1587_v62 = vpop.f32.mrb[26].mxu1 }
 0x12d   : > { %v1457_v58 = vpack.c.bf16 %v982_v52, %v981_v49  ;;  %v1540_v63 = vpop.f32.mrb[27].mxu0  ;;  %v1588_v0 = vpop.f32.mrb[27].mxu1 }
 0x12e   : > { %1473 = vst [vmem:[%s1863_s8 + $0x28] sm:$0xff] %v1417_v57   ;;  %v935_v1 = vadd.f32 %v1538_v59, %v1853_v51  ;;  %v951_v2 = vadd.f32 %v1586_v60, %v1853_v51  ;;  %v1541_v3 = vadd.f32 %v1540_v63, %v1539_v61  ;;  %v1589_v4 = vadd.f32 %v1588_v0, %v1587_v62 }
 0x12f   : > { %1481 = vst [vmem:[%s1863_s8 + $0x68] sm:$0xff] %v1457_v58  }
 0x130   : > { %v936_v5 = vadd.f32 %v1541_v3, %v1853_v51  ;;  %v952_v6 = vadd.f32 %v1589_v4, %v1853_v51  ;;  %v967_v7 = vmax.f32 %v935_v1, 0.0  ;;  %v983_v8 = vmax.f32 %v951_v2, 0.0 }
 0x132   : > { %v968_v9 = vmax.f32 %v936_v5, 0.0  ;;  %v984_v10 = vmax.f32 %v952_v6, 0.0  ;;  %v1542_v11 = vpop.f32.mrb[28].mxu0  ;;  %v1590_v12 = vpop.f32.mrb[28].mxu1 }
 0x133   : > { %v1543_v13 = vpop.f32.mrb[29].mxu0  ;;  %v1591_v14 = vpop.f32.mrb[29].mxu1 }
 0x134   : > { %v1422_v15 = vpack.c.bf16 %v968_v9, %v967_v7  ;;  %v1462_v16 = vpack.c.bf16 %v984_v10, %v983_v8  ;;  %v1544_v17 = vadd.f32 %v1543_v13, %v1542_v11  ;;  %v1592_v18 = vadd.f32 %v1591_v14, %v1590_v12  ;;  %v1545_v19 = vpop.f32.mrb[30].mxu0  ;;  %v1593_v20 = vpop.f32.mrb[30].mxu1 }
 0x135   : > { %v1546_v21 = vpop.f32.mrb[31].mxu0  ;;  %v1594_v22 = vpop.f32.mrb[31].mxu1 }
 0x136   : > { %1474 = vst [vmem:[%s1863_s8 + $0x30] sm:$0xff] %v1422_v15   ;;  %1482 = vst [vmem:[%s1863_s8 + $0x70] sm:$0xff] %v1462_v16   ;;  %v937_v23 = vadd.f32 %v1544_v17, %v1853_v51  ;;  %v953_v24 = vadd.f32 %v1592_v18, %v1853_v51  ;;  %v1547_v25 = vadd.f32 %v1546_v21, %v1545_v19 }
 0x137   : > { %v1595_v26 = vadd.f32 %v1594_v22, %v1593_v20 }
 0x138   : > { %v938_v27 = vadd.f32 %v1547_v25, %v1853_v51  ;;  %v969_v29 = vmax.f32 %v937_v23, 0.0  ;;  %v985_v30 = vmax.f32 %v953_v24, 0.0 }
 0x139   : > { %v954_v28 = vadd.f32 %v1595_v26, %v1853_v51 }
 0x13a   : > { %v970_v31 = vmax.f32 %v938_v27, 0.0 }
 0x13b   : > { %v986_v32 = vmax.f32 %v954_v28, 0.0 }
 0x13c   : > { %v1427_v33 = vpack.c.bf16 %v970_v31, %v969_v29 }
 0x13d   : > { %v1467_v34 = vpack.c.bf16 %v986_v32, %v985_v30 }
 0x13e   : > { %1475 = vst [vmem:[%s1863_s8 + $0x38] sm:$0xff] %v1427_v33  }
 0x13f   : > { %1483 = vst [vmem:[%s1863_s8 + $0x78] sm:$0xff] %v1467_v34  }
 0x140 PF: > { %s13_s14 = sadd.s32 1, %s1722_s14   ;;  %s1922_s12 = smov %s1718_s13 }
 0x141   : > { %p10_p5 = scmp.ge.s32.totalorder %s13_s14, 4   ;;  %s1923_s13 = smov %s1925_s15 }
 0x143   :  { %12 = sbr.rel (!%p10_p5) target bundleno = 2 (0x2), region = 76 }

// kernel: _lambda_.22
= control target key start
LH: loop header
LB: loop body
LE: loop exit
PB: predicated region body
PF: predicated region fallthrough
CT: control target
= control target key end

     0   :  { %s1190_s12 = smov 0   ;;  %s1192_s13 = smov 0   ;;  %s1322_s0 = inlined_call_operand.vmem [shape: bf16[128,640], index: 0, kind: input, shape index: {}]   ;;  %s1323_s1 = inlined_call_operand.vmem [shape: bf16[640,128], index: 1, kind: input, shape index: {}]   ;;  %s1324_s2 = inlined_call_operand.vmem [shape: f32[1,128], index: 2, kind: input, shape index: {}]   ;;  %s1325_s3 = inlined_call_operand.vmem [shape: bf16[128,128], index: 3, kind: output, shape index: {}]  }
   0x1   :  { %s1194_s14 = smov 0   ;;  %s1196_s15 = smov 0  }
   0x2   :  { %s1198_s16 = smov 0  }
   0x3 LB: > { %s25_s17 = sadd.s32 1, %s1163_s15  ;;  %p48_p1 = scmp.ne.s32.totalorder %s1155_s13, %s1151_s12  ;;  %s1167_s16 = sphi %s1198_s16, %s13_s16   ;;  %s1163_s15 = sphi %s1196_s15, %s1329_s15   ;;  %s1159_s14 = sphi %s1194_s14, %s1328_s14   ;;  %s1155_s13 = sphi %s1192_s13, %s1327_s13   ;;  %s1151_s12 = sphi %s1190_s12, %s1326_s12  }
   0x4   : > { %p26_p0 = scmp.ge.s32.totalorder %s25_s17, 5  ;;  %p49_p2 = scmp.eq.s32.totalorder %s1167_s16, 0 }
   0x5   : > { %s41_s19 = sadd.s32 1, %s1155_s13  ;;  %p899_p5 = scmp.ge.s32.totalorder %s1167_s16, 5 }
   0x6   : > { %s1331_s17 = smov (%p26_p0, %s25_s17), 0  ;;  %p50_p3 = por %p49_p2, %p48_p1 }
   0x7   : > { %s37_s18 = ssub.s32 %s1163_s15, %s1331_s17  ;;  %162 = sbr.rel (%p899_p5) target bundleno = 28 (0x1c), region = 20 }
   0x8   : > { %p39_p4 = scmp.eq.s32.totalorder %s37_s18, 0 }
   0xa   : > { %s1225_s20 = scalar_select %p39_p4, %s1155_s13, %s41_s19  }
   0xe   : > { %165 = sbr.rel (!%p50_p3) target bundleno = 28 (0x1c), region = 24  ;;  %s167_s21 = sand.u32 (%p50_p3), 1, %s1155_s13  }
   0xf   : > { %s901_s22 = sshll.u32 (%p50_p3), %s1163_s15, 2  ;;  %s900_s23 = sshll.u32 (%p50_p3), %s167_s21, 6 }
  0x10   : > { %s1233_s26 = scalar_lea.vmem (%p50_p3), %s1322_s0, %s901_s22  ;;  %s169_s27 = scalar_lea.vmem (%p50_p3), [#allocation3], %s900_s23 }
  0x11   : > { %v190_v0 = vld [vmem:[%s1233_s26] sm:$0xf] (%p50_p3)  ;;  %v192_v1 = vld [vmem:[%s1233_s26 + $0x14] sm:$0xf] (%p50_p3)  ;;  %v194_v2 = vld [vmem:[%s1233_s26 + $0x28] sm:$0xf] (%p50_p3) }
  0x12   : > { %191 = vst [vmem:[%s169_s27] sm:$0xf] (%p50_p3), %v190_v0  ;;  %193 = vst [vmem:[%s169_s27 + $0x4] sm:$0xf] (%p50_p3), %v192_v1  ;;  %v196_v3 = vld [vmem:[%s1233_s26 + $0x3c] sm:$0xf] (%p50_p3) }
  0x13   : > { %v198_v4 = vld [vmem:[%s1233_s26 + $0x50] sm:$0xf] (%p50_p3)  ;;  %195 = vst [vmem:[%s169_s27 + $0x8] sm:$0xf] (%p50_p3), %v194_v2  ;;  %197 = vst [vmem:[%s169_s27 + $0xc] sm:$0xf] (%p50_p3), %v196_v3 }
  0x14   : > { %199 = vst [vmem:[%s169_s27 + $0x10] sm:$0xf] (%p50_p3), %v198_v4  ;;  %v200_v5 = vld [vmem:[%s1233_s26 + $0x64] sm:$0xf] (%p50_p3)  ;;  %v202_v6 = vld [vmem:[%s1233_s26 + $0x78] sm:$0xf] (%p50_p3) }
  0x15   : > { %v204_v7 = vld [vmem:[%s1233_s26 + $0x8c] sm:$0xf]  ;;  %201 = vst [vmem:[%s169_s27 + $0x14] sm:$0xf] %v200_v5  ;;  %203 = vst [vmem:[%s169_s27 + $0x18] sm:$0xf] %v202_v6 }
  0x16   : > { %205 = vst [vmem:[%s169_s27 + $0x1c] sm:$0xf] %v204_v7  ;;  %v206_v8 = vld [vmem:[%s1233_s26 + $0xa0] sm:$0xf]  ;;  %v208_v9 = vld [vmem:[%s1233_s26 + $0xb4] sm:$0xf] }
  0x17   : > { %v210_v10 = vld [vmem:[%s1233_s26 + $0xc8] sm:$0xf]  ;;  %207 = vst [vmem:[%s169_s27 + $0x20] sm:$0xf] %v206_v8  ;;  %209 = vst [vmem:[%s169_s27 + $0x24] sm:$0xf] %v208_v9 }
  0x18   : > { %211 = vst [vmem:[%s169_s27 + $0x28] sm:$0xf] %v210_v10  ;;  %v212_v11 = vld [vmem:[%s1233_s26 + $0xdc] sm:$0xf]  ;;  %v214_v12 = vld [vmem:[%s1233_s26 + $0xf0] sm:$0xf] }
  0x19   : > { %v216_v13 = vld [vmem:[%s1233_s26 + $0x104] sm:$0xf]  ;;  %213 = vst [vmem:[%s169_s27 + $0x2c] sm:$0xf] %v212_v11  ;;  %215 = vst [vmem:[%s169_s27 + $0x30] sm:$0xf] %v214_v12 }
  0x1a   : > { %217 = vst [vmem:[%s169_s27 + $0x34] sm:$0xf] %v216_v13  ;;  %v218_v14 = vld [vmem:[%s1233_s26 + $0x118] sm:$0xf]  ;;  %v220_v15 = vld [vmem:[%s1233_s26 + $0x12c] sm:$0xf] }
  0x1b   : > { %219 = vst [vmem:[%s169_s27 + $0x38] sm:$0xf] %v218_v14  ;;  %221 = vst [vmem:[%s169_s27 + $0x3c] sm:$0xf] %v220_v15 }
  0x1c PF: > { %p902_p6 = scmp.ge.s32.totalorder %s1167_s16, 1  ;;  %p287_p7 = scmp.lt.s32.totalorder %s1167_s16, 6 }
  0x1e   : > { %p288_p8 = pnand %p902_p6, %p287_p7 }
  0x1f   : > { %s294_s28 = sand.u32 (!%p288_p8), 1, %s1151_s12   ;;  %s904_s29 = sshll.u32 (!%p288_p8), %s1159_s14, 4 }
  0x20   : > { %291 = sbr.rel (%p288_p8) target bundleno = 323 (0x143), region = 69  ;;  %s903_s30 = sshll.u32 (!%p288_p8), %s294_s28, 6 }
  0x21   : > { %p333_p9 = scmp.lt.s32.totalorder (!%p288_p8), %s904_s29, 79  ;;  %s1260_s8 = scalar_lea.vmem (!%p288_p8), [#allocation3], %s903_s30 }
  0x22   : > { %p906_p10 = scmp.ne.s32.totalorder (!%p288_p8), %s1159_s14, 0 }
  0x27   : > { %s1333_s29 = smov (!%p333_p9, %s904_s29), 79  ;;  %357 = sbr.rel (%p906_p10) target bundleno = 49 (0x31), region = 77 }
  0x28   : > { %s905_s4 = sshll.u32 %s1333_s29, 2  ;;  %v1169_v16 = vmov (!%p906_p10), 0.0  }
  0x29   : > { %s1258_s7 = scalar_lea.vmem %s1323_s1, %s905_s4  ;;  %358 = vst [vmem:[#allocation2] sm:$0xff] (!%p906_p10), %v1169_v16  ;;  %359 = vst [vmem:[#allocation2 + $0x8] sm:$0xff] (!%p906_p10), %v1169_v16 }
  0x2a   : > { %360 = vst [vmem:[#allocation2 + $0x10] sm:$0xff] (!%p906_p10), %v1169_v16  ;;  %361 = vst [vmem:[#allocation2 + $0x18] sm:$0xff] (!%p906_p10), %v1169_v16 }
  0x2b   : > { %362 = vst [vmem:[#allocation2 + $0x20] sm:$0xff] (!%p906_p10), %v1169_v16  ;;  %363 = vst [vmem:[#allocation2 + $0x28] sm:$0xff] (!%p906_p10), %v1169_v16 }
  0x2c   : > { %364 = vst [vmem:[#allocation2 + $0x30] sm:$0xff] (!%p906_p10), %v1169_v16  ;;  %365 = vst [vmem:[#allocation2 + $0x38] sm:$0xff] (!%p906_p10), %v1169_v16 }
  0x2d   : > { %366 = vst [vmem:[#allocation2 + $0x40] sm:$0xff] (!%p906_p10), %v1169_v16  ;;  %367 = vst [vmem:[#allocation2 + $0x48] sm:$0xff] (!%p906_p10), %v1169_v16 }
  0x2e   : > { %368 = vst [vmem:[#allocation2 + $0x50] sm:$0xff] %v1169_v16  ;;  %369 = vst [vmem:[#allocation2 + $0x58] sm:$0xff] %v1169_v16 }
  0x2f   : > { %370 = vst [vmem:[#allocation2 + $0x60] sm:$0xff] %v1169_v16  ;;  %371 = vst [vmem:[#allocation2 + $0x68] sm:$0xff] %v1169_v16 }
  0x30   : > { %372 = vst [vmem:[#allocation2 + $0x70] sm:$0xff] %v1169_v16  ;;  %373 = vst [vmem:[#allocation2 + $0x78] sm:$0xff] %v1169_v16 }
  0x31 PF: > { %v1113_v17 = vld [vmem:[%s1258_s7] sm:$0xff]   ;;  %v1114_v18 = vld [vmem:[%s1258_s7 + $0x8] sm:$0xff]   ;;  %v1115_v19 = vld [vmem:[%s1258_s7 + $0x10] sm:$0xff]   ;;  %p923_p11 = scmp.ne.s32.totalorder %s1159_s14, 4 }
  0x32   : > { %1024 = vmatprep.subr.bf16.mxu0 %v1113_v17  ;;  %1056 = vmatprep.subr.bf16.mxu1 %v1113_v17  ;;  %v1116_v20 = vld [vmem:[%s1258_s7 + $0x18] sm:$0xff]   ;;  %v1121_v21 = vld [vmem:[%s1260_s8] sm:$0xff]   ;;  %v1118_v24 = vld [vmem:[%s1258_s7 + $0x28] sm:$0xff]  }
  0x33   : > { %1025 = vmatpush3.bf16.msra.mxu0 %v1113_v17  ;;  %1064 = vmatpush3.bf16.msra.mxu1 %v1113_v17  ;;  %v1122_v22 = vld [vmem:[%s1260_s8 + $0x20] sm:$0xff]   ;;  %v1119_v25 = vld [vmem:[%s1258_s7 + $0x30] sm:$0xff]   ;;  %v1120_v26 = vld [vmem:[%s1258_s7 + $0x38] sm:$0xff]  }
  0x34   : > { %1026 = vmatprep.subr.bf16.mxu0 %v1114_v18  ;;  %1057 = vmatprep.subr.bf16.mxu1 %v1114_v18  ;;  %v1117_v23 = vld [vmem:[%s1258_s7 + $0x20] sm:$0xff]   ;;  %v1123_v27 = vld [vmem:[%s1260_s8 + $0x8] sm:$0xff]   ;;  %v1125_v29 = vld [vmem:[%s1260_s8 + $0x10] sm:$0xff]  }
  0x35   : > { %1040 = vmatprep.mubr.bf16.mxu0 %v1121_v21  ;;  %1048 = vmatprep.mubr.bf16.mxu1 %v1122_v22  ;;  %v1124_v28 = vld [vmem:[%s1260_s8 + $0x28] sm:$0xff]   ;;  %v1126_v30 = vld [vmem:[%s1260_s8 + $0x30] sm:$0xff]   ;;  %v1127_v31 = vld [vmem:[%s1260_s8 + $0x18] sm:$0xff]  }
  0x36   : > { %v1128_v32 = vld [vmem:[%s1260_s8 + $0x38] sm:$0xff]   ;;  %v376_v33 = vld [vmem:[#allocation2 + $0x10] sm:$0xff]  ;;  %v374_v35 = vld [vmem:[#allocation2] sm:$0xff] }
  0x37   : > { %1027 = vmatpush3.bf16.msra.mxu0 %v1114_v18  ;;  %1065 = vmatpush3.bf16.msra.mxu1 %v1114_v18  ;;  %v384_v34 = vld [vmem:[#allocation2 + $0x50] sm:$0xff]  ;;  %v382_v36 = vld [vmem:[#allocation2 + $0x40] sm:$0xff]  ;;  %v377_v39 = vld [vmem:[#allocation2 + $0x18] sm:$0xff] }
  0x38   : > { %1028 = vmatprep.subr.bf16.mxu0 %v1115_v19  ;;  %1058 = vmatprep.subr.bf16.mxu1 %v1115_v19  ;;  %v385_v40 = vld [vmem:[#allocation2 + $0x58] sm:$0xff]  ;;  %v375_v45 = vld [vmem:[#allocation2 + $0x8] sm:$0xff]  ;;  %v380_v57 = vld [vmem:[#allocation2 + $0x30] sm:$0xff] }
  0x39   : > { %v383_v46 = vld [vmem:[#allocation2 + $0x48] sm:$0xff]  ;;  %v388_v58 = vld [vmem:[#allocation2 + $0x70] sm:$0xff]  ;;  %v378_v59 = vld [vmem:[#allocation2 + $0x20] sm:$0xff] }
  0x3a   : > { %v386_v60 = vld [vmem:[#allocation2 + $0x60] sm:$0xff]  ;;  %v381_v63 = vld [vmem:[#allocation2 + $0x38] sm:$0xff]  ;;  %v379_v5 = vld [vmem:[#allocation2 + $0x28] sm:$0xff] }
  0x3b   : > { %1029 = vmatpush3.bf16.msra.mxu0 %v1115_v19  ;;  %1066 = vmatpush3.bf16.msra.mxu1 %v1115_v19  ;;  %v389_v0 = vld [vmem:[#allocation2 + $0x78] sm:$0xff]  ;;  %v387_v6 = vld [vmem:[#allocation2 + $0x68] sm:$0xff]  ;;  %v924_v19 = vld [vmem:[%s1324_s2] ss:$0 sm:$0xff] (!%p923_p11) }
  0x3c   : > { %1030 = vmatprep.subr.bf16.mxu0 %v1116_v20  ;;  %1059 = vmatprep.subr.bf16.mxu1 %v1116_v20 }
  0x3f   : > { %1031 = vmatpush3.bf16.msra.mxu0 %v1116_v20  ;;  %1067 = vmatpush3.bf16.msra.mxu1 %v1116_v20 }
  0x40   : > { %1032 = vmatprep.subr.bf16.mxu0 %v1117_v23  ;;  %1060 = vmatprep.subr.bf16.mxu1 %v1117_v23 }
  0x43   : > { %1033 = vmatpush3.bf16.msra.mxu0 %v1117_v23  ;;  %1068 = vmatpush3.bf16.msra.mxu1 %v1117_v23 }
  0x44   : > { %1034 = vmatprep.subr.bf16.mxu0 %v1118_v24  ;;  %1061 = vmatprep.subr.bf16.mxu1 %v1118_v24 }
  0x47   : > { %1035 = vmatpush3.bf16.msra.mxu0 %v1118_v24  ;;  %1069 = vmatpush3.bf16.msra.mxu1 %v1118_v24 }
  0x48   : > { %1036 = vmatprep.subr.bf16.mxu0 %v1119_v25  ;;  %1062 = vmatprep.subr.bf16.mxu1 %v1119_v25 }
  0x4b   : > { %1037 = vmatpush3.bf16.msra.mxu0 %v1119_v25  ;;  %1070 = vmatpush3.bf16.msra.mxu1 %v1119_v25 }
  0x4c   : > { %1038 = vmatprep.subr.bf16.mxu0 %v1120_v26  ;;  %1063 = vmatprep.subr.bf16.mxu1 %v1120_v26 }
  0x4f   : > { %1039 = vmatpush3.bf16.msra.mxu0 %v1120_v26  ;;  %1071 = vmatpush3.bf16.msra.mxu1 %v1120_v26 }
  0x52   : > { %1041 = vmatmul.mubr.bf16.vlgmr.msra.gmra.mrb[0].mxu0 %v1123_v27  ;;  %1049 = vmatmul.mubr.bf16.vlgmr.msra.gmra.mrb[0].mxu1 %v1124_v28 }
  0x53   : > { %1044 = vmatprep.mubr.bf16.mxu0 %v1125_v29  ;;  %1052 = vmatprep.mubr.bf16.mxu1 %v1126_v30 }
  0x5a   : > { %1045 = vmatmul.mubr.bf16.gmra.mrb[4].mxu0 %v1127_v31  ;;  %1053 = vmatmul.mubr.bf16.gmra.mrb[4].mxu1 %v1128_v32 }
 0x125   : > { %v1042_v37 = vpop.f32.mrb[0].mxu0  ;;  %v1050_v38 = vpop.f32.mrb[0].mxu1 }
 0x126   : > { %v617_v41 = vadd.f32 %v1042_v37, %v376_v33  ;;  %v625_v42 = vadd.f32 %v1050_v38, %v384_v34  ;;  %v552_v43 = vpop.f32.mrb[1].mxu0  ;;  %v584_v44 = vpop.f32.mrb[1].mxu1 }
 0x127   : > { %v615_v47 = vadd.f32 %v552_v43, %v374_v35  ;;  %v623_v48 = vadd.f32 %v584_v44, %v382_v36  ;;  %v1043_v49 = vpop.f32.mrb[2].mxu0  ;;  %v1051_v50 = vpop.f32.mrb[2].mxu1 }
 0x128   : > { %633 = vst [vmem:[#allocation2 + $0x10] sm:$0xff] %v617_v41  ;;  %641 = vst [vmem:[#allocation2 + $0x50] sm:$0xff] %v625_v42  ;;  %v618_v51 = vadd.f32 %v1043_v49, %v377_v39  ;;  %v626_v52 = vadd.f32 %v1051_v50, %v385_v40  ;;  %v555_v53 = vpop.f32.mrb[3].mxu0  ;;  %v587_v54 = vpop.f32.mrb[3].mxu1 }
 0x129   : > { %631 = vst [vmem:[#allocation2] sm:$0xff] %v615_v47  ;;  %639 = vst [vmem:[#allocation2 + $0x40] sm:$0xff] %v623_v48  ;;  %v616_v55 = vadd.f32 %v555_v53, %v375_v45  ;;  %v624_v56 = vadd.f32 %v587_v54, %v383_v46 }
 0x12a   : > { %634 = vst [vmem:[#allocation2 + $0x18] sm:$0xff] %v618_v51  ;;  %642 = vst [vmem:[#allocation2 + $0x58] sm:$0xff] %v626_v52 }
 0x12b   : > { %632 = vst [vmem:[#allocation2 + $0x8] sm:$0xff] %v616_v55  ;;  %640 = vst [vmem:[#allocation2 + $0x48] sm:$0xff] %v624_v56 }
 0x12d   : > { %v1046_v61 = vpop.f32.mrb[4].mxu0  ;;  %v1054_v62 = vpop.f32.mrb[4].mxu1  ;;  %650 = sbr.rel (%p923_p11) target bundleno = 323 (0x143), region = 81 }
 0x12e   : > { %v621_v1 = vadd.f32 %v1046_v61, %v380_v57  ;;  %v629_v2 = vadd.f32 %v1054_v62, %v388_v58  ;;  %v568_v3 = vpop.f32.mrb[5].mxu0  ;;  %v600_v4 = vpop.f32.mrb[5].mxu1 }
 0x12f   : > { %v619_v7 = vadd.f32 %v568_v3, %v378_v59  ;;  %v627_v8 = vadd.f32 %v600_v4, %v386_v60  ;;  %v1047_v9 = vpop.f32.mrb[6].mxu0  ;;  %v1055_v10 = vpop.f32.mrb[6].mxu1  ;;  %v653_v22 = vld [vmem:[#allocation2 + $0x10] sm:$0xff] (!%p923_p11) }
 0x130   : > { %637 = vst [vmem:[#allocation2 + $0x30] sm:$0xff] %v621_v1  ;;  %645 = vst [vmem:[#allocation2 + $0x70] sm:$0xff] %v629_v2  ;;  %v622_v11 = vadd.f32 %v1047_v9, %v381_v63  ;;  %v630_v12 = vadd.f32 %v1055_v10, %v389_v0  ;;  %v571_v13 = vpop.f32.mrb[7].mxu0  ;;  %v603_v14 = vpop.f32.mrb[7].mxu1  ;;  %v651_v17 = vld [vmem:[#allocation2] sm:$0xff] (!%p923_p11)  ;;  %v676_v25 = vadd.f32 (!%p923_p11), %v924_v19, %v653_v22  ;;  %v661_v37 = vld [vmem:[#allocation2 + $0x50] sm:$0xff] (!%p923_p11) }
 0x131   : > { %635 = vst [vmem:[#allocation2 + $0x20] sm:$0xff] %v619_v7  ;;  %643 = vst [vmem:[#allocation2 + $0x60] sm:$0xff] %v627_v8  ;;  %v620_v15 = vadd.f32 %v571_v13, %v379_v5  ;;  %v628_v16 = vadd.f32 %v603_v14, %v387_v6  ;;  %v674_v20 = vadd.f32 (!%p923_p11), %v924_v19, %v651_v17  ;;  %v654_v23 = vld [vmem:[#allocation2 + $0x18] sm:$0xff] (!%p923_p11)  ;;  %v659_v35 = vld [vmem:[#allocation2 + $0x40] sm:$0xff] (!%p923_p11) }
 0x132   : > { %638 = vst [vmem:[#allocation2 + $0x38] sm:$0xff] %v622_v11  ;;  %646 = vst [vmem:[#allocation2 + $0x78] sm:$0xff] %v630_v12  ;;  %v652_v18 = vld [vmem:[#allocation2 + $0x8] sm:$0xff] (!%p923_p11)  ;;  %v677_v26 = vadd.f32 (!%p923_p11), %v924_v19, %v654_v23  ;;  %v692_v38 = vmax.f32 (!%p923_p11), %v676_v25, 0.0  ;;  %v662_v42 = vld [vmem:[#allocation2 + $0x58] sm:$0xff] (!%p923_p11)  ;;  %v682_v47 = vadd.f32 (!%p923_p11), %v924_v19, %v659_v35  ;;  %v684_v52 = vadd.f32 (!%p923_p11), %v924_v19, %v661_v37 }
 0x133   : > { %636 = vst [vmem:[#allocation2 + $0x28] sm:$0xff] %v620_v15  ;;  %644 = vst [vmem:[#allocation2 + $0x68] sm:$0xff] %v628_v16  ;;  %v675_v21 = vadd.f32 (!%p923_p11), %v924_v19, %v652_v18  ;;  %v690_v31 = vmax.f32 (!%p923_p11), %v674_v20, 0.0  ;;  %v660_v36 = vld [vmem:[#allocation2 + $0x48] sm:$0xff] (!%p923_p11)  ;;  %v685_v57 = vadd.f32 (!%p923_p11), %v924_v19, %v662_v42 }
 0x134   : > { %v693_v39 = vmax.f32 %v677_v26, 0.0  ;;  %v683_v51 = vadd.f32 %v924_v19, %v660_v36  ;;  %v698_v56 = vmax.f32 %v682_v47, 0.0  ;;  %v700_v61 = vmax.f32 %v684_v52, 0.0 }
 0x135   : > { %v691_v32 = vmax.f32 %v675_v21, 0.0  ;;  %v701_v63 = vmax.f32 %v685_v57, 0.0 }
 0x136   : > { %v969_v49 = vpack.c.bf16 %v693_v39, %v692_v38  ;;  %v699_v60 = vmax.f32 %v683_v51, 0.0 }
 0x137   : > { %v657_v29 = vld [vmem:[#allocation2 + $0x30] sm:$0xff]  ;;  %v964_v44 = vpack.c.bf16 %v691_v32, %v690_v31  ;;  %v989_v5 = vpack.c.bf16 %v701_v63, %v700_v61 }
 0x138   : > { %v655_v24 = vld [vmem:[#allocation2 + $0x20] sm:$0xff]  ;;  %v680_v34 = vadd.f32 %v924_v19, %v657_v29  ;;  %v665_v53 = vld [vmem:[#allocation2 + $0x70] sm:$0xff]  ;;  %1001 = vst [vmem:[%s1325_s3 + $0x8] sm:$0xff] %v969_v49   ;;  %v984_v3 = vpack.c.bf16 %v699_v60, %v698_v56 }
 0x139   : > { %v678_v28 = vadd.f32 %v924_v19, %v655_v24  ;;  %v658_v30 = vld [vmem:[#allocation2 + $0x38] sm:$0xff]  ;;  %v663_v43 = vld [vmem:[#allocation2 + $0x60] sm:$0xff]  ;;  %965 = vst [vmem:[%s1325_s3] sm:$0xff] %v964_v44   ;;  %v688_v1 = vadd.f32 %v924_v19, %v665_v53  ;;  %1005 = vst [vmem:[%s1325_s3 + $0x28] sm:$0xff] %v989_v5  }
 0x13a   : > { %v656_v27 = vld [vmem:[#allocation2 + $0x28] sm:$0xff]  ;;  %v681_v41 = vadd.f32 %v924_v19, %v658_v30  ;;  %v696_v46 = vmax.f32 %v680_v34, 0.0  ;;  %v666_v54 = vld [vmem:[#allocation2 + $0x78] sm:$0xff]  ;;  %v686_v58 = vadd.f32 %v924_v19, %v663_v43  ;;  %1004 = vst [vmem:[%s1325_s3 + $0x20] sm:$0xff] %v984_v3  }
 0x13b   : > { %v679_v33 = vadd.f32 %v924_v19, %v656_v27  ;;  %v694_v40 = vmax.f32 %v678_v28, 0.0  ;;  %v664_v48 = vld [vmem:[#allocation2 + $0x68] sm:$0xff]  ;;  %v689_v2 = vadd.f32 %v924_v19, %v666_v54  ;;  %v704_v6 = vmax.f32 %v688_v1, 0.0 }
 0x13c   : > { %v697_v50 = vmax.f32 %v681_v41, 0.0  ;;  %v687_v62 = vadd.f32 %v924_v19, %v664_v48  ;;  %v702_v0 = vmax.f32 %v686_v58, 0.0 }
 0x13d   : > { %v695_v45 = vmax.f32 %v679_v33, 0.0  ;;  %v705_v7 = vmax.f32 %v689_v2, 0.0 }
 0x13e   : > { %v979_v59 = vpack.c.bf16 %v697_v50, %v696_v46  ;;  %v703_v4 = vmax.f32 %v687_v62, 0.0 }
 0x13f   : > { %v974_v55 = vpack.c.bf16 %v695_v45, %v694_v40  ;;  %v999_v9 = vpack.c.bf16 %v705_v7, %v704_v6 }
 0x140   : > { %1003 = vst [vmem:[%s1325_s3 + $0x18] sm:$0xff] %v979_v59   ;;  %v994_v8 = vpack.c.bf16 %v703_v4, %v702_v0 }
 0x141   : > { %1002 = vst [vmem:[%s1325_s3 + $0x10] sm:$0xff] %v974_v55   ;;  %1007 = vst [vmem:[%s1325_s3 + $0x38] sm:$0xff] %v999_v9  }
 0x142   : > { %1006 = vst [vmem:[%s1325_s3 + $0x30] sm:$0xff] %v994_v8  }
 0x143 PF: > { %s13_s16 = sadd.s32 1, %s1167_s16   ;;  %s1326_s12 = smov %s1155_s13 }
 0x144   : > { %p10_p12 = scmp.ge.s32.totalorder %s13_s16, 7   ;;  %s1327_s13 = smov %s1225_s20 }
 0x145   : > { %s1328_s14 = smov %s1163_s15  ;;  %s1329_s15 = smov %s1331_s17 }
 0x146   :  { %12 = sbr.rel (!%p10_p12) target bundleno = 3 (0x3), region = 122 }

// kernel: _lambda_.23
= control target key start
LH: loop header
LB: loop body
LE: loop exit
PB: predicated region body
PF: predicated region fallthrough
CT: control target
= control target key end

     0   :  { %s1361_s15 = smov 0   ;;  %s1363_s16 = smov 0   ;;  %s1535_s0 = inlined_call_operand.vmem [shape: bf16[128,640], index: 0, kind: input, shape index: {}]   ;;  %s1536_s1 = inlined_call_operand.vmem [shape: bf16[640,128], index: 1, kind: input, shape index: {}]   ;;  %s1537_s2 = inlined_call_operand.vmem [shape: f32[1,128], index: 2, kind: input, shape index: {}]   ;;  %s1538_s3 = inlined_call_operand.vmem [shape: bf16[128,128], index: 3, kind: input, shape index: {}]   ;;  %s1539_s4 = inlined_call_operand.vmem [shape: bf16[128,128], index: 4, kind: output, shape index: {}]  }
   0x1   :  { %s1365_s17 = smov 0   ;;  %s1367_s18 = smov 0  }
   0x2   :  { %s1369_s19 = smov 0  }
   0x3 LB: > { %s26_s20 = sadd.s32 1, %s1329_s18  ;;  %p49_p1 = scmp.ne.s32.totalorder %s1321_s16, %s1317_s15  ;;  %s1333_s19 = sphi %s1369_s19, %s14_s19   ;;  %s1329_s18 = sphi %s1367_s18, %s1543_s18   ;;  %s1325_s17 = sphi %s1365_s17, %s1542_s17   ;;  %s1321_s16 = sphi %s1363_s16, %s1541_s16   ;;  %s1317_s15 = sphi %s1361_s15, %s1540_s15  }
   0x4   : > { %p27_p0 = scmp.ge.s32.totalorder %s26_s20, 5  ;;  %p50_p2 = scmp.eq.s32.totalorder %s1333_s19, 0 }
   0x5   : > { %s42_s22 = sadd.s32 1, %s1321_s16  ;;  %p1026_p5 = scmp.ge.s32.totalorder %s1333_s19, 5 }
   0x6   : > { %s1545_s20 = smov (%p27_p0, %s26_s20), 0  ;;  %p51_p3 = por %p50_p2, %p49_p1 }
   0x7   : > { %s38_s21 = ssub.s32 %s1329_s18, %s1545_s20  ;;  %203 = sbr.rel (%p1026_p5) target bundleno = 28 (0x1c), region = 24 }
   0x8   : > { %p40_p4 = scmp.eq.s32.totalorder %s38_s21, 0 }
   0xa   : > { %s1396_s23 = scalar_select %p40_p4, %s1321_s16, %s42_s22  }
   0xe   : > { %206 = sbr.rel (!%p51_p3) target bundleno = 28 (0x1c), region = 28  ;;  %s208_s24 = sand.u32 (%p51_p3), 1, %s1321_s16  }
   0xf   : > { %s1028_s25 = sshll.u32 (%p51_p3), %s1329_s18, 2  ;;  %s1027_s26 = sshll.u32 (%p51_p3), %s208_s24, 6 }
  0x10   : > { %s1404_s29 = scalar_lea.vmem (%p51_p3), %s1535_s0, %s1028_s25  ;;  %s210_s30 = scalar_lea.vmem (%p51_p3), [#allocation3], %s1027_s26 }
  0x11   : > { %v231_v0 = vld [vmem:[%s1404_s29] sm:$0xf] (%p51_p3)  ;;  %v233_v1 = vld [vmem:[%s1404_s29 + $0x14] sm:$0xf] (%p51_p3)  ;;  %v235_v2 = vld [vmem:[%s1404_s29 + $0x28] sm:$0xf] (%p51_p3) }
  0x12   : > { %232 = vst [vmem:[%s210_s30] sm:$0xf] (%p51_p3), %v231_v0  ;;  %234 = vst [vmem:[%s210_s30 + $0x4] sm:$0xf] (%p51_p3), %v233_v1  ;;  %v237_v3 = vld [vmem:[%s1404_s29 + $0x3c] sm:$0xf] (%p51_p3) }
  0x13   : > { %v239_v4 = vld [vmem:[%s1404_s29 + $0x50] sm:$0xf] (%p51_p3)  ;;  %236 = vst [vmem:[%s210_s30 + $0x8] sm:$0xf] (%p51_p3), %v235_v2  ;;  %238 = vst [vmem:[%s210_s30 + $0xc] sm:$0xf] (%p51_p3), %v237_v3 }
  0x14   : > { %240 = vst [vmem:[%s210_s30 + $0x10] sm:$0xf] (%p51_p3), %v239_v4  ;;  %v241_v5 = vld [vmem:[%s1404_s29 + $0x64] sm:$0xf] (%p51_p3)  ;;  %v243_v6 = vld [vmem:[%s1404_s29 + $0x78] sm:$0xf] (%p51_p3) }
  0x15   : > { %v245_v7 = vld [vmem:[%s1404_s29 + $0x8c] sm:$0xf]  ;;  %242 = vst [vmem:[%s210_s30 + $0x14] sm:$0xf] %v241_v5  ;;  %244 = vst [vmem:[%s210_s30 + $0x18] sm:$0xf] %v243_v6 }
  0x16   : > { %246 = vst [vmem:[%s210_s30 + $0x1c] sm:$0xf] %v245_v7  ;;  %v247_v8 = vld [vmem:[%s1404_s29 + $0xa0] sm:$0xf]  ;;  %v249_v9 = vld [vmem:[%s1404_s29 + $0xb4] sm:$0xf] }
  0x17   : > { %v251_v10 = vld [vmem:[%s1404_s29 + $0xc8] sm:$0xf]  ;;  %248 = vst [vmem:[%s210_s30 + $0x20] sm:$0xf] %v247_v8  ;;  %250 = vst [vmem:[%s210_s30 + $0x24] sm:$0xf] %v249_v9 }
  0x18   : > { %252 = vst [vmem:[%s210_s30 + $0x28] sm:$0xf] %v251_v10  ;;  %v253_v11 = vld [vmem:[%s1404_s29 + $0xdc] sm:$0xf]  ;;  %v255_v12 = vld [vmem:[%s1404_s29 + $0xf0] sm:$0xf] }
  0x19   : > { %v257_v13 = vld [vmem:[%s1404_s29 + $0x104] sm:$0xf]  ;;  %254 = vst [vmem:[%s210_s30 + $0x2c] sm:$0xf] %v253_v11  ;;  %256 = vst [vmem:[%s210_s30 + $0x30] sm:$0xf] %v255_v12 }
  0x1a   : > { %258 = vst [vmem:[%s210_s30 + $0x34] sm:$0xf] %v257_v13  ;;  %v259_v14 = vld [vmem:[%s1404_s29 + $0x118] sm:$0xf]  ;;  %v261_v15 = vld [vmem:[%s1404_s29 + $0x12c] sm:$0xf] }
  0x1b   : > { %260 = vst [vmem:[%s210_s30 + $0x38] sm:$0xf] %v259_v14  ;;  %262 = vst [vmem:[%s210_s30 + $0x3c] sm:$0xf] %v261_v15 }
  0x1c PF: > { %p1029_p6 = scmp.ge.s32.totalorder %s1333_s19, 1  ;;  %p328_p7 = scmp.lt.s32.totalorder %s1333_s19, 6 }
  0x1e   : > { %p329_p8 = pnand %p1029_p6, %p328_p7 }
  0x1f   : > { %s335_s5 = sand.u32 (!%p329_p8), 1, %s1317_s15   ;;  %s1031_s6 = sshll.u32 (!%p329_p8), %s1325_s17, 4 }
  0x20   : > { %332 = sbr.rel (%p329_p8) target bundleno = 328 (0x148), region = 73  ;;  %s1030_s7 = sshll.u32 (!%p329_p8), %s335_s5, 6 }
  0x21   : > { %p384_p9 = scmp.lt.s32.totalorder (!%p329_p8), %s1031_s6, 79  ;;  %s1431_s12 = scalar_lea.vmem (!%p329_p8), [#allocation3], %s1030_s7 }
  0x22   : > { %p1033_p10 = scmp.ne.s32.totalorder (!%p329_p8), %s1325_s17, 0 }
  0x27   : > { %s1547_s6 = smov (!%p384_p9, %s1031_s6), 79  ;;  %417 = sbr.rel (%p1033_p10) target bundleno = 49 (0x31), region = 81 }
  0x28   : > { %s1032_s8 = sshll.u32 %s1547_s6, 2  ;;  %v1335_v16 = vmov (!%p1033_p10), 0.0  }
  0x29   : > { %s1429_s11 = scalar_lea.vmem %s1536_s1, %s1032_s8  ;;  %418 = vst [vmem:[#allocation2] sm:$0xff] (!%p1033_p10), %v1335_v16  ;;  %419 = vst [vmem:[#allocation2 + $0x8] sm:$0xff] (!%p1033_p10), %v1335_v16 }
  0x2a   : > { %420 = vst [vmem:[#allocation2 + $0x10] sm:$0xff] (!%p1033_p10), %v1335_v16  ;;  %421 = vst [vmem:[#allocation2 + $0x18] sm:$0xff] (!%p1033_p10), %v1335_v16 }
  0x2b   : > { %422 = vst [vmem:[#allocation2 + $0x20] sm:$0xff] (!%p1033_p10), %v1335_v16  ;;  %423 = vst [vmem:[#allocation2 + $0x28] sm:$0xff] (!%p1033_p10), %v1335_v16 }
  0x2c   : > { %424 = vst [vmem:[#allocation2 + $0x30] sm:$0xff] (!%p1033_p10), %v1335_v16  ;;  %425 = vst [vmem:[#allocation2 + $0x38] sm:$0xff] (!%p1033_p10), %v1335_v16 }
  0x2d   : > { %426 = vst [vmem:[#allocation2 + $0x40] sm:$0xff] (!%p1033_p10), %v1335_v16  ;;  %427 = vst [vmem:[#allocation2 + $0x48] sm:$0xff] (!%p1033_p10), %v1335_v16 }
  0x2e   : > { %428 = vst [vmem:[#allocation2 + $0x50] sm:$0xff] %v1335_v16  ;;  %429 = vst [vmem:[#allocation2 + $0x58] sm:$0xff] %v1335_v16 }
  0x2f   : > { %430 = vst [vmem:[#allocation2 + $0x60] sm:$0xff] %v1335_v16  ;;  %431 = vst [vmem:[#allocation2 + $0x68] sm:$0xff] %v1335_v16 }
  0x30   : > { %432 = vst [vmem:[#allocation2 + $0x70] sm:$0xff] %v1335_v16  ;;  %433 = vst [vmem:[#allocation2 + $0x78] sm:$0xff] %v1335_v16 }
  0x31 PF: > { %v1279_v17 = vld [vmem:[%s1429_s11] sm:$0xff]   ;;  %v1280_v18 = vld [vmem:[%s1429_s11 + $0x8] sm:$0xff]   ;;  %v1281_v19 = vld [vmem:[%s1429_s11 + $0x10] sm:$0xff]   ;;  %p1050_p11 = scmp.ne.s32.totalorder %s1325_s17, 4 }
  0x32   : > { %1190 = vmatprep.subr.bf16.mxu0 %v1279_v17  ;;  %1222 = vmatprep.subr.bf16.mxu1 %v1279_v17  ;;  %v1282_v20 = vld [vmem:[%s1429_s11 + $0x18] sm:$0xff]   ;;  %v1287_v21 = vld [vmem:[%s1431_s12] sm:$0xff]   ;;  %v1284_v24 = vld [vmem:[%s1429_s11 + $0x28] sm:$0xff]  }
  0x33   : > { %1191 = vmatpush3.bf16.msra.mxu0 %v1279_v17  ;;  %1230 = vmatpush3.bf16.msra.mxu1 %v1279_v17  ;;  %v1288_v22 = vld [vmem:[%s1431_s12 + $0x20] sm:$0xff]   ;;  %v1285_v25 = vld [vmem:[%s1429_s11 + $0x30] sm:$0xff]   ;;  %v1286_v26 = vld [vmem:[%s1429_s11 + $0x38] sm:$0xff]  }
  0x34   : > { %1192 = vmatprep.subr.bf16.mxu0 %v1280_v18  ;;  %1223 = vmatprep.subr.bf16.mxu1 %v1280_v18  ;;  %v1283_v23 = vld [vmem:[%s1429_s11 + $0x20] sm:$0xff]   ;;  %v1289_v27 = vld [vmem:[%s1431_s12 + $0x8] sm:$0xff]   ;;  %v1291_v29 = vld [vmem:[%s1431_s12 + $0x10] sm:$0xff]  }
  0x35   : > { %1206 = vmatprep.mubr.bf16.mxu0 %v1287_v21  ;;  %1214 = vmatprep.mubr.bf16.mxu1 %v1288_v22  ;;  %v1290_v28 = vld [vmem:[%s1431_s12 + $0x28] sm:$0xff]   ;;  %v1292_v30 = vld [vmem:[%s1431_s12 + $0x30] sm:$0xff]   ;;  %v1293_v31 = vld [vmem:[%s1431_s12 + $0x18] sm:$0xff]  }
  0x36   : > { %v1294_v32 = vld [vmem:[%s1431_s12 + $0x38] sm:$0xff]   ;;  %v436_v33 = vld [vmem:[#allocation2 + $0x10] sm:$0xff]  ;;  %v434_v35 = vld [vmem:[#allocation2] sm:$0xff] }
  0x37   : > { %1193 = vmatpush3.bf16.msra.mxu0 %v1280_v18  ;;  %1231 = vmatpush3.bf16.msra.mxu1 %v1280_v18  ;;  %v444_v34 = vld [vmem:[#allocation2 + $0x50] sm:$0xff]  ;;  %v442_v36 = vld [vmem:[#allocation2 + $0x40] sm:$0xff]  ;;  %v437_v39 = vld [vmem:[#allocation2 + $0x18] sm:$0xff] }
  0x38   : > { %1194 = vmatprep.subr.bf16.mxu0 %v1281_v19  ;;  %1224 = vmatprep.subr.bf16.mxu1 %v1281_v19  ;;  %v445_v40 = vld [vmem:[#allocation2 + $0x58] sm:$0xff]  ;;  %v435_v45 = vld [vmem:[#allocation2 + $0x8] sm:$0xff]  ;;  %v440_v57 = vld [vmem:[#allocation2 + $0x30] sm:$0xff] }
  0x39   : > { %v443_v46 = vld [vmem:[#allocation2 + $0x48] sm:$0xff]  ;;  %v448_v58 = vld [vmem:[#allocation2 + $0x70] sm:$0xff]  ;;  %v438_v59 = vld [vmem:[#allocation2 + $0x20] sm:$0xff] }
  0x3a   : > { %v446_v60 = vld [vmem:[#allocation2 + $0x60] sm:$0xff]  ;;  %v441_v63 = vld [vmem:[#allocation2 + $0x38] sm:$0xff]  ;;  %v439_v5 = vld [vmem:[#allocation2 + $0x28] sm:$0xff] }
  0x3b   : > { %1195 = vmatpush3.bf16.msra.mxu0 %v1281_v19  ;;  %1232 = vmatpush3.bf16.msra.mxu1 %v1281_v19  ;;  %v449_v0 = vld [vmem:[#allocation2 + $0x78] sm:$0xff]  ;;  %v447_v6 = vld [vmem:[#allocation2 + $0x68] sm:$0xff]  ;;  %v1454_v19 = vld [vmem:[%s1537_s2] ss:$0 sm:$0xff] (!%p1050_p11) }
  0x3c   : > { %1196 = vmatprep.subr.bf16.mxu0 %v1282_v20  ;;  %1225 = vmatprep.subr.bf16.mxu1 %v1282_v20  ;;  %v1089_v22 = vld [vmem:[%s1538_s3] sm:$0xff] (!%p1050_p11)  }
  0x3f   : > { %1197 = vmatpush3.bf16.msra.mxu0 %v1282_v20  ;;  %1233 = vmatpush3.bf16.msra.mxu1 %v1282_v20 }
  0x40   : > { %1198 = vmatprep.subr.bf16.mxu0 %v1283_v23  ;;  %1226 = vmatprep.subr.bf16.mxu1 %v1283_v23 }
  0x43   : > { %1199 = vmatpush3.bf16.msra.mxu0 %v1283_v23  ;;  %1234 = vmatpush3.bf16.msra.mxu1 %v1283_v23 }
  0x44   : > { %1200 = vmatprep.subr.bf16.mxu0 %v1284_v24  ;;  %1227 = vmatprep.subr.bf16.mxu1 %v1284_v24 }
  0x47   : > { %1201 = vmatpush3.bf16.msra.mxu0 %v1284_v24  ;;  %1235 = vmatpush3.bf16.msra.mxu1 %v1284_v24 }
  0x48   : > { %1202 = vmatprep.subr.bf16.mxu0 %v1285_v25  ;;  %1228 = vmatprep.subr.bf16.mxu1 %v1285_v25 }
  0x4b   : > { %1203 = vmatpush3.bf16.msra.mxu0 %v1285_v25  ;;  %1236 = vmatpush3.bf16.msra.mxu1 %v1285_v25  ;;  %v1090_v25 = vunpack.c.l.bf16 (!%p1050_p11), %v1089_v22 }
  0x4c   : > { %1204 = vmatprep.subr.bf16.mxu0 %v1286_v26  ;;  %1229 = vmatprep.subr.bf16.mxu1 %v1286_v26 }
  0x4f   : > { %1205 = vmatpush3.bf16.msra.mxu0 %v1286_v26  ;;  %1237 = vmatpush3.bf16.msra.mxu1 %v1286_v26  ;;  %v1091_v26 = vunpack.c.h.bf16 (!%p1050_p11), %v1089_v22 }
  0x52   : > { %1207 = vmatmul.mubr.bf16.vlgmr.msra.gmra.mrb[0].mxu0 %v1289_v27  ;;  %1215 = vmatmul.mubr.bf16.vlgmr.msra.gmra.mrb[0].mxu1 %v1290_v28 }
  0x53   : > { %1210 = vmatprep.mubr.bf16.mxu0 %v1291_v29  ;;  %1218 = vmatprep.mubr.bf16.mxu1 %v1292_v30  ;;  %v1160_v29 = vld [vmem:[%s1538_s3 + $0x8] sm:$0xff] (!%p1050_p11)  }
  0x5a   : > { %1211 = vmatmul.mubr.bf16.gmra.mrb[4].mxu0 %v1293_v31  ;;  %1219 = vmatmul.mubr.bf16.gmra.mrb[4].mxu1 %v1294_v32  ;;  %v1094_v32 = vunpack.c.l.bf16 (!%p1050_p11), %v1160_v29 }
 0x125   : > { %v1208_v37 = vpop.f32.mrb[0].mxu0  ;;  %v1216_v38 = vpop.f32.mrb[0].mxu1 }
 0x126   : > { %v677_v41 = vadd.f32 %v1208_v37, %v436_v33  ;;  %v685_v42 = vadd.f32 %v1216_v38, %v444_v34  ;;  %v612_v43 = vpop.f32.mrb[1].mxu0  ;;  %v644_v44 = vpop.f32.mrb[1].mxu1  ;;  %v1095_v33 = vunpack.c.h.bf16 (!%p1050_p11), %v1160_v29 }
 0x127   : > { %v675_v47 = vadd.f32 %v612_v43, %v434_v35  ;;  %v683_v48 = vadd.f32 %v644_v44, %v442_v36  ;;  %v1209_v49 = vpop.f32.mrb[2].mxu0  ;;  %v1217_v50 = vpop.f32.mrb[2].mxu1  ;;  %v1161_v36 = vld [vmem:[%s1538_s3 + $0x10] sm:$0xff] (!%p1050_p11)   ;;  %v1162_v43 = vld [vmem:[%s1538_s3 + $0x18] sm:$0xff] (!%p1050_p11)  }
 0x128   : > { %693 = vst [vmem:[#allocation2 + $0x10] sm:$0xff] %v677_v41  ;;  %701 = vst [vmem:[#allocation2 + $0x50] sm:$0xff] %v685_v42  ;;  %v678_v51 = vadd.f32 %v1209_v49, %v437_v39  ;;  %v686_v52 = vadd.f32 %v1217_v50, %v445_v40  ;;  %v615_v53 = vpop.f32.mrb[3].mxu0  ;;  %v647_v54 = vpop.f32.mrb[3].mxu1  ;;  %v1098_v41 = vunpack.c.l.bf16 (!%p1050_p11), %v1161_v36  ;;  %v1099_v42 = vunpack.c.h.bf16 (!%p1050_p11), %v1161_v36 }
 0x129   : > { %691 = vst [vmem:[#allocation2] sm:$0xff] %v675_v47  ;;  %699 = vst [vmem:[#allocation2 + $0x40] sm:$0xff] %v683_v48  ;;  %v676_v55 = vadd.f32 %v615_v53, %v435_v45  ;;  %v684_v56 = vadd.f32 %v647_v54, %v443_v46 }
 0x12a   : > { %694 = vst [vmem:[#allocation2 + $0x18] sm:$0xff] %v678_v51  ;;  %702 = vst [vmem:[#allocation2 + $0x58] sm:$0xff] %v686_v52 }
 0x12b   : > { %692 = vst [vmem:[#allocation2 + $0x8] sm:$0xff] %v676_v55  ;;  %700 = vst [vmem:[#allocation2 + $0x48] sm:$0xff] %v684_v56  ;;  %v1102_v56 = vunpack.c.l.bf16 (!%p1050_p11), %v1162_v43 }
 0x12d   : > { %v1212_v61 = vpop.f32.mrb[4].mxu0  ;;  %v1220_v62 = vpop.f32.mrb[4].mxu1  ;;  %710 = sbr.rel (%p1050_p11) target bundleno = 328 (0x148), region = 85 }
 0x12e   : > { %v681_v1 = vadd.f32 %v1212_v61, %v440_v57  ;;  %v689_v2 = vadd.f32 %v1220_v62, %v448_v58  ;;  %v628_v3 = vpop.f32.mrb[5].mxu0  ;;  %v660_v4 = vpop.f32.mrb[5].mxu1  ;;  %v1103_v57 = vunpack.c.h.bf16 (!%p1050_p11), %v1162_v43  ;;  %v1163_v58 = vld [vmem:[%s1538_s3 + $0x20] sm:$0xff] (!%p1050_p11)  }
 0x12f   : > { %v679_v7 = vadd.f32 %v628_v3, %v438_v59  ;;  %v687_v8 = vadd.f32 %v660_v4, %v446_v60  ;;  %v1213_v9 = vpop.f32.mrb[6].mxu0  ;;  %v1221_v10 = vpop.f32.mrb[6].mxu1  ;;  %v713_v23 = vld [vmem:[#allocation2 + $0x10] sm:$0xff] (!%p1050_p11) }
 0x130   : > { %697 = vst [vmem:[#allocation2 + $0x30] sm:$0xff] %v681_v1  ;;  %705 = vst [vmem:[#allocation2 + $0x70] sm:$0xff] %v689_v2  ;;  %v682_v11 = vadd.f32 %v1213_v9, %v441_v63  ;;  %v690_v12 = vadd.f32 %v1221_v10, %v449_v0  ;;  %v631_v13 = vpop.f32.mrb[7].mxu0  ;;  %v663_v14 = vpop.f32.mrb[7].mxu1  ;;  %v711_v17 = vld [vmem:[#allocation2] sm:$0xff] (!%p1050_p11)  ;;  %v736_v27 = vadd.f32 (!%p1050_p11), %v1454_v19, %v713_v23  ;;  %v721_v59 = vld [vmem:[#allocation2 + $0x50] sm:$0xff] (!%p1050_p11)  ;;  %v1107_v9 = vunpack.c.h.bf16 (!%p1050_p11), %v1163_v58 }
 0x131   : > { %695 = vst [vmem:[#allocation2 + $0x20] sm:$0xff] %v679_v7  ;;  %703 = vst [vmem:[#allocation2 + $0x60] sm:$0xff] %v687_v8  ;;  %v680_v15 = vadd.f32 %v631_v13, %v439_v5  ;;  %v688_v16 = vadd.f32 %v663_v14, %v447_v6  ;;  %v734_v20 = vadd.f32 (!%p1050_p11), %v1454_v19, %v711_v17  ;;  %v714_v24 = vld [vmem:[#allocation2 + $0x18] sm:$0xff] (!%p1050_p11)  ;;  %v719_v48 = vld [vmem:[#allocation2 + $0x40] sm:$0xff] (!%p1050_p11)  ;;  %v1106_v8 = vunpack.c.l.bf16 (!%p1050_p11), %v1163_v58 }
 0x132   : > { %698 = vst [vmem:[#allocation2 + $0x38] sm:$0xff] %v682_v11  ;;  %706 = vst [vmem:[#allocation2 + $0x78] sm:$0xff] %v690_v12  ;;  %v712_v18 = vld [vmem:[#allocation2 + $0x8] sm:$0xff] (!%p1050_p11)  ;;  %v737_v28 = vadd.f32 (!%p1050_p11), %v1454_v19, %v714_v24  ;;  %v784_v44 = vadd.f32 (!%p1050_p11), %v1094_v32, %v736_v27  ;;  %v742_v63 = vadd.f32 (!%p1050_p11), %v1454_v19, %v719_v48  ;;  %v722_v0 = vld [vmem:[#allocation2 + $0x58] sm:$0xff] (!%p1050_p11) }
 0x133   : > { %696 = vst [vmem:[#allocation2 + $0x28] sm:$0xff] %v680_v15  ;;  %704 = vst [vmem:[#allocation2 + $0x68] sm:$0xff] %v688_v16  ;;  %v735_v21 = vadd.f32 (!%p1050_p11), %v1454_v19, %v712_v18  ;;  %v782_v39 = vadd.f32 (!%p1050_p11), %v1090_v25, %v734_v20  ;;  %v720_v53 = vld [vmem:[#allocation2 + $0x48] sm:$0xff] (!%p1050_p11)  ;;  %v744_v10 = vadd.f32 (!%p1050_p11), %v1454_v19, %v721_v59  ;;  %v1165_v12 = vld [vmem:[%s1538_s3 + $0x30] sm:$0xff] (!%p1050_p11)  }
 0x134   : > { %v785_v45 = vadd.f32 %v1095_v33, %v737_v28  ;;  %v800_v54 = vmax.f32 %v784_v44, 0.0  ;;  %v1164_v1 = vld [vmem:[%s1538_s3 + $0x28] sm:$0xff]   ;;  %v743_v5 = vadd.f32 %v1454_v19, %v720_v53  ;;  %v745_v15 = vadd.f32 %v1454_v19, %v722_v0  ;;  %v1166_v28 = vld [vmem:[%s1538_s3 + $0x38] sm:$0xff]  }
 0x135   : > { %v783_v40 = vadd.f32 %v1091_v26, %v735_v21  ;;  %v798_v49 = vmax.f32 %v782_v39, 0.0  ;;  %v1110_v16 = vunpack.c.l.bf16 %v1164_v1  ;;  %v790_v17 = vadd.f32 %v1106_v8, %v742_v63 }
 0x136   : > { %v801_v55 = vmax.f32 %v785_v45, 0.0  ;;  %v791_v18 = vadd.f32 %v1107_v9, %v743_v5  ;;  %v1111_v20 = vunpack.c.h.bf16 %v1164_v1  ;;  %v1114_v27 = vunpack.c.l.bf16 %v1165_v12 }
 0x137   : > { %v717_v37 = vld [vmem:[#allocation2 + $0x30] sm:$0xff]  ;;  %v799_v50 = vmax.f32 %v783_v40, 0.0  ;;  %v792_v25 = vadd.f32 %v1110_v16, %v744_v10  ;;  %v806_v29 = vmax.f32 %v790_v17, 0.0  ;;  %v1115_v32 = vunpack.c.h.bf16 %v1165_v12 }
 0x138   : > { %v715_v30 = vld [vmem:[#allocation2 + $0x20] sm:$0xff]  ;;  %v740_v46 = vadd.f32 %v1454_v19, %v717_v37  ;;  %v1128_v2 = vpack.c.bf16 %v801_v55, %v800_v54  ;;  %v725_v22 = vld [vmem:[#allocation2 + $0x70] sm:$0xff]  ;;  %v1118_v40 = vunpack.c.l.bf16 %v1166_v28 }
 0x139   : > { %v738_v34 = vadd.f32 %v1454_v19, %v715_v30  ;;  %v718_v38 = vld [vmem:[#allocation2 + $0x38] sm:$0xff]  ;;  %v1123_v60 = vpack.c.bf16 %v799_v50, %v798_v49  ;;  %v723_v6 = vld [vmem:[#allocation2 + $0x60] sm:$0xff]  ;;  %v807_v30 = vmax.f32 %v791_v18, 0.0  ;;  %v808_v33 = vmax.f32 %v792_v25, 0.0 }
 0x13a   : > { %v716_v31 = vld [vmem:[#allocation2 + $0x28] sm:$0xff]  ;;  %v741_v47 = vadd.f32 %v1454_v19, %v718_v38  ;;  %v788_v3 = vadd.f32 %v1102_v56, %v740_v46  ;;  %1167 = vst [vmem:[%s1539_s4 + $0x8] sm:$0xff] %v1128_v2   ;;  %v746_v21 = vadd.f32 %v1454_v19, %v723_v6  ;;  %v726_v23 = vld [vmem:[#allocation2 + $0x78] sm:$0xff] }
 0x13b   : > { %v739_v35 = vadd.f32 %v1454_v19, %v716_v31  ;;  %v786_v51 = vadd.f32 %v1098_v41, %v738_v34  ;;  %1124 = vst [vmem:[%s1539_s4] sm:$0xff] %v1123_v60   ;;  %v724_v11 = vld [vmem:[#allocation2 + $0x68] sm:$0xff]  ;;  %v793_v31 = vadd.f32 %v1111_v20, %v745_v15  ;;  %v749_v36 = vadd.f32 %v1454_v19, %v726_v23 }
 0x13c   : > { %v789_v4 = vadd.f32 %v1103_v57, %v741_v47  ;;  %v804_v13 = vmax.f32 %v788_v3, 0.0  ;;  %v747_v26 = vadd.f32 %v1454_v19, %v724_v11  ;;  %v794_v34 = vadd.f32 %v1114_v27, %v746_v21 }
 0x13d   : > { %v787_v52 = vadd.f32 %v1099_v42, %v739_v35  ;;  %v802_v61 = vmax.f32 %v786_v51, 0.0  ;;  %v748_v35 = vadd.f32 %v1454_v19, %v725_v22  ;;  %v1143_v37 = vpack.c.bf16 %v807_v30, %v806_v29 }
 0x13e   : > { %v805_v14 = vmax.f32 %v789_v4, 0.0  ;;  %v809_v38 = vmax.f32 %v793_v31, 0.0  ;;  %v795_v39 = vadd.f32 %v1115_v32, %v747_v26  ;;  %v810_v41 = vmax.f32 %v794_v34, 0.0 }
 0x13f   : > { %v803_v62 = vmax.f32 %v787_v52, 0.0  ;;  %v1119_v42 = vunpack.c.h.bf16 %v1166_v28  ;;  %1170 = vst [vmem:[%s1539_s4 + $0x20] sm:$0xff] %v1143_v37   ;;  %v796_v45 = vadd.f32 %v1118_v40, %v748_v35 }
 0x140   : > { %v1138_v24 = vpack.c.bf16 %v805_v14, %v804_v13  ;;  %v1148_v43 = vpack.c.bf16 %v809_v38, %v808_v33  ;;  %v811_v44 = vmax.f32 %v795_v39, 0.0 }
 0x141   : > { %v1133_v7 = vpack.c.bf16 %v803_v62, %v802_v61  ;;  %v797_v46 = vadd.f32 %v1119_v42, %v749_v36  ;;  %v812_v19 = vmax.f32 %v796_v45, 0.0 }
 0x142   : > { %1169 = vst [vmem:[%s1539_s4 + $0x18] sm:$0xff] %v1138_v24   ;;  %1171 = vst [vmem:[%s1539_s4 + $0x28] sm:$0xff] %v1148_v43   ;;  %v1153_v47 = vpack.c.bf16 %v811_v44, %v810_v41 }
 0x143   : > { %1168 = vst [vmem:[%s1539_s4 + $0x10] sm:$0xff] %v1133_v7   ;;  %v813_v48 = vmax.f32 %v797_v46, 0.0 }
 0x144   : > { %1172 = vst [vmem:[%s1539_s4 + $0x30] sm:$0xff] %v1153_v47  }
 0x145   : > { %v1158_v49 = vpack.c.bf16 %v813_v48, %v812_v19 }
 0x147   : > { %1173 = vst [vmem:[%s1539_s4 + $0x38] sm:$0xff] %v1158_v49  }
 0x148 PF: > { %s14_s19 = sadd.s32 1, %s1333_s19   ;;  %s1540_s15 = smov %s1321_s16 }
 0x149   : > { %p11_p12 = scmp.ge.s32.totalorder %s14_s19, 7   ;;  %s1541_s16 = smov %s1396_s23 }
 0x14a   : > { %s1542_s17 = smov %s1329_s18  ;;  %s1543_s18 = smov %s1545_s20 }
 0x14b   :  { %13 = sbr.rel (!%p11_p12) target bundleno = 3 (0x3), region = 129 }

// kernel: _lambda_.26
= control target key start
LH: loop header
LB: loop body
LE: loop exit
PB: predicated region body
PF: predicated region fallthrough
CT: control target
= control target key end

     0   :  { %s796_s12 = smov 0   ;;  %s798_s13 = smov 0   ;;  %s889_s0 = inlined_call_operand.vmem [shape: bf16[32,640], index: 0, kind: input, shape index: {}]   ;;  %s890_s1 = inlined_call_operand.vmem [shape: bf16[640,128], index: 1, kind: input, shape index: {}]   ;;  %s891_s2 = inlined_call_operand.vmem [shape: f32[1,128], index: 2, kind: input, shape index: {}]   ;;  %s892_s3 = inlined_call_operand.vmem [shape: bf16[32,128], index: 3, kind: output, shape index: {}]  }
   0x1   :  { %s800_s14 = smov 0   ;;  %s802_s15 = smov 0  }
   0x2   :  { %s804_s16 = smov 0  }
   0x3 LB: > { %s25_s17 = sadd.s32 1, %s769_s15  ;;  %p48_p1 = scmp.ne.s32.totalorder %s761_s13, %s757_s12  ;;  %s773_s16 = sphi %s804_s16, %s13_s16   ;;  %s769_s15 = sphi %s802_s15, %s896_s15   ;;  %s765_s14 = sphi %s800_s14, %s895_s14   ;;  %s761_s13 = sphi %s798_s13, %s894_s13   ;;  %s757_s12 = sphi %s796_s12, %s893_s12  }
   0x4   : > { %p26_p0 = scmp.ge.s32.totalorder %s25_s17, 5  ;;  %p49_p2 = scmp.eq.s32.totalorder %s773_s16, 0 }
   0x5   : > { %s41_s19 = sadd.s32 1, %s761_s13  ;;  %p611_p5 = scmp.ge.s32.totalorder %s773_s16, 5 }
   0x6   : > { %s898_s17 = smov (%p26_p0, %s25_s17), 0  ;;  %p50_p3 = por %p49_p2, %p48_p1 }
   0x7   : > { %s37_s18 = ssub.s32 %s769_s15, %s898_s17  ;;  %162 = sbr.rel (%p611_p5) target bundleno = 21 (0x15), region = 20 }
   0x8   : > { %p39_p4 = scmp.eq.s32.totalorder %s37_s18, 0 }
   0xa   : > { %s831_s20 = scalar_select %p39_p4, %s761_s13, %s41_s19  }
   0xe   : > { %165 = sbr.rel (!%p50_p3) target bundleno = 21 (0x15), region = 24  ;;  %s167_s21 = sand.u32 (%p50_p3), 1, %s761_s13  }
   0xf   : > { %s613_s22 = sshll.u32 (%p50_p3), %s769_s15, 2  ;;  %s612_s23 = sshll.u32 (%p50_p3), %s167_s21, 4 }
  0x10   : > { %s174_s26 = scalar_lea.vmem (%p50_p3), %s889_s0, %s613_s22  ;;  %s169_s27 = scalar_lea.vmem (%p50_p3), [#allocation3], %s612_s23 }
  0x11   : > { %v190_v0 = vld [vmem:[%s174_s26] sm:$0xf] (%p50_p3)  ;;  %v192_v1 = vld [vmem:[%s174_s26 + $0x14] sm:$0xf] (%p50_p3)  ;;  %v194_v2 = vld [vmem:[%s174_s26 + $0x28] sm:$0xf] (%p50_p3) }
  0x12   : > { %191 = vst [vmem:[%s169_s27] sm:$0xf] (%p50_p3), %v190_v0  ;;  %193 = vst [vmem:[%s169_s27 + $0x4] sm:$0xf] (%p50_p3), %v192_v1  ;;  %v196_v3 = vld [vmem:[%s174_s26 + $0x3c] sm:$0xf] (%p50_p3) }
  0x13   : > { %195 = vst [vmem:[%s169_s27 + $0x8] sm:$0xf] (%p50_p3), %v194_v2  ;;  %197 = vst [vmem:[%s169_s27 + $0xc] sm:$0xf] (%p50_p3), %v196_v3 }
  0x15 PF: > { %p614_p6 = scmp.ge.s32.totalorder %s773_s16, 1  ;;  %p239_p7 = scmp.lt.s32.totalorder %s773_s16, 6 }
  0x17   : > { %p240_p8 = pnand %p614_p6, %p239_p7 }
  0x18   : > { %s246_s28 = sand.u32 (!%p240_p8), 1, %s757_s12   ;;  %s616_s29 = sshll.u32 (!%p240_p8), %s765_s14, 4 }
  0x19   : > { %243 = sbr.rel (%p240_p8) target bundleno = 304 (0x130), region = 69  ;;  %s843_s30 = sshll.u32 (!%p240_p8), %s246_s28, 4 }
  0x1a   : > { %p285_p9 = scmp.lt.s32.totalorder (!%p240_p8), %s616_s29, 79  ;;  %s248_s8 = scalar_lea.vmem (!%p240_p8), [#allocation3], %s843_s30 }
  0x1b   : > { %p618_p10 = scmp.ne.s32.totalorder (!%p240_p8), %s765_s14, 0 }
  0x20   : > { %s900_s29 = smov (!%p285_p9, %s616_s29), 79  ;;  %309 = sbr.rel (%p618_p10) target bundleno = 39 (0x27), region = 77 }
  0x21   : > { %s617_s4 = sshll.u32 %s900_s29, 2  ;;  %v775_v4 = vmov (!%p618_p10), 0.0  }
  0x22   : > { %s848_s7 = scalar_lea.vmem %s890_s1, %s617_s4  ;;  %310 = vst [vmem:[#allocation2] sm:$0xff] (!%p618_p10), %v775_v4  ;;  %311 = vst [vmem:[#allocation2 + $0x8] sm:$0xff] (!%p618_p10), %v775_v4 }
  0x23   : > { %312 = vst [vmem:[#allocation2 + $0x10] sm:$0xff] (!%p618_p10), %v775_v4  ;;  %313 = vst [vmem:[#allocation2 + $0x18] sm:$0xff] (!%p618_p10), %v775_v4 }
  0x27 PF: > { %v725_v5 = vld [vmem:[%s848_s7] sm:$0xff]   ;;  %v726_v6 = vld [vmem:[%s848_s7 + $0x8] sm:$0xff]   ;;  %v727_v7 = vld [vmem:[%s848_s7 + $0x10] sm:$0xff]   ;;  %p629_p11 = scmp.ne.s32.totalorder %s765_s14, 4 }
  0x28   : > { %664 = vmatprep.subr.bf16.mxu0 %v725_v5  ;;  %v728_v8 = vld [vmem:[%s848_s7 + $0x18] sm:$0xff]   ;;  %v733_v9 = vld [vmem:[%s248_s8] sm:$0xff]   ;;  %v730_v11 = vld [vmem:[%s848_s7 + $0x28] sm:$0xff]  }
  0x29   : > { %665 = vmatpush3.bf16.msra.mxu0 %v725_v5  ;;  %680 = vmatprep.mubr.bf16.mxu0 %v733_v9  ;;  %v729_v10 = vld [vmem:[%s848_s7 + $0x20] sm:$0xff]   ;;  %v731_v12 = vld [vmem:[%s848_s7 + $0x30] sm:$0xff]   ;;  %v732_v13 = vld [vmem:[%s848_s7 + $0x38] sm:$0xff]  }
  0x2a   : > { %666 = vmatprep.subr.bf16.mxu0 %v726_v6  ;;  %v734_v14 = vld [vmem:[%s248_s8 + $0x8] sm:$0xff]   ;;  %v316_v15 = vld [vmem:[#allocation2 + $0x10] sm:$0xff]  ;;  %v314_v16 = vld [vmem:[#allocation2] sm:$0xff] }
  0x2b   : > { %v317_v18 = vld [vmem:[#allocation2 + $0x18] sm:$0xff]  ;;  %v315_v21 = vld [vmem:[#allocation2 + $0x8] sm:$0xff]  ;;  %v630_v29 = vld [vmem:[%s891_s2] ss:$0 sm:$0xff] (!%p629_p11) }
  0x2d   : > { %667 = vmatpush3.bf16.msra.mxu0 %v726_v6 }
  0x2e   : > { %668 = vmatprep.subr.bf16.mxu0 %v727_v7 }
  0x31   : > { %669 = vmatpush3.bf16.msra.mxu0 %v727_v7 }
  0x32   : > { %670 = vmatprep.subr.bf16.mxu0 %v728_v8 }
  0x35   : > { %671 = vmatpush3.bf16.msra.mxu0 %v728_v8 }
  0x36   : > { %672 = vmatprep.subr.bf16.mxu0 %v729_v10 }
  0x39   : > { %673 = vmatpush3.bf16.msra.mxu0 %v729_v10 }
  0x3a   : > { %674 = vmatprep.subr.bf16.mxu0 %v730_v11 }
  0x3d   : > { %675 = vmatpush3.bf16.msra.mxu0 %v730_v11 }
  0x3e   : > { %676 = vmatprep.subr.bf16.mxu0 %v731_v12 }
  0x41   : > { %677 = vmatpush3.bf16.msra.mxu0 %v731_v12 }
  0x42   : > { %678 = vmatprep.subr.bf16.mxu0 %v732_v13 }
  0x45   : > { %679 = vmatpush3.bf16.msra.mxu0 %v732_v13 }
  0x48   : > { %681 = vmatmul.mubr.bf16.vlgmr.msra.gmra.mrb[0].mxu0 %v734_v14 }
 0x11b   : > { %v682_v17 = vpop.f32.mrb[0].mxu0  ;;  %458 = sbr.rel (%p629_p11) target bundleno = 304 (0x130), region = 81 }
 0x11c   : > { %v449_v19 = vadd.f32 %v682_v17, %v316_v15  ;;  %v432_v20 = vpop.f32.mrb[1].mxu0 }
 0x11d   : > { %v447_v22 = vadd.f32 %v432_v20, %v314_v16  ;;  %v683_v23 = vpop.f32.mrb[2].mxu0 }
 0x11e   : > { %453 = vst [vmem:[#allocation2 + $0x10] sm:$0xff] %v449_v19  ;;  %v450_v24 = vadd.f32 %v683_v23, %v317_v18  ;;  %v435_v25 = vpop.f32.mrb[3].mxu0 }
 0x11f   : > { %451 = vst [vmem:[#allocation2] sm:$0xff] %v447_v22  ;;  %v448_v26 = vadd.f32 %v435_v25, %v315_v21 }
 0x120   : > { %454 = vst [vmem:[#allocation2 + $0x18] sm:$0xff] %v450_v24 }
 0x121   : > { %452 = vst [vmem:[#allocation2 + $0x8] sm:$0xff] %v448_v26 }
 0x125   : > { %v461_v32 = vld [vmem:[#allocation2 + $0x10] sm:$0xff] }
 0x126   : > { %v459_v27 = vld [vmem:[#allocation2] sm:$0xff]  ;;  %v472_v34 = vadd.f32 %v630_v29, %v461_v32 }
 0x127   : > { %v470_v30 = vadd.f32 %v630_v29, %v459_v27  ;;  %v462_v33 = vld [vmem:[#allocation2 + $0x18] sm:$0xff] }
 0x128   : > { %v460_v28 = vld [vmem:[#allocation2 + $0x8] sm:$0xff]  ;;  %v473_v35 = vadd.f32 %v630_v29, %v462_v33  ;;  %v476_v38 = vmax.f32 %v472_v34, 0.0 }
 0x129   : > { %v471_v31 = vadd.f32 %v630_v29, %v460_v28  ;;  %v474_v36 = vmax.f32 %v470_v30, 0.0 }
 0x12a   : > { %v477_v39 = vmax.f32 %v473_v35, 0.0 }
 0x12b   : > { %v475_v37 = vmax.f32 %v471_v31, 0.0 }
 0x12c   : > { %v651_v41 = vpack.c.bf16 %v477_v39, %v476_v38 }
 0x12d   : > { %v646_v40 = vpack.c.bf16 %v475_v37, %v474_v36 }
 0x12e   : > { %653 = vst [vmem:[%s892_s3 + $0x8] sm:$0xff] %v651_v41  }
 0x12f   : > { %647 = vst [vmem:[%s892_s3] sm:$0xff] %v646_v40  }
 0x130 PF: > { %s13_s16 = sadd.s32 1, %s773_s16   ;;  %s893_s12 = smov %s761_s13 }
 0x131   : > { %p10_p12 = scmp.ge.s32.totalorder %s13_s16, 7   ;;  %s894_s13 = smov %s831_s20 }
 0x132   : > { %s895_s14 = smov %s769_s15  ;;  %s896_s15 = smov %s898_s17 }
 0x133   :  { %12 = sbr.rel (!%p10_p12) target bundleno = 3 (0x3), region = 122 }

// kernel: _lambda_.27
= control target key start
LH: loop header
LB: loop body
LE: loop exit
PB: predicated region body
PF: predicated region fallthrough
CT: control target
= control target key end

     0   :  { %s335_s1 = inlined_call_operand.vmem [shape: bf16[128,128], index: 1, kind: input, shape index: {}]   ;;  %s336_s0 = inlined_call_operand.vmem [shape: bf16[32,128], index: 0, kind: input, shape index: {}]   ;;  %s337_s2 = inlined_call_operand.vmem [shape: f32[1,128], index: 2, kind: input, shape index: {}]   ;;  %s338_s3 = inlined_call_operand.vmem [shape: bf16[32,128], index: 3, kind: output, shape index: {}]  }
   0x1   :  { %v266_v0 = vld [vmem:[%s335_s1] sm:$0xff]   ;;  %v267_v1 = vld [vmem:[%s335_s1 + $0x8] sm:$0xff]   ;;  %v268_v2 = vld [vmem:[%s335_s1 + $0x10] sm:$0xff]  }
   0x2   :  { %246 = vmatprep.subr.bf16.mxu0 %v266_v0  ;;  %v269_v3 = vld [vmem:[%s335_s1 + $0x18] sm:$0xff]   ;;  %v274_v4 = vld [vmem:[%s336_s0] sm:$0xff]   ;;  %v271_v6 = vld [vmem:[%s335_s1 + $0x28] sm:$0xff]  }
   0x3   :  { %247 = vmatpush3.bf16.msra.mxu0 %v266_v0  ;;  %262 = vmatprep.mubr.bf16.mxu0 %v274_v4  ;;  %v270_v5 = vld [vmem:[%s335_s1 + $0x20] sm:$0xff]   ;;  %v272_v7 = vld [vmem:[%s335_s1 + $0x30] sm:$0xff]   ;;  %v273_v8 = vld [vmem:[%s335_s1 + $0x38] sm:$0xff]  }
   0x4   :  { %248 = vmatprep.subr.bf16.mxu0 %v267_v1  ;;  %v275_v9 = vld [vmem:[%s336_s0 + $0x8] sm:$0xff]   ;;  %v216_v11 = vld [vmem:[%s337_s2] ss:$0 sm:$0xff] }
   0x7   :  { %249 = vmatpush3.bf16.msra.mxu0 %v267_v1 }
   0x8   :  { %250 = vmatprep.subr.bf16.mxu0 %v268_v2 }
   0xb   :  { %251 = vmatpush3.bf16.msra.mxu0 %v268_v2 }
   0xc   :  { %252 = vmatprep.subr.bf16.mxu0 %v269_v3 }
   0xf   :  { %253 = vmatpush3.bf16.msra.mxu0 %v269_v3 }
  0x10   :  { %254 = vmatprep.subr.bf16.mxu0 %v270_v5 }
  0x13   :  { %255 = vmatpush3.bf16.msra.mxu0 %v270_v5 }
  0x14   :  { %256 = vmatprep.subr.bf16.mxu0 %v271_v6 }
  0x17   :  { %257 = vmatpush3.bf16.msra.mxu0 %v271_v6 }
  0x18   :  { %258 = vmatprep.subr.bf16.mxu0 %v272_v7 }
  0x1b   :  { %259 = vmatpush3.bf16.msra.mxu0 %v272_v7 }
  0x1c   :  { %260 = vmatprep.subr.bf16.mxu0 %v273_v8 }
  0x1f   :  { %261 = vmatpush3.bf16.msra.mxu0 %v273_v8 }
  0x22   :  { %263 = vmatmul.mubr.bf16.vlgmr.msra.gmra.mrb[0].mxu0 %v275_v9 }
  0xf5   :  { %v264_v10 = vpop.f32.mrb[0].mxu0 }
  0xf6   :  { %v141_v12 = vpop.f32.mrb[1].mxu0  ;;  %v180_v14 = vadd.f32 %v264_v10, %v216_v11 }
  0xf7   :  { %v265_v13 = vpop.f32.mrb[2].mxu0  ;;  %v178_v17 = vadd.f32 %v216_v11, %v141_v12 }
  0xf8   :  { %v181_v15 = vadd.f32 %v265_v13, %v216_v11  ;;  %v144_v16 = vpop.f32.mrb[3].mxu0 }
  0xf9   :  { %v179_v18 = vadd.f32 %v216_v11, %v144_v16 }
  0xfa   :  { %v233_v19 = vpack.c.bf16 %v181_v15, %v180_v14 }
  0xfb   :  { %v228_v20 = vpack.c.bf16 %v179_v18, %v178_v17 }
  0xfc   :  { %235 = vst [vmem:[%s338_s3 + $0x8] sm:$0xff] %v233_v19  }
  0xfd   :  { %229 = vst [vmem:[%s338_s3] sm:$0xff] %v228_v20  }

// kernel: _lambda_.28
= control target key start
LH: loop header
LB: loop body
LE: loop exit
PB: predicated region body
PF: predicated region fallthrough
CT: control target
= control target key end

     0   :  { %s1176_s15 = smov 0   ;;  %s1178_s16 = smov 0   ;;  %s1292_s0 = inlined_call_operand.vmem [shape: bf16[32,1152], index: 0, kind: input, shape index: {}]   ;;  %s1293_s1 = inlined_call_operand.vmem [shape: bf16[1152,128], index: 1, kind: input, shape index: {}]   ;;  %s1294_s2 = inlined_call_operand.vmem [shape: f32[1,128], index: 2, kind: input, shape index: {}]   ;;  %s1295_s3 = inlined_call_operand.vmem [shape: bf16[32,128], index: 3, kind: input, shape index: {}]   ;;  %s1296_s4 = inlined_call_operand.vmem [shape: bf16[32,128], index: 4, kind: output, shape index: {}]  }
   0x1   :  { %s1180_s17 = smov 0   ;;  %s1182_s18 = smov 0  }
   0x2   :  { %s1184_s19 = smov 0  }
   0x3 LB: > { %s26_s20 = sadd.s32 1, %s1144_s18  ;;  %p49_p1 = scmp.ne.s32.totalorder %s1136_s16, %s1132_s15  ;;  %s1148_s19 = sphi %s1184_s19, %s14_s19   ;;  %s1144_s18 = sphi %s1182_s18, %s1300_s18   ;;  %s1140_s17 = sphi %s1180_s17, %s1299_s17   ;;  %s1136_s16 = sphi %s1178_s16, %s1298_s16   ;;  %s1132_s15 = sphi %s1176_s15, %s1297_s15  }
   0x4   : > { %p27_p0 = scmp.ge.s32.totalorder %s26_s20, 3  ;;  %p50_p2 = scmp.eq.s32.totalorder %s1148_s19, 0 }
   0x5   : > { %s42_s22 = sadd.s32 1, %s1136_s16  ;;  %p899_p5 = scmp.ge.s32.totalorder %s1148_s19, 3 }
   0x6   : > { %s1302_s20 = smov (%p27_p0, %s26_s20), 0  ;;  %p51_p3 = por %p50_p2, %p49_p1 }
   0x7   : > { %s38_s21 = ssub.s32 %s1144_s18, %s1302_s20  ;;  %203 = sbr.rel (%p899_p5) target bundleno = 23 (0x17), region = 24 }
   0x8   : > { %p40_p4 = scmp.eq.s32.totalorder %s38_s21, 0 }
   0xa   : > { %s1211_s23 = scalar_select %p40_p4, %s1136_s16, %s42_s22  }
   0xe   : > { %206 = sbr.rel (!%p51_p3) target bundleno = 23 (0x17), region = 28  ;;  %s208_s24 = sand.u32 (%p51_p3), 1, %s1136_s16  }
   0xf   : > { %s952_s25 = smul.u32 (%p51_p3), 12, %s1144_s18 }
  0x10   : > { %s1035_s26 = smul.u32 (%p51_p3), 48, %s208_s24 }
  0x11   : > { %s216_s29 = scalar_lea.vmem (%p51_p3), %s1292_s0, %s952_s25 }
  0x12   : > { %v231_v0 = vld [vmem:[%s216_s29] sm:$0xff] (%p51_p3)  ;;  %v235_v2 = vld [vmem:[%s216_s29 + $0x48] sm:$0xff] (%p51_p3)  ;;  %s210_s30 = scalar_lea.vmem (%p51_p3), [#allocation3], %s1035_s26  ;;  %v905_v6 = vld [vmem:[%s216_s29 + $0x50] sm:$0xf] (%p51_p3) }
  0x13   : > { %v233_v1 = vld [vmem:[%s216_s29 + $0x24] sm:$0xff] (%p51_p3)  ;;  %232 = vst [vmem:[%s210_s30] sm:$0xff] (%p51_p3), %v231_v0  ;;  %236 = vst [vmem:[%s210_s30 + $0x18] sm:$0xff] (%p51_p3), %v235_v2  ;;  %v237_v3 = vld [vmem:[%s216_s29 + $0x6c] sm:$0xff] (%p51_p3) }
  0x14   : > { %234 = vst [vmem:[%s210_s30 + $0xc] sm:$0xff] (%p51_p3), %v233_v1  ;;  %v901_v4 = vld [vmem:[%s216_s29 + $0x8] sm:$0xf] (%p51_p3)  ;;  %v903_v5 = vld [vmem:[%s216_s29 + $0x2c] sm:$0xf] (%p51_p3)  ;;  %238 = vst [vmem:[%s210_s30 + $0x24] sm:$0xff] (%p51_p3), %v237_v3 }
  0x15   : > { %902 = vst [vmem:[%s210_s30 + $0x8] sm:$0xf] %v901_v4  ;;  %904 = vst [vmem:[%s210_s30 + $0x14] sm:$0xf] %v903_v5  ;;  %v907_v7 = vld [vmem:[%s216_s29 + $0x74] sm:$0xf] }
  0x16   : > { %906 = vst [vmem:[%s210_s30 + $0x20] sm:$0xf] %v905_v6  ;;  %908 = vst [vmem:[%s210_s30 + $0x2c] sm:$0xf] %v907_v7 }
  0x17 PF: > { %p909_p6 = scmp.ge.s32.totalorder %s1148_s19, 1  ;;  %p270_p7 = scmp.lt.s32.totalorder %s1148_s19, 4 }
  0x19   : > { %p271_p8 = pnand %p909_p6, %p270_p7 }
  0x1a   : > { %s277_s5 = sand.u32 (!%p271_p8), 1, %s1132_s15   ;;  %s326_s6 = smul.u32 (!%p271_p8), 48, %s1140_s17 }
  0x1b   : > { %274 = sbr.rel (%p271_p8) target bundleno = 320 (0x140), region = 58  ;;  %p911_p10 = scmp.ne.s32.totalorder (!%p271_p8), %s1140_s17, 0 }
  0x1c   : > { %s1036_s7 = smul.u32 (!%p271_p8), 48, %s277_s5  ;;  %p327_p9 = scmp.lt.s32.totalorder (!%p271_p8), %s326_s6, 143 }
  0x1e   : > { %s1228_s12 = scalar_lea.vmem (!%p271_p8), [#allocation3], %s1036_s7 }
  0x22   : > { %s1304_s6 = smov (!%p327_p9, %s326_s6), 143  ;;  %360 = sbr.rel (%p911_p10) target bundleno = 41 (0x29), region = 66 }
  0x23   : > { %s910_s8 = sshll.u32 %s1304_s6, 2  ;;  %v1150_v8 = vmov (!%p911_p10), 0.0  }
  0x24   : > { %s1226_s11 = scalar_lea.vmem %s1293_s1, %s910_s8  ;;  %361 = vst [vmem:[#allocation2] sm:$0xff] (!%p911_p10), %v1150_v8  ;;  %362 = vst [vmem:[#allocation2 + $0x8] sm:$0xff] (!%p911_p10), %v1150_v8 }
  0x25   : > { %363 = vst [vmem:[#allocation2 + $0x10] sm:$0xff] (!%p911_p10), %v1150_v8  ;;  %364 = vst [vmem:[#allocation2 + $0x18] sm:$0xff] (!%p911_p10), %v1150_v8 }
  0x29 PF: > { %v1078_v9 = vld [vmem:[%s1226_s11 + $0x40] sm:$0xff]   ;;  %v1081_v12 = vld [vmem:[%s1226_s11 + $0x48] sm:$0xff]   ;;  %v1084_v15 = vld [vmem:[%s1226_s11 + $0x50] sm:$0xff]   ;;  %p942_p11 = scmp.ne.s32.totalorder %s1140_s17, 2 }
  0x2a   : > { %v1079_v10 = vld [vmem:[%s1226_s11] sm:$0xff]   ;;  %977 = vmatprep.subr.bf16.mxu0 %v1078_v9  ;;  %v1082_v13 = vld [vmem:[%s1226_s11 + $0x8] sm:$0xff]   ;;  %v1085_v16 = vld [vmem:[%s1226_s11 + $0x10] sm:$0xff]  }
  0x2b   : > { %v1080_v11 = vld [vmem:[%s1226_s11 + $0x80] sm:$0xff]   ;;  %978 = vmatpush3.bf16.msra.mxu0 %v1079_v10  ;;  %v1083_v14 = vld [vmem:[%s1226_s11 + $0x88] sm:$0xff]   ;;  %v1086_v17 = vld [vmem:[%s1226_s11 + $0x90] sm:$0xff]  }
  0x2c   : > { %1015 = vmatprep.subr.bf16.mxu1 %v1080_v11  ;;  %979 = vmatprep.subr.bf16.mxu0 %v1081_v12  ;;  %v1087_v18 = vld [vmem:[%s1226_s11 + $0x58] sm:$0xff]   ;;  %v1090_v21 = vld [vmem:[%s1226_s11 + $0x60] sm:$0xff]   ;;  %v1093_v24 = vld [vmem:[%s1226_s11 + $0x68] sm:$0xff]  }
  0x2d   : > { %1016 = vmatpush3.bf16.msra.mxu1 %v1080_v11  ;;  %v1088_v19 = vld [vmem:[%s1226_s11 + $0x18] sm:$0xff]   ;;  %v1092_v22 = vld [vmem:[%s1226_s11 + $0xa0] sm:$0xff]   ;;  %v1095_v25 = vld [vmem:[%s1226_s11 + $0xa8] sm:$0xff]  }
  0x2e   : > { %1017 = vmatprep.subr.bf16.mxu1 %v1083_v14  ;;  %v1089_v20 = vld [vmem:[%s1226_s11 + $0x98] sm:$0xff]   ;;  %v1091_v23 = vld [vmem:[%s1226_s11 + $0x20] sm:$0xff]   ;;  %v1094_v26 = vld [vmem:[%s1226_s11 + $0x28] sm:$0xff]  }
  0x2f   : > { %980 = vmatpush3.bf16.msra.mxu0 %v1082_v13  ;;  %v1096_v27 = vld [vmem:[%s1226_s11 + $0x70] sm:$0xff]   ;;  %v1099_v30 = vld [vmem:[%s1226_s11 + $0x78] sm:$0xff]   ;;  %v365_v45 = vld [vmem:[#allocation2] sm:$0xff] }
  0x30   : > { %981 = vmatprep.subr.bf16.mxu0 %v1084_v15  ;;  %v1097_v28 = vld [vmem:[%s1226_s11 + $0x30] sm:$0xff]   ;;  %v1101_v31 = vld [vmem:[%s1226_s11 + $0xb8] sm:$0xff]   ;;  %v366_v50 = vld [vmem:[#allocation2 + $0x8] sm:$0xff] }
  0x31   : > { %1018 = vmatpush3.bf16.msra.mxu1 %v1083_v14  ;;  %v1098_v29 = vld [vmem:[%s1226_s11 + $0xb0] sm:$0xff]   ;;  %v1100_v34 = vld [vmem:[%s1226_s11 + $0x38] sm:$0xff]   ;;  %v943_v5 = vld [vmem:[%s1294_s2] ss:$0 sm:$0xff] (!%p942_p11) }
  0x32   : > { %1019 = vmatprep.subr.bf16.mxu1 %v1086_v17  ;;  %v1104_v32 = vld [vmem:[%s1228_s12 + $0x4] ss:$12 sps:$4 sm:$0xff]   ;;  %v1105_v33 = vld [vmem:[%s1228_s12 + $0x8] ss:$12 sps:$4 sm:$0xff]   ;;  %v1102_v35 = vld [vmem:[%s1228_s12] ss:$12 sps:$4 sm:$0xff]  }
  0x33   : > { %982 = vmatpush3.bf16.msra.mxu0 %v1085_v16  ;;  %633 = vmatprep.mubr.bf16.mxu0 %v1104_v32  ;;  %v1107_v36 = vld [vmem:[%s1228_s12 + $0x1c] ss:$12 sps:$4 sm:$0xff]   ;;  %v1106_v37 = vld [vmem:[%s1228_s12 + $0x20] ss:$12 sps:$4 sm:$0xff]   ;;  %v1109_v38 = vld [vmem:[%s1228_s12 + $0x18] ss:$12 sps:$4 sm:$0xff]  }
  0x34   : > { %983 = vmatprep.subr.bf16.mxu0 %v1087_v18  ;;  %1031 = vmatprep.mubr.bf16.mxu1 %v1105_v33  ;;  %v367_v59 = vld [vmem:[#allocation2 + $0x10] sm:$0xff]  ;;  %v368_v63 = vld [vmem:[#allocation2 + $0x18] sm:$0xff]  ;;  %v958_v8 = vld [vmem:[%s1295_s3] sm:$0xff] (!%p942_p11)  }
  0x35   : > { %1020 = vmatpush3.bf16.msra.mxu1 %v1086_v17  ;;  %v959_v11 = vunpack.c.l.bf16 (!%p942_p11), %v958_v8  ;;  %v960_v12 = vunpack.c.h.bf16 (!%p942_p11), %v958_v8  ;;  %v975_v15 = vld [vmem:[%s1295_s3 + $0x8] sm:$0xff] (!%p942_p11)  }
  0x36   : > { %1021 = vmatprep.subr.bf16.mxu1 %v1089_v20  ;;  %v963_v16 = vunpack.c.l.bf16 (!%p942_p11), %v975_v15  ;;  %v964_v17 = vunpack.c.h.bf16 (!%p942_p11), %v975_v15 }
  0x37   : > { %984 = vmatpush3.bf16.msra.mxu0 %v1088_v19 }
  0x38   : > { %985 = vmatprep.subr.bf16.mxu0 %v1090_v21 }
  0x39   : > { %1022 = vmatpush3.bf16.msra.mxu1 %v1089_v20 }
  0x3a   : > { %1023 = vmatprep.subr.bf16.mxu1 %v1092_v22 }
  0x3b   : > { %986 = vmatpush3.bf16.msra.mxu0 %v1091_v23 }
  0x3c   : > { %987 = vmatprep.subr.bf16.mxu0 %v1093_v24 }
  0x3d   : > { %1024 = vmatpush3.bf16.msra.mxu1 %v1092_v22 }
  0x3e   : > { %1025 = vmatprep.subr.bf16.mxu1 %v1095_v25 }
  0x3f   : > { %988 = vmatpush3.bf16.msra.mxu0 %v1094_v26 }
  0x40   : > { %989 = vmatprep.subr.bf16.mxu0 %v1096_v27 }
  0x41   : > { %1026 = vmatpush3.bf16.msra.mxu1 %v1095_v25 }
  0x42   : > { %1027 = vmatprep.subr.bf16.mxu1 %v1098_v29 }
  0x43   : > { %990 = vmatpush3.bf16.msra.mxu0 %v1097_v28 }
  0x44   : > { %991 = vmatprep.subr.bf16.mxu0 %v1099_v30 }
  0x45   : > { %1028 = vmatpush3.bf16.msra.mxu1 %v1098_v29 }
  0x46   : > { %1029 = vmatprep.subr.bf16.mxu1 %v1101_v31 }
  0x47   : > { %992 = vmatpush3.bf16.msra.mxu0 %v1100_v34 }
  0x49   : > { %1030 = vmatpush3.bf16.msra.mxu1 %v1101_v31 }
  0x4a   : > { %634 = vmatmul.mubr.bf16.vlgmr.msra.gmra.mrb[0].mxu0 %v1102_v35 }
  0x4b   : > { %641 = vmatprep.mubr.bf16.mxu0 %v1107_v36 }
  0x4c   : > { %1032 = vmatmul.mubr.bf16.vlgmr.msra.gmra.mrb[0].mxu1 %v1106_v37 }
  0x52   : > { %642 = vmatmul.mubr.bf16.gmra.mrb[4].mxu0 %v1109_v38 }
 0x11d   : > { %v993_v39 = vpop.f32.mrb[0].mxu0 }
 0x11e   : > { %v994_v40 = vpop.f32.mrb[1].mxu0 }
 0x11f   : > { %v995_v41 = vadd.f32 %v994_v40, %v993_v39  ;;  %v996_v42 = vpop.f32.mrb[2].mxu0  ;;  %v1033_v43 = vpop.f32.mrb[0].mxu1 }
 0x120   : > { %v997_v44 = vpop.f32.mrb[3].mxu0  ;;  %v684_v46 = vpop.f32.mrb[1].mxu1 }
 0x121   : > { %v998_v47 = vadd.f32 %v997_v44, %v996_v42  ;;  %v685_v48 = vadd.f32 %v995_v41, %v684_v46  ;;  %v1034_v49 = vpop.f32.mrb[2].mxu1 }
 0x122   : > { %v687_v51 = vpop.f32.mrb[3].mxu1 }
 0x123   : > { %v699_v52 = vadd.f32 %v685_v48, %v365_v45  ;;  %v688_v53 = vadd.f32 %v998_v47, %v687_v51 }
 0x125   : > { %703 = vst [vmem:[#allocation2] sm:$0xff] %v699_v52  ;;  %v700_v54 = vadd.f32 %v688_v53, %v366_v50  ;;  %v999_v55 = vpop.f32.mrb[4].mxu0 }
 0x126   : > { %v1000_v56 = vpop.f32.mrb[5].mxu0 }
 0x127   : > { %704 = vst [vmem:[#allocation2 + $0x8] sm:$0xff] %v700_v54  ;;  %v1001_v57 = vadd.f32 %v1000_v56, %v999_v55  ;;  %v1002_v58 = vpop.f32.mrb[6].mxu0 }
 0x128   : > { %v1003_v60 = vpop.f32.mrb[7].mxu0 }
 0x129   : > { %v693_v61 = vadd.f32 %v1033_v43, %v1001_v57  ;;  %v1004_v62 = vadd.f32 %v1003_v60, %v1002_v58  ;;  %710 = sbr.rel (%p942_p11) target bundleno = 320 (0x140), region = 70 }
 0x12b   : > { %v701_v0 = vadd.f32 %v693_v61, %v367_v59  ;;  %v696_v1 = vadd.f32 %v1034_v49, %v1004_v62 }
 0x12c   : > { %v711_v3 = vld [vmem:[#allocation2] sm:$0xff] (!%p942_p11) }
 0x12d   : > { %705 = vst [vmem:[#allocation2 + $0x10] sm:$0xff] %v701_v0  ;;  %v702_v2 = vadd.f32 %v696_v1, %v368_v63  ;;  %v722_v6 = vadd.f32 (!%p942_p11), %v943_v5, %v711_v3 }
 0x12e   : > { %v712_v4 = vld [vmem:[#allocation2 + $0x8] sm:$0xff] (!%p942_p11) }
 0x12f   : > { %706 = vst [vmem:[#allocation2 + $0x18] sm:$0xff] %v702_v2  ;;  %v723_v7 = vadd.f32 (!%p942_p11), %v943_v5, %v712_v4  ;;  %v734_v18 = vadd.f32 (!%p942_p11), %v959_v11, %v722_v6 }
 0x131   : > { %v735_v19 = vadd.f32 %v960_v12, %v723_v7  ;;  %v738_v22 = vmax.f32 %v734_v18, 0.0 }
 0x133   : > { %v739_v23 = vmax.f32 %v735_v19, 0.0 }
 0x134   : > { %v713_v9 = vld [vmem:[#allocation2 + $0x10] sm:$0xff] }
 0x135   : > { %v724_v13 = vadd.f32 %v943_v5, %v713_v9  ;;  %v968_v26 = vpack.c.bf16 %v739_v23, %v738_v22 }
 0x136   : > { %v714_v10 = vld [vmem:[#allocation2 + $0x18] sm:$0xff] }
 0x137   : > { %v725_v14 = vadd.f32 %v943_v5, %v714_v10  ;;  %v736_v20 = vadd.f32 %v963_v16, %v724_v13  ;;  %969 = vst [vmem:[%s1296_s4] sm:$0xff] %v968_v26  }
 0x139   : > { %v737_v21 = vadd.f32 %v964_v17, %v725_v14  ;;  %v740_v24 = vmax.f32 %v736_v20, 0.0 }
 0x13b   : > { %v741_v25 = vmax.f32 %v737_v21, 0.0 }
 0x13d   : > { %v973_v27 = vpack.c.bf16 %v741_v25, %v740_v24 }
 0x13f   : > { %976 = vst [vmem:[%s1296_s4 + $0x8] sm:$0xff] %v973_v27  }
 0x140 PF: > { %s14_s19 = sadd.s32 1, %s1148_s19   ;;  %s1297_s15 = smov %s1136_s16 }
 0x141   : > { %p11_p12 = scmp.ge.s32.totalorder %s14_s19, 5   ;;  %s1298_s16 = smov %s1211_s23 }
 0x142   : > { %s1299_s17 = smov %s1144_s18  ;;  %s1300_s18 = smov %s1302_s20 }
 0x143   :  { %13 = sbr.rel (!%p11_p12) target bundleno = 3 (0x3), region = 120 }

// kernel: _lambda_.29
= control target key start
LH: loop header
LB: loop body
LE: loop exit
PB: predicated region body
PF: predicated region fallthrough
CT: control target
= control target key end

     0   :  { %s1071_s12 = smov 0   ;;  %s1073_s13 = smov 0   ;;  %s1181_s0 = inlined_call_operand.vmem [shape: bf16[32,1152], index: 0, kind: input, shape index: {}]   ;;  %s1182_s1 = inlined_call_operand.vmem [shape: bf16[1152,128], index: 1, kind: input, shape index: {}]   ;;  %s1183_s2 = inlined_call_operand.vmem [shape: f32[1,128], index: 2, kind: input, shape index: {}]   ;;  %s1184_s3 = inlined_call_operand.vmem [shape: bf16[32,128], index: 3, kind: output, shape index: {}]  }
   0x1   :  { %s1075_s14 = smov 0   ;;  %s1077_s15 = smov 0  }
   0x2   :  { %s1079_s16 = smov 0  }
   0x3 LB: > { %s25_s17 = sadd.s32 1, %s1044_s15  ;;  %p48_p1 = scmp.ne.s32.totalorder %s1036_s13, %s1032_s12  ;;  %s1048_s16 = sphi %s1079_s16, %s13_s16   ;;  %s1044_s15 = sphi %s1077_s15, %s1188_s15   ;;  %s1040_s14 = sphi %s1075_s14, %s1187_s14   ;;  %s1036_s13 = sphi %s1073_s13, %s1186_s13   ;;  %s1032_s12 = sphi %s1071_s12, %s1185_s12  }
   0x4   : > { %p26_p0 = scmp.ge.s32.totalorder %s25_s17, 3  ;;  %p49_p2 = scmp.eq.s32.totalorder %s1048_s16, 0 }
   0x5   : > { %s41_s19 = sadd.s32 1, %s1036_s13  ;;  %p808_p5 = scmp.ge.s32.totalorder %s1048_s16, 3 }
   0x6   : > { %s1190_s17 = smov (%p26_p0, %s25_s17), 0  ;;  %p50_p3 = por %p49_p2, %p48_p1 }
   0x7   : > { %s37_s18 = ssub.s32 %s1044_s15, %s1190_s17  ;;  %162 = sbr.rel (%p808_p5) target bundleno = 23 (0x17), region = 20 }
   0x8   : > { %p39_p4 = scmp.eq.s32.totalorder %s37_s18, 0 }
   0xa   : > { %s1106_s20 = scalar_select %p39_p4, %s1036_s13, %s41_s19  }
   0xe   : > { %165 = sbr.rel (!%p50_p3) target bundleno = 23 (0x17), region = 24  ;;  %s167_s21 = sand.u32 (%p50_p3), 1, %s1036_s13  }
   0xf   : > { %s861_s22 = smul.u32 (%p50_p3), 12, %s1044_s15 }
  0x10   : > { %s935_s23 = smul.u32 (%p50_p3), 48, %s167_s21 }
  0x11   : > { %s175_s26 = scalar_lea.vmem (%p50_p3), %s1181_s0, %s861_s22 }
  0x12   : > { %v190_v0 = vld [vmem:[%s175_s26] sm:$0xff] (%p50_p3)  ;;  %v194_v2 = vld [vmem:[%s175_s26 + $0x48] sm:$0xff] (%p50_p3)  ;;  %s169_s27 = scalar_lea.vmem (%p50_p3), [#allocation3], %s935_s23  ;;  %v814_v6 = vld [vmem:[%s175_s26 + $0x50] sm:$0xf] (%p50_p3) }
  0x13   : > { %v192_v1 = vld [vmem:[%s175_s26 + $0x24] sm:$0xff] (%p50_p3)  ;;  %191 = vst [vmem:[%s169_s27] sm:$0xff] (%p50_p3), %v190_v0  ;;  %195 = vst [vmem:[%s169_s27 + $0x18] sm:$0xff] (%p50_p3), %v194_v2  ;;  %v196_v3 = vld [vmem:[%s175_s26 + $0x6c] sm:$0xff] (%p50_p3) }
  0x14   : > { %193 = vst [vmem:[%s169_s27 + $0xc] sm:$0xff] (%p50_p3), %v192_v1  ;;  %v810_v4 = vld [vmem:[%s175_s26 + $0x8] sm:$0xf] (%p50_p3)  ;;  %v812_v5 = vld [vmem:[%s175_s26 + $0x2c] sm:$0xf] (%p50_p3)  ;;  %197 = vst [vmem:[%s169_s27 + $0x24] sm:$0xff] (%p50_p3), %v196_v3 }
  0x15   : > { %811 = vst [vmem:[%s169_s27 + $0x8] sm:$0xf] %v810_v4  ;;  %813 = vst [vmem:[%s169_s27 + $0x14] sm:$0xf] %v812_v5  ;;  %v816_v7 = vld [vmem:[%s175_s26 + $0x74] sm:$0xf] }
  0x16   : > { %815 = vst [vmem:[%s169_s27 + $0x20] sm:$0xf] %v814_v6  ;;  %817 = vst [vmem:[%s169_s27 + $0x2c] sm:$0xf] %v816_v7 }
  0x17 PF: > { %p818_p6 = scmp.ge.s32.totalorder %s1048_s16, 1  ;;  %p229_p7 = scmp.lt.s32.totalorder %s1048_s16, 4 }
  0x19   : > { %p230_p8 = pnand %p818_p6, %p229_p7 }
  0x1a   : > { %s236_s28 = sand.u32 (!%p230_p8), 1, %s1032_s12   ;;  %s275_s29 = smul.u32 (!%p230_p8), 48, %s1040_s14 }
  0x1b   : > { %233 = sbr.rel (%p230_p8) target bundleno = 318 (0x13e), region = 54  ;;  %p820_p10 = scmp.ne.s32.totalorder (!%p230_p8), %s1040_s14, 0 }
  0x1c   : > { %s936_s30 = smul.u32 (!%p230_p8), 48, %s236_s28  ;;  %p276_p9 = scmp.lt.s32.totalorder (!%p230_p8), %s275_s29, 143 }
  0x1e   : > { %s1123_s8 = scalar_lea.vmem (!%p230_p8), [#allocation3], %s936_s30 }
  0x22   : > { %s1192_s29 = smov (!%p276_p9, %s275_s29), 143  ;;  %300 = sbr.rel (%p820_p10) target bundleno = 41 (0x29), region = 62 }
  0x23   : > { %s819_s4 = sshll.u32 %s1192_s29, 2  ;;  %v1050_v8 = vmov (!%p820_p10), 0.0  }
  0x24   : > { %s1121_s7 = scalar_lea.vmem %s1182_s1, %s819_s4  ;;  %301 = vst [vmem:[#allocation2] sm:$0xff] (!%p820_p10), %v1050_v8  ;;  %302 = vst [vmem:[#allocation2 + $0x8] sm:$0xff] (!%p820_p10), %v1050_v8 }
  0x25   : > { %303 = vst [vmem:[#allocation2 + $0x10] sm:$0xff] (!%p820_p10), %v1050_v8  ;;  %304 = vst [vmem:[#allocation2 + $0x18] sm:$0xff] (!%p820_p10), %v1050_v8 }
  0x29 PF: > { %v978_v9 = vld [vmem:[%s1121_s7 + $0x40] sm:$0xff]   ;;  %v981_v12 = vld [vmem:[%s1121_s7 + $0x48] sm:$0xff]   ;;  %v984_v15 = vld [vmem:[%s1121_s7 + $0x50] sm:$0xff]   ;;  %p851_p11 = scmp.ne.s32.totalorder %s1040_s14, 2 }
  0x2a   : > { %v979_v10 = vld [vmem:[%s1121_s7] sm:$0xff]   ;;  %877 = vmatprep.subr.bf16.mxu0 %v978_v9  ;;  %v982_v13 = vld [vmem:[%s1121_s7 + $0x8] sm:$0xff]   ;;  %v985_v16 = vld [vmem:[%s1121_s7 + $0x10] sm:$0xff]  }
  0x2b   : > { %v980_v11 = vld [vmem:[%s1121_s7 + $0x80] sm:$0xff]   ;;  %878 = vmatpush3.bf16.msra.mxu0 %v979_v10  ;;  %v983_v14 = vld [vmem:[%s1121_s7 + $0x88] sm:$0xff]   ;;  %v986_v17 = vld [vmem:[%s1121_s7 + $0x90] sm:$0xff]  }
  0x2c   : > { %915 = vmatprep.subr.bf16.mxu1 %v980_v11  ;;  %879 = vmatprep.subr.bf16.mxu0 %v981_v12  ;;  %v987_v18 = vld [vmem:[%s1121_s7 + $0x58] sm:$0xff]   ;;  %v990_v21 = vld [vmem:[%s1121_s7 + $0x60] sm:$0xff]   ;;  %v993_v24 = vld [vmem:[%s1121_s7 + $0x68] sm:$0xff]  }
  0x2d   : > { %916 = vmatpush3.bf16.msra.mxu1 %v980_v11  ;;  %v988_v19 = vld [vmem:[%s1121_s7 + $0x18] sm:$0xff]   ;;  %v992_v22 = vld [vmem:[%s1121_s7 + $0xa0] sm:$0xff]   ;;  %v995_v25 = vld [vmem:[%s1121_s7 + $0xa8] sm:$0xff]  }
  0x2e   : > { %917 = vmatprep.subr.bf16.mxu1 %v983_v14  ;;  %v989_v20 = vld [vmem:[%s1121_s7 + $0x98] sm:$0xff]   ;;  %v991_v23 = vld [vmem:[%s1121_s7 + $0x20] sm:$0xff]   ;;  %v994_v26 = vld [vmem:[%s1121_s7 + $0x28] sm:$0xff]  }
  0x2f   : > { %880 = vmatpush3.bf16.msra.mxu0 %v982_v13  ;;  %v996_v27 = vld [vmem:[%s1121_s7 + $0x70] sm:$0xff]   ;;  %v999_v30 = vld [vmem:[%s1121_s7 + $0x78] sm:$0xff]   ;;  %v305_v45 = vld [vmem:[#allocation2] sm:$0xff] }
  0x30   : > { %881 = vmatprep.subr.bf16.mxu0 %v984_v15  ;;  %v997_v28 = vld [vmem:[%s1121_s7 + $0x30] sm:$0xff]   ;;  %v1001_v31 = vld [vmem:[%s1121_s7 + $0xb8] sm:$0xff]   ;;  %v306_v50 = vld [vmem:[#allocation2 + $0x8] sm:$0xff] }
  0x31   : > { %918 = vmatpush3.bf16.msra.mxu1 %v983_v14  ;;  %v998_v29 = vld [vmem:[%s1121_s7 + $0xb0] sm:$0xff]   ;;  %v1000_v34 = vld [vmem:[%s1121_s7 + $0x38] sm:$0xff]   ;;  %v852_v5 = vld [vmem:[%s1183_s2] ss:$0 sm:$0xff] (!%p851_p11) }
  0x32   : > { %919 = vmatprep.subr.bf16.mxu1 %v986_v17  ;;  %v1004_v32 = vld [vmem:[%s1123_s8 + $0x4] ss:$12 sps:$4 sm:$0xff]   ;;  %v1005_v33 = vld [vmem:[%s1123_s8 + $0x8] ss:$12 sps:$4 sm:$0xff]   ;;  %v1002_v35 = vld [vmem:[%s1123_s8] ss:$12 sps:$4 sm:$0xff]  }
  0x33   : > { %882 = vmatpush3.bf16.msra.mxu0 %v985_v16  ;;  %573 = vmatprep.mubr.bf16.mxu0 %v1004_v32  ;;  %v1007_v36 = vld [vmem:[%s1123_s8 + $0x1c] ss:$12 sps:$4 sm:$0xff]   ;;  %v1006_v37 = vld [vmem:[%s1123_s8 + $0x20] ss:$12 sps:$4 sm:$0xff]   ;;  %v1009_v38 = vld [vmem:[%s1123_s8 + $0x18] ss:$12 sps:$4 sm:$0xff]  }
  0x34   : > { %883 = vmatprep.subr.bf16.mxu0 %v987_v18  ;;  %931 = vmatprep.mubr.bf16.mxu1 %v1005_v33  ;;  %v307_v59 = vld [vmem:[#allocation2 + $0x10] sm:$0xff]  ;;  %v308_v63 = vld [vmem:[#allocation2 + $0x18] sm:$0xff] }
  0x35   : > { %920 = vmatpush3.bf16.msra.mxu1 %v986_v17 }
  0x36   : > { %921 = vmatprep.subr.bf16.mxu1 %v989_v20 }
  0x37   : > { %884 = vmatpush3.bf16.msra.mxu0 %v988_v19 }
  0x38   : > { %885 = vmatprep.subr.bf16.mxu0 %v990_v21 }
  0x39   : > { %922 = vmatpush3.bf16.msra.mxu1 %v989_v20 }
  0x3a   : > { %923 = vmatprep.subr.bf16.mxu1 %v992_v22 }
  0x3b   : > { %886 = vmatpush3.bf16.msra.mxu0 %v991_v23 }
  0x3c   : > { %887 = vmatprep.subr.bf16.mxu0 %v993_v24 }
  0x3d   : > { %924 = vmatpush3.bf16.msra.mxu1 %v992_v22 }
  0x3e   : > { %925 = vmatprep.subr.bf16.mxu1 %v995_v25 }
  0x3f   : > { %888 = vmatpush3.bf16.msra.mxu0 %v994_v26 }
  0x40   : > { %889 = vmatprep.subr.bf16.mxu0 %v996_v27 }
  0x41   : > { %926 = vmatpush3.bf16.msra.mxu1 %v995_v25 }
  0x42   : > { %927 = vmatprep.subr.bf16.mxu1 %v998_v29 }
  0x43   : > { %890 = vmatpush3.bf16.msra.mxu0 %v997_v28 }
  0x44   : > { %891 = vmatprep.subr.bf16.mxu0 %v999_v30 }
  0x45   : > { %928 = vmatpush3.bf16.msra.mxu1 %v998_v29 }
  0x46   : > { %929 = vmatprep.subr.bf16.mxu1 %v1001_v31 }
  0x47   : > { %892 = vmatpush3.bf16.msra.mxu0 %v1000_v34 }
  0x49   : > { %930 = vmatpush3.bf16.msra.mxu1 %v1001_v31 }
  0x4a   : > { %574 = vmatmul.mubr.bf16.vlgmr.msra.gmra.mrb[0].mxu0 %v1002_v35 }
  0x4b   : > { %581 = vmatprep.mubr.bf16.mxu0 %v1007_v36 }
  0x4c   : > { %932 = vmatmul.mubr.bf16.vlgmr.msra.gmra.mrb[0].mxu1 %v1006_v37 }
  0x52   : > { %582 = vmatmul.mubr.bf16.gmra.mrb[4].mxu0 %v1009_v38 }
 0x11d   : > { %v893_v39 = vpop.f32.mrb[0].mxu0 }
 0x11e   : > { %v894_v40 = vpop.f32.mrb[1].mxu0 }
 0x11f   : > { %v895_v41 = vadd.f32 %v894_v40, %v893_v39  ;;  %v896_v42 = vpop.f32.mrb[2].mxu0  ;;  %v933_v43 = vpop.f32.mrb[0].mxu1 }
 0x120   : > { %v897_v44 = vpop.f32.mrb[3].mxu0  ;;  %v624_v46 = vpop.f32.mrb[1].mxu1 }
 0x121   : > { %v898_v47 = vadd.f32 %v897_v44, %v896_v42  ;;  %v625_v48 = vadd.f32 %v895_v41, %v624_v46  ;;  %v934_v49 = vpop.f32.mrb[2].mxu1 }
 0x122   : > { %v627_v51 = vpop.f32.mrb[3].mxu1 }
 0x123   : > { %v639_v52 = vadd.f32 %v625_v48, %v305_v45  ;;  %v628_v53 = vadd.f32 %v898_v47, %v627_v51 }
 0x125   : > { %643 = vst [vmem:[#allocation2] sm:$0xff] %v639_v52  ;;  %v640_v54 = vadd.f32 %v628_v53, %v306_v50  ;;  %v899_v55 = vpop.f32.mrb[4].mxu0 }
 0x126   : > { %v900_v56 = vpop.f32.mrb[5].mxu0 }
 0x127   : > { %644 = vst [vmem:[#allocation2 + $0x8] sm:$0xff] %v640_v54  ;;  %v901_v57 = vadd.f32 %v900_v56, %v899_v55  ;;  %v902_v58 = vpop.f32.mrb[6].mxu0 }
 0x128   : > { %v903_v60 = vpop.f32.mrb[7].mxu0 }
 0x129   : > { %v633_v61 = vadd.f32 %v933_v43, %v901_v57  ;;  %v904_v62 = vadd.f32 %v903_v60, %v902_v58  ;;  %650 = sbr.rel (%p851_p11) target bundleno = 318 (0x13e), region = 66 }
 0x12b   : > { %v641_v0 = vadd.f32 %v633_v61, %v307_v59  ;;  %v636_v1 = vadd.f32 %v934_v49, %v904_v62 }
 0x12c   : > { %v651_v3 = vld [vmem:[#allocation2] sm:$0xff] (!%p851_p11) }
 0x12d   : > { %645 = vst [vmem:[#allocation2 + $0x10] sm:$0xff] %v641_v0  ;;  %v642_v2 = vadd.f32 %v636_v1, %v308_v63  ;;  %v662_v6 = vadd.f32 (!%p851_p11), %v852_v5, %v651_v3 }
 0x12e   : > { %v652_v4 = vld [vmem:[#allocation2 + $0x8] sm:$0xff] (!%p851_p11) }
 0x12f   : > { %646 = vst [vmem:[#allocation2 + $0x18] sm:$0xff] %v642_v2  ;;  %v663_v7 = vadd.f32 (!%p851_p11), %v852_v5, %v652_v4  ;;  %v666_v12 = vmax.f32 (!%p851_p11), %v662_v6, 0.0 }
 0x131   : > { %v667_v13 = vmax.f32 %v663_v7, 0.0 }
 0x133   : > { %v869_v16 = vpack.c.bf16 %v667_v13, %v666_v12 }
 0x134   : > { %v653_v8 = vld [vmem:[#allocation2 + $0x10] sm:$0xff] }
 0x135   : > { %v664_v10 = vadd.f32 %v852_v5, %v653_v8  ;;  %870 = vst [vmem:[%s1184_s3] sm:$0xff] %v869_v16  }
 0x136   : > { %v654_v9 = vld [vmem:[#allocation2 + $0x18] sm:$0xff] }
 0x137   : > { %v665_v11 = vadd.f32 %v852_v5, %v654_v9  ;;  %v668_v14 = vmax.f32 %v664_v10, 0.0 }
 0x139   : > { %v669_v15 = vmax.f32 %v665_v11, 0.0 }
 0x13b   : > { %v874_v17 = vpack.c.bf16 %v669_v15, %v668_v14 }
 0x13d   : > { %876 = vst [vmem:[%s1184_s3 + $0x8] sm:$0xff] %v874_v17  }
 0x13e PF: > { %s13_s16 = sadd.s32 1, %s1048_s16   ;;  %s1185_s12 = smov %s1036_s13 }
 0x13f   : > { %p10_p12 = scmp.ge.s32.totalorder %s13_s16, 5   ;;  %s1186_s13 = smov %s1106_s20 }
 0x140   : > { %s1187_s14 = smov %s1044_s15  ;;  %s1188_s15 = smov %s1190_s17 }
 0x141   :  { %12 = sbr.rel (!%p10_p12) target bundleno = 3 (0x3), region = 113 }

// kernel: _lambda_.31
= control target key start
LH: loop header
LB: loop body
LE: loop exit
PB: predicated region body
PF: predicated region fallthrough
CT: control target
= control target key end

     0   :  { %s1036_s12 = smov 0   ;;  %s1038_s13 = smov 0   ;;  %s1135_s0 = inlined_call_operand.vmem [shape: bf16[8,1152], index: 0, kind: input, shape index: {}]   ;;  %s1136_s1 = inlined_call_operand.vmem [shape: bf16[1152,256], index: 1, kind: input, shape index: {}]   ;;  %s1137_s2 = inlined_call_operand.vmem [shape: f32[1,256], index: 2, kind: input, shape index: {}]   ;;  %s1138_s3 = inlined_call_operand.vmem [shape: bf16[8,256], index: 3, kind: output, shape index: {}]  }
   0x1   :  { %s1040_s14 = smov 0  }
   0x2 LB: > { %s25_s15 = sadd.s32 1, %s1008_s13  ;;  %p825_p0 = scmp.ge.s32.totalorder %s1012_s14, 1  ;;  %s1012_s14 = sphi %s1040_s14, %s13_s14   ;;  %s1008_s13 = sphi %s1038_s13, %s1140_s13   ;;  %s1004_s12 = sphi %s1036_s12, %s1139_s12  }
   0x3   : > { %p26_p1 = scmp.ge.s32.totalorder %s25_s15, 3  ;;  %p194_p2 = scmp.lt.s32.totalorder %s1012_s14, 4 }
   0x5   : > { %s1142_s15 = smov (%p26_p1, %s25_s15), 0  ;;  %p195_p3 = pnand %p825_p0, %p194_p2 }
   0x6   : > { %s240_s16 = smul.u32 (!%p195_p3), 3, %s1004_s12  ;;  %p829_p6 = scmp.ne.s32.totalorder (!%p195_p3), %s1004_s12, 0 }
   0x7   : > { %198 = sbr.rel (%p195_p3) target bundleno = 321 (0x141), region = 32 }
   0x8   : > { %s250_s17 = smul.u32 (!%p195_p3), 48, %s1004_s12  ;;  %p243_p4 = scmp.lt.s32.totalorder (!%p195_p3), %s240_s16, 8 }
   0xa   : > { %p252_p5 = scmp.lt.s32.totalorder (!%p195_p3), %s250_s17, 143 }
   0xe   : > { %s1144_s16 = smov (!%p243_p4, %s240_s16), 8  ;;  %s1146_s17 = smov (!%p252_p5, %s250_s17), 143 }
   0xf   : > { %s826_s18 = sshll.u32 %s1144_s16, 2  ;;  %s887_s22 = sshll.u32 %s1146_s17, 3  ;;  %v1014_v0 = vmov (!%p829_p6), 0.0  }
  0x10   : > { %s1061_s21 = scalar_lea.vmem %s1135_s0, %s826_s18  ;;  %s1066_s25 = scalar_lea.vmem %s1136_s1, %s887_s22  ;;  %282 = vst [vmem:[#allocation2] sm:$0xff] (!%p829_p6), %v1014_v0  ;;  %283 = vst [vmem:[#allocation2 + $0x8] sm:$0xff] (!%p829_p6), %v1014_v0 }
  0x11   : > { %281 = sbr.rel (%p829_p6) target bundleno = 24 (0x18), region = 36 }
  0x18 PF: > { %v915_v1 = vld [vmem:[%s1066_s25 + $0x4] ss:$8 sps:$4 sm:$0xff]   ;;  %v917_v2 = vld [vmem:[%s1066_s25] ss:$8 sps:$4 sm:$0xff]   ;;  %v1015_v3 = vmov 0   ;;  %p881_p7 = scmp.ne.s32.totalorder %s1004_s12, 2 }
  0x19   : > { %660 = vmatprep.mubr.bf16.mxu1 %v1015_v3  ;;  %587 = vmatprep.subr.bf16.mxu0 %v915_v1  ;;  %v918_v4 = vld [vmem:[%s1066_s25 + $0x14] ss:$8 sps:$4 sm:$0xff]   ;;  %v920_v5 = vld [vmem:[%s1066_s25 + $0x10] ss:$8 sps:$4 sm:$0xff]   ;;  %v921_v6 = vld [vmem:[%s1066_s25 + $0x24] ss:$8 sps:$4 sm:$0xff]  }
  0x1a   : > { %588 = vmatpush1.bf16.msra.mxu0 %v917_v2  ;;  %v923_v7 = vld [vmem:[%s1066_s25 + $0x20] ss:$8 sps:$4 sm:$0xff]   ;;  %v924_v8 = vld [vmem:[%s1066_s25 + $0x34] ss:$8 sps:$4 sm:$0xff]   ;;  %v926_v9 = vld [vmem:[%s1066_s25 + $0x30] ss:$8 sps:$4 sm:$0xff]  }
  0x1b   : > { %589 = vmatprep.subr.bf16.mxu0 %v918_v4  ;;  %v939_v10 = vld [vmem:[%s1066_s25 + $0x104] ss:$8 sps:$4 sm:$0xff]   ;;  %v941_v11 = vld [vmem:[%s1066_s25 + $0x100] ss:$8 sps:$4 sm:$0xff]   ;;  %v945_v13 = vld [vmem:[%s1066_s25 + $0x114] ss:$8 sps:$4 sm:$0xff]   ;;  %v681_v4 = vlaneseq (!%p881_p7) }
  0x1c   : > { %v927_v12 = vld [vmem:[%s1066_s25 + $0x44] ss:$8 sps:$4 sm:$0xff]   ;;  %628 = vmatprep.subr.bf16.mxu1 %v939_v10  ;;  %v947_v14 = vld [vmem:[%s1066_s25 + $0x110] ss:$8 sps:$4 sm:$0xff]   ;;  %v929_v15 = vld [vmem:[%s1066_s25 + $0x40] ss:$8 sps:$4 sm:$0xff]  }
  0x1d   : > { %629 = vmatpush1.bf16.msra.mxu1 %v941_v11  ;;  %v930_v16 = vld [vmem:[%s1066_s25 + $0x54] ss:$8 sps:$4 sm:$0xff]   ;;  %v951_v17 = vld [vmem:[%s1066_s25 + $0x124] ss:$8 sps:$4 sm:$0xff]   ;;  %v953_v18 = vld [vmem:[%s1066_s25 + $0x120] ss:$8 sps:$4 sm:$0xff]  }
  0x1e   : > { %590 = vmatpush1.bf16.msra.mxu0 %v920_v5  ;;  %630 = vmatprep.subr.bf16.mxu1 %v945_v13  ;;  %v932_v19 = vld [vmem:[%s1066_s25 + $0x50] ss:$8 sps:$4 sm:$0xff]   ;;  %v957_v20 = vld [vmem:[%s1066_s25 + $0x134] ss:$8 sps:$4 sm:$0xff]   ;;  %v933_v21 = vld [vmem:[%s1066_s25 + $0x64] ss:$8 sps:$4 sm:$0xff]  }
  0x1f   : > { %591 = vmatprep.subr.bf16.mxu0 %v921_v6  ;;  %v959_v22 = vld [vmem:[%s1066_s25 + $0x130] ss:$8 sps:$4 sm:$0xff]   ;;  %v935_v23 = vld [vmem:[%s1066_s25 + $0x60] ss:$8 sps:$4 sm:$0xff]   ;;  %v963_v24 = vld [vmem:[%s1066_s25 + $0x144] ss:$8 sps:$4 sm:$0xff]  }
  0x20   : > { %v936_v25 = vld [vmem:[%s1066_s25 + $0x74] ss:$8 sps:$4 sm:$0xff]   ;;  %v965_v26 = vld [vmem:[%s1066_s25 + $0x140] ss:$8 sps:$4 sm:$0xff]   ;;  %v938_v27 = vld [vmem:[%s1066_s25 + $0x70] ss:$8 sps:$4 sm:$0xff]  }
  0x21   : > { %631 = vmatpush1.bf16.msra.mxu1 %v947_v14  ;;  %v969_v28 = vld [vmem:[%s1066_s25 + $0x154] ss:$8 sps:$4 sm:$0xff]   ;;  %v942_v29 = vld [vmem:[%s1066_s25 + $0x84] ss:$8 sps:$4 sm:$0xff]   ;;  %v971_v30 = vld [vmem:[%s1066_s25 + $0x150] ss:$8 sps:$4 sm:$0xff]  }
  0x22   : > { %592 = vmatpush1.bf16.msra.mxu0 %v923_v7  ;;  %632 = vmatprep.subr.bf16.mxu1 %v951_v17  ;;  %v944_v31 = vld [vmem:[%s1066_s25 + $0x80] ss:$8 sps:$4 sm:$0xff]   ;;  %v975_v32 = vld [vmem:[%s1066_s25 + $0x164] ss:$8 sps:$4 sm:$0xff]   ;;  %v948_v33 = vld [vmem:[%s1066_s25 + $0x94] ss:$8 sps:$4 sm:$0xff]  }
  0x23   : > { %593 = vmatprep.subr.bf16.mxu0 %v924_v8  ;;  %v286_v34 = vld [vmem:[%s1061_s21] sm:$0xff]  ;;  %v950_v37 = vld [vmem:[%s1066_s25 + $0x90] ss:$8 sps:$4 sm:$0xff]   ;;  %v981_v38 = vld [vmem:[%s1066_s25 + $0x174] ss:$8 sps:$4 sm:$0xff]   ;;  %v682_v5 = vshrl.u32 (!%p881_p7), %v681_v4, 7 }
  0x24   : > { %v831_v35 = vcombine.high %v286_v34, %v286_v34  ;;  %v977_v36 = vld [vmem:[%s1066_s25 + $0x160] ss:$8 sps:$4 sm:$0xff]   ;;  %v954_v39 = vld [vmem:[%s1066_s25 + $0xa4] ss:$8 sps:$4 sm:$0xff]   ;;  %v983_v40 = vld [vmem:[%s1066_s25 + $0x170] ss:$8 sps:$4 sm:$0xff]   ;;  %v830_v53 = vcombine.low %v286_v34, %v286_v34 }
  0x25   : > { %633 = vmatpush1.bf16.msra.mxu1 %v953_v18  ;;  %v956_v41 = vld [vmem:[%s1066_s25 + $0xa0] ss:$8 sps:$4 sm:$0xff]   ;;  %v960_v42 = vld [vmem:[%s1066_s25 + $0xb4] ss:$8 sps:$4 sm:$0xff]   ;;  %v962_v44 = vld [vmem:[%s1066_s25 + $0xb0] ss:$8 sps:$4 sm:$0xff]  }
  0x26   : > { %594 = vmatpush1.bf16.msra.mxu0 %v926_v9  ;;  %634 = vmatprep.subr.bf16.mxu1 %v957_v20  ;;  %v987_v43 = vld [vmem:[%s1061_s21 + $0x8] ss:$0 sps:$4 sm:$0xff]   ;;  %v966_v45 = vld [vmem:[%s1066_s25 + $0xc4] ss:$8 sps:$4 sm:$0xff]   ;;  %v972_v47 = vld [vmem:[%s1066_s25 + $0xd4] ss:$8 sps:$4 sm:$0xff]  }
  0x27   : > { %595 = vmatprep.subr.bf16.mxu0 %v927_v12  ;;  %619 = vmatprep.mubr.bf16.mxu0 %v831_v35  ;;  %v968_v46 = vld [vmem:[%s1066_s25 + $0xc0] ss:$8 sps:$4 sm:$0xff]   ;;  %v974_v48 = vld [vmem:[%s1066_s25 + $0xd0] ss:$8 sps:$4 sm:$0xff]   ;;  %v978_v49 = vld [vmem:[%s1066_s25 + $0xe4] ss:$8 sps:$4 sm:$0xff]  }
  0x28   : > { %v980_v50 = vld [vmem:[%s1066_s25 + $0xe0] ss:$8 sps:$4 sm:$0xff]   ;;  %v984_v51 = vld [vmem:[%s1066_s25 + $0xf4] ss:$8 sps:$4 sm:$0xff]   ;;  %v986_v52 = vld [vmem:[%s1066_s25 + $0xf0] ss:$8 sps:$4 sm:$0xff]  }
  0x29   : > { %635 = vmatpush1.bf16.msra.mxu1 %v959_v22  ;;  %v284_v58 = vld [vmem:[#allocation2] sm:$0xff]  ;;  %v285_v61 = vld [vmem:[#allocation2 + $0x8] sm:$0xff]  ;;  %v683_v7 = vsub.s32 (!%p881_p7), 0, %v682_v5  ;;  %v687_v8 = vsub.s32 (!%p881_p7), 1, %v682_v5 }
  0x2a   : > { %596 = vmatpush1.bf16.msra.mxu0 %v929_v15  ;;  %636 = vmatprep.subr.bf16.mxu1 %v963_v24  ;;  %v679_v6 = vld [vmem:[%s1137_s2] sm:$0x3] (!%p881_p7) }
  0x2b   : > { %597 = vmatprep.subr.bf16.mxu0 %v930_v16  ;;  %v684_v11 = vrot.slane (!%p881_p7), %v679_v6, %v683_v7  ;;  %v688_v12 = vrot.slane (!%p881_p7), %v679_v6, %v687_v8 }
  0x2d   : > { %637 = vmatpush1.bf16.msra.mxu1 %v965_v26 }
  0x2e   : > { %598 = vmatpush1.bf16.msra.mxu0 %v932_v19  ;;  %638 = vmatprep.subr.bf16.mxu1 %v969_v28 }
  0x2f   : > { %599 = vmatprep.subr.bf16.mxu0 %v933_v21 }
  0x31   : > { %639 = vmatpush1.bf16.msra.mxu1 %v971_v30 }
  0x32   : > { %600 = vmatpush1.bf16.msra.mxu0 %v935_v23  ;;  %640 = vmatprep.subr.bf16.mxu1 %v975_v32 }
  0x33   : > { %601 = vmatprep.subr.bf16.mxu0 %v936_v25 }
  0x35   : > { %641 = vmatpush1.bf16.msra.mxu1 %v977_v36 }
  0x36   : > { %602 = vmatpush1.bf16.msra.mxu0 %v938_v27  ;;  %642 = vmatprep.subr.bf16.mxu1 %v981_v38 }
  0x37   : > { %603 = vmatprep.subr.bf16.mxu0 %v942_v29 }
  0x39   : > { %643 = vmatpush1.bf16.msra.mxu1 %v983_v40 }
  0x3a   : > { %604 = vmatpush1.bf16.msra.mxu0 %v944_v31 }
  0x3b   : > { %605 = vmatprep.subr.bf16.mxu0 %v948_v33 }
  0x3c   : > { %661 = vmatmul.mubr.bf16.vlgmr.msra.gmra.mrb[0].mxu1 %v987_v43 }
  0x3e   : > { %606 = vmatpush1.bf16.msra.mxu0 %v950_v37 }
  0x3f   : > { %607 = vmatprep.subr.bf16.mxu0 %v954_v39 }
  0x42   : > { %608 = vmatpush1.bf16.msra.mxu0 %v956_v41 }
  0x43   : > { %609 = vmatprep.subr.bf16.mxu0 %v960_v42 }
  0x46   : > { %610 = vmatpush1.bf16.msra.mxu0 %v962_v44 }
  0x47   : > { %611 = vmatprep.subr.bf16.mxu0 %v966_v45 }
  0x4a   : > { %612 = vmatpush1.bf16.msra.mxu0 %v968_v46 }
  0x4b   : > { %613 = vmatprep.subr.bf16.mxu0 %v972_v47 }
  0x4e   : > { %614 = vmatpush1.bf16.msra.mxu0 %v974_v48 }
  0x4f   : > { %615 = vmatprep.subr.bf16.mxu0 %v978_v49 }
  0x52   : > { %616 = vmatpush1.bf16.msra.mxu0 %v980_v50 }
  0x53   : > { %617 = vmatprep.subr.bf16.mxu0 %v984_v51 }
  0x56   : > { %618 = vmatpush1.bf16.msra.mxu0 %v986_v52 }
  0x59   : > { %620 = vmatmul.mubr.bf16.vlgmr.msra.gmra.mrb[0].mxu0 %v830_v53 }
 0x10f   : > { %v662_v54 = vpop.f32.mrb[0].mxu1 }
 0x110   : > { %v664_v55 = vpop.f32.mrb[1].mxu1 }
 0x111   : > { %v666_v56 = vpop.f32.mrb[2].mxu1 }
 0x112   : > { %v667_v57 = vpop.f32.mrb[3].mxu1 }
 0x12c   : > { %v621_v59 = vpop.f32.mrb[0].mxu0  ;;  %676 = sbr.rel (%p881_p7) target bundleno = 321 (0x141), region = 40 }
 0x12d   : > { %v663_v60 = vadd.f32 %v662_v54, %v621_v59  ;;  %v623_v62 = vpop.f32.mrb[1].mxu0 }
 0x12e   : > { %v665_v63 = vadd.f32 %v664_v55, %v623_v62  ;;  %v625_v0 = vpop.f32.mrb[2].mxu0 }
 0x12f   : > { %v669_v1 = vadd.f32 %v663_v60, %v284_v58  ;;  %v626_v2 = vpop.f32.mrb[3].mxu0 }
 0x130   : > { %v670_v3 = vadd.f32 %v665_v63, %v285_v61 }
 0x131   : > { %671 = vst [vmem:[#allocation2] sm:$0xff] %v669_v1 }
 0x132   : > { %672 = vst [vmem:[#allocation2 + $0x8] sm:$0xff] %v670_v3 }
 0x138   : > { %v677_v9 = vld [vmem:[#allocation2] sm:$0xff] }
 0x139   : > { %v678_v10 = vld [vmem:[#allocation2 + $0x8] sm:$0xff]  ;;  %v691_v13 = vadd.f32 %v684_v11, %v677_v9 }
 0x13a   : > { %v692_v14 = vadd.f32 %v688_v12, %v678_v10 }
 0x13b   : > { %v693_v15 = vmax.f32 %v691_v13, 0.0 }
 0x13c   : > { %v694_v16 = vmax.f32 %v692_v14, 0.0 }
 0x13e   : > { %v888_v17 = vpack.c.bf16 %v694_v16, %v693_v15 }
 0x140   : > { %703 = vst [vmem:[%s1138_s3] sm:$0xff] %v888_v17 }
 0x141 PF: > { %s13_s14 = sadd.s32 1, %s1012_s14   ;;  %s1139_s12 = smov %s1008_s13 }
 0x142   : > { %p10_p8 = scmp.ge.s32.totalorder %s13_s14, 5   ;;  %s1140_s13 = smov %s1142_s15 }
 0x144   :  { %12 = sbr.rel (!%p10_p8) target bundleno = 2 (0x2), region = 76 }

// kernel: _lambda_.32
= control target key start
LH: loop header
LB: loop body
LE: loop exit
PB: predicated region body
PF: predicated region fallthrough
CT: control target
= control target key end

     0   :  { %v240_v1 = vmov 0   ;;  %v172_v18 = vlaneseq  ;;  %s318_s1 = inlined_call_operand.vmem [shape: bf16[128,256], index: 1, kind: input, shape index: {}]   ;;  %s319_s0 = inlined_call_operand.vmem [shape: bf16[8,128], index: 0, kind: input, shape index: {}]   ;;  %s320_s2 = inlined_call_operand.vmem [shape: f32[1,256], index: 2, kind: input, shape index: {}]   ;;  %s321_s3 = inlined_call_operand.vmem [shape: bf16[8,256], index: 3, kind: output, shape index: {}]  }
   0x1   :  { %v216_v0 = vld [vmem:[%s318_s1 + $0x4] ss:$8 sps:$4 sm:$0xff]   ;;  %152 = vmatprep.mubr.bf16.mxu0 %v240_v1  ;;  %v218_v2 = vld [vmem:[%s318_s1] ss:$8 sps:$4 sm:$0xff]   ;;  %v219_v3 = vld [vmem:[%s318_s1 + $0x14] ss:$8 sps:$4 sm:$0xff]  }
   0x2   :  { %120 = vmatprep.subr.bf16.mxu0 %v216_v0  ;;  %v221_v4 = vld [vmem:[%s318_s1 + $0x10] ss:$8 sps:$4 sm:$0xff]   ;;  %v222_v5 = vld [vmem:[%s318_s1 + $0x24] ss:$8 sps:$4 sm:$0xff]   ;;  %v224_v6 = vld [vmem:[%s318_s1 + $0x20] ss:$8 sps:$4 sm:$0xff]  }
   0x3   :  { %121 = vmatpush1.bf16.msra.mxu0 %v218_v2  ;;  %v225_v7 = vld [vmem:[%s318_s1 + $0x34] ss:$8 sps:$4 sm:$0xff]   ;;  %v227_v8 = vld [vmem:[%s318_s1 + $0x30] ss:$8 sps:$4 sm:$0xff]   ;;  %v228_v9 = vld [vmem:[%s318_s1 + $0x44] ss:$8 sps:$4 sm:$0xff]  }
   0x4   :  { %122 = vmatprep.subr.bf16.mxu0 %v219_v3  ;;  %v230_v10 = vld [vmem:[%s318_s1 + $0x40] ss:$8 sps:$4 sm:$0xff]   ;;  %v231_v11 = vld [vmem:[%s318_s1 + $0x54] ss:$8 sps:$4 sm:$0xff]   ;;  %v233_v12 = vld [vmem:[%s318_s1 + $0x50] ss:$8 sps:$4 sm:$0xff]  }
   0x5   :  { %v234_v13 = vld [vmem:[%s318_s1 + $0x64] ss:$8 sps:$4 sm:$0xff]   ;;  %v236_v14 = vld [vmem:[%s318_s1 + $0x60] ss:$8 sps:$4 sm:$0xff]   ;;  %v237_v15 = vld [vmem:[%s318_s1 + $0x74] ss:$8 sps:$4 sm:$0xff]  }
   0x6   :  { %v239_v16 = vld [vmem:[%s318_s1 + $0x70] ss:$8 sps:$4 sm:$0xff]   ;;  %v23_v17 = vld [vmem:[%s319_s0] sm:$0xf]  ;;  %v173_v19 = vshrl.u32 %v172_v18, 7 }
   0x7   :  { %123 = vmatpush1.bf16.msra.mxu0 %v221_v4  ;;  %v170_v21 = vld [vmem:[%s320_s2] sm:$0x3] }
   0x8   :  { %124 = vmatprep.subr.bf16.mxu0 %v222_v5  ;;  %v174_v20 = vsub.s32 0, %v173_v19  ;;  %v178_v22 = vsub.s32 1, %v173_v19 }
   0xa   :  { %v175_v23 = vrot.slane %v170_v21, %v174_v20  ;;  %v179_v24 = vrot.slane %v170_v21, %v178_v22 }
   0xb   :  { %125 = vmatpush1.bf16.msra.mxu0 %v224_v6 }
   0xc   :  { %126 = vmatprep.subr.bf16.mxu0 %v225_v7 }
   0xf   :  { %127 = vmatpush1.bf16.msra.mxu0 %v227_v8 }
  0x10   :  { %128 = vmatprep.subr.bf16.mxu0 %v228_v9 }
  0x13   :  { %129 = vmatpush1.bf16.msra.mxu0 %v230_v10 }
  0x14   :  { %130 = vmatprep.subr.bf16.mxu0 %v231_v11 }
  0x17   :  { %131 = vmatpush1.bf16.msra.mxu0 %v233_v12 }
  0x18   :  { %132 = vmatprep.subr.bf16.mxu0 %v234_v13 }
  0x1b   :  { %133 = vmatpush1.bf16.msra.mxu0 %v236_v14 }
  0x1c   :  { %134 = vmatprep.subr.bf16.mxu0 %v237_v15 }
  0x1f   :  { %135 = vmatpush1.bf16.msra.mxu0 %v239_v16 }
  0x22   :  { %153 = vmatmul.mubr.bf16.vlgmr.msra.gmra.mrb[0].mxu0 %v23_v17 }
  0xf5   :  { %v154_v25 = vpop.f32.mrb[0].mxu0 }
  0xf6   :  { %v182_v26 = vadd.f32 %v175_v23, %v154_v25  ;;  %v156_v27 = vpop.f32.mrb[1].mxu0 }
  0xf7   :  { %v183_v28 = vadd.f32 %v179_v24, %v156_v27  ;;  %v158_v29 = vpop.f32.mrb[2].mxu0 }
  0xf8   :  { %v159_v30 = vpop.f32.mrb[3].mxu0 }
  0xf9   :  { %v214_v31 = vpack.c.bf16 %v183_v28, %v182_v26 }
  0xfb   :  { %192 = vst [vmem:[%s321_s3] sm:$0xff] %v214_v31 }

// kernel: _lambda_.33
= control target key start
LH: loop header
LB: loop body
LE: loop exit
PB: predicated region body
PF: predicated region fallthrough
CT: control target
= control target key end

     0   :  { %s1131_s15 = smov 0   ;;  %s1133_s16 = smov 0   ;;  %s1233_s0 = inlined_call_operand.vmem [shape: bf16[8,2304], index: 0, kind: input, shape index: {}]   ;;  %s1234_s1 = inlined_call_operand.vmem [shape: bf16[2304,256], index: 1, kind: input, shape index: {}]   ;;  %s1235_s2 = inlined_call_operand.vmem [shape: f32[1,256], index: 2, kind: input, shape index: {}]   ;;  %s1236_s3 = inlined_call_operand.vmem [shape: bf16[8,256], index: 3, kind: input, shape index: {}]   ;;  %s1237_s4 = inlined_call_operand.vmem [shape: bf16[8,256], index: 4, kind: output, shape index: {}]  }
   0x1   :  { %s1135_s17 = smov 0  }
   0x2 LB: > { %s26_s18 = sadd.s32 1, %s1098_s16  ;;  %p915_p0 = scmp.ge.s32.totalorder %s1102_s17, 1  ;;  %s1102_s17 = sphi %s1135_s17, %s14_s17   ;;  %s1098_s16 = sphi %s1133_s16, %s1239_s16   ;;  %s1094_s15 = sphi %s1131_s15, %s1238_s15  }
   0x3   : > { %p27_p1 = scmp.ge.s32.totalorder %s26_s18, 6  ;;  %p236_p2 = scmp.lt.s32.totalorder %s1102_s17, 7 }
   0x5   : > { %s1241_s18 = smov (%p27_p1, %s26_s18), 0  ;;  %p237_p3 = pnand %p915_p0, %p236_p2 }
   0x6   : > { %s293_s19 = smul.u32 (!%p237_p3), 3, %s1094_s15  ;;  %p919_p6 = scmp.ne.s32.totalorder (!%p237_p3), %s1094_s15, 0 }
   0x7   : > { %240 = sbr.rel (%p237_p3) target bundleno = 323 (0x143), region = 36 }
   0x8   : > { %s303_s20 = smul.u32 (!%p237_p3), 48, %s1094_s15  ;;  %p296_p4 = scmp.lt.s32.totalorder (!%p237_p3), %s293_s19, 17 }
   0xa   : > { %p305_p5 = scmp.lt.s32.totalorder (!%p237_p3), %s303_s20, 287 }
   0xe   : > { %s1243_s19 = smov (!%p296_p4, %s293_s19), 17  ;;  %s1245_s20 = smov (!%p305_p5, %s303_s20), 287 }
   0xf   : > { %s916_s21 = sshll.u32 %s1243_s19, 2  ;;  %s977_s25 = sshll.u32 %s1245_s20, 3  ;;  %v1104_v0 = vmov (!%p919_p6), 0.0  }
  0x10   : > { %s1156_s24 = scalar_lea.vmem %s1233_s0, %s916_s21  ;;  %s1161_s28 = scalar_lea.vmem %s1234_s1, %s977_s25  ;;  %345 = vst [vmem:[#allocation2] sm:$0xff] (!%p919_p6), %v1104_v0  ;;  %346 = vst [vmem:[#allocation2 + $0x8] sm:$0xff] (!%p919_p6), %v1104_v0 }
  0x11   : > { %344 = sbr.rel (%p919_p6) target bundleno = 24 (0x18), region = 40 }
  0x18 PF: > { %v1005_v1 = vld [vmem:[%s1161_s28 + $0x4] ss:$8 sps:$4 sm:$0xff]   ;;  %v1007_v2 = vld [vmem:[%s1161_s28] ss:$8 sps:$4 sm:$0xff]   ;;  %v1105_v3 = vmov 0   ;;  %p971_p7 = scmp.ne.s32.totalorder %s1094_s15, 5 }
  0x19   : > { %723 = vmatprep.mubr.bf16.mxu1 %v1105_v3  ;;  %650 = vmatprep.subr.bf16.mxu0 %v1005_v1  ;;  %v1008_v4 = vld [vmem:[%s1161_s28 + $0x14] ss:$8 sps:$4 sm:$0xff]   ;;  %v1010_v5 = vld [vmem:[%s1161_s28 + $0x10] ss:$8 sps:$4 sm:$0xff]   ;;  %v1011_v6 = vld [vmem:[%s1161_s28 + $0x24] ss:$8 sps:$4 sm:$0xff]  }
  0x1a   : > { %651 = vmatpush1.bf16.msra.mxu0 %v1007_v2  ;;  %v1013_v7 = vld [vmem:[%s1161_s28 + $0x20] ss:$8 sps:$4 sm:$0xff]   ;;  %v1014_v8 = vld [vmem:[%s1161_s28 + $0x34] ss:$8 sps:$4 sm:$0xff]   ;;  %v1016_v9 = vld [vmem:[%s1161_s28 + $0x30] ss:$8 sps:$4 sm:$0xff]  }
  0x1b   : > { %652 = vmatprep.subr.bf16.mxu0 %v1008_v4  ;;  %v1029_v10 = vld [vmem:[%s1161_s28 + $0x104] ss:$8 sps:$4 sm:$0xff]   ;;  %v1031_v11 = vld [vmem:[%s1161_s28 + $0x100] ss:$8 sps:$4 sm:$0xff]   ;;  %v1035_v13 = vld [vmem:[%s1161_s28 + $0x114] ss:$8 sps:$4 sm:$0xff]   ;;  %v744_v4 = vlaneseq (!%p971_p7) }
  0x1c   : > { %v1017_v12 = vld [vmem:[%s1161_s28 + $0x44] ss:$8 sps:$4 sm:$0xff]   ;;  %691 = vmatprep.subr.bf16.mxu1 %v1029_v10  ;;  %v1037_v14 = vld [vmem:[%s1161_s28 + $0x110] ss:$8 sps:$4 sm:$0xff]   ;;  %v1019_v15 = vld [vmem:[%s1161_s28 + $0x40] ss:$8 sps:$4 sm:$0xff]  }
  0x1d   : > { %692 = vmatpush1.bf16.msra.mxu1 %v1031_v11  ;;  %v1020_v16 = vld [vmem:[%s1161_s28 + $0x54] ss:$8 sps:$4 sm:$0xff]   ;;  %v1041_v17 = vld [vmem:[%s1161_s28 + $0x124] ss:$8 sps:$4 sm:$0xff]   ;;  %v1043_v18 = vld [vmem:[%s1161_s28 + $0x120] ss:$8 sps:$4 sm:$0xff]  }
  0x1e   : > { %653 = vmatpush1.bf16.msra.mxu0 %v1010_v5  ;;  %693 = vmatprep.subr.bf16.mxu1 %v1035_v13  ;;  %v1022_v19 = vld [vmem:[%s1161_s28 + $0x50] ss:$8 sps:$4 sm:$0xff]   ;;  %v1047_v20 = vld [vmem:[%s1161_s28 + $0x134] ss:$8 sps:$4 sm:$0xff]   ;;  %v1023_v21 = vld [vmem:[%s1161_s28 + $0x64] ss:$8 sps:$4 sm:$0xff]  }
  0x1f   : > { %654 = vmatprep.subr.bf16.mxu0 %v1011_v6  ;;  %v1049_v22 = vld [vmem:[%s1161_s28 + $0x130] ss:$8 sps:$4 sm:$0xff]   ;;  %v1025_v23 = vld [vmem:[%s1161_s28 + $0x60] ss:$8 sps:$4 sm:$0xff]   ;;  %v1053_v24 = vld [vmem:[%s1161_s28 + $0x144] ss:$8 sps:$4 sm:$0xff]  }
  0x20   : > { %v1026_v25 = vld [vmem:[%s1161_s28 + $0x74] ss:$8 sps:$4 sm:$0xff]   ;;  %v1055_v26 = vld [vmem:[%s1161_s28 + $0x140] ss:$8 sps:$4 sm:$0xff]   ;;  %v1028_v27 = vld [vmem:[%s1161_s28 + $0x70] ss:$8 sps:$4 sm:$0xff]  }
  0x21   : > { %694 = vmatpush1.bf16.msra.mxu1 %v1037_v14  ;;  %v1059_v28 = vld [vmem:[%s1161_s28 + $0x154] ss:$8 sps:$4 sm:$0xff]   ;;  %v1032_v29 = vld [vmem:[%s1161_s28 + $0x84] ss:$8 sps:$4 sm:$0xff]   ;;  %v1061_v30 = vld [vmem:[%s1161_s28 + $0x150] ss:$8 sps:$4 sm:$0xff]  }
  0x22   : > { %655 = vmatpush1.bf16.msra.mxu0 %v1013_v7  ;;  %695 = vmatprep.subr.bf16.mxu1 %v1041_v17  ;;  %v1034_v31 = vld [vmem:[%s1161_s28 + $0x80] ss:$8 sps:$4 sm:$0xff]   ;;  %v1065_v32 = vld [vmem:[%s1161_s28 + $0x164] ss:$8 sps:$4 sm:$0xff]   ;;  %v1038_v33 = vld [vmem:[%s1161_s28 + $0x94] ss:$8 sps:$4 sm:$0xff]  }
  0x23   : > { %656 = vmatprep.subr.bf16.mxu0 %v1014_v8  ;;  %v349_v34 = vld [vmem:[%s1156_s24] sm:$0xff]  ;;  %v1040_v37 = vld [vmem:[%s1161_s28 + $0x90] ss:$8 sps:$4 sm:$0xff]   ;;  %v1071_v38 = vld [vmem:[%s1161_s28 + $0x174] ss:$8 sps:$4 sm:$0xff]   ;;  %v745_v5 = vshrl.u32 (!%p971_p7), %v744_v4, 7 }
  0x24   : > { %v921_v35 = vcombine.high %v349_v34, %v349_v34  ;;  %v1067_v36 = vld [vmem:[%s1161_s28 + $0x160] ss:$8 sps:$4 sm:$0xff]   ;;  %v1044_v39 = vld [vmem:[%s1161_s28 + $0xa4] ss:$8 sps:$4 sm:$0xff]   ;;  %v1073_v40 = vld [vmem:[%s1161_s28 + $0x170] ss:$8 sps:$4 sm:$0xff]   ;;  %v920_v53 = vcombine.low %v349_v34, %v349_v34 }
  0x25   : > { %696 = vmatpush1.bf16.msra.mxu1 %v1043_v18  ;;  %v1046_v41 = vld [vmem:[%s1161_s28 + $0xa0] ss:$8 sps:$4 sm:$0xff]   ;;  %v1050_v42 = vld [vmem:[%s1161_s28 + $0xb4] ss:$8 sps:$4 sm:$0xff]   ;;  %v1052_v44 = vld [vmem:[%s1161_s28 + $0xb0] ss:$8 sps:$4 sm:$0xff]  }
  0x26   : > { %657 = vmatpush1.bf16.msra.mxu0 %v1016_v9  ;;  %697 = vmatprep.subr.bf16.mxu1 %v1047_v20  ;;  %v1077_v43 = vld [vmem:[%s1156_s24 + $0x8] ss:$0 sps:$4 sm:$0xff]   ;;  %v1056_v45 = vld [vmem:[%s1161_s28 + $0xc4] ss:$8 sps:$4 sm:$0xff]   ;;  %v1062_v47 = vld [vmem:[%s1161_s28 + $0xd4] ss:$8 sps:$4 sm:$0xff]  }
  0x27   : > { %658 = vmatprep.subr.bf16.mxu0 %v1017_v12  ;;  %682 = vmatprep.mubr.bf16.mxu0 %v921_v35  ;;  %v1058_v46 = vld [vmem:[%s1161_s28 + $0xc0] ss:$8 sps:$4 sm:$0xff]   ;;  %v1064_v48 = vld [vmem:[%s1161_s28 + $0xd0] ss:$8 sps:$4 sm:$0xff]   ;;  %v1068_v49 = vld [vmem:[%s1161_s28 + $0xe4] ss:$8 sps:$4 sm:$0xff]  }
  0x28   : > { %v1070_v50 = vld [vmem:[%s1161_s28 + $0xe0] ss:$8 sps:$4 sm:$0xff]   ;;  %v1074_v51 = vld [vmem:[%s1161_s28 + $0xf4] ss:$8 sps:$4 sm:$0xff]   ;;  %v1076_v52 = vld [vmem:[%s1161_s28 + $0xf0] ss:$8 sps:$4 sm:$0xff]  }
  0x29   : > { %698 = vmatpush1.bf16.msra.mxu1 %v1049_v22  ;;  %v347_v58 = vld [vmem:[#allocation2] sm:$0xff]  ;;  %v348_v61 = vld [vmem:[#allocation2 + $0x8] sm:$0xff]  ;;  %v746_v8 = vsub.s32 (!%p971_p7), 0, %v745_v5  ;;  %v750_v9 = vsub.s32 (!%p971_p7), 1, %v745_v5 }
  0x2a   : > { %659 = vmatpush1.bf16.msra.mxu0 %v1019_v15  ;;  %699 = vmatprep.subr.bf16.mxu1 %v1053_v24  ;;  %v742_v6 = vld [vmem:[%s1235_s2] sm:$0x3] (!%p971_p7) }
  0x2b   : > { %660 = vmatprep.subr.bf16.mxu0 %v1020_v16  ;;  %v756_v7 = vld [vmem:[%s1236_s3] sm:$0xff] (!%p971_p7)  ;;  %v747_v12 = vrot.slane (!%p971_p7), %v742_v6, %v746_v8  ;;  %v751_v13 = vrot.slane (!%p971_p7), %v742_v6, %v750_v9 }
  0x2c   : > { %v757_v14 = vunpack.c.l.bf16 (!%p971_p7), %v756_v7  ;;  %v758_v15 = vunpack.c.h.bf16 (!%p971_p7), %v756_v7 }
  0x2d   : > { %700 = vmatpush1.bf16.msra.mxu1 %v1055_v26 }
  0x2e   : > { %661 = vmatpush1.bf16.msra.mxu0 %v1022_v19  ;;  %701 = vmatprep.subr.bf16.mxu1 %v1059_v28 }
  0x2f   : > { %662 = vmatprep.subr.bf16.mxu0 %v1023_v21 }
  0x31   : > { %702 = vmatpush1.bf16.msra.mxu1 %v1061_v30 }
  0x32   : > { %663 = vmatpush1.bf16.msra.mxu0 %v1025_v23  ;;  %703 = vmatprep.subr.bf16.mxu1 %v1065_v32 }
  0x33   : > { %664 = vmatprep.subr.bf16.mxu0 %v1026_v25 }
  0x35   : > { %704 = vmatpush1.bf16.msra.mxu1 %v1067_v36 }
  0x36   : > { %665 = vmatpush1.bf16.msra.mxu0 %v1028_v27  ;;  %705 = vmatprep.subr.bf16.mxu1 %v1071_v38 }
  0x37   : > { %666 = vmatprep.subr.bf16.mxu0 %v1032_v29 }
  0x39   : > { %706 = vmatpush1.bf16.msra.mxu1 %v1073_v40 }
  0x3a   : > { %667 = vmatpush1.bf16.msra.mxu0 %v1034_v31 }
  0x3b   : > { %668 = vmatprep.subr.bf16.mxu0 %v1038_v33 }
  0x3c   : > { %724 = vmatmul.mubr.bf16.vlgmr.msra.gmra.mrb[0].mxu1 %v1077_v43 }
  0x3e   : > { %669 = vmatpush1.bf16.msra.mxu0 %v1040_v37 }
  0x3f   : > { %670 = vmatprep.subr.bf16.mxu0 %v1044_v39 }
  0x42   : > { %671 = vmatpush1.bf16.msra.mxu0 %v1046_v41 }
  0x43   : > { %672 = vmatprep.subr.bf16.mxu0 %v1050_v42 }
  0x46   : > { %673 = vmatpush1.bf16.msra.mxu0 %v1052_v44 }
  0x47   : > { %674 = vmatprep.subr.bf16.mxu0 %v1056_v45 }
  0x4a   : > { %675 = vmatpush1.bf16.msra.mxu0 %v1058_v46 }
  0x4b   : > { %676 = vmatprep.subr.bf16.mxu0 %v1062_v47 }
  0x4e   : > { %677 = vmatpush1.bf16.msra.mxu0 %v1064_v48 }
  0x4f   : > { %678 = vmatprep.subr.bf16.mxu0 %v1068_v49 }
  0x52   : > { %679 = vmatpush1.bf16.msra.mxu0 %v1070_v50 }
  0x53   : > { %680 = vmatprep.subr.bf16.mxu0 %v1074_v51 }
  0x56   : > { %681 = vmatpush1.bf16.msra.mxu0 %v1076_v52 }
  0x59   : > { %683 = vmatmul.mubr.bf16.vlgmr.msra.gmra.mrb[0].mxu0 %v920_v53 }
 0x10f   : > { %v725_v54 = vpop.f32.mrb[0].mxu1 }
 0x110   : > { %v727_v55 = vpop.f32.mrb[1].mxu1 }
 0x111   : > { %v729_v56 = vpop.f32.mrb[2].mxu1 }
 0x112   : > { %v730_v57 = vpop.f32.mrb[3].mxu1 }
 0x12c   : > { %v684_v59 = vpop.f32.mrb[0].mxu0  ;;  %739 = sbr.rel (%p971_p7) target bundleno = 323 (0x143), region = 44 }
 0x12d   : > { %v726_v60 = vadd.f32 %v725_v54, %v684_v59  ;;  %v686_v62 = vpop.f32.mrb[1].mxu0 }
 0x12e   : > { %v728_v63 = vadd.f32 %v727_v55, %v686_v62  ;;  %v688_v0 = vpop.f32.mrb[2].mxu0 }
 0x12f   : > { %v732_v1 = vadd.f32 %v726_v60, %v347_v58  ;;  %v689_v2 = vpop.f32.mrb[3].mxu0 }
 0x130   : > { %v733_v3 = vadd.f32 %v728_v63, %v348_v61 }
 0x131   : > { %734 = vst [vmem:[#allocation2] sm:$0xff] %v732_v1 }
 0x132   : > { %735 = vst [vmem:[#allocation2 + $0x8] sm:$0xff] %v733_v3 }
 0x138   : > { %v740_v10 = vld [vmem:[#allocation2] sm:$0xff] }
 0x139   : > { %v741_v11 = vld [vmem:[#allocation2 + $0x8] sm:$0xff]  ;;  %v754_v16 = vadd.f32 %v747_v12, %v740_v10 }
 0x13a   : > { %v755_v17 = vadd.f32 %v751_v13, %v741_v11 }
 0x13b   : > { %v759_v18 = vadd.f32 %v757_v14, %v754_v16 }
 0x13c   : > { %v760_v19 = vadd.f32 %v758_v15, %v755_v17 }
 0x13d   : > { %v761_v20 = vmax.f32 %v759_v18, 0.0 }
 0x13e   : > { %v762_v21 = vmax.f32 %v760_v19, 0.0 }
 0x140   : > { %v978_v22 = vpack.c.bf16 %v762_v21, %v761_v20 }
 0x142   : > { %771 = vst [vmem:[%s1237_s4] sm:$0xff] %v978_v22 }
 0x143 PF: > { %s14_s17 = sadd.s32 1, %s1102_s17   ;;  %s1238_s15 = smov %s1098_s16 }
 0x144   : > { %p11_p8 = scmp.ge.s32.totalorder %s14_s17, 8   ;;  %s1239_s16 = smov %s1241_s18 }
 0x146   :  { %13 = sbr.rel (!%p11_p8) target bundleno = 2 (0x2), region = 83 }

// kernel: _lambda_.34
= control target key start
LH: loop header
LB: loop body
LE: loop exit
PB: predicated region body
PF: predicated region fallthrough
CT: control target
= control target key end

     0   :  { %s1036_s12 = smov 0   ;;  %s1038_s13 = smov 0   ;;  %s1135_s0 = inlined_call_operand.vmem [shape: bf16[8,2304], index: 0, kind: input, shape index: {}]   ;;  %s1136_s1 = inlined_call_operand.vmem [shape: bf16[2304,256], index: 1, kind: input, shape index: {}]   ;;  %s1137_s2 = inlined_call_operand.vmem [shape: f32[1,256], index: 2, kind: input, shape index: {}]   ;;  %s1138_s3 = inlined_call_operand.vmem [shape: bf16[8,256], index: 3, kind: output, shape index: {}]  }
   0x1   :  { %s1040_s14 = smov 0  }
   0x2 LB: > { %s25_s15 = sadd.s32 1, %s1008_s13  ;;  %p825_p0 = scmp.ge.s32.totalorder %s1012_s14, 1  ;;  %s1012_s14 = sphi %s1040_s14, %s13_s14   ;;  %s1008_s13 = sphi %s1038_s13, %s1140_s13   ;;  %s1004_s12 = sphi %s1036_s12, %s1139_s12  }
   0x3   : > { %p26_p1 = scmp.ge.s32.totalorder %s25_s15, 6  ;;  %p194_p2 = scmp.lt.s32.totalorder %s1012_s14, 7 }
   0x5   : > { %s1142_s15 = smov (%p26_p1, %s25_s15), 0  ;;  %p195_p3 = pnand %p825_p0, %p194_p2 }
   0x6   : > { %s240_s16 = smul.u32 (!%p195_p3), 3, %s1004_s12  ;;  %p829_p6 = scmp.ne.s32.totalorder (!%p195_p3), %s1004_s12, 0 }
   0x7   : > { %198 = sbr.rel (%p195_p3) target bundleno = 321 (0x141), region = 32 }
   0x8   : > { %s250_s17 = smul.u32 (!%p195_p3), 48, %s1004_s12  ;;  %p243_p4 = scmp.lt.s32.totalorder (!%p195_p3), %s240_s16, 17 }
   0xa   : > { %p252_p5 = scmp.lt.s32.totalorder (!%p195_p3), %s250_s17, 287 }
   0xe   : > { %s1144_s16 = smov (!%p243_p4, %s240_s16), 17  ;;  %s1146_s17 = smov (!%p252_p5, %s250_s17), 287 }
   0xf   : > { %s826_s18 = sshll.u32 %s1144_s16, 2  ;;  %s887_s22 = sshll.u32 %s1146_s17, 3  ;;  %v1014_v0 = vmov (!%p829_p6), 0.0  }
  0x10   : > { %s1061_s21 = scalar_lea.vmem %s1135_s0, %s826_s18  ;;  %s1066_s25 = scalar_lea.vmem %s1136_s1, %s887_s22  ;;  %282 = vst [vmem:[#allocation2] sm:$0xff] (!%p829_p6), %v1014_v0  ;;  %283 = vst [vmem:[#allocation2 + $0x8] sm:$0xff] (!%p829_p6), %v1014_v0 }
  0x11   : > { %281 = sbr.rel (%p829_p6) target bundleno = 24 (0x18), region = 36 }
  0x18 PF: > { %v915_v1 = vld [vmem:[%s1066_s25 + $0x4] ss:$8 sps:$4 sm:$0xff]   ;;  %v917_v2 = vld [vmem:[%s1066_s25] ss:$8 sps:$4 sm:$0xff]   ;;  %v1015_v3 = vmov 0   ;;  %p881_p7 = scmp.ne.s32.totalorder %s1004_s12, 5 }
  0x19   : > { %660 = vmatprep.mubr.bf16.mxu1 %v1015_v3  ;;  %587 = vmatprep.subr.bf16.mxu0 %v915_v1  ;;  %v918_v4 = vld [vmem:[%s1066_s25 + $0x14] ss:$8 sps:$4 sm:$0xff]   ;;  %v920_v5 = vld [vmem:[%s1066_s25 + $0x10] ss:$8 sps:$4 sm:$0xff]   ;;  %v921_v6 = vld [vmem:[%s1066_s25 + $0x24] ss:$8 sps:$4 sm:$0xff]  }
  0x1a   : > { %588 = vmatpush1.bf16.msra.mxu0 %v917_v2  ;;  %v923_v7 = vld [vmem:[%s1066_s25 + $0x20] ss:$8 sps:$4 sm:$0xff]   ;;  %v924_v8 = vld [vmem:[%s1066_s25 + $0x34] ss:$8 sps:$4 sm:$0xff]   ;;  %v926_v9 = vld [vmem:[%s1066_s25 + $0x30] ss:$8 sps:$4 sm:$0xff]  }
  0x1b   : > { %589 = vmatprep.subr.bf16.mxu0 %v918_v4  ;;  %v939_v10 = vld [vmem:[%s1066_s25 + $0x104] ss:$8 sps:$4 sm:$0xff]   ;;  %v941_v11 = vld [vmem:[%s1066_s25 + $0x100] ss:$8 sps:$4 sm:$0xff]   ;;  %v945_v13 = vld [vmem:[%s1066_s25 + $0x114] ss:$8 sps:$4 sm:$0xff]   ;;  %v681_v4 = vlaneseq (!%p881_p7) }
  0x1c   : > { %v927_v12 = vld [vmem:[%s1066_s25 + $0x44] ss:$8 sps:$4 sm:$0xff]   ;;  %628 = vmatprep.subr.bf16.mxu1 %v939_v10  ;;  %v947_v14 = vld [vmem:[%s1066_s25 + $0x110] ss:$8 sps:$4 sm:$0xff]   ;;  %v929_v15 = vld [vmem:[%s1066_s25 + $0x40] ss:$8 sps:$4 sm:$0xff]  }
  0x1d   : > { %629 = vmatpush1.bf16.msra.mxu1 %v941_v11  ;;  %v930_v16 = vld [vmem:[%s1066_s25 + $0x54] ss:$8 sps:$4 sm:$0xff]   ;;  %v951_v17 = vld [vmem:[%s1066_s25 + $0x124] ss:$8 sps:$4 sm:$0xff]   ;;  %v953_v18 = vld [vmem:[%s1066_s25 + $0x120] ss:$8 sps:$4 sm:$0xff]  }
  0x1e   : > { %590 = vmatpush1.bf16.msra.mxu0 %v920_v5  ;;  %630 = vmatprep.subr.bf16.mxu1 %v945_v13  ;;  %v932_v19 = vld [vmem:[%s1066_s25 + $0x50] ss:$8 sps:$4 sm:$0xff]   ;;  %v957_v20 = vld [vmem:[%s1066_s25 + $0x134] ss:$8 sps:$4 sm:$0xff]   ;;  %v933_v21 = vld [vmem:[%s1066_s25 + $0x64] ss:$8 sps:$4 sm:$0xff]  }
  0x1f   : > { %591 = vmatprep.subr.bf16.mxu0 %v921_v6  ;;  %v959_v22 = vld [vmem:[%s1066_s25 + $0x130] ss:$8 sps:$4 sm:$0xff]   ;;  %v935_v23 = vld [vmem:[%s1066_s25 + $0x60] ss:$8 sps:$4 sm:$0xff]   ;;  %v963_v24 = vld [vmem:[%s1066_s25 + $0x144] ss:$8 sps:$4 sm:$0xff]  }
  0x20   : > { %v936_v25 = vld [vmem:[%s1066_s25 + $0x74] ss:$8 sps:$4 sm:$0xff]   ;;  %v965_v26 = vld [vmem:[%s1066_s25 + $0x140] ss:$8 sps:$4 sm:$0xff]   ;;  %v938_v27 = vld [vmem:[%s1066_s25 + $0x70] ss:$8 sps:$4 sm:$0xff]  }
  0x21   : > { %631 = vmatpush1.bf16.msra.mxu1 %v947_v14  ;;  %v969_v28 = vld [vmem:[%s1066_s25 + $0x154] ss:$8 sps:$4 sm:$0xff]   ;;  %v942_v29 = vld [vmem:[%s1066_s25 + $0x84] ss:$8 sps:$4 sm:$0xff]   ;;  %v971_v30 = vld [vmem:[%s1066_s25 + $0x150] ss:$8 sps:$4 sm:$0xff]  }
  0x22   : > { %592 = vmatpush1.bf16.msra.mxu0 %v923_v7  ;;  %632 = vmatprep.subr.bf16.mxu1 %v951_v17  ;;  %v944_v31 = vld [vmem:[%s1066_s25 + $0x80] ss:$8 sps:$4 sm:$0xff]   ;;  %v975_v32 = vld [vmem:[%s1066_s25 + $0x164] ss:$8 sps:$4 sm:$0xff]   ;;  %v948_v33 = vld [vmem:[%s1066_s25 + $0x94] ss:$8 sps:$4 sm:$0xff]  }
  0x23   : > { %593 = vmatprep.subr.bf16.mxu0 %v924_v8  ;;  %v286_v34 = vld [vmem:[%s1061_s21] sm:$0xff]  ;;  %v950_v37 = vld [vmem:[%s1066_s25 + $0x90] ss:$8 sps:$4 sm:$0xff]   ;;  %v981_v38 = vld [vmem:[%s1066_s25 + $0x174] ss:$8 sps:$4 sm:$0xff]   ;;  %v682_v5 = vshrl.u32 (!%p881_p7), %v681_v4, 7 }
  0x24   : > { %v831_v35 = vcombine.high %v286_v34, %v286_v34  ;;  %v977_v36 = vld [vmem:[%s1066_s25 + $0x160] ss:$8 sps:$4 sm:$0xff]   ;;  %v954_v39 = vld [vmem:[%s1066_s25 + $0xa4] ss:$8 sps:$4 sm:$0xff]   ;;  %v983_v40 = vld [vmem:[%s1066_s25 + $0x170] ss:$8 sps:$4 sm:$0xff]   ;;  %v830_v53 = vcombine.low %v286_v34, %v286_v34 }
  0x25   : > { %633 = vmatpush1.bf16.msra.mxu1 %v953_v18  ;;  %v956_v41 = vld [vmem:[%s1066_s25 + $0xa0] ss:$8 sps:$4 sm:$0xff]   ;;  %v960_v42 = vld [vmem:[%s1066_s25 + $0xb4] ss:$8 sps:$4 sm:$0xff]   ;;  %v962_v44 = vld [vmem:[%s1066_s25 + $0xb0] ss:$8 sps:$4 sm:$0xff]  }
  0x26   : > { %594 = vmatpush1.bf16.msra.mxu0 %v926_v9  ;;  %634 = vmatprep.subr.bf16.mxu1 %v957_v20  ;;  %v987_v43 = vld [vmem:[%s1061_s21 + $0x8] ss:$0 sps:$4 sm:$0xff]   ;;  %v966_v45 = vld [vmem:[%s1066_s25 + $0xc4] ss:$8 sps:$4 sm:$0xff]   ;;  %v972_v47 = vld [vmem:[%s1066_s25 + $0xd4] ss:$8 sps:$4 sm:$0xff]  }
  0x27   : > { %595 = vmatprep.subr.bf16.mxu0 %v927_v12  ;;  %619 = vmatprep.mubr.bf16.mxu0 %v831_v35  ;;  %v968_v46 = vld [vmem:[%s1066_s25 + $0xc0] ss:$8 sps:$4 sm:$0xff]   ;;  %v974_v48 = vld [vmem:[%s1066_s25 + $0xd0] ss:$8 sps:$4 sm:$0xff]   ;;  %v978_v49 = vld [vmem:[%s1066_s25 + $0xe4] ss:$8 sps:$4 sm:$0xff]  }
  0x28   : > { %v980_v50 = vld [vmem:[%s1066_s25 + $0xe0] ss:$8 sps:$4 sm:$0xff]   ;;  %v984_v51 = vld [vmem:[%s1066_s25 + $0xf4] ss:$8 sps:$4 sm:$0xff]   ;;  %v986_v52 = vld [vmem:[%s1066_s25 + $0xf0] ss:$8 sps:$4 sm:$0xff]  }
  0x29   : > { %635 = vmatpush1.bf16.msra.mxu1 %v959_v22  ;;  %v284_v58 = vld [vmem:[#allocation2] sm:$0xff]  ;;  %v285_v61 = vld [vmem:[#allocation2 + $0x8] sm:$0xff]  ;;  %v683_v7 = vsub.s32 (!%p881_p7), 0, %v682_v5  ;;  %v687_v8 = vsub.s32 (!%p881_p7), 1, %v682_v5 }
  0x2a   : > { %596 = vmatpush1.bf16.msra.mxu0 %v929_v15  ;;  %636 = vmatprep.subr.bf16.mxu1 %v963_v24  ;;  %v679_v6 = vld [vmem:[%s1137_s2] sm:$0x3] (!%p881_p7) }
  0x2b   : > { %597 = vmatprep.subr.bf16.mxu0 %v930_v16  ;;  %v684_v11 = vrot.slane (!%p881_p7), %v679_v6, %v683_v7  ;;  %v688_v12 = vrot.slane (!%p881_p7), %v679_v6, %v687_v8 }
  0x2d   : > { %637 = vmatpush1.bf16.msra.mxu1 %v965_v26 }
  0x2e   : > { %598 = vmatpush1.bf16.msra.mxu0 %v932_v19  ;;  %638 = vmatprep.subr.bf16.mxu1 %v969_v28 }
  0x2f   : > { %599 = vmatprep.subr.bf16.mxu0 %v933_v21 }
  0x31   : > { %639 = vmatpush1.bf16.msra.mxu1 %v971_v30 }
  0x32   : > { %600 = vmatpush1.bf16.msra.mxu0 %v935_v23  ;;  %640 = vmatprep.subr.bf16.mxu1 %v975_v32 }
  0x33   : > { %601 = vmatprep.subr.bf16.mxu0 %v936_v25 }
  0x35   : > { %641 = vmatpush1.bf16.msra.mxu1 %v977_v36 }
  0x36   : > { %602 = vmatpush1.bf16.msra.mxu0 %v938_v27  ;;  %642 = vmatprep.subr.bf16.mxu1 %v981_v38 }
  0x37   : > { %603 = vmatprep.subr.bf16.mxu0 %v942_v29 }
  0x39   : > { %643 = vmatpush1.bf16.msra.mxu1 %v983_v40 }
  0x3a   : > { %604 = vmatpush1.bf16.msra.mxu0 %v944_v31 }
  0x3b   : > { %605 = vmatprep.subr.bf16.mxu0 %v948_v33 }
  0x3c   : > { %661 = vmatmul.mubr.bf16.vlgmr.msra.gmra.mrb[0].mxu1 %v987_v43 }
  0x3e   : > { %606 = vmatpush1.bf16.msra.mxu0 %v950_v37 }
  0x3f   : > { %607 = vmatprep.subr.bf16.mxu0 %v954_v39 }
  0x42   : > { %608 = vmatpush1.bf16.msra.mxu0 %v956_v41 }
  0x43   : > { %609 = vmatprep.subr.bf16.mxu0 %v960_v42 }
  0x46   : > { %610 = vmatpush1.bf16.msra.mxu0 %v962_v44 }
  0x47   : > { %611 = vmatprep.subr.bf16.mxu0 %v966_v45 }
  0x4a   : > { %612 = vmatpush1.bf16.msra.mxu0 %v968_v46 }
  0x4b   : > { %613 = vmatprep.subr.bf16.mxu0 %v972_v47 }
  0x4e   : > { %614 = vmatpush1.bf16.msra.mxu0 %v974_v48 }
  0x4f   : > { %615 = vmatprep.subr.bf16.mxu0 %v978_v49 }
  0x52   : > { %616 = vmatpush1.bf16.msra.mxu0 %v980_v50 }
  0x53   : > { %617 = vmatprep.subr.bf16.mxu0 %v984_v51 }
  0x56   : > { %618 = vmatpush1.bf16.msra.mxu0 %v986_v52 }
  0x59   : > { %620 = vmatmul.mubr.bf16.vlgmr.msra.gmra.mrb[0].mxu0 %v830_v53 }
 0x10f   : > { %v662_v54 = vpop.f32.mrb[0].mxu1 }
 0x110   : > { %v664_v55 = vpop.f32.mrb[1].mxu1 }
 0x111   : > { %v666_v56 = vpop.f32.mrb[2].mxu1 }
 0x112   : > { %v667_v57 = vpop.f32.mrb[3].mxu1 }
 0x12c   : > { %v621_v59 = vpop.f32.mrb[0].mxu0  ;;  %676 = sbr.rel (%p881_p7) target bundleno = 321 (0x141), region = 40 }
 0x12d   : > { %v663_v60 = vadd.f32 %v662_v54, %v621_v59  ;;  %v623_v62 = vpop.f32.mrb[1].mxu0 }
 0x12e   : > { %v665_v63 = vadd.f32 %v664_v55, %v623_v62  ;;  %v625_v0 = vpop.f32.mrb[2].mxu0 }
 0x12f   : > { %v669_v1 = vadd.f32 %v663_v60, %v284_v58  ;;  %v626_v2 = vpop.f32.mrb[3].mxu0 }
 0x130   : > { %v670_v3 = vadd.f32 %v665_v63, %v285_v61 }
 0x131   : > { %671 = vst [vmem:[#allocation2] sm:$0xff] %v669_v1 }
 0x132   : > { %672 = vst [vmem:[#allocation2 + $0x8] sm:$0xff] %v670_v3 }
 0x138   : > { %v677_v9 = vld [vmem:[#allocation2] sm:$0xff] }
 0x139   : > { %v678_v10 = vld [vmem:[#allocation2 + $0x8] sm:$0xff]  ;;  %v691_v13 = vadd.f32 %v684_v11, %v677_v9 }
 0x13a   : > { %v692_v14 = vadd.f32 %v688_v12, %v678_v10 }
 0x13b   : > { %v693_v15 = vmax.f32 %v691_v13, 0.0 }
 0x13c   : > { %v694_v16 = vmax.f32 %v692_v14, 0.0 }
 0x13e   : > { %v888_v17 = vpack.c.bf16 %v694_v16, %v693_v15 }
 0x140   : > { %703 = vst [vmem:[%s1138_s3] sm:$0xff] %v888_v17 }
 0x141 PF: > { %s13_s14 = sadd.s32 1, %s1012_s14   ;;  %s1139_s12 = smov %s1008_s13 }
 0x142   : > { %p10_p8 = scmp.ge.s32.totalorder %s13_s14, 8   ;;  %s1140_s13 = smov %s1142_s15 }
 0x144   :  { %12 = sbr.rel (!%p10_p8) target bundleno = 2 (0x2), region = 76 }

// kernel: _lambda_.36
= control target key start
LH: loop header
LB: loop body
LE: loop exit
PB: predicated region body
PF: predicated region fallthrough
CT: control target
= control target key end

     0   :  { %s1319_s12 = smov 0   ;;  %s1321_s13 = smov 0   ;;  %s1582_s0 = inlined_call_operand.vmem [shape: bf16[8,2304], index: 0, kind: input, shape index: {}]   ;;  %s1583_s1 = inlined_call_operand.vmem [shape: bf16[2304,512], index: 1, kind: input, shape index: {}]   ;;  %s1584_s2 = inlined_call_operand.vmem [shape: f32[1,512], index: 2, kind: input, shape index: {}]   ;;  %s1585_s3 = inlined_call_operand.vmem [shape: bf16[8,512], index: 3, kind: output, shape index: {}]  }
   0x1   :  { %s1323_s14 = smov 0   ;;  %s1325_s15 = smov 0  }
   0x2   :  { %s1327_s16 = smov 0   ;;  %s1329_s17 = smov 0  }
   0x3   :  { %s1331_s18 = smov 0  }
   0x4 LB: > { %s25_s19 = sadd.s32 1, %s1287_s16  ;;  %s28_s20 = sadd.s32 1, %s1291_s17  ;;  %s1295_s18 = sphi %s1331_s18, %s13_s18   ;;  %s1291_s17 = sphi %s1329_s17, %s1591_s17   ;;  %s1287_s16 = sphi %s1327_s16, %s1590_s16   ;;  %s1283_s15 = sphi %s1325_s15, %s1589_s15   ;;  %s1279_s14 = sphi %s1323_s14, %s1588_s14   ;;  %s1275_s13 = sphi %s1321_s13, %s1587_s13   ;;  %s1271_s12 = sphi %s1319_s12, %s1586_s12  }
   0x5   : > { %p26_p0 = scmp.ge.s32.totalorder %s25_s19, 6  ;;  %p76_p1 = scmp.ne.s32.totalorder %s1275_s13, %s1271_s12 }
   0x6   : > { %p77_p2 = scmp.eq.s32.totalorder %s1295_s18, 0  ;;  %s69_s24 = sadd.s32 1, %s1275_s13 }
   0x7   : > { %s1593_s19 = smov (%p26_p0, %s25_s19), 0  ;;  %s1595_s20 = smov (!%p26_p0, %s28_s20), %s1291_s17 }
   0x8   : > { %p78_p3 = por %p77_p2, %p76_p1  ;;  %p30_p4 = scmp.ge.s32.totalorder %s1595_s20, 2 }
   0x9   : > { %s64_s21 = ssub.s32 %s1287_s16, %s1593_s19  ;;  %p1039_p6 = scmp.ge.s32.totalorder %s1295_s18, 12 }
   0xa   : > { %s1597_s20 = smov (%p30_p4, %s1595_s20), 0 }
   0xb   : > { %s65_s22 = ssub.s32 %s1291_s17, %s1597_s20  ;;  %156 = sbr.rel (%p1039_p6) target bundleno = 50 (0x32), region = 16 }
   0xc   : > { %s66_s23 = sor.u32 %s65_s22, %s64_s21 }
   0xd   : > { %p67_p5 = scmp.eq.s32.totalorder %s66_s23, 0 }
   0xf   : > { %s1370_s25 = scalar_select %p67_p5, %s1275_s13, %s69_s24  }
  0x12   : > { %172 = sbr.rel (!%p78_p3) target bundleno = 50 (0x32), region = 24  ;;  %s174_s26 = sand.u32 (%p78_p3), 1, %s1275_s13  }
  0x13   : > { %s1106_s27 = smul.u32 (%p78_p3), 384, %s174_s26  ;;  %s1040_s28 = sshll.u32 (%p78_p3), %s1291_s17, 1 }
  0x14   : > { %s1104_s29 = smul.u32 (%p78_p3), 192, %s1287_s16 }
  0x15   : > { %s1384_s8 = scalar_lea.vmem (%p78_p3), [#allocation3], %s1106_s27 }
  0x16   : > { %s180_s30 = sadd.s32 (%p78_p3), %s1104_s29, %s1040_s28 }
  0x17   : > { %s1042_s4 = sshll.u32 (%p78_p3), %s180_s30, 2 }
  0x18   : > { %s1379_s7 = scalar_lea.vmem (%p78_p3), %s1583_s1, %s1042_s4 }
  0x19   : > { %v304_v0 = vld [vmem:[%s1379_s7] sm:$0xff]  ;;  %v306_v1 = vld [vmem:[%s1379_s7 + $0x10] sm:$0xff] }
  0x1a   : > { %v308_v2 = vld [vmem:[%s1379_s7 + $0x20] sm:$0xff]  ;;  %305 = vst [vmem:[%s1384_s8] sm:$0xff] %v304_v0  ;;  %307 = vst [vmem:[%s1384_s8 + $0x8] sm:$0xff] %v306_v1  ;;  %v310_v3 = vld [vmem:[%s1379_s7 + $0x30] sm:$0xff] }
  0x1b   : > { %309 = vst [vmem:[%s1384_s8 + $0x10] sm:$0xff] %v308_v2  ;;  %v312_v4 = vld [vmem:[%s1379_s7 + $0x40] sm:$0xff]  ;;  %v314_v5 = vld [vmem:[%s1379_s7 + $0x50] sm:$0xff]  ;;  %311 = vst [vmem:[%s1384_s8 + $0x18] sm:$0xff] %v310_v3 }
  0x1c   : > { %313 = vst [vmem:[%s1384_s8 + $0x20] sm:$0xff] %v312_v4  ;;  %315 = vst [vmem:[%s1384_s8 + $0x28] sm:$0xff] %v314_v5  ;;  %v316_v6 = vld [vmem:[%s1379_s7 + $0x60] sm:$0xff]  ;;  %v318_v7 = vld [vmem:[%s1379_s7 + $0x70] sm:$0xff] }
  0x1d   : > { %v320_v8 = vld [vmem:[%s1379_s7 + $0x80] sm:$0xff]  ;;  %317 = vst [vmem:[%s1384_s8 + $0x30] sm:$0xff] %v316_v6  ;;  %319 = vst [vmem:[%s1384_s8 + $0x38] sm:$0xff] %v318_v7  ;;  %v322_v9 = vld [vmem:[%s1379_s7 + $0x90] sm:$0xff] }
  0x1e   : > { %321 = vst [vmem:[%s1384_s8 + $0x40] sm:$0xff] %v320_v8  ;;  %v324_v10 = vld [vmem:[%s1379_s7 + $0xa0] sm:$0xff]  ;;  %v326_v11 = vld [vmem:[%s1379_s7 + $0xb0] sm:$0xff]  ;;  %323 = vst [vmem:[%s1384_s8 + $0x48] sm:$0xff] %v322_v9 }
  0x1f   : > { %325 = vst [vmem:[%s1384_s8 + $0x50] sm:$0xff] %v324_v10  ;;  %327 = vst [vmem:[%s1384_s8 + $0x58] sm:$0xff] %v326_v11  ;;  %v328_v12 = vld [vmem:[%s1379_s7 + $0xc0] sm:$0xff]  ;;  %v330_v13 = vld [vmem:[%s1379_s7 + $0xd0] sm:$0xff] }
  0x20   : > { %v332_v14 = vld [vmem:[%s1379_s7 + $0xe0] sm:$0xff]  ;;  %329 = vst [vmem:[%s1384_s8 + $0x60] sm:$0xff] %v328_v12  ;;  %331 = vst [vmem:[%s1384_s8 + $0x68] sm:$0xff] %v330_v13  ;;  %v334_v15 = vld [vmem:[%s1379_s7 + $0xf0] sm:$0xff] }
  0x21   : > { %333 = vst [vmem:[%s1384_s8 + $0x70] sm:$0xff] %v332_v14  ;;  %v336_v16 = vld [vmem:[%s1379_s7 + $0x100] sm:$0xff]  ;;  %v338_v17 = vld [vmem:[%s1379_s7 + $0x110] sm:$0xff]  ;;  %335 = vst [vmem:[%s1384_s8 + $0x78] sm:$0xff] %v334_v15 }
  0x22   : > { %337 = vst [vmem:[%s1384_s8 + $0x80] sm:$0xff] %v336_v16  ;;  %339 = vst [vmem:[%s1384_s8 + $0x88] sm:$0xff] %v338_v17  ;;  %v340_v18 = vld [vmem:[%s1379_s7 + $0x120] sm:$0xff]  ;;  %v342_v19 = vld [vmem:[%s1379_s7 + $0x130] sm:$0xff] }
  0x23   : > { %v344_v20 = vld [vmem:[%s1379_s7 + $0x140] sm:$0xff]  ;;  %341 = vst [vmem:[%s1384_s8 + $0x90] sm:$0xff] %v340_v18  ;;  %343 = vst [vmem:[%s1384_s8 + $0x98] sm:$0xff] %v342_v19  ;;  %v346_v21 = vld [vmem:[%s1379_s7 + $0x150] sm:$0xff] }
  0x24   : > { %345 = vst [vmem:[%s1384_s8 + $0xa0] sm:$0xff] %v344_v20  ;;  %v348_v22 = vld [vmem:[%s1379_s7 + $0x160] sm:$0xff]  ;;  %v350_v23 = vld [vmem:[%s1379_s7 + $0x170] sm:$0xff]  ;;  %347 = vst [vmem:[%s1384_s8 + $0xa8] sm:$0xff] %v346_v21 }
  0x25   : > { %349 = vst [vmem:[%s1384_s8 + $0xb0] sm:$0xff] %v348_v22  ;;  %351 = vst [vmem:[%s1384_s8 + $0xb8] sm:$0xff] %v350_v23  ;;  %v352_v24 = vld [vmem:[%s1379_s7 + $0x180] sm:$0xff]  ;;  %v354_v25 = vld [vmem:[%s1379_s7 + $0x190] sm:$0xff] }
  0x26   : > { %v356_v26 = vld [vmem:[%s1379_s7 + $0x1a0] sm:$0xff]  ;;  %353 = vst [vmem:[%s1384_s8 + $0xc0] sm:$0xff] %v352_v24  ;;  %355 = vst [vmem:[%s1384_s8 + $0xc8] sm:$0xff] %v354_v25  ;;  %v358_v27 = vld [vmem:[%s1379_s7 + $0x1b0] sm:$0xff] }
  0x27   : > { %357 = vst [vmem:[%s1384_s8 + $0xd0] sm:$0xff] %v356_v26  ;;  %v360_v28 = vld [vmem:[%s1379_s7 + $0x1c0] sm:$0xff]  ;;  %v362_v29 = vld [vmem:[%s1379_s7 + $0x1d0] sm:$0xff]  ;;  %359 = vst [vmem:[%s1384_s8 + $0xd8] sm:$0xff] %v358_v27 }
  0x28   : > { %361 = vst [vmem:[%s1384_s8 + $0xe0] sm:$0xff] %v360_v28  ;;  %363 = vst [vmem:[%s1384_s8 + $0xe8] sm:$0xff] %v362_v29  ;;  %v364_v30 = vld [vmem:[%s1379_s7 + $0x1e0] sm:$0xff]  ;;  %v366_v31 = vld [vmem:[%s1379_s7 + $0x1f0] sm:$0xff] }
  0x29   : > { %v368_v32 = vld [vmem:[%s1379_s7 + $0x200] sm:$0xff]  ;;  %365 = vst [vmem:[%s1384_s8 + $0xf0] sm:$0xff] %v364_v30  ;;  %367 = vst [vmem:[%s1384_s8 + $0xf8] sm:$0xff] %v366_v31  ;;  %v370_v33 = vld [vmem:[%s1379_s7 + $0x210] sm:$0xff] }
  0x2a   : > { %369 = vst [vmem:[%s1384_s8 + $0x100] sm:$0xff] %v368_v32  ;;  %v372_v34 = vld [vmem:[%s1379_s7 + $0x220] sm:$0xff]  ;;  %v374_v35 = vld [vmem:[%s1379_s7 + $0x230] sm:$0xff]  ;;  %371 = vst [vmem:[%s1384_s8 + $0x108] sm:$0xff] %v370_v33 }
  0x2b   : > { %373 = vst [vmem:[%s1384_s8 + $0x110] sm:$0xff] %v372_v34  ;;  %375 = vst [vmem:[%s1384_s8 + $0x118] sm:$0xff] %v374_v35  ;;  %v376_v36 = vld [vmem:[%s1379_s7 + $0x240] sm:$0xff]  ;;  %v378_v37 = vld [vmem:[%s1379_s7 + $0x250] sm:$0xff] }
  0x2c   : > { %v380_v38 = vld [vmem:[%s1379_s7 + $0x260] sm:$0xff]  ;;  %377 = vst [vmem:[%s1384_s8 + $0x120] sm:$0xff] %v376_v36  ;;  %379 = vst [vmem:[%s1384_s8 + $0x128] sm:$0xff] %v378_v37  ;;  %v382_v39 = vld [vmem:[%s1379_s7 + $0x270] sm:$0xff] }
  0x2d   : > { %381 = vst [vmem:[%s1384_s8 + $0x130] sm:$0xff] %v380_v38  ;;  %v384_v40 = vld [vmem:[%s1379_s7 + $0x280] sm:$0xff]  ;;  %v386_v41 = vld [vmem:[%s1379_s7 + $0x290] sm:$0xff]  ;;  %383 = vst [vmem:[%s1384_s8 + $0x138] sm:$0xff] %v382_v39 }
  0x2e   : > { %385 = vst [vmem:[%s1384_s8 + $0x140] sm:$0xff] %v384_v40  ;;  %387 = vst [vmem:[%s1384_s8 + $0x148] sm:$0xff] %v386_v41  ;;  %v388_v42 = vld [vmem:[%s1379_s7 + $0x2a0] sm:$0xff]  ;;  %v390_v43 = vld [vmem:[%s1379_s7 + $0x2b0] sm:$0xff] }
  0x2f   : > { %v392_v44 = vld [vmem:[%s1379_s7 + $0x2c0] sm:$0xff]  ;;  %389 = vst [vmem:[%s1384_s8 + $0x150] sm:$0xff] %v388_v42  ;;  %391 = vst [vmem:[%s1384_s8 + $0x158] sm:$0xff] %v390_v43  ;;  %v394_v45 = vld [vmem:[%s1379_s7 + $0x2d0] sm:$0xff] }
  0x30   : > { %393 = vst [vmem:[%s1384_s8 + $0x160] sm:$0xff] %v392_v44  ;;  %v396_v46 = vld [vmem:[%s1379_s7 + $0x2e0] sm:$0xff]  ;;  %v398_v47 = vld [vmem:[%s1379_s7 + $0x2f0] sm:$0xff]  ;;  %395 = vst [vmem:[%s1384_s8 + $0x168] sm:$0xff] %v394_v45 }
  0x31   : > { %397 = vst [vmem:[%s1384_s8 + $0x170] sm:$0xff] %v396_v46  ;;  %399 = vst [vmem:[%s1384_s8 + $0x178] sm:$0xff] %v398_v47 }
  0x32 PF: > { %p1043_p7 = scmp.ge.s32.totalorder %s1295_s18, 1  ;;  %p412_p8 = scmp.lt.s32.totalorder %s1295_s18, 13 }
  0x34   : > { %p413_p9 = pnand %p1043_p7, %p412_p8 }
  0x35   : > { %s419_s9 = sand.u32 (!%p413_p9), 1, %s1271_s12   ;;  %s459_s10 = smul.u32 (!%p413_p9), 3, %s1279_s14 }
  0x36   : > { %416 = sbr.rel (%p413_p9) target bundleno = 368 (0x170), region = 66  ;;  %s1045_s21 = sshll.u32 (!%p413_p9), %s1283_s15, 1 }
  0x37   : > { %s1107_s11 = smul.u32 (!%p413_p9), 384, %s419_s9  ;;  %p462_p10 = scmp.lt.s32.totalorder (!%p413_p9), %s459_s10, 17 }
  0x38   : > { %p472_p11 = scmp.lt.s32.totalorder (!%p413_p9), %s1045_s21, 3  ;;  %p1048_p12 = scmp.ne.s32.totalorder (!%p413_p9), %s1279_s14, 0 }
  0x39   : > { %s1501_s5 = scalar_lea.vmem (!%p413_p9), [#allocation3], %s1107_s11 }
  0x3d   : > { %s1599_s10 = smov (!%p462_p10, %s459_s10), 17  ;;  %s1601_s21 = smov (!%p472_p11, %s1045_s21), 3 }
  0x3e   : > { %s1044_s22 = sshll.u32 %s1599_s10, 2  ;;  %s474_s12 = scalar_lea.vmem %s1584_s2, %s1601_s21  ;;  %v1297_v48 = vmov (!%p1048_p12), 0.0  }
  0x3f   : > { %s1489_s26 = scalar_lea.vmem %s1582_s0, %s1044_s22  ;;  %s1047_s29 = sshll.u32 %s1601_s21, 2  ;;  %491 = vst [vmem:[#allocation2] sm:$0xff] (!%p1048_p12), %v1297_v48  ;;  %492 = vst [vmem:[#allocation2 + $0x8] sm:$0xff] (!%p1048_p12), %v1297_v48 }
  0x40   : > { %s1499_s4 = scalar_lea.vmem %s1585_s3, %s1047_s29  ;;  %490 = sbr.rel (%p1048_p12) target bundleno = 71 (0x47), region = 74 }
  0x47 PF: > { %v1166_v49 = vld [vmem:[%s1501_s5 + $0x4] ss:$8 sps:$4 sm:$0xff]   ;;  %v1168_v50 = vld [vmem:[%s1501_s5] ss:$8 sps:$4 sm:$0xff]   ;;  %v1298_v51 = vmov 0   ;;  %v495_v18 = vld [vmem:[%s1489_s26] sm:$0xff] }
  0x48   : > { %869 = vmatprep.mubr.bf16.mxu1 %v1298_v51  ;;  %796 = vmatprep.subr.bf16.mxu0 %v1166_v49  ;;  %v1169_v52 = vld [vmem:[%s1501_s5 + $0x14] ss:$8 sps:$4 sm:$0xff]   ;;  %v1171_v53 = vld [vmem:[%s1501_s5 + $0x10] ss:$8 sps:$4 sm:$0xff]   ;;  %v1172_v54 = vld [vmem:[%s1501_s5 + $0x24] ss:$8 sps:$4 sm:$0xff]   ;;  %v1050_v19 = vcombine.high %v495_v18, %v495_v18  ;;  %v1049_v37 = vcombine.low %v495_v18, %v495_v18 }
  0x49   : > { %797 = vmatpush1.bf16.msra.mxu0 %v1168_v50  ;;  %v1174_v55 = vld [vmem:[%s1501_s5 + $0x20] ss:$8 sps:$4 sm:$0xff]   ;;  %v1175_v56 = vld [vmem:[%s1501_s5 + $0x34] ss:$8 sps:$4 sm:$0xff]   ;;  %v1177_v57 = vld [vmem:[%s1501_s5 + $0x30] ss:$8 sps:$4 sm:$0xff]  }
  0x4a   : > { %798 = vmatprep.subr.bf16.mxu0 %v1169_v52  ;;  %v1190_v58 = vld [vmem:[%s1501_s5 + $0x104] ss:$8 sps:$4 sm:$0xff]   ;;  %v1192_v59 = vld [vmem:[%s1501_s5 + $0x100] ss:$8 sps:$4 sm:$0xff]   ;;  %v1196_v61 = vld [vmem:[%s1501_s5 + $0x114] ss:$8 sps:$4 sm:$0xff]   ;;  %828 = vmatprep.mubr.bf16.mxu0 %v1050_v19 }
  0x4b   : > { %v1178_v60 = vld [vmem:[%s1501_s5 + $0x44] ss:$8 sps:$4 sm:$0xff]   ;;  %837 = vmatprep.subr.bf16.mxu1 %v1190_v58  ;;  %v1198_v62 = vld [vmem:[%s1501_s5 + $0x110] ss:$8 sps:$4 sm:$0xff]   ;;  %v1180_v63 = vld [vmem:[%s1501_s5 + $0x40] ss:$8 sps:$4 sm:$0xff]  }
  0x4c   : > { %838 = vmatpush1.bf16.msra.mxu1 %v1192_v59  ;;  %v1181_v0 = vld [vmem:[%s1501_s5 + $0x54] ss:$8 sps:$4 sm:$0xff]   ;;  %v1202_v1 = vld [vmem:[%s1501_s5 + $0x124] ss:$8 sps:$4 sm:$0xff]   ;;  %v1204_v2 = vld [vmem:[%s1501_s5 + $0x120] ss:$8 sps:$4 sm:$0xff]  }
  0x4d   : > { %799 = vmatpush1.bf16.msra.mxu0 %v1171_v53  ;;  %839 = vmatprep.subr.bf16.mxu1 %v1196_v61  ;;  %v1183_v3 = vld [vmem:[%s1501_s5 + $0x50] ss:$8 sps:$4 sm:$0xff]   ;;  %v1208_v4 = vld [vmem:[%s1501_s5 + $0x134] ss:$8 sps:$4 sm:$0xff]   ;;  %v1184_v5 = vld [vmem:[%s1501_s5 + $0x64] ss:$8 sps:$4 sm:$0xff]  }
  0x4e   : > { %800 = vmatprep.subr.bf16.mxu0 %v1172_v54  ;;  %v1210_v6 = vld [vmem:[%s1501_s5 + $0x130] ss:$8 sps:$4 sm:$0xff]   ;;  %v1186_v7 = vld [vmem:[%s1501_s5 + $0x60] ss:$8 sps:$4 sm:$0xff]   ;;  %v1214_v8 = vld [vmem:[%s1501_s5 + $0x144] ss:$8 sps:$4 sm:$0xff]  }
  0x4f   : > { %v1187_v9 = vld [vmem:[%s1501_s5 + $0x74] ss:$8 sps:$4 sm:$0xff]   ;;  %v1216_v10 = vld [vmem:[%s1501_s5 + $0x140] ss:$8 sps:$4 sm:$0xff]   ;;  %v1189_v11 = vld [vmem:[%s1501_s5 + $0x70] ss:$8 sps:$4 sm:$0xff]  }
  0x50   : > { %840 = vmatpush1.bf16.msra.mxu1 %v1198_v62  ;;  %v1220_v12 = vld [vmem:[%s1501_s5 + $0x154] ss:$8 sps:$4 sm:$0xff]   ;;  %v1193_v13 = vld [vmem:[%s1501_s5 + $0x84] ss:$8 sps:$4 sm:$0xff]   ;;  %v1222_v14 = vld [vmem:[%s1501_s5 + $0x150] ss:$8 sps:$4 sm:$0xff]  }
  0x51   : > { %801 = vmatpush1.bf16.msra.mxu0 %v1174_v55  ;;  %841 = vmatprep.subr.bf16.mxu1 %v1202_v1  ;;  %v1195_v15 = vld [vmem:[%s1501_s5 + $0x80] ss:$8 sps:$4 sm:$0xff]   ;;  %v1226_v16 = vld [vmem:[%s1501_s5 + $0x164] ss:$8 sps:$4 sm:$0xff]   ;;  %v1199_v17 = vld [vmem:[%s1501_s5 + $0x94] ss:$8 sps:$4 sm:$0xff]  }
  0x52   : > { %802 = vmatprep.subr.bf16.mxu0 %v1175_v56  ;;  %v1228_v20 = vld [vmem:[%s1501_s5 + $0x160] ss:$8 sps:$4 sm:$0xff]   ;;  %v1201_v21 = vld [vmem:[%s1501_s5 + $0x90] ss:$8 sps:$4 sm:$0xff]   ;;  %v1232_v22 = vld [vmem:[%s1501_s5 + $0x174] ss:$8 sps:$4 sm:$0xff]  }
  0x53   : > { %v1205_v23 = vld [vmem:[%s1501_s5 + $0xa4] ss:$8 sps:$4 sm:$0xff]   ;;  %v1234_v24 = vld [vmem:[%s1501_s5 + $0x170] ss:$8 sps:$4 sm:$0xff]   ;;  %v1207_v25 = vld [vmem:[%s1501_s5 + $0xa0] ss:$8 sps:$4 sm:$0xff]  }
  0x54   : > { %842 = vmatpush1.bf16.msra.mxu1 %v1204_v2  ;;  %v1211_v26 = vld [vmem:[%s1501_s5 + $0xb4] ss:$8 sps:$4 sm:$0xff]   ;;  %v1238_v27 = vld [vmem:[%s1489_s26 + $0x8] ss:$0 sps:$4 sm:$0xff]   ;;  %v1217_v29 = vld [vmem:[%s1501_s5 + $0xc4] ss:$8 sps:$4 sm:$0xff]  }
  0x55   : > { %803 = vmatpush1.bf16.msra.mxu0 %v1177_v57  ;;  %843 = vmatprep.subr.bf16.mxu1 %v1208_v4  ;;  %v1213_v28 = vld [vmem:[%s1501_s5 + $0xb0] ss:$8 sps:$4 sm:$0xff]   ;;  %v1219_v30 = vld [vmem:[%s1501_s5 + $0xc0] ss:$8 sps:$4 sm:$0xff]   ;;  %v1223_v31 = vld [vmem:[%s1501_s5 + $0xd4] ss:$8 sps:$4 sm:$0xff]  }
  0x56   : > { %804 = vmatprep.subr.bf16.mxu0 %v1178_v60  ;;  %v1225_v32 = vld [vmem:[%s1501_s5 + $0xd0] ss:$8 sps:$4 sm:$0xff]   ;;  %v1229_v33 = vld [vmem:[%s1501_s5 + $0xe4] ss:$8 sps:$4 sm:$0xff]   ;;  %v1231_v34 = vld [vmem:[%s1501_s5 + $0xe0] ss:$8 sps:$4 sm:$0xff]  }
  0x57   : > { %v1235_v35 = vld [vmem:[%s1501_s5 + $0xf4] ss:$8 sps:$4 sm:$0xff]   ;;  %v1237_v36 = vld [vmem:[%s1501_s5 + $0xf0] ss:$8 sps:$4 sm:$0xff]   ;;  %p1100_p13 = scmp.ne.s32.totalorder %s1279_s14, 5 }
  0x58   : > { %844 = vmatpush1.bf16.msra.mxu1 %v1210_v6  ;;  %v493_v42 = vld [vmem:[#allocation2] sm:$0xff]  ;;  %v494_v45 = vld [vmem:[#allocation2 + $0x8] sm:$0xff]  ;;  %v890_v52 = vlaneseq (!%p1100_p13) }
  0x59   : > { %805 = vmatpush1.bf16.msra.mxu0 %v1180_v63  ;;  %845 = vmatprep.subr.bf16.mxu1 %v1214_v8  ;;  %v888_v54 = vld [vmem:[%s474_s12] sm:$0x3] (!%p1100_p13) }
  0x5a   : > { %806 = vmatprep.subr.bf16.mxu0 %v1181_v0  ;;  %v891_v53 = vshrl.u32 (!%p1100_p13), %v890_v52, 7 }
  0x5c   : > { %846 = vmatpush1.bf16.msra.mxu1 %v1216_v10  ;;  %v892_v55 = vsub.s32 (!%p1100_p13), 0, %v891_v53  ;;  %v896_v56 = vsub.s32 (!%p1100_p13), 1, %v891_v53 }
  0x5d   : > { %807 = vmatpush1.bf16.msra.mxu0 %v1183_v3  ;;  %847 = vmatprep.subr.bf16.mxu1 %v1220_v12 }
  0x5e   : > { %808 = vmatprep.subr.bf16.mxu0 %v1184_v5  ;;  %v893_v59 = vrot.slane (!%p1100_p13), %v888_v54, %v892_v55  ;;  %v897_v60 = vrot.slane (!%p1100_p13), %v888_v54, %v896_v56 }
  0x60   : > { %848 = vmatpush1.bf16.msra.mxu1 %v1222_v14 }
  0x61   : > { %809 = vmatpush1.bf16.msra.mxu0 %v1186_v7  ;;  %849 = vmatprep.subr.bf16.mxu1 %v1226_v16 }
  0x62   : > { %810 = vmatprep.subr.bf16.mxu0 %v1187_v9 }
  0x64   : > { %850 = vmatpush1.bf16.msra.mxu1 %v1228_v20 }
  0x65   : > { %811 = vmatpush1.bf16.msra.mxu0 %v1189_v11  ;;  %851 = vmatprep.subr.bf16.mxu1 %v1232_v22 }
  0x66   : > { %812 = vmatprep.subr.bf16.mxu0 %v1193_v13 }
  0x68   : > { %852 = vmatpush1.bf16.msra.mxu1 %v1234_v24 }
  0x69   : > { %813 = vmatpush1.bf16.msra.mxu0 %v1195_v15 }
  0x6a   : > { %814 = vmatprep.subr.bf16.mxu0 %v1199_v17 }
  0x6b   : > { %870 = vmatmul.mubr.bf16.vlgmr.msra.gmra.mrb[0].mxu1 %v1238_v27 }
  0x6d   : > { %815 = vmatpush1.bf16.msra.mxu0 %v1201_v21 }
  0x6e   : > { %816 = vmatprep.subr.bf16.mxu0 %v1205_v23 }
  0x71   : > { %817 = vmatpush1.bf16.msra.mxu0 %v1207_v25 }
  0x72   : > { %818 = vmatprep.subr.bf16.mxu0 %v1211_v26 }
  0x75   : > { %819 = vmatpush1.bf16.msra.mxu0 %v1213_v28 }
  0x76   : > { %820 = vmatprep.subr.bf16.mxu0 %v1217_v29 }
  0x79   : > { %821 = vmatpush1.bf16.msra.mxu0 %v1219_v30 }
  0x7a   : > { %822 = vmatprep.subr.bf16.mxu0 %v1223_v31 }
  0x7d   : > { %823 = vmatpush1.bf16.msra.mxu0 %v1225_v32 }
  0x7e   : > { %824 = vmatprep.subr.bf16.mxu0 %v1229_v33 }
  0x81   : > { %825 = vmatpush1.bf16.msra.mxu0 %v1231_v34 }
  0x82   : > { %826 = vmatprep.subr.bf16.mxu0 %v1235_v35 }
  0x85   : > { %827 = vmatpush1.bf16.msra.mxu0 %v1237_v36 }
  0x88   : > { %829 = vmatmul.mubr.bf16.vlgmr.msra.gmra.mrb[0].mxu0 %v1049_v37 }
 0x13e   : > { %v871_v38 = vpop.f32.mrb[0].mxu1 }
 0x13f   : > { %v873_v39 = vpop.f32.mrb[1].mxu1 }
 0x140   : > { %v875_v40 = vpop.f32.mrb[2].mxu1 }
 0x141   : > { %v876_v41 = vpop.f32.mrb[3].mxu1 }
 0x15b   : > { %v830_v43 = vpop.f32.mrb[0].mxu0  ;;  %885 = sbr.rel (%p1100_p13) target bundleno = 368 (0x170), region = 78 }
 0x15c   : > { %v872_v44 = vadd.f32 %v871_v38, %v830_v43  ;;  %v832_v46 = vpop.f32.mrb[1].mxu0 }
 0x15d   : > { %v874_v47 = vadd.f32 %v873_v39, %v832_v46  ;;  %v834_v48 = vpop.f32.mrb[2].mxu0 }
 0x15e   : > { %v878_v49 = vadd.f32 %v872_v44, %v493_v42  ;;  %v835_v50 = vpop.f32.mrb[3].mxu0 }
 0x15f   : > { %v879_v51 = vadd.f32 %v874_v47, %v494_v45 }
 0x160   : > { %880 = vst [vmem:[#allocation2] sm:$0xff] %v878_v49 }
 0x161   : > { %881 = vst [vmem:[#allocation2 + $0x8] sm:$0xff] %v879_v51 }
 0x167   : > { %v886_v57 = vld [vmem:[#allocation2] sm:$0xff] }
 0x168   : > { %v887_v58 = vld [vmem:[#allocation2 + $0x8] sm:$0xff]  ;;  %v900_v61 = vadd.f32 %v893_v59, %v886_v57 }
 0x169   : > { %v901_v62 = vadd.f32 %v897_v60, %v887_v58 }
 0x16a   : > { %v902_v63 = vmax.f32 %v900_v61, 0.0 }
 0x16b   : > { %v903_v0 = vmax.f32 %v901_v62, 0.0 }
 0x16d   : > { %v1105_v1 = vpack.c.bf16 %v903_v0, %v902_v63 }
 0x16f   : > { %912 = vst [vmem:[%s1499_s4] sm:$0xff] %v1105_v1 }
 0x170 PF: > { %s13_s18 = sadd.s32 1, %s1295_s18   ;;  %s1586_s12 = smov %s1275_s13 }
 0x171   : > { %p10_p0 = scmp.ge.s32.totalorder %s13_s18, 14   ;;  %s1587_s13 = smov %s1370_s25 }
 0x172   : > { %s1588_s14 = smov %s1287_s16  ;;  %s1589_s15 = smov %s1291_s17 }
 0x173   : > { %s1590_s16 = smov %s1593_s19  ;;  %s1591_s17 = smov %s1597_s20 }
 0x174   :  { %12 = sbr.rel (!%p10_p0) target bundleno = 4 (0x4), region = 119 }

// kernel: _lambda_.37
= control target key start
LH: loop header
LB: loop body
LE: loop exit
PB: predicated region body
PF: predicated region fallthrough
CT: control target
= control target key end

     0   :  { %s1028_s12 = smov 0   ;;  %s1030_s13 = smov 0   ;;  %s1207_s0 = inlined_call_operand.vmem [shape: bf16[8,256], index: 0, kind: input, shape index: {}]   ;;  %s1208_s1 = inlined_call_operand.vmem [shape: bf16[256,512], index: 1, kind: input, shape index: {}]   ;;  %s1209_s2 = inlined_call_operand.vmem [shape: f32[1,512], index: 2, kind: input, shape index: {}]   ;;  %s1210_s3 = inlined_call_operand.vmem [shape: bf16[8,512], index: 3, kind: output, shape index: {}]  }
   0x1   :  { %s1032_s14 = smov 0   ;;  %s1034_s15 = smov 0  }
   0x2   :  { %s1036_s16 = smov 0  }
   0x3 LB: > { %s28_s17 = sadd.s32 1, %s1002_s15  ;;  %p76_p1 = scmp.ne.s32.totalorder %s994_s13, %s990_s12  ;;  %s1006_s16 = sphi %s1036_s16, %s13_s16   ;;  %s1002_s15 = sphi %s1034_s15, %s1214_s15   ;;  %s998_s14 = sphi %s1032_s14, %s1213_s14   ;;  %s994_s13 = sphi %s1030_s13, %s1212_s13   ;;  %s990_s12 = sphi %s1028_s12, %s1211_s12  }
   0x4   : > { %p30_p0 = scmp.ge.s32.totalorder %s28_s17, 2  ;;  %p77_p2 = scmp.eq.s32.totalorder %s1006_s16, 0 }
   0x5   : > { %s69_s19 = sadd.s32 1, %s994_s13  ;;  %p830_p5 = scmp.ge.s32.totalorder %s1006_s16, 2 }
   0x6   : > { %s1216_s17 = smov (%p30_p0, %s28_s17), 0  ;;  %p78_p3 = por %p77_p2, %p76_p1 }
   0x7   : > { %s65_s18 = ssub.s32 %s1002_s15, %s1216_s17  ;;  %169 = sbr.rel (%p830_p5) target bundleno = 34 (0x22), region = 20 }
   0x8   : > { %p67_p4 = scmp.eq.s32.totalorder %s65_s18, 0 }
   0xa   : > { %s1063_s20 = scalar_select %p67_p4, %s994_s13, %s69_s19  }
   0xe   : > { %172 = sbr.rel (!%p78_p3) target bundleno = 34 (0x22), region = 24  ;;  %s174_s21 = sand.u32 (%p78_p3), 1, %s994_s13  }
   0xf   : > { %s876_s22 = sshll.u32 (%p78_p3), %s1002_s15, 3  ;;  %s831_s23 = sshll.u32 (%p78_p3), %s174_s21, 8 }
  0x10   : > { %s1071_s26 = scalar_lea.vmem (%p78_p3), %s1208_s1, %s876_s22  ;;  %s1076_s27 = scalar_lea.vmem (%p78_p3), [#allocation3], %s831_s23 }
  0x11   : > { %v272_v0 = vld [vmem:[%s1071_s26] sm:$0xff] (%p78_p3)  ;;  %v274_v1 = vld [vmem:[%s1071_s26 + $0x10] sm:$0xff] (%p78_p3) }
  0x12   : > { %v276_v2 = vld [vmem:[%s1071_s26 + $0x20] sm:$0xff] (%p78_p3)  ;;  %273 = vst [vmem:[%s1076_s27] sm:$0xff] (%p78_p3), %v272_v0  ;;  %275 = vst [vmem:[%s1076_s27 + $0x8] sm:$0xff] (%p78_p3), %v274_v1  ;;  %v278_v3 = vld [vmem:[%s1071_s26 + $0x30] sm:$0xff] (%p78_p3) }
  0x13   : > { %277 = vst [vmem:[%s1076_s27 + $0x10] sm:$0xff] (%p78_p3), %v276_v2  ;;  %v280_v4 = vld [vmem:[%s1071_s26 + $0x40] sm:$0xff] (%p78_p3)  ;;  %v282_v5 = vld [vmem:[%s1071_s26 + $0x50] sm:$0xff] (%p78_p3)  ;;  %279 = vst [vmem:[%s1076_s27 + $0x18] sm:$0xff] (%p78_p3), %v278_v3 }
  0x14   : > { %281 = vst [vmem:[%s1076_s27 + $0x20] sm:$0xff] (%p78_p3), %v280_v4  ;;  %283 = vst [vmem:[%s1076_s27 + $0x28] sm:$0xff] (%p78_p3), %v282_v5  ;;  %v284_v6 = vld [vmem:[%s1071_s26 + $0x60] sm:$0xff] (%p78_p3)  ;;  %v286_v7 = vld [vmem:[%s1071_s26 + $0x70] sm:$0xff] (%p78_p3) }
  0x15   : > { %v288_v8 = vld [vmem:[%s1071_s26 + $0x80] sm:$0xff]  ;;  %285 = vst [vmem:[%s1076_s27 + $0x30] sm:$0xff] %v284_v6  ;;  %287 = vst [vmem:[%s1076_s27 + $0x38] sm:$0xff] %v286_v7  ;;  %v290_v9 = vld [vmem:[%s1071_s26 + $0x90] sm:$0xff] }
  0x16   : > { %289 = vst [vmem:[%s1076_s27 + $0x40] sm:$0xff] %v288_v8  ;;  %v292_v10 = vld [vmem:[%s1071_s26 + $0xa0] sm:$0xff]  ;;  %v294_v11 = vld [vmem:[%s1071_s26 + $0xb0] sm:$0xff]  ;;  %291 = vst [vmem:[%s1076_s27 + $0x48] sm:$0xff] %v290_v9 }
  0x17   : > { %293 = vst [vmem:[%s1076_s27 + $0x50] sm:$0xff] %v292_v10  ;;  %295 = vst [vmem:[%s1076_s27 + $0x58] sm:$0xff] %v294_v11  ;;  %v296_v12 = vld [vmem:[%s1071_s26 + $0xc0] sm:$0xff]  ;;  %v298_v13 = vld [vmem:[%s1071_s26 + $0xd0] sm:$0xff] }
  0x18   : > { %v300_v14 = vld [vmem:[%s1071_s26 + $0xe0] sm:$0xff]  ;;  %297 = vst [vmem:[%s1076_s27 + $0x60] sm:$0xff] %v296_v12  ;;  %299 = vst [vmem:[%s1076_s27 + $0x68] sm:$0xff] %v298_v13  ;;  %v302_v15 = vld [vmem:[%s1071_s26 + $0xf0] sm:$0xff] }
  0x19   : > { %301 = vst [vmem:[%s1076_s27 + $0x70] sm:$0xff] %v300_v14  ;;  %v304_v16 = vld [vmem:[%s1071_s26 + $0x100] sm:$0xff]  ;;  %v306_v17 = vld [vmem:[%s1071_s26 + $0x110] sm:$0xff]  ;;  %303 = vst [vmem:[%s1076_s27 + $0x78] sm:$0xff] %v302_v15 }
  0x1a   : > { %305 = vst [vmem:[%s1076_s27 + $0x80] sm:$0xff] %v304_v16  ;;  %307 = vst [vmem:[%s1076_s27 + $0x88] sm:$0xff] %v306_v17  ;;  %v308_v18 = vld [vmem:[%s1071_s26 + $0x120] sm:$0xff]  ;;  %v310_v19 = vld [vmem:[%s1071_s26 + $0x130] sm:$0xff] }
  0x1b   : > { %v312_v20 = vld [vmem:[%s1071_s26 + $0x140] sm:$0xff]  ;;  %309 = vst [vmem:[%s1076_s27 + $0x90] sm:$0xff] %v308_v18  ;;  %311 = vst [vmem:[%s1076_s27 + $0x98] sm:$0xff] %v310_v19  ;;  %v314_v21 = vld [vmem:[%s1071_s26 + $0x150] sm:$0xff] }
  0x1c   : > { %313 = vst [vmem:[%s1076_s27 + $0xa0] sm:$0xff] %v312_v20  ;;  %v316_v22 = vld [vmem:[%s1071_s26 + $0x160] sm:$0xff]  ;;  %v318_v23 = vld [vmem:[%s1071_s26 + $0x170] sm:$0xff]  ;;  %315 = vst [vmem:[%s1076_s27 + $0xa8] sm:$0xff] %v314_v21 }
  0x1d   : > { %317 = vst [vmem:[%s1076_s27 + $0xb0] sm:$0xff] %v316_v22  ;;  %319 = vst [vmem:[%s1076_s27 + $0xb8] sm:$0xff] %v318_v23  ;;  %v320_v24 = vld [vmem:[%s1071_s26 + $0x180] sm:$0xff]  ;;  %v322_v25 = vld [vmem:[%s1071_s26 + $0x190] sm:$0xff] }
  0x1e   : > { %v324_v26 = vld [vmem:[%s1071_s26 + $0x1a0] sm:$0xff]  ;;  %321 = vst [vmem:[%s1076_s27 + $0xc0] sm:$0xff] %v320_v24  ;;  %323 = vst [vmem:[%s1076_s27 + $0xc8] sm:$0xff] %v322_v25  ;;  %v326_v27 = vld [vmem:[%s1071_s26 + $0x1b0] sm:$0xff] }
  0x1f   : > { %325 = vst [vmem:[%s1076_s27 + $0xd0] sm:$0xff] %v324_v26  ;;  %v328_v28 = vld [vmem:[%s1071_s26 + $0x1c0] sm:$0xff]  ;;  %v330_v29 = vld [vmem:[%s1071_s26 + $0x1d0] sm:$0xff]  ;;  %327 = vst [vmem:[%s1076_s27 + $0xd8] sm:$0xff] %v326_v27 }
  0x20   : > { %329 = vst [vmem:[%s1076_s27 + $0xe0] sm:$0xff] %v328_v28  ;;  %331 = vst [vmem:[%s1076_s27 + $0xe8] sm:$0xff] %v330_v29  ;;  %v332_v30 = vld [vmem:[%s1071_s26 + $0x1e0] sm:$0xff]  ;;  %v334_v31 = vld [vmem:[%s1071_s26 + $0x1f0] sm:$0xff] }
  0x21   : > { %333 = vst [vmem:[%s1076_s27 + $0xf0] sm:$0xff] %v332_v30  ;;  %335 = vst [vmem:[%s1076_s27 + $0xf8] sm:$0xff] %v334_v31 }
  0x22 PF: > { %p834_p6 = scmp.ge.s32.totalorder %s1006_s16, 1  ;;  %p348_p7 = scmp.lt.s32.totalorder %s1006_s16, 3 }
  0x24   : > { %p349_p8 = pnand %p834_p6, %p348_p7 }
  0x25   : > { %s355_s28 = sand.u32 (!%p349_p8), 1, %s990_s12   ;;  %v1145_v32 = vld [vmem:[%s1207_s0] sm:$0xff] (!%p349_p8)  ;;  %s836_s6 = sshll.u32 (!%p349_p8), %s998_s14, 1  ;;  %v682_v3 = vlaneseq (!%p349_p8) }
  0x26   : > { %352 = sbr.rel (%p349_p8) target bundleno = 323 (0x143), region = 66  ;;  %s835_s4 = sshll.u32 (!%p349_p8), %s355_s28, 8  ;;  %v840_v33 = vcombine.high (!%p349_p8), %v1145_v32, %v1145_v32  ;;  %v839_v2 = vcombine.low (!%p349_p8), %v1145_v32, %v1145_v32 }
  0x27   : > { %s1149_s5 = scalar_lea.vmem (!%p349_p8), [#allocation3], %s835_s4  ;;  %p408_p9 = scmp.lt.s32.totalorder (!%p349_p8), %s836_s6, 3  ;;  %v683_v4 = vshrl.u32 (!%p349_p8), %v682_v3, 7 }
  0x28   : > { %v918_v34 = vld [vmem:[%s1149_s5 + $0x4] ss:$8 sps:$4 sm:$0xff] (!%p349_p8)   ;;  %662 = vmatprep.mubr.bf16.mxu0 (!%p349_p8), %v840_v33  ;;  %v920_v35 = vld [vmem:[%s1149_s5] ss:$8 sps:$4 sm:$0xff] (!%p349_p8)   ;;  %v921_v36 = vld [vmem:[%s1149_s5 + $0x14] ss:$8 sps:$4 sm:$0xff] (!%p349_p8)  }
  0x29   : > { %630 = vmatprep.subr.bf16.mxu0 (!%p349_p8), %v918_v34  ;;  %v923_v37 = vld [vmem:[%s1149_s5 + $0x10] ss:$8 sps:$4 sm:$0xff] (!%p349_p8)   ;;  %v924_v38 = vld [vmem:[%s1149_s5 + $0x24] ss:$8 sps:$4 sm:$0xff] (!%p349_p8)   ;;  %v926_v39 = vld [vmem:[%s1149_s5 + $0x20] ss:$8 sps:$4 sm:$0xff] (!%p349_p8)  }
  0x2a   : > { %631 = vmatpush1.bf16.msra.mxu0 (!%p349_p8), %v920_v35  ;;  %v927_v40 = vld [vmem:[%s1149_s5 + $0x34] ss:$8 sps:$4 sm:$0xff] (!%p349_p8)   ;;  %v929_v41 = vld [vmem:[%s1149_s5 + $0x30] ss:$8 sps:$4 sm:$0xff] (!%p349_p8)   ;;  %v930_v42 = vld [vmem:[%s1149_s5 + $0x44] ss:$8 sps:$4 sm:$0xff] (!%p349_p8)  }
  0x2b   : > { %632 = vmatprep.subr.bf16.mxu0 (!%p349_p8), %v921_v36  ;;  %v932_v43 = vld [vmem:[%s1149_s5 + $0x40] ss:$8 sps:$4 sm:$0xff] (!%p349_p8)   ;;  %v933_v44 = vld [vmem:[%s1149_s5 + $0x54] ss:$8 sps:$4 sm:$0xff] (!%p349_p8)   ;;  %v935_v45 = vld [vmem:[%s1149_s5 + $0x50] ss:$8 sps:$4 sm:$0xff] (!%p349_p8)  }
  0x2c   : > { %v936_v46 = vld [vmem:[%s1149_s5 + $0x64] ss:$8 sps:$4 sm:$0xff] (!%p349_p8)   ;;  %v938_v47 = vld [vmem:[%s1149_s5 + $0x60] ss:$8 sps:$4 sm:$0xff] (!%p349_p8)   ;;  %v939_v48 = vld [vmem:[%s1149_s5 + $0x74] ss:$8 sps:$4 sm:$0xff] (!%p349_p8)  }
  0x2d   : > { %v941_v49 = vld [vmem:[%s1149_s5 + $0x70] ss:$8 sps:$4 sm:$0xff]   ;;  %v942_v50 = vld [vmem:[%s1149_s5 + $0x84] ss:$8 sps:$4 sm:$0xff]   ;;  %v944_v51 = vld [vmem:[%s1149_s5 + $0x80] ss:$8 sps:$4 sm:$0xff]  }
  0x2e   : > { %633 = vmatpush1.bf16.msra.mxu0 %v923_v37  ;;  %v945_v52 = vld [vmem:[%s1149_s5 + $0x94] ss:$8 sps:$4 sm:$0xff]   ;;  %v947_v53 = vld [vmem:[%s1149_s5 + $0x90] ss:$8 sps:$4 sm:$0xff]   ;;  %v948_v54 = vld [vmem:[%s1149_s5 + $0xa4] ss:$8 sps:$4 sm:$0xff]  }
  0x2f   : > { %634 = vmatprep.subr.bf16.mxu0 %v924_v38  ;;  %v950_v55 = vld [vmem:[%s1149_s5 + $0xa0] ss:$8 sps:$4 sm:$0xff]   ;;  %v951_v56 = vld [vmem:[%s1149_s5 + $0xb4] ss:$8 sps:$4 sm:$0xff]   ;;  %v953_v57 = vld [vmem:[%s1149_s5 + $0xb0] ss:$8 sps:$4 sm:$0xff]  }
  0x30   : > { %v954_v58 = vld [vmem:[%s1149_s5 + $0xc4] ss:$8 sps:$4 sm:$0xff]   ;;  %v956_v59 = vld [vmem:[%s1149_s5 + $0xc0] ss:$8 sps:$4 sm:$0xff]   ;;  %v957_v60 = vld [vmem:[%s1149_s5 + $0xd4] ss:$8 sps:$4 sm:$0xff]  }
  0x31   : > { %v959_v61 = vld [vmem:[%s1149_s5 + $0xd0] ss:$8 sps:$4 sm:$0xff]   ;;  %v960_v62 = vld [vmem:[%s1149_s5 + $0xe4] ss:$8 sps:$4 sm:$0xff]   ;;  %v962_v63 = vld [vmem:[%s1149_s5 + $0xe0] ss:$8 sps:$4 sm:$0xff]  }
  0x32   : > { %635 = vmatpush1.bf16.msra.mxu0 %v926_v39  ;;  %v963_v0 = vld [vmem:[%s1149_s5 + $0xf4] ss:$8 sps:$4 sm:$0xff]   ;;  %v965_v1 = vld [vmem:[%s1149_s5 + $0xf0] ss:$8 sps:$4 sm:$0xff]   ;;  %s1218_s6 = smov (!%p408_p9, %s836_s6), 3  ;;  %v684_v5 = vsub.s32 0, %v683_v4 }
  0x33   : > { %636 = vmatprep.subr.bf16.mxu0 %v927_v40  ;;  %s410_s9 = scalar_lea.vmem %s1209_s2, %s1218_s6  ;;  %v688_v7 = vsub.s32 1, %v683_v4  ;;  %s838_s10 = sshll.u32 %s1218_s6, 2 }
  0x34   : > { %v680_v6 = vld [vmem:[%s410_s9] sm:$0x3]  ;;  %s420_s14 = scalar_lea.vmem %s1210_s3, %s838_s10 }
  0x35   : > { %v685_v8 = vrot.slane %v680_v6, %v684_v5  ;;  %v689_v9 = vrot.slane %v680_v6, %v688_v7 }
  0x36   : > { %637 = vmatpush1.bf16.msra.mxu0 %v929_v41 }
  0x37   : > { %638 = vmatprep.subr.bf16.mxu0 %v930_v42 }
  0x3a   : > { %639 = vmatpush1.bf16.msra.mxu0 %v932_v43 }
  0x3b   : > { %640 = vmatprep.subr.bf16.mxu0 %v933_v44 }
  0x3e   : > { %641 = vmatpush1.bf16.msra.mxu0 %v935_v45 }
  0x3f   : > { %642 = vmatprep.subr.bf16.mxu0 %v936_v46 }
  0x42   : > { %643 = vmatpush1.bf16.msra.mxu0 %v938_v47 }
  0x43   : > { %644 = vmatprep.subr.bf16.mxu0 %v939_v48 }
  0x46   : > { %645 = vmatpush1.bf16.msra.mxu0 %v941_v49 }
  0x47   : > { %646 = vmatprep.subr.bf16.mxu0 %v942_v50 }
  0x4a   : > { %647 = vmatpush1.bf16.msra.mxu0 %v944_v51 }
  0x4b   : > { %648 = vmatprep.subr.bf16.mxu0 %v945_v52 }
  0x4e   : > { %649 = vmatpush1.bf16.msra.mxu0 %v947_v53 }
  0x4f   : > { %650 = vmatprep.subr.bf16.mxu0 %v948_v54 }
  0x52   : > { %651 = vmatpush1.bf16.msra.mxu0 %v950_v55 }
  0x53   : > { %652 = vmatprep.subr.bf16.mxu0 %v951_v56 }
  0x56   : > { %653 = vmatpush1.bf16.msra.mxu0 %v953_v57 }
  0x57   : > { %654 = vmatprep.subr.bf16.mxu0 %v954_v58 }
  0x5a   : > { %655 = vmatpush1.bf16.msra.mxu0 %v956_v59 }
  0x5b   : > { %656 = vmatprep.subr.bf16.mxu0 %v957_v60 }
  0x5e   : > { %657 = vmatpush1.bf16.msra.mxu0 %v959_v61 }
  0x5f   : > { %658 = vmatprep.subr.bf16.mxu0 %v960_v62 }
  0x62   : > { %659 = vmatpush1.bf16.msra.mxu0 %v962_v63 }
  0x63   : > { %660 = vmatprep.subr.bf16.mxu0 %v963_v0 }
  0x66   : > { %661 = vmatpush1.bf16.msra.mxu0 %v965_v1 }
  0x69   : > { %663 = vmatmul.mubr.bf16.vlgmr.msra.gmra.mrb[0].mxu0 %v839_v2 }
 0x13c   : > { %v664_v10 = vpop.f32.mrb[0].mxu0 }
 0x13d   : > { %v692_v11 = vadd.f32 %v685_v8, %v664_v10  ;;  %v666_v12 = vpop.f32.mrb[1].mxu0 }
 0x13e   : > { %v693_v13 = vadd.f32 %v689_v9, %v666_v12  ;;  %v668_v14 = vpop.f32.mrb[2].mxu0 }
 0x13f   : > { %v669_v15 = vpop.f32.mrb[3].mxu0 }
 0x140   : > { %v877_v16 = vpack.c.bf16 %v693_v13, %v692_v11 }
 0x142   : > { %702 = vst [vmem:[%s420_s14] sm:$0xff] %v877_v16 }
 0x143 PF: > { %s13_s16 = sadd.s32 1, %s1006_s16   ;;  %s1211_s12 = smov %s994_s13 }
 0x144   : > { %p10_p10 = scmp.ge.s32.totalorder %s13_s16, 4   ;;  %s1212_s13 = smov %s1063_s20 }
 0x145   : > { %s1213_s14 = smov %s1002_s15  ;;  %s1214_s15 = smov %s1216_s17 }
 0x146   :  { %12 = sbr.rel (!%p10_p10) target bundleno = 3 (0x3), region = 119 }

// kernel: _lambda_.39
= control target key start
LH: loop header
LB: loop body
LE: loop exit
PB: predicated region body
PF: predicated region fallthrough
CT: control target
= control target key end

     0   :  { %s1523_s12 = smov 0   ;;  %s1525_s13 = smov 0   ;;  %s1834_s0 = inlined_call_operand.vmem [shape: bf16[8,4608], index: 0, kind: input, shape index: {}]   ;;  %s1835_s1 = inlined_call_operand.vmem [shape: bf16[4608,512], index: 1, kind: input, shape index: {}]   ;;  %s1836_s2 = inlined_call_operand.vmem [shape: f32[1,512], index: 2, kind: input, shape index: {}]   ;;  %s1837_s3 = inlined_call_operand.vmem [shape: bf16[8,512], index: 3, kind: output, shape index: {}]  }
   0x1   :  { %s1527_s14 = smov 0   ;;  %s1529_s15 = smov 0  }
   0x2   :  { %s1531_s16 = smov 0   ;;  %s1533_s17 = smov 0  }
   0x3   :  { %s1535_s18 = smov 0  }
   0x4 LB: > { %s25_s19 = sadd.s32 1, %s1492_s16  ;;  %s28_s20 = sadd.s32 1, %s1496_s17  ;;  %s1500_s18 = sphi %s1535_s18, %s13_s18   ;;  %s1496_s17 = sphi %s1533_s17, %s1843_s17   ;;  %s1492_s16 = sphi %s1531_s16, %s1842_s16   ;;  %s1488_s15 = sphi %s1529_s15, %s1841_s15   ;;  %s1484_s14 = sphi %s1527_s14, %s1840_s14   ;;  %s1480_s13 = sphi %s1525_s13, %s1839_s13   ;;  %s1476_s12 = sphi %s1523_s12, %s1838_s12  }
   0x5   : > { %p26_p0 = scmp.ge.s32.totalorder %s25_s19, 9  ;;  %p76_p1 = scmp.ne.s32.totalorder %s1480_s13, %s1476_s12 }
   0x6   : > { %p77_p2 = scmp.eq.s32.totalorder %s1500_s18, 0  ;;  %s69_s24 = sadd.s32 1, %s1480_s13 }
   0x7   : > { %s1845_s19 = smov (%p26_p0, %s25_s19), 0  ;;  %s1847_s20 = smov (!%p26_p0, %s28_s20), %s1496_s17 }
   0x8   : > { %p78_p3 = por %p77_p2, %p76_p1  ;;  %p30_p4 = scmp.ge.s32.totalorder %s1847_s20, 2 }
   0x9   : > { %s64_s21 = ssub.s32 %s1492_s16, %s1845_s19  ;;  %p1201_p6 = scmp.ge.s32.totalorder %s1500_s18, 18 }
   0xa   : > { %s1849_s20 = smov (%p30_p4, %s1847_s20), 0 }
   0xb   : > { %s65_s22 = ssub.s32 %s1496_s17, %s1849_s20  ;;  %156 = sbr.rel (%p1201_p6) target bundleno = 57 (0x39), region = 16 }
   0xc   : > { %s66_s23 = sor.u32 %s65_s22, %s64_s21 }
   0xd   : > { %p67_p5 = scmp.eq.s32.totalorder %s66_s23, 0 }
   0xf   : > { %s1574_s25 = scalar_select %p67_p5, %s1480_s13, %s69_s24  }
  0x12   : > { %172 = sbr.rel (!%p78_p3) target bundleno = 57 (0x39), region = 24  ;;  %s174_s26 = sand.u32 (%p78_p3), 1, %s1480_s13  }
  0x13   : > { %s1204_s27 = sshll.u32 (%p78_p3), %s1496_s17, 1  ;;  %s1202_s28 = sshll.u32 (%p78_p3), %s174_s26, 9 }
  0x14   : > { %s1287_s29 = sshll.u32 (%p78_p3), %s1492_s16, 8  ;;  %s1588_s8 = scalar_lea.vmem (%p78_p3), [#allocation3], %s1202_s28 }
  0x15   : > { %s180_s30 = sadd.s32 (%p78_p3), %s1287_s29, %s1204_s27 }
  0x16   : > { %s1206_s4 = sshll.u32 (%p78_p3), %s180_s30, 2 }
  0x17   : > { %s1583_s7 = scalar_lea.vmem (%p78_p3), %s1835_s1, %s1206_s4 }
  0x18   : > { %v336_v0 = vld [vmem:[%s1583_s7] sm:$0xff] (%p78_p3)  ;;  %v338_v1 = vld [vmem:[%s1583_s7 + $0x10] sm:$0xff] (%p78_p3) }
  0x19   : > { %v340_v2 = vld [vmem:[%s1583_s7 + $0x20] sm:$0xff]  ;;  %337 = vst [vmem:[%s1588_s8] sm:$0xff] %v336_v0  ;;  %339 = vst [vmem:[%s1588_s8 + $0x8] sm:$0xff] %v338_v1  ;;  %v342_v3 = vld [vmem:[%s1583_s7 + $0x30] sm:$0xff] }
  0x1a   : > { %341 = vst [vmem:[%s1588_s8 + $0x10] sm:$0xff] %v340_v2  ;;  %v344_v4 = vld [vmem:[%s1583_s7 + $0x40] sm:$0xff]  ;;  %v346_v5 = vld [vmem:[%s1583_s7 + $0x50] sm:$0xff]  ;;  %343 = vst [vmem:[%s1588_s8 + $0x18] sm:$0xff] %v342_v3 }
  0x1b   : > { %345 = vst [vmem:[%s1588_s8 + $0x20] sm:$0xff] %v344_v4  ;;  %347 = vst [vmem:[%s1588_s8 + $0x28] sm:$0xff] %v346_v5  ;;  %v348_v6 = vld [vmem:[%s1583_s7 + $0x60] sm:$0xff]  ;;  %v350_v7 = vld [vmem:[%s1583_s7 + $0x70] sm:$0xff] }
  0x1c   : > { %v352_v8 = vld [vmem:[%s1583_s7 + $0x80] sm:$0xff]  ;;  %349 = vst [vmem:[%s1588_s8 + $0x30] sm:$0xff] %v348_v6  ;;  %351 = vst [vmem:[%s1588_s8 + $0x38] sm:$0xff] %v350_v7  ;;  %v354_v9 = vld [vmem:[%s1583_s7 + $0x90] sm:$0xff] }
  0x1d   : > { %353 = vst [vmem:[%s1588_s8 + $0x40] sm:$0xff] %v352_v8  ;;  %v356_v10 = vld [vmem:[%s1583_s7 + $0xa0] sm:$0xff]  ;;  %v358_v11 = vld [vmem:[%s1583_s7 + $0xb0] sm:$0xff]  ;;  %355 = vst [vmem:[%s1588_s8 + $0x48] sm:$0xff] %v354_v9 }
  0x1e   : > { %357 = vst [vmem:[%s1588_s8 + $0x50] sm:$0xff] %v356_v10  ;;  %359 = vst [vmem:[%s1588_s8 + $0x58] sm:$0xff] %v358_v11  ;;  %v360_v12 = vld [vmem:[%s1583_s7 + $0xc0] sm:$0xff]  ;;  %v362_v13 = vld [vmem:[%s1583_s7 + $0xd0] sm:$0xff] }
  0x1f   : > { %v364_v14 = vld [vmem:[%s1583_s7 + $0xe0] sm:$0xff]  ;;  %361 = vst [vmem:[%s1588_s8 + $0x60] sm:$0xff] %v360_v12  ;;  %363 = vst [vmem:[%s1588_s8 + $0x68] sm:$0xff] %v362_v13  ;;  %v366_v15 = vld [vmem:[%s1583_s7 + $0xf0] sm:$0xff] }
  0x20   : > { %365 = vst [vmem:[%s1588_s8 + $0x70] sm:$0xff] %v364_v14  ;;  %v368_v16 = vld [vmem:[%s1583_s7 + $0x100] sm:$0xff]  ;;  %v370_v17 = vld [vmem:[%s1583_s7 + $0x110] sm:$0xff]  ;;  %367 = vst [vmem:[%s1588_s8 + $0x78] sm:$0xff] %v366_v15 }
  0x21   : > { %369 = vst [vmem:[%s1588_s8 + $0x80] sm:$0xff] %v368_v16  ;;  %371 = vst [vmem:[%s1588_s8 + $0x88] sm:$0xff] %v370_v17  ;;  %v372_v18 = vld [vmem:[%s1583_s7 + $0x120] sm:$0xff]  ;;  %v374_v19 = vld [vmem:[%s1583_s7 + $0x130] sm:$0xff] }
  0x22   : > { %v376_v20 = vld [vmem:[%s1583_s7 + $0x140] sm:$0xff]  ;;  %373 = vst [vmem:[%s1588_s8 + $0x90] sm:$0xff] %v372_v18  ;;  %375 = vst [vmem:[%s1588_s8 + $0x98] sm:$0xff] %v374_v19  ;;  %v378_v21 = vld [vmem:[%s1583_s7 + $0x150] sm:$0xff] }
  0x23   : > { %377 = vst [vmem:[%s1588_s8 + $0xa0] sm:$0xff] %v376_v20  ;;  %v380_v22 = vld [vmem:[%s1583_s7 + $0x160] sm:$0xff]  ;;  %v382_v23 = vld [vmem:[%s1583_s7 + $0x170] sm:$0xff]  ;;  %379 = vst [vmem:[%s1588_s8 + $0xa8] sm:$0xff] %v378_v21 }
  0x24   : > { %381 = vst [vmem:[%s1588_s8 + $0xb0] sm:$0xff] %v380_v22  ;;  %383 = vst [vmem:[%s1588_s8 + $0xb8] sm:$0xff] %v382_v23  ;;  %v384_v24 = vld [vmem:[%s1583_s7 + $0x180] sm:$0xff]  ;;  %v386_v25 = vld [vmem:[%s1583_s7 + $0x190] sm:$0xff] }
  0x25   : > { %v388_v26 = vld [vmem:[%s1583_s7 + $0x1a0] sm:$0xff]  ;;  %385 = vst [vmem:[%s1588_s8 + $0xc0] sm:$0xff] %v384_v24  ;;  %387 = vst [vmem:[%s1588_s8 + $0xc8] sm:$0xff] %v386_v25  ;;  %v390_v27 = vld [vmem:[%s1583_s7 + $0x1b0] sm:$0xff] }
  0x26   : > { %389 = vst [vmem:[%s1588_s8 + $0xd0] sm:$0xff] %v388_v26  ;;  %v392_v28 = vld [vmem:[%s1583_s7 + $0x1c0] sm:$0xff]  ;;  %v394_v29 = vld [vmem:[%s1583_s7 + $0x1d0] sm:$0xff]  ;;  %391 = vst [vmem:[%s1588_s8 + $0xd8] sm:$0xff] %v390_v27 }
  0x27   : > { %393 = vst [vmem:[%s1588_s8 + $0xe0] sm:$0xff] %v392_v28  ;;  %395 = vst [vmem:[%s1588_s8 + $0xe8] sm:$0xff] %v394_v29  ;;  %v396_v30 = vld [vmem:[%s1583_s7 + $0x1e0] sm:$0xff]  ;;  %v398_v31 = vld [vmem:[%s1583_s7 + $0x1f0] sm:$0xff] }
  0x28   : > { %v400_v32 = vld [vmem:[%s1583_s7 + $0x200] sm:$0xff]  ;;  %397 = vst [vmem:[%s1588_s8 + $0xf0] sm:$0xff] %v396_v30  ;;  %399 = vst [vmem:[%s1588_s8 + $0xf8] sm:$0xff] %v398_v31  ;;  %v402_v33 = vld [vmem:[%s1583_s7 + $0x210] sm:$0xff] }
  0x29   : > { %401 = vst [vmem:[%s1588_s8 + $0x100] sm:$0xff] %v400_v32  ;;  %v404_v34 = vld [vmem:[%s1583_s7 + $0x220] sm:$0xff]  ;;  %v406_v35 = vld [vmem:[%s1583_s7 + $0x230] sm:$0xff]  ;;  %403 = vst [vmem:[%s1588_s8 + $0x108] sm:$0xff] %v402_v33 }
  0x2a   : > { %405 = vst [vmem:[%s1588_s8 + $0x110] sm:$0xff] %v404_v34  ;;  %407 = vst [vmem:[%s1588_s8 + $0x118] sm:$0xff] %v406_v35  ;;  %v408_v36 = vld [vmem:[%s1583_s7 + $0x240] sm:$0xff]  ;;  %v410_v37 = vld [vmem:[%s1583_s7 + $0x250] sm:$0xff] }
  0x2b   : > { %v412_v38 = vld [vmem:[%s1583_s7 + $0x260] sm:$0xff]  ;;  %409 = vst [vmem:[%s1588_s8 + $0x120] sm:$0xff] %v408_v36  ;;  %411 = vst [vmem:[%s1588_s8 + $0x128] sm:$0xff] %v410_v37  ;;  %v414_v39 = vld [vmem:[%s1583_s7 + $0x270] sm:$0xff] }
  0x2c   : > { %413 = vst [vmem:[%s1588_s8 + $0x130] sm:$0xff] %v412_v38  ;;  %v416_v40 = vld [vmem:[%s1583_s7 + $0x280] sm:$0xff]  ;;  %v418_v41 = vld [vmem:[%s1583_s7 + $0x290] sm:$0xff]  ;;  %415 = vst [vmem:[%s1588_s8 + $0x138] sm:$0xff] %v414_v39 }
  0x2d   : > { %417 = vst [vmem:[%s1588_s8 + $0x140] sm:$0xff] %v416_v40  ;;  %419 = vst [vmem:[%s1588_s8 + $0x148] sm:$0xff] %v418_v41  ;;  %v420_v42 = vld [vmem:[%s1583_s7 + $0x2a0] sm:$0xff]  ;;  %v422_v43 = vld [vmem:[%s1583_s7 + $0x2b0] sm:$0xff] }
  0x2e   : > { %v424_v44 = vld [vmem:[%s1583_s7 + $0x2c0] sm:$0xff]  ;;  %421 = vst [vmem:[%s1588_s8 + $0x150] sm:$0xff] %v420_v42  ;;  %423 = vst [vmem:[%s1588_s8 + $0x158] sm:$0xff] %v422_v43  ;;  %v426_v45 = vld [vmem:[%s1583_s7 + $0x2d0] sm:$0xff] }
  0x2f   : > { %425 = vst [vmem:[%s1588_s8 + $0x160] sm:$0xff] %v424_v44  ;;  %v428_v46 = vld [vmem:[%s1583_s7 + $0x2e0] sm:$0xff]  ;;  %v430_v47 = vld [vmem:[%s1583_s7 + $0x2f0] sm:$0xff]  ;;  %427 = vst [vmem:[%s1588_s8 + $0x168] sm:$0xff] %v426_v45 }
  0x30   : > { %429 = vst [vmem:[%s1588_s8 + $0x170] sm:$0xff] %v428_v46  ;;  %431 = vst [vmem:[%s1588_s8 + $0x178] sm:$0xff] %v430_v47  ;;  %v432_v48 = vld [vmem:[%s1583_s7 + $0x300] sm:$0xff]  ;;  %v434_v49 = vld [vmem:[%s1583_s7 + $0x310] sm:$0xff] }
  0x31   : > { %v436_v50 = vld [vmem:[%s1583_s7 + $0x320] sm:$0xff]  ;;  %433 = vst [vmem:[%s1588_s8 + $0x180] sm:$0xff] %v432_v48  ;;  %435 = vst [vmem:[%s1588_s8 + $0x188] sm:$0xff] %v434_v49  ;;  %v438_v51 = vld [vmem:[%s1583_s7 + $0x330] sm:$0xff] }
  0x32   : > { %437 = vst [vmem:[%s1588_s8 + $0x190] sm:$0xff] %v436_v50  ;;  %v440_v52 = vld [vmem:[%s1583_s7 + $0x340] sm:$0xff]  ;;  %v442_v53 = vld [vmem:[%s1583_s7 + $0x350] sm:$0xff]  ;;  %439 = vst [vmem:[%s1588_s8 + $0x198] sm:$0xff] %v438_v51 }
  0x33   : > { %441 = vst [vmem:[%s1588_s8 + $0x1a0] sm:$0xff] %v440_v52  ;;  %443 = vst [vmem:[%s1588_s8 + $0x1a8] sm:$0xff] %v442_v53  ;;  %v444_v54 = vld [vmem:[%s1583_s7 + $0x360] sm:$0xff]  ;;  %v446_v55 = vld [vmem:[%s1583_s7 + $0x370] sm:$0xff] }
  0x34   : > { %v448_v56 = vld [vmem:[%s1583_s7 + $0x380] sm:$0xff]  ;;  %445 = vst [vmem:[%s1588_s8 + $0x1b0] sm:$0xff] %v444_v54  ;;  %447 = vst [vmem:[%s1588_s8 + $0x1b8] sm:$0xff] %v446_v55  ;;  %v450_v57 = vld [vmem:[%s1583_s7 + $0x390] sm:$0xff] }
  0x35   : > { %449 = vst [vmem:[%s1588_s8 + $0x1c0] sm:$0xff] %v448_v56  ;;  %v452_v58 = vld [vmem:[%s1583_s7 + $0x3a0] sm:$0xff]  ;;  %v454_v59 = vld [vmem:[%s1583_s7 + $0x3b0] sm:$0xff]  ;;  %451 = vst [vmem:[%s1588_s8 + $0x1c8] sm:$0xff] %v450_v57 }
  0x36   : > { %453 = vst [vmem:[%s1588_s8 + $0x1d0] sm:$0xff] %v452_v58  ;;  %455 = vst [vmem:[%s1588_s8 + $0x1d8] sm:$0xff] %v454_v59  ;;  %v456_v60 = vld [vmem:[%s1583_s7 + $0x3c0] sm:$0xff]  ;;  %v458_v61 = vld [vmem:[%s1583_s7 + $0x3d0] sm:$0xff] }
  0x37   : > { %v460_v62 = vld [vmem:[%s1583_s7 + $0x3e0] sm:$0xff]  ;;  %457 = vst [vmem:[%s1588_s8 + $0x1e0] sm:$0xff] %v456_v60  ;;  %459 = vst [vmem:[%s1588_s8 + $0x1e8] sm:$0xff] %v458_v61  ;;  %v462_v63 = vld [vmem:[%s1583_s7 + $0x3f0] sm:$0xff] }
  0x38   : > { %461 = vst [vmem:[%s1588_s8 + $0x1f0] sm:$0xff] %v460_v62  ;;  %463 = vst [vmem:[%s1588_s8 + $0x1f8] sm:$0xff] %v462_v63 }
  0x39 PF: > { %p1207_p7 = scmp.ge.s32.totalorder %s1500_s18, 1  ;;  %p476_p8 = scmp.lt.s32.totalorder %s1500_s18, 19 }
  0x3b   : > { %p477_p9 = pnand %p1207_p7, %p476_p8 }
  0x3c   : > { %s483_s9 = sand.u32 (!%p477_p9), 1, %s1476_s12   ;;  %s1209_s10 = sshll.u32 (!%p477_p9), %s1484_s14, 2 }
  0x3d   : > { %480 = sbr.rel (%p477_p9) target bundleno = 376 (0x178), region = 66  ;;  %s1208_s11 = sshll.u32 (!%p477_p9), %s483_s9, 9 }
  0x3e   : > { %p526_p10 = scmp.lt.s32.totalorder (!%p477_p9), %s1209_s10, 35  ;;  %s1211_s21 = sshll.u32 (!%p477_p9), %s1488_s15, 1 }
  0x3f   : > { %p536_p11 = scmp.lt.s32.totalorder (!%p477_p9), %s1211_s21, 3  ;;  %s1737_s5 = scalar_lea.vmem (!%p477_p9), [#allocation3], %s1208_s11 }
  0x40   : > { %p1214_p12 = scmp.ne.s32.totalorder (!%p477_p9), %s1484_s14, 0 }
  0x44   : > { %s1851_s10 = smov (!%p526_p10, %s1209_s10), 35  ;;  %s1853_s21 = smov (!%p536_p11, %s1211_s21), 3 }
  0x45   : > { %s1210_s22 = sshll.u32 %s1851_s10, 2  ;;  %s538_s12 = scalar_lea.vmem %s1836_s2, %s1853_s21  ;;  %v1502_v0 = vmov (!%p1214_p12), 0.0  }
  0x46   : > { %s1723_s26 = scalar_lea.vmem %s1834_s0, %s1210_s22  ;;  %s1213_s29 = sshll.u32 %s1853_s21, 2  ;;  %554 = vst [vmem:[#allocation2] sm:$0xff] (!%p1214_p12), %v1502_v0  ;;  %555 = vst [vmem:[#allocation2 + $0x8] sm:$0xff] (!%p1214_p12), %v1502_v0 }
  0x47   : > { %s1735_s15 = scalar_lea.vmem %s1837_s3, %s1213_s29  ;;  %553 = sbr.rel (%p1214_p12) target bundleno = 78 (0x4e), region = 74 }
  0x4e PF: > { %v1346_v1 = vld [vmem:[%s1737_s5 + $0x4] ss:$8 sps:$4 sm:$0xff]   ;;  %v1350_v3 = vld [vmem:[%s1737_s5] ss:$8 sps:$4 sm:$0xff]   ;;  %v1352_v5 = vld [vmem:[%s1737_s5 + $0x14] ss:$8 sps:$4 sm:$0xff]  }
  0x4f   : > { %v1348_v2 = vld [vmem:[%s1737_s5 + $0x104] ss:$8 sps:$4 sm:$0xff]   ;;  %958 = vmatprep.subr.bf16.mxu0 %v1346_v1  ;;  %v1351_v4 = vld [vmem:[%s1737_s5 + $0x100] ss:$8 sps:$4 sm:$0xff]   ;;  %v1354_v6 = vld [vmem:[%s1737_s5 + $0x114] ss:$8 sps:$4 sm:$0xff]  }
  0x50   : > { %999 = vmatprep.subr.bf16.mxu1 %v1348_v2  ;;  %959 = vmatpush1.bf16.msra.mxu0 %v1350_v3  ;;  %v1356_v7 = vld [vmem:[%s1737_s5 + $0x10] ss:$8 sps:$4 sm:$0xff]   ;;  %v1358_v9 = vld [vmem:[%s1737_s5 + $0x24] ss:$8 sps:$4 sm:$0xff]   ;;  %v1362_v11 = vld [vmem:[%s1737_s5 + $0x20] ss:$8 sps:$4 sm:$0xff]  }
  0x51   : > { %1000 = vmatpush1.bf16.msra.mxu1 %v1351_v4  ;;  %960 = vmatprep.subr.bf16.mxu0 %v1352_v5  ;;  %v1357_v8 = vld [vmem:[%s1737_s5 + $0x110] ss:$8 sps:$4 sm:$0xff]   ;;  %v1360_v10 = vld [vmem:[%s1737_s5 + $0x124] ss:$8 sps:$4 sm:$0xff]   ;;  %v1363_v12 = vld [vmem:[%s1737_s5 + $0x120] ss:$8 sps:$4 sm:$0xff]  }
  0x52   : > { %1001 = vmatprep.subr.bf16.mxu1 %v1354_v6  ;;  %v1364_v13 = vld [vmem:[%s1737_s5 + $0x34] ss:$8 sps:$4 sm:$0xff]   ;;  %v1368_v15 = vld [vmem:[%s1737_s5 + $0x30] ss:$8 sps:$4 sm:$0xff]   ;;  %v1370_v17 = vld [vmem:[%s1737_s5 + $0x44] ss:$8 sps:$4 sm:$0xff]  }
  0x53   : > { %v1366_v14 = vld [vmem:[%s1737_s5 + $0x134] ss:$8 sps:$4 sm:$0xff]   ;;  %v1369_v16 = vld [vmem:[%s1737_s5 + $0x130] ss:$8 sps:$4 sm:$0xff]   ;;  %v1372_v18 = vld [vmem:[%s1737_s5 + $0x144] ss:$8 sps:$4 sm:$0xff]  }
  0x54   : > { %961 = vmatpush1.bf16.msra.mxu0 %v1356_v7  ;;  %v1374_v19 = vld [vmem:[%s1737_s5 + $0x40] ss:$8 sps:$4 sm:$0xff]   ;;  %v1376_v21 = vld [vmem:[%s1737_s5 + $0x54] ss:$8 sps:$4 sm:$0xff]   ;;  %v1380_v23 = vld [vmem:[%s1737_s5 + $0x50] ss:$8 sps:$4 sm:$0xff]  }
  0x55   : > { %1002 = vmatpush1.bf16.msra.mxu1 %v1357_v8  ;;  %962 = vmatprep.subr.bf16.mxu0 %v1358_v9  ;;  %v1375_v20 = vld [vmem:[%s1737_s5 + $0x140] ss:$8 sps:$4 sm:$0xff]   ;;  %v1378_v22 = vld [vmem:[%s1737_s5 + $0x154] ss:$8 sps:$4 sm:$0xff]   ;;  %v1381_v24 = vld [vmem:[%s1737_s5 + $0x150] ss:$8 sps:$4 sm:$0xff]  }
  0x56   : > { %1003 = vmatprep.subr.bf16.mxu1 %v1360_v10  ;;  %v1382_v25 = vld [vmem:[%s1737_s5 + $0x64] ss:$8 sps:$4 sm:$0xff]   ;;  %v1386_v27 = vld [vmem:[%s1737_s5 + $0x60] ss:$8 sps:$4 sm:$0xff]   ;;  %v1388_v29 = vld [vmem:[%s1737_s5 + $0x74] ss:$8 sps:$4 sm:$0xff]  }
  0x57   : > { %v1384_v26 = vld [vmem:[%s1737_s5 + $0x164] ss:$8 sps:$4 sm:$0xff]   ;;  %v1387_v28 = vld [vmem:[%s1737_s5 + $0x160] ss:$8 sps:$4 sm:$0xff]   ;;  %v1390_v30 = vld [vmem:[%s1737_s5 + $0x174] ss:$8 sps:$4 sm:$0xff]  }
  0x58   : > { %963 = vmatpush1.bf16.msra.mxu0 %v1362_v11  ;;  %v1392_v31 = vld [vmem:[%s1737_s5 + $0x70] ss:$8 sps:$4 sm:$0xff]   ;;  %v1394_v33 = vld [vmem:[%s1737_s5 + $0x84] ss:$8 sps:$4 sm:$0xff]   ;;  %v1398_v35 = vld [vmem:[%s1737_s5 + $0x80] ss:$8 sps:$4 sm:$0xff]  }
  0x59   : > { %1004 = vmatpush1.bf16.msra.mxu1 %v1363_v12  ;;  %964 = vmatprep.subr.bf16.mxu0 %v1364_v13  ;;  %v1393_v32 = vld [vmem:[%s1737_s5 + $0x170] ss:$8 sps:$4 sm:$0xff]   ;;  %v1396_v34 = vld [vmem:[%s1737_s5 + $0x184] ss:$8 sps:$4 sm:$0xff]   ;;  %v1399_v36 = vld [vmem:[%s1737_s5 + $0x180] ss:$8 sps:$4 sm:$0xff]  }
  0x5a   : > { %1005 = vmatprep.subr.bf16.mxu1 %v1366_v14  ;;  %v1400_v37 = vld [vmem:[%s1737_s5 + $0x94] ss:$8 sps:$4 sm:$0xff]   ;;  %v1404_v39 = vld [vmem:[%s1737_s5 + $0x90] ss:$8 sps:$4 sm:$0xff]   ;;  %v1406_v41 = vld [vmem:[%s1737_s5 + $0xa4] ss:$8 sps:$4 sm:$0xff]  }
  0x5b   : > { %v1402_v38 = vld [vmem:[%s1737_s5 + $0x194] ss:$8 sps:$4 sm:$0xff]   ;;  %v1405_v40 = vld [vmem:[%s1737_s5 + $0x190] ss:$8 sps:$4 sm:$0xff]   ;;  %v1408_v42 = vld [vmem:[%s1737_s5 + $0x1a4] ss:$8 sps:$4 sm:$0xff]  }
  0x5c   : > { %965 = vmatpush1.bf16.msra.mxu0 %v1368_v15  ;;  %v1410_v43 = vld [vmem:[%s1737_s5 + $0xa0] ss:$8 sps:$4 sm:$0xff]   ;;  %v1412_v45 = vld [vmem:[%s1737_s5 + $0xb4] ss:$8 sps:$4 sm:$0xff]   ;;  %v1416_v50 = vld [vmem:[%s1737_s5 + $0xb0] ss:$8 sps:$4 sm:$0xff]  }
  0x5d   : > { %1006 = vmatpush1.bf16.msra.mxu1 %v1369_v16  ;;  %966 = vmatprep.subr.bf16.mxu0 %v1370_v17  ;;  %v1411_v44 = vld [vmem:[%s1737_s5 + $0x1a0] ss:$8 sps:$4 sm:$0xff]   ;;  %v1414_v46 = vld [vmem:[%s1737_s5 + $0x1b4] ss:$8 sps:$4 sm:$0xff]   ;;  %v1417_v51 = vld [vmem:[%s1737_s5 + $0x1b0] ss:$8 sps:$4 sm:$0xff]  }
  0x5e   : > { %1007 = vmatprep.subr.bf16.mxu1 %v1372_v18  ;;  %v558_v47 = vld [vmem:[%s1723_s26] sm:$0xff]  ;;  %v559_v49 = vld [vmem:[%s1723_s26 + $0x8] sm:$0xff]  ;;  %v1418_v53 = vld [vmem:[%s1737_s5 + $0xc4] ss:$8 sps:$4 sm:$0xff]   ;;  %p1283_p13 = scmp.ne.s32.totalorder %s1484_s14, 8 }
  0x5f   : > { %v1216_v48 = vcombine.high %v558_v47, %v558_v47  ;;  %v1218_v52 = vcombine.high %v559_v49, %v559_v49  ;;  %v1420_v54 = vld [vmem:[%s1737_s5 + $0x1c4] ss:$8 sps:$4 sm:$0xff]   ;;  %v1422_v55 = vld [vmem:[%s1737_s5 + $0xc0] ss:$8 sps:$4 sm:$0xff]   ;;  %v1424_v57 = vld [vmem:[%s1737_s5 + $0xd4] ss:$8 sps:$4 sm:$0xff]   ;;  %v1215_v5 = vcombine.low %v558_v47, %v558_v47  ;;  %v1217_v6 = vcombine.low %v559_v49, %v559_v49 }
  0x60   : > { %967 = vmatpush1.bf16.msra.mxu0 %v1374_v19  ;;  %v1423_v56 = vld [vmem:[%s1737_s5 + $0x1c0] ss:$8 sps:$4 sm:$0xff]   ;;  %v1426_v58 = vld [vmem:[%s1737_s5 + $0x1d4] ss:$8 sps:$4 sm:$0xff]   ;;  %v1428_v59 = vld [vmem:[%s1737_s5 + $0xd0] ss:$8 sps:$4 sm:$0xff]  }
  0x61   : > { %1008 = vmatpush1.bf16.msra.mxu1 %v1375_v20  ;;  %968 = vmatprep.subr.bf16.mxu0 %v1376_v21  ;;  %v1429_v60 = vld [vmem:[%s1737_s5 + $0x1d0] ss:$8 sps:$4 sm:$0xff]   ;;  %v1430_v61 = vld [vmem:[%s1737_s5 + $0xe4] ss:$8 sps:$4 sm:$0xff]   ;;  %v1434_v63 = vld [vmem:[%s1737_s5 + $0xe0] ss:$8 sps:$4 sm:$0xff]   ;;  %v1052_v21 = vlaneseq (!%p1283_p13) }
  0x62   : > { %1009 = vmatprep.subr.bf16.mxu1 %v1378_v22  ;;  %990 = vmatprep.mubr.bf16.mxu0 %v1216_v48  ;;  %v1432_v62 = vld [vmem:[%s1737_s5 + $0x1e4] ss:$8 sps:$4 sm:$0xff]   ;;  %v1435_v0 = vld [vmem:[%s1737_s5 + $0x1e0] ss:$8 sps:$4 sm:$0xff]   ;;  %v1436_v1 = vld [vmem:[%s1737_s5 + $0xf4] ss:$8 sps:$4 sm:$0xff]  }
  0x63   : > { %1031 = vmatprep.mubr.bf16.mxu1 %v1218_v52  ;;  %v1438_v2 = vld [vmem:[%s1737_s5 + $0x1f4] ss:$8 sps:$4 sm:$0xff]   ;;  %v1440_v3 = vld [vmem:[%s1737_s5 + $0xf0] ss:$8 sps:$4 sm:$0xff]   ;;  %v1053_v22 = vshrl.u32 (!%p1283_p13), %v1052_v21, 7 }
  0x64   : > { %969 = vmatpush1.bf16.msra.mxu0 %v1380_v23  ;;  %v1441_v4 = vld [vmem:[%s1737_s5 + $0x1f0] ss:$8 sps:$4 sm:$0xff]  }
  0x65   : > { %1010 = vmatpush1.bf16.msra.mxu1 %v1381_v24  ;;  %970 = vmatprep.subr.bf16.mxu0 %v1382_v25  ;;  %v556_v8 = vld [vmem:[#allocation2] sm:$0xff]  ;;  %v557_v12 = vld [vmem:[#allocation2 + $0x8] sm:$0xff]  ;;  %v1054_v24 = vsub.s32 (!%p1283_p13), 0, %v1053_v22  ;;  %v1058_v25 = vsub.s32 (!%p1283_p13), 1, %v1053_v22 }
  0x66   : > { %1011 = vmatprep.subr.bf16.mxu1 %v1384_v26  ;;  %v1050_v23 = vld [vmem:[%s538_s12] sm:$0x3] (!%p1283_p13) }
  0x68   : > { %971 = vmatpush1.bf16.msra.mxu0 %v1386_v27 }
  0x69   : > { %1012 = vmatpush1.bf16.msra.mxu1 %v1387_v28  ;;  %972 = vmatprep.subr.bf16.mxu0 %v1388_v29  ;;  %v1055_v28 = vrot.slane (!%p1283_p13), %v1050_v23, %v1054_v24  ;;  %v1059_v29 = vrot.slane (!%p1283_p13), %v1050_v23, %v1058_v25 }
  0x6a   : > { %1013 = vmatprep.subr.bf16.mxu1 %v1390_v30 }
  0x6c   : > { %973 = vmatpush1.bf16.msra.mxu0 %v1392_v31 }
  0x6d   : > { %1014 = vmatpush1.bf16.msra.mxu1 %v1393_v32  ;;  %974 = vmatprep.subr.bf16.mxu0 %v1394_v33 }
  0x6e   : > { %1015 = vmatprep.subr.bf16.mxu1 %v1396_v34 }
  0x70   : > { %975 = vmatpush1.bf16.msra.mxu0 %v1398_v35 }
  0x71   : > { %1016 = vmatpush1.bf16.msra.mxu1 %v1399_v36  ;;  %976 = vmatprep.subr.bf16.mxu0 %v1400_v37 }
  0x72   : > { %1017 = vmatprep.subr.bf16.mxu1 %v1402_v38 }
  0x74   : > { %977 = vmatpush1.bf16.msra.mxu0 %v1404_v39 }
  0x75   : > { %1018 = vmatpush1.bf16.msra.mxu1 %v1405_v40  ;;  %978 = vmatprep.subr.bf16.mxu0 %v1406_v41 }
  0x76   : > { %1019 = vmatprep.subr.bf16.mxu1 %v1408_v42 }
  0x78   : > { %979 = vmatpush1.bf16.msra.mxu0 %v1410_v43 }
  0x79   : > { %1020 = vmatpush1.bf16.msra.mxu1 %v1411_v44  ;;  %980 = vmatprep.subr.bf16.mxu0 %v1412_v45 }
  0x7a   : > { %1021 = vmatprep.subr.bf16.mxu1 %v1414_v46 }
  0x7c   : > { %981 = vmatpush1.bf16.msra.mxu0 %v1416_v50 }
  0x7d   : > { %1022 = vmatpush1.bf16.msra.mxu1 %v1417_v51  ;;  %982 = vmatprep.subr.bf16.mxu0 %v1418_v53 }
  0x7e   : > { %1023 = vmatprep.subr.bf16.mxu1 %v1420_v54 }
  0x80   : > { %983 = vmatpush1.bf16.msra.mxu0 %v1422_v55 }
  0x81   : > { %1024 = vmatpush1.bf16.msra.mxu1 %v1423_v56  ;;  %984 = vmatprep.subr.bf16.mxu0 %v1424_v57 }
  0x82   : > { %1025 = vmatprep.subr.bf16.mxu1 %v1426_v58 }
  0x84   : > { %985 = vmatpush1.bf16.msra.mxu0 %v1428_v59 }
  0x85   : > { %1026 = vmatpush1.bf16.msra.mxu1 %v1429_v60  ;;  %986 = vmatprep.subr.bf16.mxu0 %v1430_v61 }
  0x86   : > { %1027 = vmatprep.subr.bf16.mxu1 %v1432_v62 }
  0x88   : > { %987 = vmatpush1.bf16.msra.mxu0 %v1434_v63 }
  0x89   : > { %1028 = vmatpush1.bf16.msra.mxu1 %v1435_v0  ;;  %988 = vmatprep.subr.bf16.mxu0 %v1436_v1 }
  0x8a   : > { %1029 = vmatprep.subr.bf16.mxu1 %v1438_v2 }
  0x8c   : > { %989 = vmatpush1.bf16.msra.mxu0 %v1440_v3 }
  0x8d   : > { %1030 = vmatpush1.bf16.msra.mxu1 %v1441_v4 }
  0x8f   : > { %991 = vmatmul.mubr.bf16.vlgmr.msra.gmra.mrb[0].mxu0 %v1215_v5 }
  0x90   : > { %1032 = vmatmul.mubr.bf16.vlgmr.msra.gmra.mrb[0].mxu1 %v1217_v6 }
 0x162   : > { %v992_v7 = vpop.f32.mrb[0].mxu0 }
 0x163   : > { %v1033_v9 = vpop.f32.mrb[0].mxu1  ;;  %v994_v11 = vpop.f32.mrb[1].mxu0  ;;  %1047 = sbr.rel (%p1283_p13) target bundleno = 376 (0x178), region = 78 }
 0x164   : > { %v1034_v10 = vadd.f32 %v1033_v9, %v992_v7  ;;  %v1035_v13 = vpop.f32.mrb[1].mxu1  ;;  %v996_v15 = vpop.f32.mrb[2].mxu0 }
 0x165   : > { %v1036_v14 = vadd.f32 %v1035_v13, %v994_v11  ;;  %v1037_v16 = vpop.f32.mrb[2].mxu1  ;;  %v997_v18 = vpop.f32.mrb[3].mxu0 }
 0x166   : > { %v1040_v17 = vadd.f32 %v1034_v10, %v556_v8  ;;  %v1038_v19 = vpop.f32.mrb[3].mxu1 }
 0x167   : > { %v1041_v20 = vadd.f32 %v1036_v14, %v557_v12 }
 0x168   : > { %1042 = vst [vmem:[#allocation2] sm:$0xff] %v1040_v17 }
 0x169   : > { %1043 = vst [vmem:[#allocation2 + $0x8] sm:$0xff] %v1041_v20 }
 0x16f   : > { %v1048_v26 = vld [vmem:[#allocation2] sm:$0xff] }
 0x170   : > { %v1049_v27 = vld [vmem:[#allocation2 + $0x8] sm:$0xff]  ;;  %v1062_v30 = vadd.f32 %v1055_v28, %v1048_v26 }
 0x171   : > { %v1063_v31 = vadd.f32 %v1059_v29, %v1049_v27 }
 0x172   : > { %v1064_v32 = vmax.f32 %v1062_v30, 0.0 }
 0x173   : > { %v1065_v33 = vmax.f32 %v1063_v31, 0.0 }
 0x175   : > { %v1288_v34 = vpack.c.bf16 %v1065_v33, %v1064_v32 }
 0x177   : > { %1074 = vst [vmem:[%s1735_s15] sm:$0xff] %v1288_v34 }
 0x178 PF: > { %s13_s18 = sadd.s32 1, %s1500_s18   ;;  %s1838_s12 = smov %s1480_s13 }
 0x179   : > { %p10_p0 = scmp.ge.s32.totalorder %s13_s18, 20   ;;  %s1839_s13 = smov %s1574_s25 }
 0x17a   : > { %s1840_s14 = smov %s1492_s16  ;;  %s1841_s15 = smov %s1496_s17 }
 0x17b   : > { %s1842_s16 = smov %s1845_s19  ;;  %s1843_s17 = smov %s1849_s20 }
 0x17c   :  { %12 = sbr.rel (!%p10_p0) target bundleno = 4 (0x4), region = 119 }

// kernel: _lambda_.38
= control target key start
LH: loop header
LB: loop body
LE: loop exit
PB: predicated region body
PF: predicated region fallthrough
CT: control target
= control target key end

     0   :  { %s1616_s15 = smov 0   ;;  %s1618_s16 = smov 0   ;;  %s1933_s0 = inlined_call_operand.vmem [shape: bf16[8,4608], index: 0, kind: input, shape index: {}]   ;;  %s1934_s1 = inlined_call_operand.vmem [shape: bf16[4608,512], index: 1, kind: input, shape index: {}]   ;;  %s1935_s2 = inlined_call_operand.vmem [shape: f32[1,512], index: 2, kind: input, shape index: {}]   ;;  %s1936_s3 = inlined_call_operand.vmem [shape: bf16[8,512], index: 3, kind: input, shape index: {}]   ;;  %s1937_s4 = inlined_call_operand.vmem [shape: bf16[8,512], index: 4, kind: output, shape index: {}]  }
   0x1   :  { %s1620_s17 = smov 0   ;;  %s1622_s18 = smov 0  }
   0x2   :  { %s1624_s19 = smov 0   ;;  %s1626_s20 = smov 0  }
   0x3   :  { %s1628_s21 = smov 0  }
   0x4 LB: > { %s26_s22 = sadd.s32 1, %s1580_s19  ;;  %s29_s23 = sadd.s32 1, %s1584_s20  ;;  %s1588_s21 = sphi %s1628_s21, %s14_s21   ;;  %s1584_s20 = sphi %s1626_s20, %s1943_s20   ;;  %s1580_s19 = sphi %s1624_s19, %s1942_s19   ;;  %s1576_s18 = sphi %s1622_s18, %s1941_s18   ;;  %s1572_s17 = sphi %s1620_s17, %s1940_s17   ;;  %s1568_s16 = sphi %s1618_s16, %s1939_s16   ;;  %s1564_s15 = sphi %s1616_s15, %s1938_s15  }
   0x5   : > { %p27_p0 = scmp.ge.s32.totalorder %s26_s22, 9  ;;  %p77_p1 = scmp.ne.s32.totalorder %s1568_s16, %s1564_s15 }
   0x6   : > { %p78_p2 = scmp.eq.s32.totalorder %s1588_s21, 0  ;;  %s70_s27 = sadd.s32 1, %s1568_s16 }
   0x7   : > { %s1945_s22 = smov (%p27_p0, %s26_s22), 0  ;;  %s1947_s23 = smov (!%p27_p0, %s29_s23), %s1584_s20 }
   0x8   : > { %p79_p3 = por %p78_p2, %p77_p1  ;;  %p31_p4 = scmp.ge.s32.totalorder %s1947_s23, 2 }
   0x9   : > { %s65_s24 = ssub.s32 %s1580_s19, %s1945_s22  ;;  %p1287_p6 = scmp.ge.s32.totalorder %s1588_s21, 18 }
   0xa   : > { %s1949_s23 = smov (%p31_p4, %s1947_s23), 0 }
   0xb   : > { %s66_s25 = ssub.s32 %s1584_s20, %s1949_s23  ;;  %185 = sbr.rel (%p1287_p6) target bundleno = 57 (0x39), region = 16 }
   0xc   : > { %s67_s26 = sor.u32 %s66_s25, %s65_s24 }
   0xd   : > { %p68_p5 = scmp.eq.s32.totalorder %s67_s26, 0 }
   0xf   : > { %s1667_s28 = scalar_select %p68_p5, %s1568_s16, %s70_s27  }
  0x12   : > { %201 = sbr.rel (!%p79_p3) target bundleno = 57 (0x39), region = 24  ;;  %s203_s29 = sand.u32 (%p79_p3), 1, %s1568_s16  }
  0x13   : > { %s1290_s30 = sshll.u32 (%p79_p3), %s1584_s20, 1  ;;  %s1288_s5 = sshll.u32 (%p79_p3), %s203_s29, 9 }
  0x14   : > { %s1375_s6 = sshll.u32 (%p79_p3), %s1580_s19, 8  ;;  %s1681_s12 = scalar_lea.vmem (%p79_p3), [#allocation3], %s1288_s5 }
  0x15   : > { %s209_s7 = sadd.s32 (%p79_p3), %s1375_s6, %s1290_s30 }
  0x16   : > { %s1292_s8 = sshll.u32 (%p79_p3), %s209_s7, 2 }
  0x17   : > { %s1676_s11 = scalar_lea.vmem (%p79_p3), %s1934_s1, %s1292_s8 }
  0x18   : > { %v365_v0 = vld [vmem:[%s1676_s11] sm:$0xff] (%p79_p3)  ;;  %v367_v1 = vld [vmem:[%s1676_s11 + $0x10] sm:$0xff] (%p79_p3) }
  0x19   : > { %v369_v2 = vld [vmem:[%s1676_s11 + $0x20] sm:$0xff]  ;;  %366 = vst [vmem:[%s1681_s12] sm:$0xff] %v365_v0  ;;  %368 = vst [vmem:[%s1681_s12 + $0x8] sm:$0xff] %v367_v1  ;;  %v371_v3 = vld [vmem:[%s1676_s11 + $0x30] sm:$0xff] }
  0x1a   : > { %370 = vst [vmem:[%s1681_s12 + $0x10] sm:$0xff] %v369_v2  ;;  %v373_v4 = vld [vmem:[%s1676_s11 + $0x40] sm:$0xff]  ;;  %v375_v5 = vld [vmem:[%s1676_s11 + $0x50] sm:$0xff]  ;;  %372 = vst [vmem:[%s1681_s12 + $0x18] sm:$0xff] %v371_v3 }
  0x1b   : > { %374 = vst [vmem:[%s1681_s12 + $0x20] sm:$0xff] %v373_v4  ;;  %376 = vst [vmem:[%s1681_s12 + $0x28] sm:$0xff] %v375_v5  ;;  %v377_v6 = vld [vmem:[%s1676_s11 + $0x60] sm:$0xff]  ;;  %v379_v7 = vld [vmem:[%s1676_s11 + $0x70] sm:$0xff] }
  0x1c   : > { %v381_v8 = vld [vmem:[%s1676_s11 + $0x80] sm:$0xff]  ;;  %378 = vst [vmem:[%s1681_s12 + $0x30] sm:$0xff] %v377_v6  ;;  %380 = vst [vmem:[%s1681_s12 + $0x38] sm:$0xff] %v379_v7  ;;  %v383_v9 = vld [vmem:[%s1676_s11 + $0x90] sm:$0xff] }
  0x1d   : > { %382 = vst [vmem:[%s1681_s12 + $0x40] sm:$0xff] %v381_v8  ;;  %v385_v10 = vld [vmem:[%s1676_s11 + $0xa0] sm:$0xff]  ;;  %v387_v11 = vld [vmem:[%s1676_s11 + $0xb0] sm:$0xff]  ;;  %384 = vst [vmem:[%s1681_s12 + $0x48] sm:$0xff] %v383_v9 }
  0x1e   : > { %386 = vst [vmem:[%s1681_s12 + $0x50] sm:$0xff] %v385_v10  ;;  %388 = vst [vmem:[%s1681_s12 + $0x58] sm:$0xff] %v387_v11  ;;  %v389_v12 = vld [vmem:[%s1676_s11 + $0xc0] sm:$0xff]  ;;  %v391_v13 = vld [vmem:[%s1676_s11 + $0xd0] sm:$0xff] }
  0x1f   : > { %v393_v14 = vld [vmem:[%s1676_s11 + $0xe0] sm:$0xff]  ;;  %390 = vst [vmem:[%s1681_s12 + $0x60] sm:$0xff] %v389_v12  ;;  %392 = vst [vmem:[%s1681_s12 + $0x68] sm:$0xff] %v391_v13  ;;  %v395_v15 = vld [vmem:[%s1676_s11 + $0xf0] sm:$0xff] }
  0x20   : > { %394 = vst [vmem:[%s1681_s12 + $0x70] sm:$0xff] %v393_v14  ;;  %v397_v16 = vld [vmem:[%s1676_s11 + $0x100] sm:$0xff]  ;;  %v399_v17 = vld [vmem:[%s1676_s11 + $0x110] sm:$0xff]  ;;  %396 = vst [vmem:[%s1681_s12 + $0x78] sm:$0xff] %v395_v15 }
  0x21   : > { %398 = vst [vmem:[%s1681_s12 + $0x80] sm:$0xff] %v397_v16  ;;  %400 = vst [vmem:[%s1681_s12 + $0x88] sm:$0xff] %v399_v17  ;;  %v401_v18 = vld [vmem:[%s1676_s11 + $0x120] sm:$0xff]  ;;  %v403_v19 = vld [vmem:[%s1676_s11 + $0x130] sm:$0xff] }
  0x22   : > { %v405_v20 = vld [vmem:[%s1676_s11 + $0x140] sm:$0xff]  ;;  %402 = vst [vmem:[%s1681_s12 + $0x90] sm:$0xff] %v401_v18  ;;  %404 = vst [vmem:[%s1681_s12 + $0x98] sm:$0xff] %v403_v19  ;;  %v407_v21 = vld [vmem:[%s1676_s11 + $0x150] sm:$0xff] }
  0x23   : > { %406 = vst [vmem:[%s1681_s12 + $0xa0] sm:$0xff] %v405_v20  ;;  %v409_v22 = vld [vmem:[%s1676_s11 + $0x160] sm:$0xff]  ;;  %v411_v23 = vld [vmem:[%s1676_s11 + $0x170] sm:$0xff]  ;;  %408 = vst [vmem:[%s1681_s12 + $0xa8] sm:$0xff] %v407_v21 }
  0x24   : > { %410 = vst [vmem:[%s1681_s12 + $0xb0] sm:$0xff] %v409_v22  ;;  %412 = vst [vmem:[%s1681_s12 + $0xb8] sm:$0xff] %v411_v23  ;;  %v413_v24 = vld [vmem:[%s1676_s11 + $0x180] sm:$0xff]  ;;  %v415_v25 = vld [vmem:[%s1676_s11 + $0x190] sm:$0xff] }
  0x25   : > { %v417_v26 = vld [vmem:[%s1676_s11 + $0x1a0] sm:$0xff]  ;;  %414 = vst [vmem:[%s1681_s12 + $0xc0] sm:$0xff] %v413_v24  ;;  %416 = vst [vmem:[%s1681_s12 + $0xc8] sm:$0xff] %v415_v25  ;;  %v419_v27 = vld [vmem:[%s1676_s11 + $0x1b0] sm:$0xff] }
  0x26   : > { %418 = vst [vmem:[%s1681_s12 + $0xd0] sm:$0xff] %v417_v26  ;;  %v421_v28 = vld [vmem:[%s1676_s11 + $0x1c0] sm:$0xff]  ;;  %v423_v29 = vld [vmem:[%s1676_s11 + $0x1d0] sm:$0xff]  ;;  %420 = vst [vmem:[%s1681_s12 + $0xd8] sm:$0xff] %v419_v27 }
  0x27   : > { %422 = vst [vmem:[%s1681_s12 + $0xe0] sm:$0xff] %v421_v28  ;;  %424 = vst [vmem:[%s1681_s12 + $0xe8] sm:$0xff] %v423_v29  ;;  %v425_v30 = vld [vmem:[%s1676_s11 + $0x1e0] sm:$0xff]  ;;  %v427_v31 = vld [vmem:[%s1676_s11 + $0x1f0] sm:$0xff] }
  0x28   : > { %v429_v32 = vld [vmem:[%s1676_s11 + $0x200] sm:$0xff]  ;;  %426 = vst [vmem:[%s1681_s12 + $0xf0] sm:$0xff] %v425_v30  ;;  %428 = vst [vmem:[%s1681_s12 + $0xf8] sm:$0xff] %v427_v31  ;;  %v431_v33 = vld [vmem:[%s1676_s11 + $0x210] sm:$0xff] }
  0x29   : > { %430 = vst [vmem:[%s1681_s12 + $0x100] sm:$0xff] %v429_v32  ;;  %v433_v34 = vld [vmem:[%s1676_s11 + $0x220] sm:$0xff]  ;;  %v435_v35 = vld [vmem:[%s1676_s11 + $0x230] sm:$0xff]  ;;  %432 = vst [vmem:[%s1681_s12 + $0x108] sm:$0xff] %v431_v33 }
  0x2a   : > { %434 = vst [vmem:[%s1681_s12 + $0x110] sm:$0xff] %v433_v34  ;;  %436 = vst [vmem:[%s1681_s12 + $0x118] sm:$0xff] %v435_v35  ;;  %v437_v36 = vld [vmem:[%s1676_s11 + $0x240] sm:$0xff]  ;;  %v439_v37 = vld [vmem:[%s1676_s11 + $0x250] sm:$0xff] }
  0x2b   : > { %v441_v38 = vld [vmem:[%s1676_s11 + $0x260] sm:$0xff]  ;;  %438 = vst [vmem:[%s1681_s12 + $0x120] sm:$0xff] %v437_v36  ;;  %440 = vst [vmem:[%s1681_s12 + $0x128] sm:$0xff] %v439_v37  ;;  %v443_v39 = vld [vmem:[%s1676_s11 + $0x270] sm:$0xff] }
  0x2c   : > { %442 = vst [vmem:[%s1681_s12 + $0x130] sm:$0xff] %v441_v38  ;;  %v445_v40 = vld [vmem:[%s1676_s11 + $0x280] sm:$0xff]  ;;  %v447_v41 = vld [vmem:[%s1676_s11 + $0x290] sm:$0xff]  ;;  %444 = vst [vmem:[%s1681_s12 + $0x138] sm:$0xff] %v443_v39 }
  0x2d   : > { %446 = vst [vmem:[%s1681_s12 + $0x140] sm:$0xff] %v445_v40  ;;  %448 = vst [vmem:[%s1681_s12 + $0x148] sm:$0xff] %v447_v41  ;;  %v449_v42 = vld [vmem:[%s1676_s11 + $0x2a0] sm:$0xff]  ;;  %v451_v43 = vld [vmem:[%s1676_s11 + $0x2b0] sm:$0xff] }
  0x2e   : > { %v453_v44 = vld [vmem:[%s1676_s11 + $0x2c0] sm:$0xff]  ;;  %450 = vst [vmem:[%s1681_s12 + $0x150] sm:$0xff] %v449_v42  ;;  %452 = vst [vmem:[%s1681_s12 + $0x158] sm:$0xff] %v451_v43  ;;  %v455_v45 = vld [vmem:[%s1676_s11 + $0x2d0] sm:$0xff] }
  0x2f   : > { %454 = vst [vmem:[%s1681_s12 + $0x160] sm:$0xff] %v453_v44  ;;  %v457_v46 = vld [vmem:[%s1676_s11 + $0x2e0] sm:$0xff]  ;;  %v459_v47 = vld [vmem:[%s1676_s11 + $0x2f0] sm:$0xff]  ;;  %456 = vst [vmem:[%s1681_s12 + $0x168] sm:$0xff] %v455_v45 }
  0x30   : > { %458 = vst [vmem:[%s1681_s12 + $0x170] sm:$0xff] %v457_v46  ;;  %460 = vst [vmem:[%s1681_s12 + $0x178] sm:$0xff] %v459_v47  ;;  %v461_v48 = vld [vmem:[%s1676_s11 + $0x300] sm:$0xff]  ;;  %v463_v49 = vld [vmem:[%s1676_s11 + $0x310] sm:$0xff] }
  0x31   : > { %v465_v50 = vld [vmem:[%s1676_s11 + $0x320] sm:$0xff]  ;;  %462 = vst [vmem:[%s1681_s12 + $0x180] sm:$0xff] %v461_v48  ;;  %464 = vst [vmem:[%s1681_s12 + $0x188] sm:$0xff] %v463_v49  ;;  %v467_v51 = vld [vmem:[%s1676_s11 + $0x330] sm:$0xff] }
  0x32   : > { %466 = vst [vmem:[%s1681_s12 + $0x190] sm:$0xff] %v465_v50  ;;  %v469_v52 = vld [vmem:[%s1676_s11 + $0x340] sm:$0xff]  ;;  %v471_v53 = vld [vmem:[%s1676_s11 + $0x350] sm:$0xff]  ;;  %468 = vst [vmem:[%s1681_s12 + $0x198] sm:$0xff] %v467_v51 }
  0x33   : > { %470 = vst [vmem:[%s1681_s12 + $0x1a0] sm:$0xff] %v469_v52  ;;  %472 = vst [vmem:[%s1681_s12 + $0x1a8] sm:$0xff] %v471_v53  ;;  %v473_v54 = vld [vmem:[%s1676_s11 + $0x360] sm:$0xff]  ;;  %v475_v55 = vld [vmem:[%s1676_s11 + $0x370] sm:$0xff] }
  0x34   : > { %v477_v56 = vld [vmem:[%s1676_s11 + $0x380] sm:$0xff]  ;;  %474 = vst [vmem:[%s1681_s12 + $0x1b0] sm:$0xff] %v473_v54  ;;  %476 = vst [vmem:[%s1681_s12 + $0x1b8] sm:$0xff] %v475_v55  ;;  %v479_v57 = vld [vmem:[%s1676_s11 + $0x390] sm:$0xff] }
  0x35   : > { %478 = vst [vmem:[%s1681_s12 + $0x1c0] sm:$0xff] %v477_v56  ;;  %v481_v58 = vld [vmem:[%s1676_s11 + $0x3a0] sm:$0xff]  ;;  %v483_v59 = vld [vmem:[%s1676_s11 + $0x3b0] sm:$0xff]  ;;  %480 = vst [vmem:[%s1681_s12 + $0x1c8] sm:$0xff] %v479_v57 }
  0x36   : > { %482 = vst [vmem:[%s1681_s12 + $0x1d0] sm:$0xff] %v481_v58  ;;  %484 = vst [vmem:[%s1681_s12 + $0x1d8] sm:$0xff] %v483_v59  ;;  %v485_v60 = vld [vmem:[%s1676_s11 + $0x3c0] sm:$0xff]  ;;  %v487_v61 = vld [vmem:[%s1676_s11 + $0x3d0] sm:$0xff] }
  0x37   : > { %v489_v62 = vld [vmem:[%s1676_s11 + $0x3e0] sm:$0xff]  ;;  %486 = vst [vmem:[%s1681_s12 + $0x1e0] sm:$0xff] %v485_v60  ;;  %488 = vst [vmem:[%s1681_s12 + $0x1e8] sm:$0xff] %v487_v61  ;;  %v491_v63 = vld [vmem:[%s1676_s11 + $0x3f0] sm:$0xff] }
  0x38   : > { %490 = vst [vmem:[%s1681_s12 + $0x1f0] sm:$0xff] %v489_v62  ;;  %492 = vst [vmem:[%s1681_s12 + $0x1f8] sm:$0xff] %v491_v63 }
  0x39 PF: > { %p1293_p7 = scmp.ge.s32.totalorder %s1588_s21, 1  ;;  %p518_p8 = scmp.lt.s32.totalorder %s1588_s21, 19 }
  0x3b   : > { %p519_p9 = pnand %p1293_p7, %p518_p8 }
  0x3c   : > { %s525_s13 = sand.u32 (!%p519_p9), 1, %s1564_s15   ;;  %s1295_s14 = sshll.u32 (!%p519_p9), %s1572_s17, 2 }
  0x3d   : > { %522 = sbr.rel (%p519_p9) target bundleno = 379 (0x17b), region = 70  ;;  %s1294_s24 = sshll.u32 (!%p519_p9), %s525_s13, 9 }
  0x3e   : > { %p579_p10 = scmp.lt.s32.totalorder (!%p519_p9), %s1295_s14, 35  ;;  %s1297_s25 = sshll.u32 (!%p519_p9), %s1576_s18, 1 }
  0x3f   : > { %p589_p11 = scmp.lt.s32.totalorder (!%p519_p9), %s1297_s25, 3  ;;  %s1835_s13 = scalar_lea.vmem (!%p519_p9), [#allocation3], %s1294_s24 }
  0x40   : > { %p1302_p12 = scmp.ne.s32.totalorder (!%p519_p9), %s1572_s17, 0 }
  0x44   : > { %s1951_s14 = smov (!%p579_p10, %s1295_s14), 35  ;;  %s1953_s25 = smov (!%p589_p11, %s1297_s25), 3 }
  0x45   : > { %s1296_s26 = sshll.u32 %s1951_s14, 2  ;;  %s591_s15 = scalar_lea.vmem %s1935_s2, %s1953_s25  ;;  %v1590_v0 = vmov (!%p1302_p12), 0.0  }
  0x46   : > { %s1816_s30 = scalar_lea.vmem %s1933_s0, %s1296_s26  ;;  %s1299_s7 = sshll.u32 %s1953_s25, 2  ;;  %617 = vst [vmem:[#allocation2] sm:$0xff] (!%p1302_p12), %v1590_v0  ;;  %618 = vst [vmem:[#allocation2 + $0x8] sm:$0xff] (!%p1302_p12), %v1590_v0 }
  0x47   : > { %s1828_s18 = scalar_lea.vmem %s1936_s3, %s1299_s7  ;;  %s1833_s12 = scalar_lea.vmem %s1937_s4, %s1299_s7 }
  0x48   : > { %616 = sbr.rel (%p1302_p12) target bundleno = 79 (0x4f), region = 78 }
  0x4f PF: > { %v1434_v1 = vld [vmem:[%s1835_s13 + $0x4] ss:$8 sps:$4 sm:$0xff]   ;;  %v1438_v3 = vld [vmem:[%s1835_s13] ss:$8 sps:$4 sm:$0xff]   ;;  %v1440_v5 = vld [vmem:[%s1835_s13 + $0x14] ss:$8 sps:$4 sm:$0xff]  }
  0x50   : > { %v1436_v2 = vld [vmem:[%s1835_s13 + $0x104] ss:$8 sps:$4 sm:$0xff]   ;;  %1021 = vmatprep.subr.bf16.mxu0 %v1434_v1  ;;  %v1439_v4 = vld [vmem:[%s1835_s13 + $0x100] ss:$8 sps:$4 sm:$0xff]   ;;  %v1442_v6 = vld [vmem:[%s1835_s13 + $0x114] ss:$8 sps:$4 sm:$0xff]  }
  0x51   : > { %1062 = vmatprep.subr.bf16.mxu1 %v1436_v2  ;;  %1022 = vmatpush1.bf16.msra.mxu0 %v1438_v3  ;;  %v1444_v7 = vld [vmem:[%s1835_s13 + $0x10] ss:$8 sps:$4 sm:$0xff]   ;;  %v1446_v9 = vld [vmem:[%s1835_s13 + $0x24] ss:$8 sps:$4 sm:$0xff]   ;;  %v1450_v11 = vld [vmem:[%s1835_s13 + $0x20] ss:$8 sps:$4 sm:$0xff]  }
  0x52   : > { %1063 = vmatpush1.bf16.msra.mxu1 %v1439_v4  ;;  %1023 = vmatprep.subr.bf16.mxu0 %v1440_v5  ;;  %v1445_v8 = vld [vmem:[%s1835_s13 + $0x110] ss:$8 sps:$4 sm:$0xff]   ;;  %v1448_v10 = vld [vmem:[%s1835_s13 + $0x124] ss:$8 sps:$4 sm:$0xff]   ;;  %v1451_v12 = vld [vmem:[%s1835_s13 + $0x120] ss:$8 sps:$4 sm:$0xff]  }
  0x53   : > { %1064 = vmatprep.subr.bf16.mxu1 %v1442_v6  ;;  %v1452_v13 = vld [vmem:[%s1835_s13 + $0x34] ss:$8 sps:$4 sm:$0xff]   ;;  %v1456_v15 = vld [vmem:[%s1835_s13 + $0x30] ss:$8 sps:$4 sm:$0xff]   ;;  %v1458_v17 = vld [vmem:[%s1835_s13 + $0x44] ss:$8 sps:$4 sm:$0xff]  }
  0x54   : > { %v1454_v14 = vld [vmem:[%s1835_s13 + $0x134] ss:$8 sps:$4 sm:$0xff]   ;;  %v1457_v16 = vld [vmem:[%s1835_s13 + $0x130] ss:$8 sps:$4 sm:$0xff]   ;;  %v1460_v18 = vld [vmem:[%s1835_s13 + $0x144] ss:$8 sps:$4 sm:$0xff]  }
  0x55   : > { %1024 = vmatpush1.bf16.msra.mxu0 %v1444_v7  ;;  %v1462_v19 = vld [vmem:[%s1835_s13 + $0x40] ss:$8 sps:$4 sm:$0xff]   ;;  %v1464_v21 = vld [vmem:[%s1835_s13 + $0x54] ss:$8 sps:$4 sm:$0xff]   ;;  %v1468_v23 = vld [vmem:[%s1835_s13 + $0x50] ss:$8 sps:$4 sm:$0xff]  }
  0x56   : > { %1065 = vmatpush1.bf16.msra.mxu1 %v1445_v8  ;;  %1025 = vmatprep.subr.bf16.mxu0 %v1446_v9  ;;  %v1463_v20 = vld [vmem:[%s1835_s13 + $0x140] ss:$8 sps:$4 sm:$0xff]   ;;  %v1466_v22 = vld [vmem:[%s1835_s13 + $0x154] ss:$8 sps:$4 sm:$0xff]   ;;  %v1469_v24 = vld [vmem:[%s1835_s13 + $0x150] ss:$8 sps:$4 sm:$0xff]  }
  0x57   : > { %1066 = vmatprep.subr.bf16.mxu1 %v1448_v10  ;;  %v1470_v25 = vld [vmem:[%s1835_s13 + $0x64] ss:$8 sps:$4 sm:$0xff]   ;;  %v1474_v27 = vld [vmem:[%s1835_s13 + $0x60] ss:$8 sps:$4 sm:$0xff]   ;;  %v1476_v29 = vld [vmem:[%s1835_s13 + $0x74] ss:$8 sps:$4 sm:$0xff]  }
  0x58   : > { %v1472_v26 = vld [vmem:[%s1835_s13 + $0x164] ss:$8 sps:$4 sm:$0xff]   ;;  %v1475_v28 = vld [vmem:[%s1835_s13 + $0x160] ss:$8 sps:$4 sm:$0xff]   ;;  %v1478_v30 = vld [vmem:[%s1835_s13 + $0x174] ss:$8 sps:$4 sm:$0xff]  }
  0x59   : > { %1026 = vmatpush1.bf16.msra.mxu0 %v1450_v11  ;;  %v1480_v31 = vld [vmem:[%s1835_s13 + $0x70] ss:$8 sps:$4 sm:$0xff]   ;;  %v1482_v33 = vld [vmem:[%s1835_s13 + $0x84] ss:$8 sps:$4 sm:$0xff]   ;;  %v1486_v35 = vld [vmem:[%s1835_s13 + $0x80] ss:$8 sps:$4 sm:$0xff]  }
  0x5a   : > { %1067 = vmatpush1.bf16.msra.mxu1 %v1451_v12  ;;  %1027 = vmatprep.subr.bf16.mxu0 %v1452_v13  ;;  %v1481_v32 = vld [vmem:[%s1835_s13 + $0x170] ss:$8 sps:$4 sm:$0xff]   ;;  %v1484_v34 = vld [vmem:[%s1835_s13 + $0x184] ss:$8 sps:$4 sm:$0xff]   ;;  %v1487_v36 = vld [vmem:[%s1835_s13 + $0x180] ss:$8 sps:$4 sm:$0xff]  }
  0x5b   : > { %1068 = vmatprep.subr.bf16.mxu1 %v1454_v14  ;;  %v1488_v37 = vld [vmem:[%s1835_s13 + $0x94] ss:$8 sps:$4 sm:$0xff]   ;;  %v1492_v39 = vld [vmem:[%s1835_s13 + $0x90] ss:$8 sps:$4 sm:$0xff]   ;;  %v1494_v41 = vld [vmem:[%s1835_s13 + $0xa4] ss:$8 sps:$4 sm:$0xff]  }
  0x5c   : > { %v1490_v38 = vld [vmem:[%s1835_s13 + $0x194] ss:$8 sps:$4 sm:$0xff]   ;;  %v1493_v40 = vld [vmem:[%s1835_s13 + $0x190] ss:$8 sps:$4 sm:$0xff]   ;;  %v1496_v42 = vld [vmem:[%s1835_s13 + $0x1a4] ss:$8 sps:$4 sm:$0xff]  }
  0x5d   : > { %1028 = vmatpush1.bf16.msra.mxu0 %v1456_v15  ;;  %v1498_v43 = vld [vmem:[%s1835_s13 + $0xa0] ss:$8 sps:$4 sm:$0xff]   ;;  %v1500_v45 = vld [vmem:[%s1835_s13 + $0xb4] ss:$8 sps:$4 sm:$0xff]   ;;  %v1504_v50 = vld [vmem:[%s1835_s13 + $0xb0] ss:$8 sps:$4 sm:$0xff]  }
  0x5e   : > { %1069 = vmatpush1.bf16.msra.mxu1 %v1457_v16  ;;  %1029 = vmatprep.subr.bf16.mxu0 %v1458_v17  ;;  %v1499_v44 = vld [vmem:[%s1835_s13 + $0x1a0] ss:$8 sps:$4 sm:$0xff]   ;;  %v1502_v46 = vld [vmem:[%s1835_s13 + $0x1b4] ss:$8 sps:$4 sm:$0xff]   ;;  %v1505_v51 = vld [vmem:[%s1835_s13 + $0x1b0] ss:$8 sps:$4 sm:$0xff]  }
  0x5f   : > { %1070 = vmatprep.subr.bf16.mxu1 %v1460_v18  ;;  %v621_v47 = vld [vmem:[%s1816_s30] sm:$0xff]  ;;  %v622_v49 = vld [vmem:[%s1816_s30 + $0x8] sm:$0xff]  ;;  %v1506_v53 = vld [vmem:[%s1835_s13 + $0xc4] ss:$8 sps:$4 sm:$0xff]   ;;  %p1371_p13 = scmp.ne.s32.totalorder %s1572_s17, 8 }
  0x60   : > { %v1304_v48 = vcombine.high %v621_v47, %v621_v47  ;;  %v1306_v52 = vcombine.high %v622_v49, %v622_v49  ;;  %v1508_v54 = vld [vmem:[%s1835_s13 + $0x1c4] ss:$8 sps:$4 sm:$0xff]   ;;  %v1510_v55 = vld [vmem:[%s1835_s13 + $0xc0] ss:$8 sps:$4 sm:$0xff]   ;;  %v1512_v57 = vld [vmem:[%s1835_s13 + $0xd4] ss:$8 sps:$4 sm:$0xff]   ;;  %v1303_v5 = vcombine.low %v621_v47, %v621_v47  ;;  %v1305_v6 = vcombine.low %v622_v49, %v622_v49 }
  0x61   : > { %1030 = vmatpush1.bf16.msra.mxu0 %v1462_v19  ;;  %v1511_v56 = vld [vmem:[%s1835_s13 + $0x1c0] ss:$8 sps:$4 sm:$0xff]   ;;  %v1514_v58 = vld [vmem:[%s1835_s13 + $0x1d4] ss:$8 sps:$4 sm:$0xff]   ;;  %v1516_v59 = vld [vmem:[%s1835_s13 + $0xd0] ss:$8 sps:$4 sm:$0xff]  }
  0x62   : > { %1071 = vmatpush1.bf16.msra.mxu1 %v1463_v20  ;;  %1031 = vmatprep.subr.bf16.mxu0 %v1464_v21  ;;  %v1517_v60 = vld [vmem:[%s1835_s13 + $0x1d0] ss:$8 sps:$4 sm:$0xff]   ;;  %v1518_v61 = vld [vmem:[%s1835_s13 + $0xe4] ss:$8 sps:$4 sm:$0xff]   ;;  %v1522_v63 = vld [vmem:[%s1835_s13 + $0xe0] ss:$8 sps:$4 sm:$0xff]   ;;  %v1115_v21 = vlaneseq (!%p1371_p13) }
  0x63   : > { %1072 = vmatprep.subr.bf16.mxu1 %v1466_v22  ;;  %1053 = vmatprep.mubr.bf16.mxu0 %v1304_v48  ;;  %v1520_v62 = vld [vmem:[%s1835_s13 + $0x1e4] ss:$8 sps:$4 sm:$0xff]   ;;  %v1523_v0 = vld [vmem:[%s1835_s13 + $0x1e0] ss:$8 sps:$4 sm:$0xff]   ;;  %v1524_v1 = vld [vmem:[%s1835_s13 + $0xf4] ss:$8 sps:$4 sm:$0xff]  }
  0x64   : > { %1094 = vmatprep.mubr.bf16.mxu1 %v1306_v52  ;;  %v1526_v2 = vld [vmem:[%s1835_s13 + $0x1f4] ss:$8 sps:$4 sm:$0xff]   ;;  %v1528_v3 = vld [vmem:[%s1835_s13 + $0xf0] ss:$8 sps:$4 sm:$0xff]   ;;  %v1116_v22 = vshrl.u32 (!%p1371_p13), %v1115_v21, 7 }
  0x65   : > { %1032 = vmatpush1.bf16.msra.mxu0 %v1468_v23  ;;  %v1529_v4 = vld [vmem:[%s1835_s13 + $0x1f0] ss:$8 sps:$4 sm:$0xff]  }
  0x66   : > { %1073 = vmatpush1.bf16.msra.mxu1 %v1469_v24  ;;  %1033 = vmatprep.subr.bf16.mxu0 %v1470_v25  ;;  %v619_v8 = vld [vmem:[#allocation2] sm:$0xff]  ;;  %v620_v12 = vld [vmem:[#allocation2 + $0x8] sm:$0xff]  ;;  %v1117_v25 = vsub.s32 (!%p1371_p13), 0, %v1116_v22 }
  0x67   : > { %1074 = vmatprep.subr.bf16.mxu1 %v1472_v26  ;;  %v1113_v23 = vld [vmem:[%s591_s15] sm:$0x3] (!%p1371_p13)  ;;  %v1121_v26 = vsub.s32 (!%p1371_p13), 1, %v1116_v22 }
  0x68   : > { %v1127_v24 = vld [vmem:[%s1828_s18] sm:$0xff] (!%p1371_p13) }
  0x69   : > { %1034 = vmatpush1.bf16.msra.mxu0 %v1474_v27 }
  0x6a   : > { %1075 = vmatpush1.bf16.msra.mxu1 %v1475_v28  ;;  %1035 = vmatprep.subr.bf16.mxu0 %v1476_v29  ;;  %v1118_v29 = vrot.slane (!%p1371_p13), %v1113_v23, %v1117_v25 }
  0x6b   : > { %1076 = vmatprep.subr.bf16.mxu1 %v1478_v30  ;;  %v1122_v30 = vrot.slane (!%p1371_p13), %v1113_v23, %v1121_v26 }
  0x6d   : > { %1036 = vmatpush1.bf16.msra.mxu0 %v1480_v31  ;;  %v1128_v31 = vunpack.c.l.bf16 (!%p1371_p13), %v1127_v24 }
  0x6e   : > { %1077 = vmatpush1.bf16.msra.mxu1 %v1481_v32  ;;  %1037 = vmatprep.subr.bf16.mxu0 %v1482_v33  ;;  %v1129_v32 = vunpack.c.h.bf16 (!%p1371_p13), %v1127_v24 }
  0x6f   : > { %1078 = vmatprep.subr.bf16.mxu1 %v1484_v34 }
  0x71   : > { %1038 = vmatpush1.bf16.msra.mxu0 %v1486_v35 }
  0x72   : > { %1079 = vmatpush1.bf16.msra.mxu1 %v1487_v36  ;;  %1039 = vmatprep.subr.bf16.mxu0 %v1488_v37 }
  0x73   : > { %1080 = vmatprep.subr.bf16.mxu1 %v1490_v38 }
  0x75   : > { %1040 = vmatpush1.bf16.msra.mxu0 %v1492_v39 }
  0x76   : > { %1081 = vmatpush1.bf16.msra.mxu1 %v1493_v40  ;;  %1041 = vmatprep.subr.bf16.mxu0 %v1494_v41 }
  0x77   : > { %1082 = vmatprep.subr.bf16.mxu1 %v1496_v42 }
  0x79   : > { %1042 = vmatpush1.bf16.msra.mxu0 %v1498_v43 }
  0x7a   : > { %1083 = vmatpush1.bf16.msra.mxu1 %v1499_v44  ;;  %1043 = vmatprep.subr.bf16.mxu0 %v1500_v45 }
  0x7b   : > { %1084 = vmatprep.subr.bf16.mxu1 %v1502_v46 }
  0x7d   : > { %1044 = vmatpush1.bf16.msra.mxu0 %v1504_v50 }
  0x7e   : > { %1085 = vmatpush1.bf16.msra.mxu1 %v1505_v51  ;;  %1045 = vmatprep.subr.bf16.mxu0 %v1506_v53 }
  0x7f   : > { %1086 = vmatprep.subr.bf16.mxu1 %v1508_v54 }
  0x81   : > { %1046 = vmatpush1.bf16.msra.mxu0 %v1510_v55 }
  0x82   : > { %1087 = vmatpush1.bf16.msra.mxu1 %v1511_v56  ;;  %1047 = vmatprep.subr.bf16.mxu0 %v1512_v57 }
  0x83   : > { %1088 = vmatprep.subr.bf16.mxu1 %v1514_v58 }
  0x85   : > { %1048 = vmatpush1.bf16.msra.mxu0 %v1516_v59 }
  0x86   : > { %1089 = vmatpush1.bf16.msra.mxu1 %v1517_v60  ;;  %1049 = vmatprep.subr.bf16.mxu0 %v1518_v61 }
  0x87   : > { %1090 = vmatprep.subr.bf16.mxu1 %v1520_v62 }
  0x89   : > { %1050 = vmatpush1.bf16.msra.mxu0 %v1522_v63 }
  0x8a   : > { %1091 = vmatpush1.bf16.msra.mxu1 %v1523_v0  ;;  %1051 = vmatprep.subr.bf16.mxu0 %v1524_v1 }
  0x8b   : > { %1092 = vmatprep.subr.bf16.mxu1 %v1526_v2 }
  0x8d   : > { %1052 = vmatpush1.bf16.msra.mxu0 %v1528_v3 }
  0x8e   : > { %1093 = vmatpush1.bf16.msra.mxu1 %v1529_v4 }
  0x90   : > { %1054 = vmatmul.mubr.bf16.vlgmr.msra.gmra.mrb[0].mxu0 %v1303_v5 }
  0x91   : > { %1095 = vmatmul.mubr.bf16.vlgmr.msra.gmra.mrb[0].mxu1 %v1305_v6 }
 0x163   : > { %v1055_v7 = vpop.f32.mrb[0].mxu0 }
 0x164   : > { %v1096_v9 = vpop.f32.mrb[0].mxu1  ;;  %v1057_v11 = vpop.f32.mrb[1].mxu0  ;;  %1110 = sbr.rel (%p1371_p13) target bundleno = 379 (0x17b), region = 82 }
 0x165   : > { %v1097_v10 = vadd.f32 %v1096_v9, %v1055_v7  ;;  %v1098_v13 = vpop.f32.mrb[1].mxu1  ;;  %v1059_v15 = vpop.f32.mrb[2].mxu0 }
 0x166   : > { %v1099_v14 = vadd.f32 %v1098_v13, %v1057_v11  ;;  %v1100_v16 = vpop.f32.mrb[2].mxu1  ;;  %v1060_v18 = vpop.f32.mrb[3].mxu0 }
 0x167   : > { %v1103_v17 = vadd.f32 %v1097_v10, %v619_v8  ;;  %v1101_v19 = vpop.f32.mrb[3].mxu1 }
 0x168   : > { %v1104_v20 = vadd.f32 %v1099_v14, %v620_v12 }
 0x169   : > { %1105 = vst [vmem:[#allocation2] sm:$0xff] %v1103_v17 }
 0x16a   : > { %1106 = vst [vmem:[#allocation2 + $0x8] sm:$0xff] %v1104_v20 }
 0x170   : > { %v1111_v27 = vld [vmem:[#allocation2] sm:$0xff] }
 0x171   : > { %v1112_v28 = vld [vmem:[#allocation2 + $0x8] sm:$0xff]  ;;  %v1125_v33 = vadd.f32 %v1118_v29, %v1111_v27 }
 0x172   : > { %v1126_v34 = vadd.f32 %v1122_v30, %v1112_v28 }
 0x173   : > { %v1130_v35 = vadd.f32 %v1128_v31, %v1125_v33 }
 0x174   : > { %v1131_v36 = vadd.f32 %v1129_v32, %v1126_v34 }
 0x175   : > { %v1132_v37 = vmax.f32 %v1130_v35, 0.0 }
 0x176   : > { %v1133_v38 = vmax.f32 %v1131_v36, 0.0 }
 0x178   : > { %v1376_v39 = vpack.c.bf16 %v1133_v38, %v1132_v37 }
 0x17a   : > { %1142 = vst [vmem:[%s1833_s12] sm:$0xff] %v1376_v39 }
 0x17b PF: > { %s14_s21 = sadd.s32 1, %s1588_s21   ;;  %s1938_s15 = smov %s1568_s16 }
 0x17c   : > { %p11_p0 = scmp.ge.s32.totalorder %s14_s21, 20   ;;  %s1939_s16 = smov %s1667_s28 }
 0x17d   : > { %s1940_s17 = smov %s1580_s19  ;;  %s1941_s18 = smov %s1584_s20 }
 0x17e   : > { %s1942_s19 = smov %s1945_s22  ;;  %s1943_s20 = smov %s1949_s23 }
 0x17f   :  { %13 = sbr.rel (!%p11_p0) target bundleno = 4 (0x4), region = 126 }

// kernel: _lambda_.41
= control target key start
LH: loop header
LB: loop body
LE: loop exit
PB: predicated region body
PF: predicated region fallthrough
CT: control target
= control target key end

     0   :  { %s637_s1 = inlined_call_operand.vmem [shape: bf16[512,128], index: 1, kind: input, shape index: {}]   ;;  %s638_s0 = inlined_call_operand.vmem [shape: bf16[8,512], index: 0, kind: input, shape index: {}]   ;;  %s639_s2 = inlined_call_operand.vmem [shape: f32[1,128], index: 2, kind: input, shape index: {}]   ;;  %s640_s3 = inlined_call_operand.vmem [shape: f32[8,128], index: 3, kind: output, shape index: {}]  }
   0x1   :  { %v473_v0 = vld [vmem:[%s637_s1 + $0x40] sm:$0xff]   ;;  %v477_v4 = vld [vmem:[%s637_s1 + $0x48] sm:$0xff]   ;;  %v481_v8 = vld [vmem:[%s637_s1 + $0x50] sm:$0xff]  }
   0x2   :  { %v474_v1 = vld [vmem:[%s637_s1 + $0xc0] sm:$0xff]   ;;  %429 = vmatprep.subr.bf16.mxu0 %v473_v0  ;;  %v478_v5 = vld [vmem:[%s637_s1 + $0xc8] sm:$0xff]   ;;  %v482_v9 = vld [vmem:[%s637_s1 + $0xd0] sm:$0xff]  }
   0x3   :  { %v475_v2 = vld [vmem:[%s637_s1] sm:$0xff]   ;;  %451 = vmatprep.subr.bf16.mxu1 %v474_v1  ;;  %v479_v6 = vld [vmem:[%s637_s1 + $0x8] sm:$0xff]   ;;  %v483_v10 = vld [vmem:[%s637_s1 + $0x10] sm:$0xff]  }
   0x4   :  { %v476_v3 = vld [vmem:[%s637_s1 + $0x80] sm:$0xff]   ;;  %430 = vmatpush3.bf16.msra.mxu0 %v475_v2  ;;  %v480_v7 = vld [vmem:[%s637_s1 + $0x88] sm:$0xff]   ;;  %v484_v11 = vld [vmem:[%s637_s1 + $0x90] sm:$0xff]  }
   0x5   :  { %452 = vmatpush3.bf16.msra.mxu1 %v476_v3  ;;  %431 = vmatprep.subr.bf16.mxu0 %v477_v4  ;;  %v485_v12 = vld [vmem:[%s637_s1 + $0x58] sm:$0xff]   ;;  %v489_v16 = vld [vmem:[%s637_s1 + $0x60] sm:$0xff]   ;;  %v493_v20 = vld [vmem:[%s637_s1 + $0x68] sm:$0xff]  }
   0x6   :  { %453 = vmatprep.subr.bf16.mxu1 %v478_v5  ;;  %v486_v13 = vld [vmem:[%s637_s1 + $0xd8] sm:$0xff]   ;;  %v490_v17 = vld [vmem:[%s637_s1 + $0xe0] sm:$0xff]   ;;  %v494_v21 = vld [vmem:[%s637_s1 + $0xe8] sm:$0xff]  }
   0x7   :  { %v487_v14 = vld [vmem:[%s637_s1 + $0x18] sm:$0xff]   ;;  %v491_v18 = vld [vmem:[%s637_s1 + $0x20] sm:$0xff]   ;;  %v495_v22 = vld [vmem:[%s637_s1 + $0x28] sm:$0xff]  }
   0x8   :  { %432 = vmatpush3.bf16.msra.mxu0 %v479_v6  ;;  %v488_v15 = vld [vmem:[%s637_s1 + $0x98] sm:$0xff]   ;;  %v492_v19 = vld [vmem:[%s637_s1 + $0xa0] sm:$0xff]   ;;  %v496_v23 = vld [vmem:[%s637_s1 + $0xa8] sm:$0xff]  }
   0x9   :  { %454 = vmatpush3.bf16.msra.mxu1 %v480_v7  ;;  %433 = vmatprep.subr.bf16.mxu0 %v481_v8  ;;  %v497_v24 = vld [vmem:[%s637_s1 + $0x70] sm:$0xff]   ;;  %v501_v28 = vld [vmem:[%s637_s1 + $0x78] sm:$0xff]   ;;  %v21_v32 = vld [vmem:[%s638_s0] sm:$0xff] }
   0xa   :  { %455 = vmatprep.subr.bf16.mxu1 %v482_v9  ;;  %v498_v25 = vld [vmem:[%s637_s1 + $0xf0] sm:$0xff]   ;;  %v502_v29 = vld [vmem:[%s637_s1 + $0xf8] sm:$0xff]   ;;  %v22_v33 = vld [vmem:[%s638_s0 + $0x8] sm:$0xff]  ;;  %v392_v34 = vcombine.low %v21_v32, %v21_v32  ;;  %v393_v35 = vcombine.high %v21_v32, %v21_v32 }
   0xb   :  { %v499_v26 = vld [vmem:[%s637_s1 + $0x30] sm:$0xff]   ;;  %v503_v30 = vld [vmem:[%s637_s1 + $0x38] sm:$0xff]   ;;  %v394_v36 = vcombine.low %v22_v33, %v22_v33  ;;  %v395_v37 = vcombine.high %v22_v33, %v22_v33  ;;  %v428_v46 = vld [vmem:[%s639_s2] ss:$0 sm:$0xff] }
   0xc   :  { %434 = vmatpush3.bf16.msra.mxu0 %v483_v10  ;;  %v500_v27 = vld [vmem:[%s637_s1 + $0xb0] sm:$0xff]   ;;  %v504_v31 = vld [vmem:[%s637_s1 + $0xb8] sm:$0xff]   ;;  %325 = vmatprep.mubr.bf16.mxu0 %v393_v35 }
   0xd   :  { %456 = vmatpush3.bf16.msra.mxu1 %v484_v11  ;;  %435 = vmatprep.subr.bf16.mxu0 %v485_v12 }
   0xe   :  { %457 = vmatprep.subr.bf16.mxu1 %v486_v13  ;;  %365 = vmatprep.mubr.bf16.mxu1 %v395_v37 }
  0x10   :  { %436 = vmatpush3.bf16.msra.mxu0 %v487_v14 }
  0x11   :  { %458 = vmatpush3.bf16.msra.mxu1 %v488_v15  ;;  %437 = vmatprep.subr.bf16.mxu0 %v489_v16 }
  0x12   :  { %459 = vmatprep.subr.bf16.mxu1 %v490_v17 }
  0x14   :  { %438 = vmatpush3.bf16.msra.mxu0 %v491_v18 }
  0x15   :  { %460 = vmatpush3.bf16.msra.mxu1 %v492_v19  ;;  %439 = vmatprep.subr.bf16.mxu0 %v493_v20 }
  0x16   :  { %461 = vmatprep.subr.bf16.mxu1 %v494_v21 }
  0x18   :  { %440 = vmatpush3.bf16.msra.mxu0 %v495_v22 }
  0x19   :  { %462 = vmatpush3.bf16.msra.mxu1 %v496_v23  ;;  %441 = vmatprep.subr.bf16.mxu0 %v497_v24 }
  0x1a   :  { %463 = vmatprep.subr.bf16.mxu1 %v498_v25 }
  0x1c   :  { %442 = vmatpush3.bf16.msra.mxu0 %v499_v26 }
  0x1d   :  { %464 = vmatpush3.bf16.msra.mxu1 %v500_v27  ;;  %443 = vmatprep.subr.bf16.mxu0 %v501_v28 }
  0x1e   :  { %465 = vmatprep.subr.bf16.mxu1 %v502_v29 }
  0x20   :  { %444 = vmatpush3.bf16.msra.mxu0 %v503_v30 }
  0x21   :  { %466 = vmatpush3.bf16.msra.mxu1 %v504_v31 }
  0x23   :  { %326 = vmatmul.mubr.bf16.vlgmr.msra.gmra.mrb[0].mxu0 %v392_v34 }
  0x24   :  { %366 = vmatmul.mubr.bf16.vlgmr.msra.gmra.mrb[0].mxu1 %v394_v36 }
  0xf6   :  { %v445_v38 = vpop.f32.mrb[0].mxu0 }
  0xf7   :  { %v467_v39 = vpop.f32.mrb[0].mxu1  ;;  %v446_v40 = vpop.f32.mrb[1].mxu0 }
  0xf8   :  { %v468_v41 = vpop.f32.mrb[1].mxu1  ;;  %v447_v42 = vadd.f32 %v446_v40, %v445_v38  ;;  %v448_v44 = vpop.f32.mrb[2].mxu0 }
  0xf9   :  { %v469_v43 = vadd.f32 %v468_v41, %v467_v39  ;;  %v470_v45 = vpop.f32.mrb[2].mxu1  ;;  %v449_v47 = vpop.f32.mrb[3].mxu0 }
  0xfa   :  { %v471_v48 = vpop.f32.mrb[3].mxu1 }
  0xfb   :  { %v368_v49 = vadd.f32 %v469_v43, %v447_v42 }
  0xfd   :  { %v386_v50 = vadd.f32 %v428_v46, %v368_v49 }
  0xff   :  { %387 = vst [vmem:[%s640_s3] sm:$0xff] %v386_v50 }

</bundles_post_ra>
